<compile_context>
chip_gen: v7x
topology: tpu7x:2x2x1
jax: 0.10.0
libtpu: 0.0.40
codegen_flags: <defaults>
</compile_context>

<pallas_src>
import math

import jax
import jax.numpy as jnp
from jax import lax
from jax.experimental import pallas as pl
from jax.experimental.pallas import tpu as pltpu

# ---- small synthetic BERT config (bert-base uses 768/12/3072; shrunk for the demo) ----
HIDDEN = 32
HEADS = 4
HEAD_DIM = HIDDEN // HEADS
INTER = 64
VISUAL_FEAT_DIM = 16
LN_EPS = 1e-12
N_SINGLE_LAYERS = 3
N_CROSS_LAYERS = 5
SCALE = 1.0 / math.sqrt(HEAD_DIM)


# --------------------------------------------------------------------------------------
# In-kernel math helpers (traced inside the Pallas kernels, operate on VMEM values)
# --------------------------------------------------------------------------------------
def _gelu(x):
    # TODO(synk): original BERT uses exact erf-based GELU; tanh approximation used here
    # (erf lowering in Mosaic is not guaranteed); max abs diff ~1e-3.
    c = math.sqrt(2.0 / math.pi)
    return 0.5 * x * (1.0 + jnp.tanh(c * (x + 0.044715 * x * x * x)))


def _ln(x, g, b):
    """LayerNorm(x) * gamma + beta (BertLayerNorm, eps=1e-12), stats in f32."""
    mu = jnp.mean(x, axis=-1, keepdims=True)
    var = jnp.mean(jnp.square(x - mu), axis=-1, keepdims=True)
    return (x - mu) * lax.rsqrt(var + LN_EPS) * g + b


def _mha_proj(q, k, v, bias_row, wo):
    """Multi-head attention followed by the output projection, folded per head.

    q: [Sq, D], k/v: [Sk, D], bias_row: [1, Sk] additive mask, wo: [D, D].
    Returns context @ Wo = sum_h (softmax(q_h k_h^T * scale + bias) v_h) @ Wo[h].
    """
    acc = None
    for h in range(HEADS):
        sl = slice(h * HEAD_DIM, (h + 1) * HEAD_DIM)
        s = lax.dot_general(q[:, sl], k[:, sl], (((1,), (1,)), ((), ())),
                            preferred_element_type=jnp.float32)
        s = s * SCALE + bias_row
        s = s - jnp.max(s, axis=-1, keepdims=True)
        p = jnp.exp(s)
        p = p * pl.reciprocal(jnp.sum(p, axis=-1, keepdims=True), approx=True)
        ctx = jnp.dot(p, v[:, sl], preferred_element_type=jnp.float32)        # [Sq, Dh]
        contrib = jnp.dot(ctx, wo[sl, :], preferred_element_type=jnp.float32)  # [Sq, D]
        acc = contrib if acc is None else acc + contrib
    return acc


def _attn_block(x_q, q, k, v, bias_row, wo, bo, g, beta):
    """BertAttention / BertCrossattLayer: MHA + output dense + residual + LayerNorm."""
    h = _mha_proj(q, k, v, bias_row, wo) + bo
    return _ln(h + x_q, g, beta)


def _ffn(x, w1, b1, w2, b2, g, beta):
    """BertIntermediate (GELU) + BertOutput (dense + residual + LayerNorm)."""
    h = _gelu(jnp.dot(x, w1, preferred_element_type=jnp.float32) + b1)
    o = jnp.dot(h, w2, preferred_element_type=jnp.float32) + b2
    return _ln(o + x, g, beta)


# --------------------------------------------------------------------------------------
# Kernel A: VisualFeatEncoder + 3 BertLayers, grid = (batch, layer)
# The output block (same block index for every layer -> VMEM-resident) is the carry.
# --------------------------------------------------------------------------------------
def _single_stack_kernel(visn_raw_ref, vbias_ref,
                         vfc_w, vfc_b, vfc_g, vfc_beta,
                         wqkv, bqkv, wo, bo, g1, b1,
                         wi, bi, wo2, bo2, g2, b2,
                         out_ref):
    l = pl.program_id(1)
    D = HIDDEN

    @pl.when(l == 0)
    def _():
        # VisualFeatEncoder: Linear(F->D) + LayerNorm (dropout = identity).
        h = jnp.dot(visn_raw_ref[0], vfc_w[...],
                    preferred_element_type=jnp.float32) + vfc_b[...]
        out_ref[0] = _ln(h, vfc_g[...], vfc_beta[...])

    x = out_ref[0]                         # [S_v, D], carried across the layer axis
    bias = vbias_ref[0]                    # [1, S_v] additive mask bias

    qkv = jnp.dot(x, wqkv[0], preferred_element_type=jnp.float32) + bqkv[0]
    a = _attn_block(x, qkv[:, :D], qkv[:, D:2 * D], qkv[:, 2 * D:], bias,
                    wo[0], bo[0], g1[0], b1[0])
    out_ref[0] = _ffn(a, wi[0], bi[0], wo2[0], bo2[0], g2[0], b2[0])


# --------------------------------------------------------------------------------------
# Kernel B: 5 Cross_Layers + BertPooler, grid = (batch, layer)
# lang/visn are carried in the VMEM-resident output blocks; pooled written at last layer.
# --------------------------------------------------------------------------------------
def _cross_stack_kernel(lang_in_ref, visn_in_ref, lbias_ref, vbias_ref,
                        ca_wq, ca_bq, ca_wkv, ca_bkv, ca_wo, ca_bo, ca_g, ca_b,
                        ls_wqkv, ls_bqkv, ls_wo, ls_bo, ls_g, ls_b,
                        vs_wqkv, vs_bqkv, vs_wo, vs_bo, vs_g, vs_b,
                        lf_w1, lf_b1, lf_w2, lf_b2, lf_g, lf_b,
                        vf_w1, vf_b1, vf_w2, vf_b2, vf_g, vf_b,
                        pool_w, pool_b,
                        lang_out_ref, visn_out_ref, pooled_ref):
    l = pl.program_id(1)
    D = HIDDEN

    @pl.when(l == 0)
    def _():
        lang_out_ref[0] = lang_in_ref[0]
        visn_out_ref[0] = visn_in_ref[0]

    lang = lang_out_ref[0]                 # [S_l, D]
    visn = visn_out_ref[0]                 # [S_v, D]
    lbias = lbias_ref[0]                   # [1, S_l]
    vbias = vbias_ref[0]                   # [1, S_v]

    # --- shared cross-attention, both directions computed from the ORIGINAL lang/visn ---
    lq = jnp.dot(lang, ca_wq[0], preferred_element_type=jnp.float32) + ca_bq[0]
    vq = jnp.dot(visn, ca_wq[0], preferred_element_type=jnp.float32) + ca_bq[0]
    vkv = jnp.dot(visn, ca_wkv[0], preferred_element_type=jnp.float32) + ca_bkv[0]
    lkv = jnp.dot(lang, ca_wkv[0], preferred_element_type=jnp.float32) + ca_bkv[0]
    lang_x = _attn_block(lang, lq, vkv[:, :D], vkv[:, D:], vbias,
                         ca_wo[0], ca_bo[0], ca_g[0], ca_b[0])
    visn_x = _attn_block(visn, vq, lkv[:, :D], lkv[:, D:], lbias,
                         ca_wo[0], ca_bo[0], ca_g[0], ca_b[0])

    # --- self-attention ---
    lqkv = jnp.dot(lang_x, ls_wqkv[0], preferred_element_type=jnp.float32) + ls_bqkv[0]
    lang_s = _attn_block(lang_x, lqkv[:, :D], lqkv[:, D:2 * D], lqkv[:, 2 * D:], lbias,
                         ls_wo[0], ls_bo[0], ls_g[0], ls_b[0])
    vqkv = jnp.dot(visn_x, vs_wqkv[0], preferred_element_type=jnp.float32) + vs_bqkv[0]
    visn_s = _attn_block(visn_x, vqkv[:, :D], vqkv[:, D:2 * D], vqkv[:, 2 * D:], vbias,
                         vs_wo[0], vs_bo[0], vs_g[0], vs_b[0])

    # --- FFNs ---
    lang_y = _ffn(lang_s, lf_w1[0], lf_b1[0], lf_w2[0], lf_b2[0], lf_g[0], lf_b[0])
    visn_y = _ffn(visn_s, vf_w1[0], vf_b1[0], vf_w2[0], vf_b2[0], vf_g[0], vf_b[0])

    lang_out_ref[0] = lang_y
    visn_out_ref[0] = visn_y

    # BertPooler: tanh(Linear(first lang token)); computed only at the last layer.
    @pl.when(l == pl.num_programs(1) - 1)
    def _():
        first = lang_y[0:1, :]
        pooled_ref[0] = jnp.tanh(
            jnp.dot(first, pool_w[...], preferred_element_type=jnp.float32) + pool_b[...])


# --------------------------------------------------------------------------------------
# BlockSpec helpers and pallas_call wrappers
# --------------------------------------------------------------------------------------
def _batch_spec(arr):
    nd = arr.ndim
    return pl.BlockSpec((1,) + arr.shape[1:],
                        lambda b, l, _nd=nd: (b,) + (0,) * (_nd - 1))


def _stacked_spec(arr):
    nd = arr.ndim
    return pl.BlockSpec((1,) + arr.shape[1:],
                        lambda b, l, _nd=nd: (l,) + (0,) * (_nd - 1))


def _full_spec(arr):
    nd = arr.ndim
    return pl.BlockSpec(arr.shape, lambda b, l, _nd=nd: (0,) * _nd)


_SINGLE_KEYS = ("wqkv", "bqkv", "wo", "bo", "g1", "b1",
                "wi", "bi", "wo2", "bo2", "g2", "b2")

_CROSS_KEYS = ("ca_wq", "ca_bq", "ca_wkv", "ca_bkv", "ca_wo", "ca_bo", "ca_g", "ca_b",
               "ls_wqkv", "ls_bqkv", "ls_wo", "ls_bo", "ls_g", "ls_b",
               "vs_wqkv", "vs_bqkv", "vs_wo", "vs_bo", "vs_g", "vs_b",
               "lf_w1", "lf_b1", "lf_w2", "lf_b2", "lf_g", "lf_b",
               "vf_w1", "vf_b1", "vf_w2", "vf_b2", "vf_g", "vf_b")


def _single_stack(vfc, sp, visn_feats, visn_bias):
    B, S_v, _ = visn_feats.shape
    args = (visn_feats, visn_bias, vfc["w"], vfc["b"], vfc["g"], vfc["beta"],
            *[sp[k] for k in _SINGLE_KEYS])
    in_specs = ([_batch_spec(visn_feats), _batch_spec(visn_bias)]
                + [_full_spec(vfc[k]) for k in ("w", "b", "g", "beta")]
                + [_stacked_spec(sp[k]) for k in _SINGLE_KEYS])
    return pl.pallas_call(
        _single_stack_kernel,
        grid=(B, N_SINGLE_LAYERS),
        in_specs=in_specs,
        out_specs=pl.BlockSpec((1, S_v, HIDDEN), lambda b, l: (b, 0, 0)),
        out_shape=jax.ShapeDtypeStruct((B, S_v, HIDDEN), jnp.float32),
        compiler_params=pltpu.CompilerParams(
            dimension_semantics=("parallel", "arbitrary")),
    )(*args)


def _cross_stack(cp, pooler, lang_feats, visn_feats, lang_bias, visn_bias):
    B, S_l, _ = lang_feats.shape
    S_v = visn_feats.shape[1]
    args = (lang_feats, visn_feats, lang_bias, visn_bias,
            *[cp[k] for k in _CROSS_KEYS], pooler["w"], pooler["b"])
    in_specs = ([_batch_spec(lang_feats), _batch_spec(visn_feats),
                 _batch_spec(lang_bias), _batch_spec(visn_bias)]
                + [_stacked_spec(cp[k]) for k in _CROSS_KEYS]
                + [_full_spec(pooler["w"]), _full_spec(pooler["b"])])
    out_shape = (jax.ShapeDtypeStruct((B, S_l, HIDDEN), jnp.float32),
                 jax.ShapeDtypeStruct((B, S_v, HIDDEN), jnp.float32),
                 jax.ShapeDtypeStruct((B, 1, HIDDEN), jnp.float32))
    out_specs = (pl.BlockSpec((1, S_l, HIDDEN), lambda b, l: (b, 0, 0)),
                 pl.BlockSpec((1, S_v, HIDDEN), lambda b, l: (b, 0, 0)),
                 pl.BlockSpec((1, 1, HIDDEN), lambda b, l: (b, 0, 0)))
    lang_out, visn_out, pooled = pl.pallas_call(
        _cross_stack_kernel,
        grid=(B, N_CROSS_LAYERS),
        in_specs=in_specs,
        out_specs=out_specs,
        out_shape=out_shape,
        compiler_params=pltpu.CompilerParams(
            dimension_semantics=("parallel", "arbitrary")),
    )(*args)
    return lang_out, visn_out, pooled[:, 0, :]


def cross_encoder_forward(params, lang_feats, lang_attention_mask,
                          visn_feats, visn_attention_mask):
    B, S_l, _ = lang_feats.shape
    S_v = visn_feats.shape[1]

    # extended masks: (1 - mask) * -10000, one additive row per batch element
    lang_bias = ((1.0 - lang_attention_mask.astype(jnp.float32)) * -10000.0
                 ).reshape(B, 1, S_l)
    visn_bias = ((1.0 - visn_attention_mask.astype(jnp.float32)) * -10000.0
                 ).reshape(B, 1, S_v)

    ret_visn_feats = _single_stack(params["visn_fc"], params["single"],
                                   visn_feats, visn_bias)
    lang_out, visn_out, pooled = _cross_stack(params["cross"], params["pooler"],
                                              lang_feats, ret_visn_feats,
                                              lang_bias, visn_bias)
    return lang_out, visn_out, pooled, ret_visn_feats


# --------------------------------------------------------------------------------------
# Deterministic synthetic parameter initialization (stacked per layer-type)
# --------------------------------------------------------------------------------------
def init_params(key):
    kiter = iter(jax.random.split(key, 64))

    def w(*shape):
        return jax.random.normal(next(kiter), shape, jnp.float32) * 0.02

    def zeros(*shape):
        return jnp.zeros(shape, jnp.float32)

    def ones(*shape):
        return jnp.ones(shape, jnp.float32)

    D, I, F = HIDDEN, INTER, VISUAL_FEAT_DIM
    L1, L2 = N_SINGLE_LAYERS, N_CROSS_LAYERS

    return dict(
        visn_fc=dict(w=w(F, D), b=zeros(1, D), g=ones(1, D), beta=zeros(1, D)),
        single=dict(
            wqkv=w(L1, D, 3 * D), bqkv=zeros(L1, 1, 3 * D),
            wo=w(L1, D, D), bo=zeros(L1, 1, D),
            g1=ones(L1, 1, D), b1=zeros(L1, 1, D),
            wi=w(L1, D, I), bi=zeros(L1, 1, I),
            wo2=w(L1, I, D), bo2=zeros(L1, 1, D),
            g2=ones(L1, 1, D), b2=zeros(L1, 1, D),
        ),
        cross=dict(
            ca_wq=w(L2, D, D), ca_bq=zeros(L2, 1, D),
            ca_wkv=w(L2, D, 2 * D), ca_bkv=zeros(L2, 1, 2 * D),
            ca_wo=w(L2, D, D), ca_bo=zeros(L2, 1, D),
            ca_g=ones(L2, 1, D), ca_b=zeros(L2, 1, D),
            ls_wqkv=w(L2, D, 3 * D), ls_bqkv=zeros(L2, 1, 3 * D),
            ls_wo=w(L2, D, D), ls_bo=zeros(L2, 1, D),
            ls_g=ones(L2, 1, D), ls_b=zeros(L2, 1, D),
            vs_wqkv=w(L2, D, 3 * D), vs_bqkv=zeros(L2, 1, 3 * D),
            vs_wo=w(L2, D, D), vs_bo=zeros(L2, 1, D),
            vs_g=ones(L2, 1, D), vs_b=zeros(L2, 1, D),
            lf_w1=w(L2, D, I), lf_b1=zeros(L2, 1, I),
            lf_w2=w(L2, I, D), lf_b2=zeros(L2, 1, D),
            lf_g=ones(L2, 1, D), lf_b=zeros(L2, 1, D),
            vf_w1=w(L2, D, I), vf_b1=zeros(L2, 1, I),
            vf_w2=w(L2, I, D), vf_b2=zeros(L2, 1, D),
            vf_g=ones(L2, 1, D), vf_b=zeros(L2, 1, D),
        ),
        pooler=dict(w=w(D, D), b=zeros(1, D)),
    )


# --------------------------------------------------------------------------------------
if __name__ == "__main__":
    B, S_LANG, S_VISN = 2, 8, 8

    key = jax.random.PRNGKey(0)
    k_lang, k_visn, k_params = jax.random.split(key, 3)

    lang_feats = jax.random.normal(k_lang, (B, S_LANG, HIDDEN), jnp.float32)
    visn_feats = jax.random.normal(k_visn, (B, S_VISN, VISUAL_FEAT_DIM), jnp.float32)
    # attention masks: 1 = attend, 0 = padded (second batch element has padding)
    lang_attention_mask = (jnp.arange(S_LANG)[None, :] <
                           jnp.array([[S_LANG], [S_LANG - 2]])).astype(jnp.float32)
    visn_attention_mask = jnp.ones((B, S_VISN), jnp.float32)

    params = init_params(k_params)

    fwd = jax.jit(cross_encoder_forward)
    lang_out, visn_out, pooled_out, ret_visn = fwd(
        params, lang_feats, lang_attention_mask, visn_feats, visn_attention_mask)
    jax.block_until_ready((lang_out, visn_out, pooled_out, ret_visn))

    assert lang_out.shape == (B, S_LANG, HIDDEN)
    assert visn_out.shape == (B, S_VISN, HIDDEN)
    assert pooled_out.shape == (B, HIDDEN)
    assert ret_visn.shape == (B, S_VISN, HIDDEN)
    assert bool(jnp.all(jnp.isfinite(lang_out))) and bool(jnp.all(jnp.isfinite(pooled_out)))
    print("KERNEL_OK")
</pallas_src>

<mosaic_0001>
module attributes {stable_mosaic.version = 11 : i64} {
  func.func @_single_stack_kernel(%arg0: i32, %arg1: i32, %arg2: memref<1x8x16xf32, #tpu.memory_space<vmem>>, %arg3: memref<1x1x8xf32, #tpu.memory_space<vmem>>, %arg4: memref<16x32xf32, #tpu.memory_space<vmem>>, %arg5: memref<1x32xf32, #tpu.memory_space<vmem>>, %arg6: memref<1x32xf32, #tpu.memory_space<vmem>>, %arg7: memref<1x32xf32, #tpu.memory_space<vmem>>, %arg8: memref<1x32x96xf32, #tpu.memory_space<vmem>>, %arg9: memref<1x1x96xf32, #tpu.memory_space<vmem>>, %arg10: memref<1x32x32xf32, #tpu.memory_space<vmem>>, %arg11: memref<1x1x32xf32, #tpu.memory_space<vmem>>, %arg12: memref<1x1x32xf32, #tpu.memory_space<vmem>>, %arg13: memref<1x1x32xf32, #tpu.memory_space<vmem>>, %arg14: memref<1x32x64xf32, #tpu.memory_space<vmem>>, %arg15: memref<1x1x64xf32, #tpu.memory_space<vmem>>, %arg16: memref<1x64x32xf32, #tpu.memory_space<vmem>>, %arg17: memref<1x1x32xf32, #tpu.memory_space<vmem>>, %arg18: memref<1x1x32xf32, #tpu.memory_space<vmem>>, %arg19: memref<1x1x32xf32, #tpu.memory_space<vmem>>, %arg20: memref<1x8x32xf32, #tpu.memory_space<vmem>>) attributes {dimension_semantics = [#tpu.dimension_semantics<parallel>, #tpu.dimension_semantics<arbitrary>], iteration_bounds = array<i64: 2, 3>, scalar_prefetch = 0 : i64, scratch_operands = 0 : i64, tpu.core_type = #tpu.core_type<tc>, window_params = [{transform_indices = @transform_0, window_bounds = array<i64: 1, 8, 16>}, {transform_indices = @transform_1, window_bounds = array<i64: 1, 1, 8>}, {pipeline_mode = #tpu.pipeline_mode<synchronous>, transform_indices = @transform_2, window_bounds = array<i64: 16, 32>}, {pipeline_mode = #tpu.pipeline_mode<synchronous>, transform_indices = @transform_3, window_bounds = array<i64: 1, 32>}, {pipeline_mode = #tpu.pipeline_mode<synchronous>, transform_indices = @transform_4, window_bounds = array<i64: 1, 32>}, {pipeline_mode = #tpu.pipeline_mode<synchronous>, transform_indices = @transform_5, window_bounds = array<i64: 1, 32>}, {transform_indices = @transform_6, window_bounds = array<i64: 1, 32, 96>}, {transform_indices = @transform_7, window_bounds = array<i64: 1, 1, 96>}, {transform_indices = @transform_8, window_bounds = array<i64: 1, 32, 32>}, {transform_indices = @transform_9, window_bounds = array<i64: 1, 1, 32>}, {transform_indices = @transform_10, window_bounds = array<i64: 1, 1, 32>}, {transform_indices = @transform_11, window_bounds = array<i64: 1, 1, 32>}, {transform_indices = @transform_12, window_bounds = array<i64: 1, 32, 64>}, {transform_indices = @transform_13, window_bounds = array<i64: 1, 1, 64>}, {transform_indices = @transform_14, window_bounds = array<i64: 1, 64, 32>}, {transform_indices = @transform_15, window_bounds = array<i64: 1, 1, 32>}, {transform_indices = @transform_16, window_bounds = array<i64: 1, 1, 32>}, {transform_indices = @transform_17, window_bounds = array<i64: 1, 1, 32>}, {transform_indices = @transform_18, window_bounds = array<i64: 1, 8, 32>}]} {
    %c0_i32 = arith.constant 0 : i32
    %0 = arith.cmpi eq, %arg1, %c0_i32 : i32
    %1 = arith.extui %0 : i1 to i32
    %c0_i32_0 = arith.constant 0 : i32
    %2 = arith.cmpi ne, %1, %c0_i32_0 : i32
    scf.if %2 {
      %c0_85 = arith.constant 0 : index
      %c0_86 = arith.constant 0 : index
      %c0_87 = arith.constant 0 : index
      %194 = vector.load %arg2[%c0_85, %c0_86, %c0_87] : memref<1x8x16xf32, #tpu.memory_space<vmem>>, vector<1x8x16xf32>
      %195 = vector.shape_cast %194 : vector<1x8x16xf32> to vector<8x16xf32>
      %c0_88 = arith.constant 0 : index
      %c0_89 = arith.constant 0 : index
      %196 = vector.load %arg4[%c0_88, %c0_89] : memref<16x32xf32, #tpu.memory_space<vmem>>, vector<16x32xf32>
      %cst_90 = arith.constant dense<0.000000e+00> : vector<8x32xf32>
      %197 = tpu.matmul %195, %196, %cst_90 {dimension_numbers = #tpu.dot_dimension_numbers<[1], [0], [0], [1], [0, 0, 1, 1], [], []>} : vector<8x16xf32>, vector<16x32xf32>, vector<8x32xf32> -> vector<8x32xf32>
      %c0_91 = arith.constant 0 : index
      %c0_92 = arith.constant 0 : index
      %198 = vector.load %arg5[%c0_91, %c0_92] : memref<1x32xf32, #tpu.memory_space<vmem>>, vector<1x32xf32>
      %199 = vector.broadcast %198 : vector<1x32xf32> to vector<8x32xf32>
      %200 = arith.addf %197, %199 : vector<8x32xf32>
      %c0_93 = arith.constant 0 : index
      %c0_94 = arith.constant 0 : index
      %201 = vector.load %arg6[%c0_93, %c0_94] : memref<1x32xf32, #tpu.memory_space<vmem>>, vector<1x32xf32>
      %c0_95 = arith.constant 0 : index
      %c0_96 = arith.constant 0 : index
      %202 = vector.load %arg7[%c0_95, %c0_96] : memref<1x32xf32, #tpu.memory_space<vmem>>, vector<1x32xf32>
      %cst_97 = arith.constant dense<0.000000e+00> : vector<8xf32>
      %203 = vector.multi_reduction <add>, %200, %cst_97 [1] : vector<8x32xf32> to vector<8xf32>
      %204 = vector.shape_cast %203 : vector<8xf32> to vector<8x1xf32>
      %cst_98 = arith.constant 3.200000e+01 : f32
      %205 = vector.broadcast %cst_98 : f32 to vector<8x1xf32>
      %206 = arith.divf %204, %205 : vector<8x1xf32>
      %207 = vector.broadcast %206 : vector<8x1xf32> to vector<8x32xf32>
      %208 = arith.subf %200, %207 : vector<8x32xf32>
      %209 = arith.mulf %208, %208 : vector<8x32xf32>
      %cst_99 = arith.constant dense<0.000000e+00> : vector<8xf32>
      %210 = vector.multi_reduction <add>, %209, %cst_99 [1] : vector<8x32xf32> to vector<8xf32>
      %211 = vector.shape_cast %210 : vector<8xf32> to vector<8x1xf32>
      %cst_100 = arith.constant 3.200000e+01 : f32
      %212 = vector.broadcast %cst_100 : f32 to vector<8x1xf32>
      %213 = arith.divf %211, %212 : vector<8x1xf32>
      %214 = vector.broadcast %206 : vector<8x1xf32> to vector<8x32xf32>
      %215 = arith.subf %200, %214 : vector<8x32xf32>
      %cst_101 = arith.constant 9.99999996E-13 : f32
      %216 = vector.broadcast %cst_101 : f32 to vector<8x1xf32>
      %217 = arith.addf %213, %216 : vector<8x1xf32>
      %218 = math.rsqrt %217 : vector<8x1xf32>
      %219 = vector.broadcast %218 : vector<8x1xf32> to vector<8x32xf32>
      %220 = arith.mulf %215, %219 : vector<8x32xf32>
      %221 = vector.broadcast %201 : vector<1x32xf32> to vector<8x32xf32>
      %222 = arith.mulf %220, %221 : vector<8x32xf32>
      %223 = vector.broadcast %202 : vector<1x32xf32> to vector<8x32xf32>
      %224 = arith.addf %222, %223 : vector<8x32xf32>
      %c0_102 = arith.constant 0 : index
      %c0_103 = arith.constant 0 : index
      %c0_104 = arith.constant 0 : index
      %225 = vector.load %arg20[%c0_102, %c0_103, %c0_104] : memref<1x8x32xf32, #tpu.memory_space<vmem>>, vector<1x8x32xf32>
      %226 = vector.shape_cast %225 : vector<1x8x32xf32> to vector<8x32xf32>
      %227 = vector.shape_cast %224 : vector<8x32xf32> to vector<1x8x32xf32>
      tpu.vector_store %arg20[%c0_102, %c0_103, %c0_104], %227 {strides = array<i32>} : memref<1x8x32xf32, #tpu.memory_space<vmem>>, vector<1x8x32xf32>,
    } else {
    }
    %c0 = arith.constant 0 : index
    %c0_1 = arith.constant 0 : index
    %c0_2 = arith.constant 0 : index
    %3 = vector.load %arg20[%c0, %c0_1, %c0_2] : memref<1x8x32xf32, #tpu.memory_space<vmem>>, vector<1x8x32xf32>
    %4 = vector.shape_cast %3 : vector<1x8x32xf32> to vector<8x32xf32>
    %c0_3 = arith.constant 0 : index
    %c0_4 = arith.constant 0 : index
    %c0_5 = arith.constant 0 : index
    %5 = vector.load %arg3[%c0_3, %c0_4, %c0_5] : memref<1x1x8xf32, #tpu.memory_space<vmem>>, vector<1x1x8xf32>
    %6 = vector.shape_cast %5 : vector<1x1x8xf32> to vector<1x8xf32>
    %c0_6 = arith.constant 0 : index
    %c0_7 = arith.constant 0 : index
    %c0_8 = arith.constant 0 : index
    %7 = vector.load %arg8[%c0_6, %c0_7, %c0_8] : memref<1x32x96xf32, #tpu.memory_space<vmem>>, vector<1x32x96xf32>
    %8 = vector.shape_cast %7 : vector<1x32x96xf32> to vector<32x96xf32>
    %cst = arith.constant dense<0.000000e+00> : vector<8x96xf32>
    %9 = tpu.matmul %4, %8, %cst {dimension_numbers = #tpu.dot_dimension_numbers<[1], [0], [0], [1], [0, 0, 1, 1], [], []>} : vector<8x32xf32>, vector<32x96xf32>, vector<8x96xf32> -> vector<8x96xf32>
    %c0_9 = arith.constant 0 : index
    %c0_10 = arith.constant 0 : index
    %c0_11 = arith.constant 0 : index
    %10 = vector.load %arg9[%c0_9, %c0_10, %c0_11] : memref<1x1x96xf32, #tpu.memory_space<vmem>>, vector<1x1x96xf32>
    %11 = vector.shape_cast %10 : vector<1x1x96xf32> to vector<1x96xf32>
    %12 = vector.broadcast %11 : vector<1x96xf32> to vector<8x96xf32>
    %13 = arith.addf %9, %12 : vector<8x96xf32>
    %14 = vector.extract_strided_slice %13 {offsets = [0, 0], sizes = [8, 32], strides = [1, 1]} : vector<8x96xf32> to vector<8x32xf32>
    %15 = vector.extract_strided_slice %13 {offsets = [0, 32], sizes = [8, 32], strides = [1, 1]} : vector<8x96xf32> to vector<8x32xf32>
    %16 = vector.extract_strided_slice %13 {offsets = [0, 64], sizes = [8, 32], strides = [1, 1]} : vector<8x96xf32> to vector<8x32xf32>
    %c0_12 = arith.constant 0 : index
    %c0_13 = arith.constant 0 : index
    %c0_14 = arith.constant 0 : index
    %17 = vector.load %arg10[%c0_12, %c0_13, %c0_14] : memref<1x32x32xf32, #tpu.memory_space<vmem>>, vector<1x32x32xf32>
    %18 = vector.shape_cast %17 : vector<1x32x32xf32> to vector<32x32xf32>
    %c0_15 = arith.constant 0 : index
    %c0_16 = arith.constant 0 : index
    %c0_17 = arith.constant 0 : index
    %19 = vector.load %arg11[%c0_15, %c0_16, %c0_17] : memref<1x1x32xf32, #tpu.memory_space<vmem>>, vector<1x1x32xf32>
    %20 = vector.shape_cast %19 : vector<1x1x32xf32> to vector<1x32xf32>
    %c0_18 = arith.constant 0 : index
    %c0_19 = arith.constant 0 : index
    %c0_20 = arith.constant 0 : index
    %21 = vector.load %arg12[%c0_18, %c0_19, %c0_20] : memref<1x1x32xf32, #tpu.memory_space<vmem>>, vector<1x1x32xf32>
    %22 = vector.shape_cast %21 : vector<1x1x32xf32> to vector<1x32xf32>
    %c0_21 = arith.constant 0 : index
    %c0_22 = arith.constant 0 : index
    %c0_23 = arith.constant 0 : index
    %23 = vector.load %arg13[%c0_21, %c0_22, %c0_23] : memref<1x1x32xf32, #tpu.memory_space<vmem>>, vector<1x1x32xf32>
    %24 = vector.shape_cast %23 : vector<1x1x32xf32> to vector<1x32xf32>
    %25 = vector.extract_strided_slice %14 {offsets = [0, 0], sizes = [8, 8], strides = [1, 1]} : vector<8x32xf32> to vector<8x8xf32>
    %26 = vector.extract_strided_slice %15 {offsets = [0, 0], sizes = [8, 8], strides = [1, 1]} : vector<8x32xf32> to vector<8x8xf32>
    %cst_24 = arith.constant dense<0.000000e+00> : vector<8x8xf32>
    %27 = tpu.matmul %25, %26, %cst_24 {dimension_numbers = #tpu.dot_dimension_numbers<[1], [1], [0], [0], [0, 0, 1, 0], [], []>} : vector<8x8xf32>, vector<8x8xf32>, vector<8x8xf32> -> vector<8x8xf32>
    %cst_25 = arith.constant 0.353553385 : f32
    %28 = vector.broadcast %cst_25 : f32 to vector<8x8xf32>
    %29 = arith.mulf %27, %28 : vector<8x8xf32>
    %30 = vector.broadcast %6 : vector<1x8xf32> to vector<8x8xf32>
    %31 = arith.addf %29, %30 : vector<8x8xf32>
    %cst_26 = arith.constant dense<0xFF800000> : vector<8xf32>
    %32 = vector.multi_reduction <maximumf>, %31, %cst_26 [1] : vector<8x8xf32> to vector<8xf32>
    %33 = vector.shape_cast %32 : vector<8xf32> to vector<8x1xf32>
    %34 = vector.broadcast %33 : vector<8x1xf32> to vector<8x8xf32>
    %35 = arith.subf %31, %34 : vector<8x8xf32>
    %36 = math.exp %35 : vector<8x8xf32>
    %cst_27 = arith.constant dense<0.000000e+00> : vector<8xf32>
    %37 = vector.multi_reduction <add>, %36, %cst_27 [1] : vector<8x8xf32> to vector<8xf32>
    %38 = vector.shape_cast %37 : vector<8xf32> to vector<8x1xf32>
    %39 = tpu.reciprocal %38 {approx = true} : vector<8x1xf32> -> vector<8x1xf32>
    %40 = vector.broadcast %39 : vector<8x1xf32> to vector<8x8xf32>
    %41 = arith.mulf %36, %40 : vector<8x8xf32>
    %42 = vector.extract_strided_slice %16 {offsets = [0, 0], sizes = [8, 8], strides = [1, 1]} : vector<8x32xf32> to vector<8x8xf32>
    %cst_28 = arith.constant dense<0.000000e+00> : vector<8x8xf32>
    %43 = tpu.matmul %41, %42, %cst_28 {dimension_numbers = #tpu.dot_dimension_numbers<[1], [0], [0], [1], [0, 0, 1, 1], [], []>} : vector<8x8xf32>, vector<8x8xf32>, vector<8x8xf32> -> vector<8x8xf32>
    %44 = vector.extract_strided_slice %18 {offsets = [0, 0], sizes = [8, 32], strides = [1, 1]} : vector<32x32xf32> to vector<8x32xf32>
    %cst_29 = arith.constant dense<0.000000e+00> : vector<8x32xf32>
    %45 = tpu.matmul %43, %44, %cst_29 {dimension_numbers = #tpu.dot_dimension_numbers<[1], [0], [0], [1], [0, 0, 1, 1], [], []>} : vector<8x8xf32>, vector<8x32xf32>, vector<8x32xf32> -> vector<8x32xf32>
    %46 = vector.extract_strided_slice %14 {offsets = [0, 8], sizes = [8, 8], strides = [1, 1]} : vector<8x32xf32> to vector<8x8xf32>
    %47 = vector.extract_strided_slice %15 {offsets = [0, 8], sizes = [8, 8], strides = [1, 1]} : vector<8x32xf32> to vector<8x8xf32>
    %cst_30 = arith.constant dense<0.000000e+00> : vector<8x8xf32>
    %48 = tpu.matmul %46, %47, %cst_30 {dimension_numbers = #tpu.dot_dimension_numbers<[1], [1], [0], [0], [0, 0, 1, 0], [], []>} : vector<8x8xf32>, vector<8x8xf32>, vector<8x8xf32> -> vector<8x8xf32>
    %cst_31 = arith.constant 0.353553385 : f32
    %49 = vector.broadcast %cst_31 : f32 to vector<8x8xf32>
    %50 = arith.mulf %48, %49 : vector<8x8xf32>
    %51 = vector.broadcast %6 : vector<1x8xf32> to vector<8x8xf32>
    %52 = arith.addf %50, %51 : vector<8x8xf32>
    %cst_32 = arith.constant dense<0xFF800000> : vector<8xf32>
    %53 = vector.multi_reduction <maximumf>, %52, %cst_32 [1] : vector<8x8xf32> to vector<8xf32>
    %54 = vector.shape_cast %53 : vector<8xf32> to vector<8x1xf32>
    %55 = vector.broadcast %54 : vector<8x1xf32> to vector<8x8xf32>
    %56 = arith.subf %52, %55 : vector<8x8xf32>
    %57 = math.exp %56 : vector<8x8xf32>
    %cst_33 = arith.constant dense<0.000000e+00> : vector<8xf32>
    %58 = vector.multi_reduction <add>, %57, %cst_33 [1] : vector<8x8xf32> to vector<8xf32>
    %59 = vector.shape_cast %58 : vector<8xf32> to vector<8x1xf32>
    %60 = tpu.reciprocal %59 {approx = true} : vector<8x1xf32> -> vector<8x1xf32>
    %61 = vector.broadcast %60 : vector<8x1xf32> to vector<8x8xf32>
    %62 = arith.mulf %57, %61 : vector<8x8xf32>
    %63 = vector.extract_strided_slice %16 {offsets = [0, 8], sizes = [8, 8], strides = [1, 1]} : vector<8x32xf32> to vector<8x8xf32>
    %cst_34 = arith.constant dense<0.000000e+00> : vector<8x8xf32>
    %64 = tpu.matmul %62, %63, %cst_34 {dimension_numbers = #tpu.dot_dimension_numbers<[1], [0], [0], [1], [0, 0, 1, 1], [], []>} : vector<8x8xf32>, vector<8x8xf32>, vector<8x8xf32> -> vector<8x8xf32>
    %65 = vector.extract_strided_slice %18 {offsets = [8, 0], sizes = [8, 32], strides = [1, 1]} : vector<32x32xf32> to vector<8x32xf32>
    %cst_35 = arith.constant dense<0.000000e+00> : vector<8x32xf32>
    %66 = tpu.matmul %64, %65, %cst_35 {dimension_numbers = #tpu.dot_dimension_numbers<[1], [0], [0], [1], [0, 0, 1, 1], [], []>} : vector<8x8xf32>, vector<8x32xf32>, vector<8x32xf32> -> vector<8x32xf32>
    %67 = arith.addf %45, %66 : vector<8x32xf32>
    %68 = vector.extract_strided_slice %14 {offsets = [0, 16], sizes = [8, 8], strides = [1, 1]} : vector<8x32xf32> to vector<8x8xf32>
    %69 = vector.extract_strided_slice %15 {offsets = [0, 16], sizes = [8, 8], strides = [1, 1]} : vector<8x32xf32> to vector<8x8xf32>
    %cst_36 = arith.constant dense<0.000000e+00> : vector<8x8xf32>
    %70 = tpu.matmul %68, %69, %cst_36 {dimension_numbers = #tpu.dot_dimension_numbers<[1], [1], [0], [0], [0, 0, 1, 0], [], []>} : vector<8x8xf32>, vector<8x8xf32>, vector<8x8xf32> -> vector<8x8xf32>
    %cst_37 = arith.constant 0.353553385 : f32
    %71 = vector.broadcast %cst_37 : f32 to vector<8x8xf32>
    %72 = arith.mulf %70, %71 : vector<8x8xf32>
    %73 = vector.broadcast %6 : vector<1x8xf32> to vector<8x8xf32>
    %74 = arith.addf %72, %73 : vector<8x8xf32>
    %cst_38 = arith.constant dense<0xFF800000> : vector<8xf32>
    %75 = vector.multi_reduction <maximumf>, %74, %cst_38 [1] : vector<8x8xf32> to vector<8xf32>
    %76 = vector.shape_cast %75 : vector<8xf32> to vector<8x1xf32>
    %77 = vector.broadcast %76 : vector<8x1xf32> to vector<8x8xf32>
    %78 = arith.subf %74, %77 : vector<8x8xf32>
    %79 = math.exp %78 : vector<8x8xf32>
    %cst_39 = arith.constant dense<0.000000e+00> : vector<8xf32>
    %80 = vector.multi_reduction <add>, %79, %cst_39 [1] : vector<8x8xf32> to vector<8xf32>
    %81 = vector.shape_cast %80 : vector<8xf32> to vector<8x1xf32>
    %82 = tpu.reciprocal %81 {approx = true} : vector<8x1xf32> -> vector<8x1xf32>
    %83 = vector.broadcast %82 : vector<8x1xf32> to vector<8x8xf32>
    %84 = arith.mulf %79, %83 : vector<8x8xf32>
    %85 = vector.extract_strided_slice %16 {offsets = [0, 16], sizes = [8, 8], strides = [1, 1]} : vector<8x32xf32> to vector<8x8xf32>
    %cst_40 = arith.constant dense<0.000000e+00> : vector<8x8xf32>
    %86 = tpu.matmul %84, %85, %cst_40 {dimension_numbers = #tpu.dot_dimension_numbers<[1], [0], [0], [1], [0, 0, 1, 1], [], []>} : vector<8x8xf32>, vector<8x8xf32>, vector<8x8xf32> -> vector<8x8xf32>
    %87 = vector.extract_strided_slice %18 {offsets = [16, 0], sizes = [8, 32], strides = [1, 1]} : vector<32x32xf32> to vector<8x32xf32>
    %cst_41 = arith.constant dense<0.000000e+00> : vector<8x32xf32>
    %88 = tpu.matmul %86, %87, %cst_41 {dimension_numbers = #tpu.dot_dimension_numbers<[1], [0], [0], [1], [0, 0, 1, 1], [], []>} : vector<8x8xf32>, vector<8x32xf32>, vector<8x32xf32> -> vector<8x32xf32>
    %89 = arith.addf %67, %88 : vector<8x32xf32>
    %90 = vector.extract_strided_slice %14 {offsets = [0, 24], sizes = [8, 8], strides = [1, 1]} : vector<8x32xf32> to vector<8x8xf32>
    %91 = vector.extract_strided_slice %15 {offsets = [0, 24], sizes = [8, 8], strides = [1, 1]} : vector<8x32xf32> to vector<8x8xf32>
    %cst_42 = arith.constant dense<0.000000e+00> : vector<8x8xf32>
    %92 = tpu.matmul %90, %91, %cst_42 {dimension_numbers = #tpu.dot_dimension_numbers<[1], [1], [0], [0], [0, 0, 1, 0], [], []>} : vector<8x8xf32>, vector<8x8xf32>, vector<8x8xf32> -> vector<8x8xf32>
    %cst_43 = arith.constant 0.353553385 : f32
    %93 = vector.broadcast %cst_43 : f32 to vector<8x8xf32>
    %94 = arith.mulf %92, %93 : vector<8x8xf32>
    %95 = vector.broadcast %6 : vector<1x8xf32> to vector<8x8xf32>
    %96 = arith.addf %94, %95 : vector<8x8xf32>
    %cst_44 = arith.constant dense<0xFF800000> : vector<8xf32>
    %97 = vector.multi_reduction <maximumf>, %96, %cst_44 [1] : vector<8x8xf32> to vector<8xf32>
    %98 = vector.shape_cast %97 : vector<8xf32> to vector<8x1xf32>
    %99 = vector.broadcast %98 : vector<8x1xf32> to vector<8x8xf32>
    %100 = arith.subf %96, %99 : vector<8x8xf32>
    %101 = math.exp %100 : vector<8x8xf32>
    %cst_45 = arith.constant dense<0.000000e+00> : vector<8xf32>
    %102 = vector.multi_reduction <add>, %101, %cst_45 [1] : vector<8x8xf32> to vector<8xf32>
    %103 = vector.shape_cast %102 : vector<8xf32> to vector<8x1xf32>
    %104 = tpu.reciprocal %103 {approx = true} : vector<8x1xf32> -> vector<8x1xf32>
    %105 = vector.broadcast %104 : vector<8x1xf32> to vector<8x8xf32>
    %106 = arith.mulf %101, %105 : vector<8x8xf32>
    %107 = vector.extract_strided_slice %16 {offsets = [0, 24], sizes = [8, 8], strides = [1, 1]} : vector<8x32xf32> to vector<8x8xf32>
    %cst_46 = arith.constant dense<0.000000e+00> : vector<8x8xf32>
    %108 = tpu.matmul %106, %107, %cst_46 {dimension_numbers = #tpu.dot_dimension_numbers<[1], [0], [0], [1], [0, 0, 1, 1], [], []>} : vector<8x8xf32>, vector<8x8xf32>, vector<8x8xf32> -> vector<8x8xf32>
    %109 = vector.extract_strided_slice %18 {offsets = [24, 0], sizes = [8, 32], strides = [1, 1]} : vector<32x32xf32> to vector<8x32xf32>
    %cst_47 = arith.constant dense<0.000000e+00> : vector<8x32xf32>
    %110 = tpu.matmul %108, %109, %cst_47 {dimension_numbers = #tpu.dot_dimension_numbers<[1], [0], [0], [1], [0, 0, 1, 1], [], []>} : vector<8x8xf32>, vector<8x32xf32>, vector<8x32xf32> -> vector<8x32xf32>
    %111 = arith.addf %89, %110 : vector<8x32xf32>
    %112 = vector.broadcast %20 : vector<1x32xf32> to vector<8x32xf32>
    %113 = arith.addf %111, %112 : vector<8x32xf32>
    %114 = arith.addf %113, %4 : vector<8x32xf32>
    %cst_48 = arith.constant dense<0.000000e+00> : vector<8xf32>
    %115 = vector.multi_reduction <add>, %114, %cst_48 [1] : vector<8x32xf32> to vector<8xf32>
    %116 = vector.shape_cast %115 : vector<8xf32> to vector<8x1xf32>
    %cst_49 = arith.constant 3.200000e+01 : f32
    %117 = vector.broadcast %cst_49 : f32 to vector<8x1xf32>
    %118 = arith.divf %116, %117 : vector<8x1xf32>
    %119 = vector.broadcast %118 : vector<8x1xf32> to vector<8x32xf32>
    %120 = arith.subf %114, %119 : vector<8x32xf32>
    %121 = arith.mulf %120, %120 : vector<8x32xf32>
    %cst_50 = arith.constant dense<0.000000e+00> : vector<8xf32>
    %122 = vector.multi_reduction <add>, %121, %cst_50 [1] : vector<8x32xf32> to vector<8xf32>
    %123 = vector.shape_cast %122 : vector<8xf32> to vector<8x1xf32>
    %cst_51 = arith.constant 3.200000e+01 : f32
    %124 = vector.broadcast %cst_51 : f32 to vector<8x1xf32>
    %125 = arith.divf %123, %124 : vector<8x1xf32>
    %126 = vector.broadcast %118 : vector<8x1xf32> to vector<8x32xf32>
    %127 = arith.subf %114, %126 : vector<8x32xf32>
    %cst_52 = arith.constant 9.99999996E-13 : f32
    %128 = vector.broadcast %cst_52 : f32 to vector<8x1xf32>
    %129 = arith.addf %125, %128 : vector<8x1xf32>
    %130 = math.rsqrt %129 : vector<8x1xf32>
    %131 = vector.broadcast %130 : vector<8x1xf32> to vector<8x32xf32>
    %132 = arith.mulf %127, %131 : vector<8x32xf32>
    %133 = vector.broadcast %22 : vector<1x32xf32> to vector<8x32xf32>
    %134 = arith.mulf %132, %133 : vector<8x32xf32>
    %135 = vector.broadcast %24 : vector<1x32xf32> to vector<8x32xf32>
    %136 = arith.addf %134, %135 : vector<8x32xf32>
    %c0_53 = arith.constant 0 : index
    %c0_54 = arith.constant 0 : index
    %c0_55 = arith.constant 0 : index
    %137 = vector.load %arg14[%c0_53, %c0_54, %c0_55] : memref<1x32x64xf32, #tpu.memory_space<vmem>>, vector<1x32x64xf32>
    %138 = vector.shape_cast %137 : vector<1x32x64xf32> to vector<32x64xf32>
    %c0_56 = arith.constant 0 : index
    %c0_57 = arith.constant 0 : index
    %c0_58 = arith.constant 0 : index
    %139 = vector.load %arg15[%c0_56, %c0_57, %c0_58] : memref<1x1x64xf32, #tpu.memory_space<vmem>>, vector<1x1x64xf32>
    %140 = vector.shape_cast %139 : vector<1x1x64xf32> to vector<1x64xf32>
    %c0_59 = arith.constant 0 : index
    %c0_60 = arith.constant 0 : index
    %c0_61 = arith.constant 0 : index
    %141 = vector.load %arg16[%c0_59, %c0_60, %c0_61] : memref<1x64x32xf32, #tpu.memory_space<vmem>>, vector<1x64x32xf32>
    %142 = vector.shape_cast %141 : vector<1x64x32xf32> to vector<64x32xf32>
    %c0_62 = arith.constant 0 : index
    %c0_63 = arith.constant 0 : index
    %c0_64 = arith.constant 0 : index
    %143 = vector.load %arg17[%c0_62, %c0_63, %c0_64] : memref<1x1x32xf32, #tpu.memory_space<vmem>>, vector<1x1x32xf32>
    %144 = vector.shape_cast %143 : vector<1x1x32xf32> to vector<1x32xf32>
    %c0_65 = arith.constant 0 : index
    %c0_66 = arith.constant 0 : index
    %c0_67 = arith.constant 0 : index
    %145 = vector.load %arg18[%c0_65, %c0_66, %c0_67] : memref<1x1x32xf32, #tpu.memory_space<vmem>>, vector<1x1x32xf32>
    %146 = vector.shape_cast %145 : vector<1x1x32xf32> to vector<1x32xf32>
    %c0_68 = arith.constant 0 : index
    %c0_69 = arith.constant 0 : index
    %c0_70 = arith.constant 0 : index
    %147 = vector.load %arg19[%c0_68, %c0_69, %c0_70] : memref<1x1x32xf32, #tpu.memory_space<vmem>>, vector<1x1x32xf32>
    %148 = vector.shape_cast %147 : vector<1x1x32xf32> to vector<1x32xf32>
    %cst_71 = arith.constant dense<0.000000e+00> : vector<8x64xf32>
    %149 = tpu.matmul %136, %138, %cst_71 {dimension_numbers = #tpu.dot_dimension_numbers<[1], [0], [0], [1], [0, 0, 1, 1], [], []>} : vector<8x32xf32>, vector<32x64xf32>, vector<8x64xf32> -> vector<8x64xf32>
    %150 = vector.broadcast %140 : vector<1x64xf32> to vector<8x64xf32>
    %151 = arith.addf %149, %150 : vector<8x64xf32>
    %cst_72 = arith.constant 5.000000e-01 : f32
    %152 = vector.broadcast %cst_72 : f32 to vector<8x64xf32>
    %153 = arith.mulf %152, %151 : vector<8x64xf32>
    %cst_73 = arith.constant 4.471500e-02 : f32
    %154 = vector.broadcast %cst_73 : f32 to vector<8x64xf32>
    %155 = arith.mulf %154, %151 : vector<8x64xf32>
    %156 = arith.mulf %155, %151 : vector<8x64xf32>
    %157 = arith.mulf %156, %151 : vector<8x64xf32>
    %158 = arith.addf %151, %157 : vector<8x64xf32>
    %cst_74 = arith.constant 0.797884583 : f32
    %159 = vector.broadcast %cst_74 : f32 to vector<8x64xf32>
    %160 = arith.mulf %159, %158 : vector<8x64xf32>
    %161 = math.tanh %160 : vector<8x64xf32>
    %cst_75 = arith.constant 1.000000e+00 : f32
    %162 = vector.broadcast %cst_75 : f32 to vector<8x64xf32>
    %163 = arith.addf %162, %161 : vector<8x64xf32>
    %164 = arith.mulf %153, %163 : vector<8x64xf32>
    %cst_76 = arith.constant dense<0.000000e+00> : vector<8x32xf32>
    %165 = tpu.matmul %164, %142, %cst_76 {dimension_numbers = #tpu.dot_dimension_numbers<[1], [0], [0], [1], [0, 0, 1, 1], [], []>} : vector<8x64xf32>, vector<64x32xf32>, vector<8x32xf32> -> vector<8x32xf32>
    %166 = vector.broadcast %144 : vector<1x32xf32> to vector<8x32xf32>
    %167 = arith.addf %165, %166 : vector<8x32xf32>
    %168 = arith.addf %167, %136 : vector<8x32xf32>
    %cst_77 = arith.constant dense<0.000000e+00> : vector<8xf32>
    %169 = vector.multi_reduction <add>, %168, %cst_77 [1] : vector<8x32xf32> to vector<8xf32>
    %170 = vector.shape_cast %169 : vector<8xf32> to vector<8x1xf32>
    %cst_78 = arith.constant 3.200000e+01 : f32
    %171 = vector.broadcast %cst_78 : f32 to vector<8x1xf32>
    %172 = arith.divf %170, %171 : vector<8x1xf32>
    %173 = vector.broadcast %172 : vector<8x1xf32> to vector<8x32xf32>
    %174 = arith.subf %168, %173 : vector<8x32xf32>
    %175 = arith.mulf %174, %174 : vector<8x32xf32>
    %cst_79 = arith.constant dense<0.000000e+00> : vector<8xf32>
    %176 = vector.multi_reduction <add>, %175, %cst_79 [1] : vector<8x32xf32> to vector<8xf32>
    %177 = vector.shape_cast %176 : vector<8xf32> to vector<8x1xf32>
    %cst_80 = arith.constant 3.200000e+01 : f32
    %178 = vector.broadcast %cst_80 : f32 to vector<8x1xf32>
    %179 = arith.divf %177, %178 : vector<8x1xf32>
    %180 = vector.broadcast %172 : vector<8x1xf32> to vector<8x32xf32>
    %181 = arith.subf %168, %180 : vector<8x32xf32>
    %cst_81 = arith.constant 9.99999996E-13 : f32
    %182 = vector.broadcast %cst_81 : f32 to vector<8x1xf32>
    %183 = arith.addf %179, %182 : vector<8x1xf32>
    %184 = math.rsqrt %183 : vector<8x1xf32>
    %185 = vector.broadcast %184 : vector<8x1xf32> to vector<8x32xf32>
    %186 = arith.mulf %181, %185 : vector<8x32xf32>
    %187 = vector.broadcast %146 : vector<1x32xf32> to vector<8x32xf32>
    %188 = arith.mulf %186, %187 : vector<8x32xf32>
    %189 = vector.broadcast %148 : vector<1x32xf32> to vector<8x32xf32>
    %190 = arith.addf %188, %189 : vector<8x32xf32>
    %c0_82 = arith.constant 0 : index
    %c0_83 = arith.constant 0 : index
    %c0_84 = arith.constant 0 : index
    %191 = vector.load %arg20[%c0_82, %c0_83, %c0_84] : memref<1x8x32xf32, #tpu.memory_space<vmem>>, vector<1x8x32xf32>
    %192 = vector.shape_cast %191 : vector<1x8x32xf32> to vector<8x32xf32>
    %193 = vector.shape_cast %190 : vector<8x32xf32> to vector<1x8x32xf32>
    tpu.vector_store %arg20[%c0_82, %c0_83, %c0_84], %193 {strides = array<i32>} : memref<1x8x32xf32, #tpu.memory_space<vmem>>, vector<1x8x32xf32>,
    return
  }
  func.func @transform_0(%arg0: i32, %arg1: i32) -> (i32, i32, i32) {
    %c0_i32 = arith.constant 0 : i32
    %c0_i32_0 = arith.constant 0 : i32
    %c0_i32_1 = arith.constant 0 : i32
    return %arg0, %c0_i32, %c0_i32_0 : i32, i32, i32
  }
  func.func @transform_1(%arg0: i32, %arg1: i32) -> (i32, i32, i32) {
    %c0_i32 = arith.constant 0 : i32
    %c0_i32_0 = arith.constant 0 : i32
    %c0_i32_1 = arith.constant 0 : i32
    return %arg0, %c0_i32, %c0_i32_0 : i32, i32, i32
  }
  func.func @transform_2(%arg0: i32, %arg1: i32) -> (i32, i32) {
    %c0_i32 = arith.constant 0 : i32
    %c0_i32_0 = arith.constant 0 : i32
    %c0_i32_1 = arith.constant 0 : i32
    return %c0_i32, %c0_i32_0 : i32, i32
  }
  func.func @transform_3(%arg0: i32, %arg1: i32) -> (i32, i32) {
    %c0_i32 = arith.constant 0 : i32
    %c0_i32_0 = arith.constant 0 : i32
    %c0_i32_1 = arith.constant 0 : i32
    return %c0_i32, %c0_i32_0 : i32, i32
  }
  func.func @transform_4(%arg0: i32, %arg1: i32) -> (i32, i32) {
    %c0_i32 = arith.constant 0 : i32
    %c0_i32_0 = arith.constant 0 : i32
    %c0_i32_1 = arith.constant 0 : i32
    return %c0_i32, %c0_i32_0 : i32, i32
  }
  func.func @transform_5(%arg0: i32, %arg1: i32) -> (i32, i32) {
    %c0_i32 = arith.constant 0 : i32
    %c0_i32_0 = arith.constant 0 : i32
    %c0_i32_1 = arith.constant 0 : i32
    return %c0_i32, %c0_i32_0 : i32, i32
  }
  func.func @transform_6(%arg0: i32, %arg1: i32) -> (i32, i32, i32) {
    %c0_i32 = arith.constant 0 : i32
    %c0_i32_0 = arith.constant 0 : i32
    %c0_i32_1 = arith.constant 0 : i32
    return %arg1, %c0_i32, %c0_i32_0 : i32, i32, i32
  }
  func.func @transform_7(%arg0: i32, %arg1: i32) -> (i32, i32, i32) {
    %c0_i32 = arith.constant 0 : i32
    %c0_i32_0 = arith.constant 0 : i32
    %c0_i32_1 = arith.constant 0 : i32
    return %arg1, %c0_i32, %c0_i32_0 : i32, i32, i32
  }
  func.func @transform_8(%arg0: i32, %arg1: i32) -> (i32, i32, i32) {
    %c0_i32 = arith.constant 0 : i32
    %c0_i32_0 = arith.constant 0 : i32
    %c0_i32_1 = arith.constant 0 : i32
    return %arg1, %c0_i32, %c0_i32_0 : i32, i32, i32
  }
  func.func @transform_9(%arg0: i32, %arg1: i32) -> (i32, i32, i32) {
    %c0_i32 = arith.constant 0 : i32
    %c0_i32_0 = arith.constant 0 : i32
    %c0_i32_1 = arith.constant 0 : i32
    return %arg1, %c0_i32, %c0_i32_0 : i32, i32, i32
  }
  func.func @transform_10(%arg0: i32, %arg1: i32) -> (i32, i32, i32) {
    %c0_i32 = arith.constant 0 : i32
    %c0_i32_0 = arith.constant 0 : i32
    %c0_i32_1 = arith.constant 0 : i32
    return %arg1, %c0_i32, %c0_i32_0 : i32, i32, i32
  }
  func.func @transform_11(%arg0: i32, %arg1: i32) -> (i32, i32, i32) {
    %c0_i32 = arith.constant 0 : i32
    %c0_i32_0 = arith.constant 0 : i32
    %c0_i32_1 = arith.constant 0 : i32
    return %arg1, %c0_i32, %c0_i32_0 : i32, i32, i32
  }
  func.func @transform_12(%arg0: i32, %arg1: i32) -> (i32, i32, i32) {
    %c0_i32 = arith.constant 0 : i32
    %c0_i32_0 = arith.constant 0 : i32
    %c0_i32_1 = arith.constant 0 : i32
    return %arg1, %c0_i32, %c0_i32_0 : i32, i32, i32
  }
  func.func @transform_13(%arg0: i32, %arg1: i32) -> (i32, i32, i32) {
    %c0_i32 = arith.constant 0 : i32
    %c0_i32_0 = arith.constant 0 : i32
    %c0_i32_1 = arith.constant 0 : i32
    return %arg1, %c0_i32, %c0_i32_0 : i32, i32, i32
  }
  func.func @transform_14(%arg0: i32, %arg1: i32) -> (i32, i32, i32) {
    %c0_i32 = arith.constant 0 : i32
    %c0_i32_0 = arith.constant 0 : i32
    %c0_i32_1 = arith.constant 0 : i32
    return %arg1, %c0_i32, %c0_i32_0 : i32, i32, i32
  }
  func.func @transform_15(%arg0: i32, %arg1: i32) -> (i32, i32, i32) {
    %c0_i32 = arith.constant 0 : i32
    %c0_i32_0 = arith.constant 0 : i32
    %c0_i32_1 = arith.constant 0 : i32
    return %arg1, %c0_i32, %c0_i32_0 : i32, i32, i32
  }
  func.func @transform_16(%arg0: i32, %arg1: i32) -> (i32, i32, i32) {
    %c0_i32 = arith.constant 0 : i32
    %c0_i32_0 = arith.constant 0 : i32
    %c0_i32_1 = arith.constant 0 : i32
    return %arg1, %c0_i32, %c0_i32_0 : i32, i32, i32
  }
  func.func @transform_17(%arg0: i32, %arg1: i32) -> (i32, i32, i32) {
    %c0_i32 = arith.constant 0 : i32
    %c0_i32_0 = arith.constant 0 : i32
    %c0_i32_1 = arith.constant 0 : i32
    return %arg1, %c0_i32, %c0_i32_0 : i32, i32, i32
  }
  func.func @transform_18(%arg0: i32, %arg1: i32) -> (i32, i32, i32) {
    %c0_i32 = arith.constant 0 : i32
    %c0_i32_0 = arith.constant 0 : i32
    %c0_i32_1 = arith.constant 0 : i32
    return %arg0, %c0_i32, %c0_i32_0 : i32, i32, i32
  }
}

module attributes {stable_mosaic.version = 11 : i64} {
  func.func @_cross_stack_kernel(%arg0: i32, %arg1: i32, %arg2: memref<1x8x32xf32, #tpu.memory_space<vmem>>, %arg3: memref<1x8x32xf32, #tpu.memory_space<vmem>>, %arg4: memref<1x1x8xf32, #tpu.memory_space<vmem>>, %arg5: memref<1x1x8xf32, #tpu.memory_space<vmem>>, %arg6: memref<1x32x32xf32, #tpu.memory_space<vmem>>, %arg7: memref<1x1x32xf32, #tpu.memory_space<vmem>>, %arg8: memref<1x32x64xf32, #tpu.memory_space<vmem>>, %arg9: memref<1x1x64xf32, #tpu.memory_space<vmem>>, %arg10: memref<1x32x32xf32, #tpu.memory_space<vmem>>, %arg11: memref<1x1x32xf32, #tpu.memory_space<vmem>>, %arg12: memref<1x1x32xf32, #tpu.memory_space<vmem>>, %arg13: memref<1x1x32xf32, #tpu.memory_space<vmem>>, %arg14: memref<1x32x96xf32, #tpu.memory_space<vmem>>, %arg15: memref<1x1x96xf32, #tpu.memory_space<vmem>>, %arg16: memref<1x32x32xf32, #tpu.memory_space<vmem>>, %arg17: memref<1x1x32xf32, #tpu.memory_space<vmem>>, %arg18: memref<1x1x32xf32, #tpu.memory_space<vmem>>, %arg19: memref<1x1x32xf32, #tpu.memory_space<vmem>>, %arg20: memref<1x32x96xf32, #tpu.memory_space<vmem>>, %arg21: memref<1x1x96xf32, #tpu.memory_space<vmem>>, %arg22: memref<1x32x32xf32, #tpu.memory_space<vmem>>, %arg23: memref<1x1x32xf32, #tpu.memory_space<vmem>>, %arg24: memref<1x1x32xf32, #tpu.memory_space<vmem>>, %arg25: memref<1x1x32xf32, #tpu.memory_space<vmem>>, %arg26: memref<1x32x64xf32, #tpu.memory_space<vmem>>, %arg27: memref<1x1x64xf32, #tpu.memory_space<vmem>>, %arg28: memref<1x64x32xf32, #tpu.memory_space<vmem>>, %arg29: memref<1x1x32xf32, #tpu.memory_space<vmem>>, %arg30: memref<1x1x32xf32, #tpu.memory_space<vmem>>, %arg31: memref<1x1x32xf32, #tpu.memory_space<vmem>>, %arg32: memref<1x32x64xf32, #tpu.memory_space<vmem>>, %arg33: memref<1x1x64xf32, #tpu.memory_space<vmem>>, %arg34: memref<1x64x32xf32, #tpu.memory_space<vmem>>, %arg35: memref<1x1x32xf32, #tpu.memory_space<vmem>>, %arg36: memref<1x1x32xf32, #tpu.memory_space<vmem>>, %arg37: memref<1x1x32xf32, #tpu.memory_space<vmem>>, %arg38: memref<32x32xf32, #tpu.memory_space<vmem>>, %arg39: memref<1x32xf32, #tpu.memory_space<vmem>>, %arg40: memref<1x8x32xf32, #tpu.memory_space<vmem>>, %arg41: memref<1x8x32xf32, #tpu.memory_space<vmem>>, %arg42: memref<1x1x32xf32, #tpu.memory_space<vmem>>) attributes {dimension_semantics = [#tpu.dimension_semantics<parallel>, #tpu.dimension_semantics<arbitrary>], iteration_bounds = array<i64: 2, 5>, scalar_prefetch = 0 : i64, scratch_operands = 0 : i64, tpu.core_type = #tpu.core_type<tc>, window_params = [{transform_indices = @transform_0, window_bounds = array<i64: 1, 8, 32>}, {transform_indices = @transform_1, window_bounds = array<i64: 1, 8, 32>}, {transform_indices = @transform_2, window_bounds = array<i64: 1, 1, 8>}, {transform_indices = @transform_3, window_bounds = array<i64: 1, 1, 8>}, {transform_indices = @transform_4, window_bounds = array<i64: 1, 32, 32>}, {transform_indices = @transform_5, window_bounds = array<i64: 1, 1, 32>}, {transform_indices = @transform_6, window_bounds = array<i64: 1, 32, 64>}, {transform_indices = @transform_7, window_bounds = array<i64: 1, 1, 64>}, {transform_indices = @transform_8, window_bounds = array<i64: 1, 32, 32>}, {transform_indices = @transform_9, window_bounds = array<i64: 1, 1, 32>}, {transform_indices = @transform_10, window_bounds = array<i64: 1, 1, 32>}, {transform_indices = @transform_11, window_bounds = array<i64: 1, 1, 32>}, {transform_indices = @transform_12, window_bounds = array<i64: 1, 32, 96>}, {transform_indices = @transform_13, window_bounds = array<i64: 1, 1, 96>}, {transform_indices = @transform_14, window_bounds = array<i64: 1, 32, 32>}, {transform_indices = @transform_15, window_bounds = array<i64: 1, 1, 32>}, {transform_indices = @transform_16, window_bounds = array<i64: 1, 1, 32>}, {transform_indices = @transform_17, window_bounds = array<i64: 1, 1, 32>}, {transform_indices = @transform_18, window_bounds = array<i64: 1, 32, 96>}, {transform_indices = @transform_19, window_bounds = array<i64: 1, 1, 96>}, {transform_indices = @transform_20, window_bounds = array<i64: 1, 32, 32>}, {transform_indices = @transform_21, window_bounds = array<i64: 1, 1, 32>}, {transform_indices = @transform_22, window_bounds = array<i64: 1, 1, 32>}, {transform_indices = @transform_23, window_bounds = array<i64: 1, 1, 32>}, {transform_indices = @transform_24, window_bounds = array<i64: 1, 32, 64>}, {transform_indices = @transform_25, window_bounds = array<i64: 1, 1, 64>}, {transform_indices = @transform_26, window_bounds = array<i64: 1, 64, 32>}, {transform_indices = @transform_27, window_bounds = array<i64: 1, 1, 32>}, {transform_indices = @transform_28, window_bounds = array<i64: 1, 1, 32>}, {transform_indices = @transform_29, window_bounds = array<i64: 1, 1, 32>}, {transform_indices = @transform_30, window_bounds = array<i64: 1, 32, 64>}, {transform_indices = @transform_31, window_bounds = array<i64: 1, 1, 64>}, {transform_indices = @transform_32, window_bounds = array<i64: 1, 64, 32>}, {transform_indices = @transform_33, window_bounds = array<i64: 1, 1, 32>}, {transform_indices = @transform_34, window_bounds = array<i64: 1, 1, 32>}, {transform_indices = @transform_35, window_bounds = array<i64: 1, 1, 32>}, {pipeline_mode = #tpu.pipeline_mode<synchronous>, transform_indices = @transform_36, window_bounds = array<i64: 32, 32>}, {pipeline_mode = #tpu.pipeline_mode<synchronous>, transform_indices = @transform_37, window_bounds = array<i64: 1, 32>}, {transform_indices = @transform_38, window_bounds = array<i64: 1, 8, 32>}, {transform_indices = @transform_39, window_bounds = array<i64: 1, 8, 32>}, {transform_indices = @transform_40, window_bounds = array<i64: 1, 1, 32>}]} {
    %c0_i32 = arith.constant 0 : i32
    %0 = arith.cmpi eq, %arg1, %c0_i32 : i32
    %1 = arith.extui %0 : i1 to i32
    %c0_i32_0 = arith.constant 0 : i32
    %2 = arith.cmpi ne, %1, %c0_i32_0 : i32
    scf.if %2 {
      %c0_282 = arith.constant 0 : index
      %c0_283 = arith.constant 0 : index
      %c0_284 = arith.constant 0 : index
      %660 = vector.load %arg2[%c0_282, %c0_283, %c0_284] : memref<1x8x32xf32, #tpu.memory_space<vmem>>, vector<1x8x32xf32>
      %661 = vector.shape_cast %660 : vector<1x8x32xf32> to vector<8x32xf32>
      %c0_285 = arith.constant 0 : index
      %c0_286 = arith.constant 0 : index
      %c0_287 = arith.constant 0 : index
      %662 = vector.load %arg40[%c0_285, %c0_286, %c0_287] : memref<1x8x32xf32, #tpu.memory_space<vmem>>, vector<1x8x32xf32>
      %663 = vector.shape_cast %662 : vector<1x8x32xf32> to vector<8x32xf32>
      %664 = vector.shape_cast %661 : vector<8x32xf32> to vector<1x8x32xf32>
      tpu.vector_store %arg40[%c0_285, %c0_286, %c0_287], %664 {strides = array<i32>} : memref<1x8x32xf32, #tpu.memory_space<vmem>>, vector<1x8x32xf32>,
      %c0_288 = arith.constant 0 : index
      %c0_289 = arith.constant 0 : index
      %c0_290 = arith.constant 0 : index
      %665 = vector.load %arg3[%c0_288, %c0_289, %c0_290] : memref<1x8x32xf32, #tpu.memory_space<vmem>>, vector<1x8x32xf32>
      %666 = vector.shape_cast %665 : vector<1x8x32xf32> to vector<8x32xf32>
      %c0_291 = arith.constant 0 : index
      %c0_292 = arith.constant 0 : index
      %c0_293 = arith.constant 0 : index
      %667 = vector.load %arg41[%c0_291, %c0_292, %c0_293] : memref<1x8x32xf32, #tpu.memory_space<vmem>>, vector<1x8x32xf32>
      %668 = vector.shape_cast %667 : vector<1x8x32xf32> to vector<8x32xf32>
      %669 = vector.shape_cast %666 : vector<8x32xf32> to vector<1x8x32xf32>
      tpu.vector_store %arg41[%c0_291, %c0_292, %c0_293], %669 {strides = array<i32>} : memref<1x8x32xf32, #tpu.memory_space<vmem>>, vector<1x8x32xf32>,
    } else {
    }
    %c0 = arith.constant 0 : index
    %c0_1 = arith.constant 0 : index
    %c0_2 = arith.constant 0 : index
    %3 = vector.load %arg40[%c0, %c0_1, %c0_2] : memref<1x8x32xf32, #tpu.memory_space<vmem>>, vector<1x8x32xf32>
    %4 = vector.shape_cast %3 : vector<1x8x32xf32> to vector<8x32xf32>
    %c0_3 = arith.constant 0 : index
    %c0_4 = arith.constant 0 : index
    %c0_5 = arith.constant 0 : index
    %5 = vector.load %arg41[%c0_3, %c0_4, %c0_5] : memref<1x8x32xf32, #tpu.memory_space<vmem>>, vector<1x8x32xf32>
    %6 = vector.shape_cast %5 : vector<1x8x32xf32> to vector<8x32xf32>
    %c0_6 = arith.constant 0 : index
    %c0_7 = arith.constant 0 : index
    %c0_8 = arith.constant 0 : index
    %7 = vector.load %arg4[%c0_6, %c0_7, %c0_8] : memref<1x1x8xf32, #tpu.memory_space<vmem>>, vector<1x1x8xf32>
    %8 = vector.shape_cast %7 : vector<1x1x8xf32> to vector<1x8xf32>
    %c0_9 = arith.constant 0 : index
    %c0_10 = arith.constant 0 : index
    %c0_11 = arith.constant 0 : index
    %9 = vector.load %arg5[%c0_9, %c0_10, %c0_11] : memref<1x1x8xf32, #tpu.memory_space<vmem>>, vector<1x1x8xf32>
    %10 = vector.shape_cast %9 : vector<1x1x8xf32> to vector<1x8xf32>
    %c0_12 = arith.constant 0 : index
    %c0_13 = arith.constant 0 : index
    %c0_14 = arith.constant 0 : index
    %11 = vector.load %arg6[%c0_12, %c0_13, %c0_14] : memref<1x32x32xf32, #tpu.memory_space<vmem>>, vector<1x32x32xf32>
    %12 = vector.shape_cast %11 : vector<1x32x32xf32> to vector<32x32xf32>
    %cst = arith.constant dense<0.000000e+00> : vector<8x32xf32>
    %13 = tpu.matmul %4, %12, %cst {dimension_numbers = #tpu.dot_dimension_numbers<[1], [0], [0], [1], [0, 0, 1, 1], [], []>} : vector<8x32xf32>, vector<32x32xf32>, vector<8x32xf32> -> vector<8x32xf32>
    %c0_15 = arith.constant 0 : index
    %c0_16 = arith.constant 0 : index
    %c0_17 = arith.constant 0 : index
    %14 = vector.load %arg7[%c0_15, %c0_16, %c0_17] : memref<1x1x32xf32, #tpu.memory_space<vmem>>, vector<1x1x32xf32>
    %15 = vector.shape_cast %14 : vector<1x1x32xf32> to vector<1x32xf32>
    %16 = vector.broadcast %15 : vector<1x32xf32> to vector<8x32xf32>
    %17 = arith.addf %13, %16 : vector<8x32xf32>
    %c0_18 = arith.constant 0 : index
    %c0_19 = arith.constant 0 : index
    %c0_20 = arith.constant 0 : index
    %18 = vector.load %arg6[%c0_18, %c0_19, %c0_20] : memref<1x32x32xf32, #tpu.memory_space<vmem>>, vector<1x32x32xf32>
    %19 = vector.shape_cast %18 : vector<1x32x32xf32> to vector<32x32xf32>
    %cst_21 = arith.constant dense<0.000000e+00> : vector<8x32xf32>
    %20 = tpu.matmul %6, %19, %cst_21 {dimension_numbers = #tpu.dot_dimension_numbers<[1], [0], [0], [1], [0, 0, 1, 1], [], []>} : vector<8x32xf32>, vector<32x32xf32>, vector<8x32xf32> -> vector<8x32xf32>
    %c0_22 = arith.constant 0 : index
    %c0_23 = arith.constant 0 : index
    %c0_24 = arith.constant 0 : index
    %21 = vector.load %arg7[%c0_22, %c0_23, %c0_24] : memref<1x1x32xf32, #tpu.memory_space<vmem>>, vector<1x1x32xf32>
    %22 = vector.shape_cast %21 : vector<1x1x32xf32> to vector<1x32xf32>
    %23 = vector.broadcast %22 : vector<1x32xf32> to vector<8x32xf32>
    %24 = arith.addf %20, %23 : vector<8x32xf32>
    %c0_25 = arith.constant 0 : index
    %c0_26 = arith.constant 0 : index
    %c0_27 = arith.constant 0 : index
    %25 = vector.load %arg8[%c0_25, %c0_26, %c0_27] : memref<1x32x64xf32, #tpu.memory_space<vmem>>, vector<1x32x64xf32>
    %26 = vector.shape_cast %25 : vector<1x32x64xf32> to vector<32x64xf32>
    %cst_28 = arith.constant dense<0.000000e+00> : vector<8x64xf32>
    %27 = tpu.matmul %6, %26, %cst_28 {dimension_numbers = #tpu.dot_dimension_numbers<[1], [0], [0], [1], [0, 0, 1, 1], [], []>} : vector<8x32xf32>, vector<32x64xf32>, vector<8x64xf32> -> vector<8x64xf32>
    %c0_29 = arith.constant 0 : index
    %c0_30 = arith.constant 0 : index
    %c0_31 = arith.constant 0 : index
    %28 = vector.load %arg9[%c0_29, %c0_30, %c0_31] : memref<1x1x64xf32, #tpu.memory_space<vmem>>, vector<1x1x64xf32>
    %29 = vector.shape_cast %28 : vector<1x1x64xf32> to vector<1x64xf32>
    %30 = vector.broadcast %29 : vector<1x64xf32> to vector<8x64xf32>
    %31 = arith.addf %27, %30 : vector<8x64xf32>
    %c0_32 = arith.constant 0 : index
    %c0_33 = arith.constant 0 : index
    %c0_34 = arith.constant 0 : index
    %32 = vector.load %arg8[%c0_32, %c0_33, %c0_34] : memref<1x32x64xf32, #tpu.memory_space<vmem>>, vector<1x32x64xf32>
    %33 = vector.shape_cast %32 : vector<1x32x64xf32> to vector<32x64xf32>
    %cst_35 = arith.constant dense<0.000000e+00> : vector<8x64xf32>
    %34 = tpu.matmul %4, %33, %cst_35 {dimension_numbers = #tpu.dot_dimension_numbers<[1], [0], [0], [1], [0, 0, 1, 1], [], []>} : vector<8x32xf32>, vector<32x64xf32>, vector<8x64xf32> -> vector<8x64xf32>
    %c0_36 = arith.constant 0 : index
    %c0_37 = arith.constant 0 : index
    %c0_38 = arith.constant 0 : index
    %35 = vector.load %arg9[%c0_36, %c0_37, %c0_38] : memref<1x1x64xf32, #tpu.memory_space<vmem>>, vector<1x1x64xf32>
    %36 = vector.shape_cast %35 : vector<1x1x64xf32> to vector<1x64xf32>
    %37 = vector.broadcast %36 : vector<1x64xf32> to vector<8x64xf32>
    %38 = arith.addf %34, %37 : vector<8x64xf32>
    %39 = vector.extract_strided_slice %31 {offsets = [0, 0], sizes = [8, 32], strides = [1, 1]} : vector<8x64xf32> to vector<8x32xf32>
    %40 = vector.extract_strided_slice %31 {offsets = [0, 32], sizes = [8, 32], strides = [1, 1]} : vector<8x64xf32> to vector<8x32xf32>
    %c0_39 = arith.constant 0 : index
    %c0_40 = arith.constant 0 : index
    %c0_41 = arith.constant 0 : index
    %41 = vector.load %arg10[%c0_39, %c0_40, %c0_41] : memref<1x32x32xf32, #tpu.memory_space<vmem>>, vector<1x32x32xf32>
    %42 = vector.shape_cast %41 : vector<1x32x32xf32> to vector<32x32xf32>
    %c0_42 = arith.constant 0 : index
    %c0_43 = arith.constant 0 : index
    %c0_44 = arith.constant 0 : index
    %43 = vector.load %arg11[%c0_42, %c0_43, %c0_44] : memref<1x1x32xf32, #tpu.memory_space<vmem>>, vector<1x1x32xf32>
    %44 = vector.shape_cast %43 : vector<1x1x32xf32> to vector<1x32xf32>
    %c0_45 = arith.constant 0 : index
    %c0_46 = arith.constant 0 : index
    %c0_47 = arith.constant 0 : index
    %45 = vector.load %arg12[%c0_45, %c0_46, %c0_47] : memref<1x1x32xf32, #tpu.memory_space<vmem>>, vector<1x1x32xf32>
    %46 = vector.shape_cast %45 : vector<1x1x32xf32> to vector<1x32xf32>
    %c0_48 = arith.constant 0 : index
    %c0_49 = arith.constant 0 : index
    %c0_50 = arith.constant 0 : index
    %47 = vector.load %arg13[%c0_48, %c0_49, %c0_50] : memref<1x1x32xf32, #tpu.memory_space<vmem>>, vector<1x1x32xf32>
    %48 = vector.shape_cast %47 : vector<1x1x32xf32> to vector<1x32xf32>
    %49 = vector.extract_strided_slice %17 {offsets = [0, 0], sizes = [8, 8], strides = [1, 1]} : vector<8x32xf32> to vector<8x8xf32>
    %50 = vector.extract_strided_slice %39 {offsets = [0, 0], sizes = [8, 8], strides = [1, 1]} : vector<8x32xf32> to vector<8x8xf32>
    %cst_51 = arith.constant dense<0.000000e+00> : vector<8x8xf32>
    %51 = tpu.matmul %49, %50, %cst_51 {dimension_numbers = #tpu.dot_dimension_numbers<[1], [1], [0], [0], [0, 0, 1, 0], [], []>} : vector<8x8xf32>, vector<8x8xf32>, vector<8x8xf32> -> vector<8x8xf32>
    %cst_52 = arith.constant 0.353553385 : f32
    %52 = vector.broadcast %cst_52 : f32 to vector<8x8xf32>
    %53 = arith.mulf %51, %52 : vector<8x8xf32>
    %54 = vector.broadcast %10 : vector<1x8xf32> to vector<8x8xf32>
    %55 = arith.addf %53, %54 : vector<8x8xf32>
    %cst_53 = arith.constant dense<0xFF800000> : vector<8xf32>
    %56 = vector.multi_reduction <maximumf>, %55, %cst_53 [1] : vector<8x8xf32> to vector<8xf32>
    %57 = vector.shape_cast %56 : vector<8xf32> to vector<8x1xf32>
    %58 = vector.broadcast %57 : vector<8x1xf32> to vector<8x8xf32>
    %59 = arith.subf %55, %58 : vector<8x8xf32>
    %60 = math.exp %59 : vector<8x8xf32>
    %cst_54 = arith.constant dense<0.000000e+00> : vector<8xf32>
    %61 = vector.multi_reduction <add>, %60, %cst_54 [1] : vector<8x8xf32> to vector<8xf32>
    %62 = vector.shape_cast %61 : vector<8xf32> to vector<8x1xf32>
    %63 = tpu.reciprocal %62 {approx = true} : vector<8x1xf32> -> vector<8x1xf32>
    %64 = vector.broadcast %63 : vector<8x1xf32> to vector<8x8xf32>
    %65 = arith.mulf %60, %64 : vector<8x8xf32>
    %66 = vector.extract_strided_slice %40 {offsets = [0, 0], sizes = [8, 8], strides = [1, 1]} : vector<8x32xf32> to vector<8x8xf32>
    %cst_55 = arith.constant dense<0.000000e+00> : vector<8x8xf32>
    %67 = tpu.matmul %65, %66, %cst_55 {dimension_numbers = #tpu.dot_dimension_numbers<[1], [0], [0], [1], [0, 0, 1, 1], [], []>} : vector<8x8xf32>, vector<8x8xf32>, vector<8x8xf32> -> vector<8x8xf32>
    %68 = vector.extract_strided_slice %42 {offsets = [0, 0], sizes = [8, 32], strides = [1, 1]} : vector<32x32xf32> to vector<8x32xf32>
    %cst_56 = arith.constant dense<0.000000e+00> : vector<8x32xf32>
    %69 = tpu.matmul %67, %68, %cst_56 {dimension_numbers = #tpu.dot_dimension_numbers<[1], [0], [0], [1], [0, 0, 1, 1], [], []>} : vector<8x8xf32>, vector<8x32xf32>, vector<8x32xf32> -> vector<8x32xf32>
    %70 = vector.extract_strided_slice %17 {offsets = [0, 8], sizes = [8, 8], strides = [1, 1]} : vector<8x32xf32> to vector<8x8xf32>
    %71 = vector.extract_strided_slice %39 {offsets = [0, 8], sizes = [8, 8], strides = [1, 1]} : vector<8x32xf32> to vector<8x8xf32>
    %cst_57 = arith.constant dense<0.000000e+00> : vector<8x8xf32>
    %72 = tpu.matmul %70, %71, %cst_57 {dimension_numbers = #tpu.dot_dimension_numbers<[1], [1], [0], [0], [0, 0, 1, 0], [], []>} : vector<8x8xf32>, vector<8x8xf32>, vector<8x8xf32> -> vector<8x8xf32>
    %cst_58 = arith.constant 0.353553385 : f32
    %73 = vector.broadcast %cst_58 : f32 to vector<8x8xf32>
    %74 = arith.mulf %72, %73 : vector<8x8xf32>
    %75 = vector.broadcast %10 : vector<1x8xf32> to vector<8x8xf32>
    %76 = arith.addf %74, %75 : vector<8x8xf32>
    %cst_59 = arith.constant dense<0xFF800000> : vector<8xf32>
    %77 = vector.multi_reduction <maximumf>, %76, %cst_59 [1] : vector<8x8xf32> to vector<8xf32>
    %78 = vector.shape_cast %77 : vector<8xf32> to vector<8x1xf32>
    %79 = vector.broadcast %78 : vector<8x1xf32> to vector<8x8xf32>
    %80 = arith.subf %76, %79 : vector<8x8xf32>
    %81 = math.exp %80 : vector<8x8xf32>
    %cst_60 = arith.constant dense<0.000000e+00> : vector<8xf32>
    %82 = vector.multi_reduction <add>, %81, %cst_60 [1] : vector<8x8xf32> to vector<8xf32>
    %83 = vector.shape_cast %82 : vector<8xf32> to vector<8x1xf32>
    %84 = tpu.reciprocal %83 {approx = true} : vector<8x1xf32> -> vector<8x1xf32>
    %85 = vector.broadcast %84 : vector<8x1xf32> to vector<8x8xf32>
    %86 = arith.mulf %81, %85 : vector<8x8xf32>
    %87 = vector.extract_strided_slice %40 {offsets = [0, 8], sizes = [8, 8], strides = [1, 1]} : vector<8x32xf32> to vector<8x8xf32>
    %cst_61 = arith.constant dense<0.000000e+00> : vector<8x8xf32>
    %88 = tpu.matmul %86, %87, %cst_61 {dimension_numbers = #tpu.dot_dimension_numbers<[1], [0], [0], [1], [0, 0, 1, 1], [], []>} : vector<8x8xf32>, vector<8x8xf32>, vector<8x8xf32> -> vector<8x8xf32>
    %89 = vector.extract_strided_slice %42 {offsets = [8, 0], sizes = [8, 32], strides = [1, 1]} : vector<32x32xf32> to vector<8x32xf32>
    %cst_62 = arith.constant dense<0.000000e+00> : vector<8x32xf32>
    %90 = tpu.matmul %88, %89, %cst_62 {dimension_numbers = #tpu.dot_dimension_numbers<[1], [0], [0], [1], [0, 0, 1, 1], [], []>} : vector<8x8xf32>, vector<8x32xf32>, vector<8x32xf32> -> vector<8x32xf32>
    %91 = arith.addf %69, %90 : vector<8x32xf32>
    %92 = vector.extract_strided_slice %17 {offsets = [0, 16], sizes = [8, 8], strides = [1, 1]} : vector<8x32xf32> to vector<8x8xf32>
    %93 = vector.extract_strided_slice %39 {offsets = [0, 16], sizes = [8, 8], strides = [1, 1]} : vector<8x32xf32> to vector<8x8xf32>
    %cst_63 = arith.constant dense<0.000000e+00> : vector<8x8xf32>
    %94 = tpu.matmul %92, %93, %cst_63 {dimension_numbers = #tpu.dot_dimension_numbers<[1], [1], [0], [0], [0, 0, 1, 0], [], []>} : vector<8x8xf32>, vector<8x8xf32>, vector<8x8xf32> -> vector<8x8xf32>
    %cst_64 = arith.constant 0.353553385 : f32
    %95 = vector.broadcast %cst_64 : f32 to vector<8x8xf32>
    %96 = arith.mulf %94, %95 : vector<8x8xf32>
    %97 = vector.broadcast %10 : vector<1x8xf32> to vector<8x8xf32>
    %98 = arith.addf %96, %97 : vector<8x8xf32>
    %cst_65 = arith.constant dense<0xFF800000> : vector<8xf32>
    %99 = vector.multi_reduction <maximumf>, %98, %cst_65 [1] : vector<8x8xf32> to vector<8xf32>
    %100 = vector.shape_cast %99 : vector<8xf32> to vector<8x1xf32>
    %101 = vector.broadcast %100 : vector<8x1xf32> to vector<8x8xf32>
    %102 = arith.subf %98, %101 : vector<8x8xf32>
    %103 = math.exp %102 : vector<8x8xf32>
    %cst_66 = arith.constant dense<0.000000e+00> : vector<8xf32>
    %104 = vector.multi_reduction <add>, %103, %cst_66 [1] : vector<8x8xf32> to vector<8xf32>
    %105 = vector.shape_cast %104 : vector<8xf32> to vector<8x1xf32>
    %106 = tpu.reciprocal %105 {approx = true} : vector<8x1xf32> -> vector<8x1xf32>
    %107 = vector.broadcast %106 : vector<8x1xf32> to vector<8x8xf32>
    %108 = arith.mulf %103, %107 : vector<8x8xf32>
    %109 = vector.extract_strided_slice %40 {offsets = [0, 16], sizes = [8, 8], strides = [1, 1]} : vector<8x32xf32> to vector<8x8xf32>
    %cst_67 = arith.constant dense<0.000000e+00> : vector<8x8xf32>
    %110 = tpu.matmul %108, %109, %cst_67 {dimension_numbers = #tpu.dot_dimension_numbers<[1], [0], [0], [1], [0, 0, 1, 1], [], []>} : vector<8x8xf32>, vector<8x8xf32>, vector<8x8xf32> -> vector<8x8xf32>
    %111 = vector.extract_strided_slice %42 {offsets = [16, 0], sizes = [8, 32], strides = [1, 1]} : vector<32x32xf32> to vector<8x32xf32>
    %cst_68 = arith.constant dense<0.000000e+00> : vector<8x32xf32>
    %112 = tpu.matmul %110, %111, %cst_68 {dimension_numbers = #tpu.dot_dimension_numbers<[1], [0], [0], [1], [0, 0, 1, 1], [], []>} : vector<8x8xf32>, vector<8x32xf32>, vector<8x32xf32> -> vector<8x32xf32>
    %113 = arith.addf %91, %112 : vector<8x32xf32>
    %114 = vector.extract_strided_slice %17 {offsets = [0, 24], sizes = [8, 8], strides = [1, 1]} : vector<8x32xf32> to vector<8x8xf32>
    %115 = vector.extract_strided_slice %39 {offsets = [0, 24], sizes = [8, 8], strides = [1, 1]} : vector<8x32xf32> to vector<8x8xf32>
    %cst_69 = arith.constant dense<0.000000e+00> : vector<8x8xf32>
    %116 = tpu.matmul %114, %115, %cst_69 {dimension_numbers = #tpu.dot_dimension_numbers<[1], [1], [0], [0], [0, 0, 1, 0], [], []>} : vector<8x8xf32>, vector<8x8xf32>, vector<8x8xf32> -> vector<8x8xf32>
    %cst_70 = arith.constant 0.353553385 : f32
    %117 = vector.broadcast %cst_70 : f32 to vector<8x8xf32>
    %118 = arith.mulf %116, %117 : vector<8x8xf32>
    %119 = vector.broadcast %10 : vector<1x8xf32> to vector<8x8xf32>
    %120 = arith.addf %118, %119 : vector<8x8xf32>
    %cst_71 = arith.constant dense<0xFF800000> : vector<8xf32>
    %121 = vector.multi_reduction <maximumf>, %120, %cst_71 [1] : vector<8x8xf32> to vector<8xf32>
    %122 = vector.shape_cast %121 : vector<8xf32> to vector<8x1xf32>
    %123 = vector.broadcast %122 : vector<8x1xf32> to vector<8x8xf32>
    %124 = arith.subf %120, %123 : vector<8x8xf32>
    %125 = math.exp %124 : vector<8x8xf32>
    %cst_72 = arith.constant dense<0.000000e+00> : vector<8xf32>
    %126 = vector.multi_reduction <add>, %125, %cst_72 [1] : vector<8x8xf32> to vector<8xf32>
    %127 = vector.shape_cast %126 : vector<8xf32> to vector<8x1xf32>
    %128 = tpu.reciprocal %127 {approx = true} : vector<8x1xf32> -> vector<8x1xf32>
    %129 = vector.broadcast %128 : vector<8x1xf32> to vector<8x8xf32>
    %130 = arith.mulf %125, %129 : vector<8x8xf32>
    %131 = vector.extract_strided_slice %40 {offsets = [0, 24], sizes = [8, 8], strides = [1, 1]} : vector<8x32xf32> to vector<8x8xf32>
    %cst_73 = arith.constant dense<0.000000e+00> : vector<8x8xf32>
    %132 = tpu.matmul %130, %131, %cst_73 {dimension_numbers = #tpu.dot_dimension_numbers<[1], [0], [0], [1], [0, 0, 1, 1], [], []>} : vector<8x8xf32>, vector<8x8xf32>, vector<8x8xf32> -> vector<8x8xf32>
    %133 = vector.extract_strided_slice %42 {offsets = [24, 0], sizes = [8, 32], strides = [1, 1]} : vector<32x32xf32> to vector<8x32xf32>
    %cst_74 = arith.constant dense<0.000000e+00> : vector<8x32xf32>
    %134 = tpu.matmul %132, %133, %cst_74 {dimension_numbers = #tpu.dot_dimension_numbers<[1], [0], [0], [1], [0, 0, 1, 1], [], []>} : vector<8x8xf32>, vector<8x32xf32>, vector<8x32xf32> -> vector<8x32xf32>
    %135 = arith.addf %113, %134 : vector<8x32xf32>
    %136 = vector.broadcast %44 : vector<1x32xf32> to vector<8x32xf32>
    %137 = arith.addf %135, %136 : vector<8x32xf32>
    %138 = arith.addf %137, %4 : vector<8x32xf32>
    %cst_75 = arith.constant dense<0.000000e+00> : vector<8xf32>
    %139 = vector.multi_reduction <add>, %138, %cst_75 [1] : vector<8x32xf32> to vector<8xf32>
    %140 = vector.shape_cast %139 : vector<8xf32> to vector<8x1xf32>
    %cst_76 = arith.constant 3.200000e+01 : f32
    %141 = vector.broadcast %cst_76 : f32 to vector<8x1xf32>
    %142 = arith.divf %140, %141 : vector<8x1xf32>
    %143 = vector.broadcast %142 : vector<8x1xf32> to vector<8x32xf32>
    %144 = arith.subf %138, %143 : vector<8x32xf32>
    %145 = arith.mulf %144, %144 : vector<8x32xf32>
    %cst_77 = arith.constant dense<0.000000e+00> : vector<8xf32>
    %146 = vector.multi_reduction <add>, %145, %cst_77 [1] : vector<8x32xf32> to vector<8xf32>
    %147 = vector.shape_cast %146 : vector<8xf32> to vector<8x1xf32>
    %cst_78 = arith.constant 3.200000e+01 : f32
    %148 = vector.broadcast %cst_78 : f32 to vector<8x1xf32>
    %149 = arith.divf %147, %148 : vector<8x1xf32>
    %150 = vector.broadcast %142 : vector<8x1xf32> to vector<8x32xf32>
    %151 = arith.subf %138, %150 : vector<8x32xf32>
    %cst_79 = arith.constant 9.99999996E-13 : f32
    %152 = vector.broadcast %cst_79 : f32 to vector<8x1xf32>
    %153 = arith.addf %149, %152 : vector<8x1xf32>
    %154 = math.rsqrt %153 : vector<8x1xf32>
    %155 = vector.broadcast %154 : vector<8x1xf32> to vector<8x32xf32>
    %156 = arith.mulf %151, %155 : vector<8x32xf32>
    %157 = vector.broadcast %46 : vector<1x32xf32> to vector<8x32xf32>
    %158 = arith.mulf %156, %157 : vector<8x32xf32>
    %159 = vector.broadcast %48 : vector<1x32xf32> to vector<8x32xf32>
    %160 = arith.addf %158, %159 : vector<8x32xf32>
    %161 = vector.extract_strided_slice %38 {offsets = [0, 0], sizes = [8, 32], strides = [1, 1]} : vector<8x64xf32> to vector<8x32xf32>
    %162 = vector.extract_strided_slice %38 {offsets = [0, 32], sizes = [8, 32], strides = [1, 1]} : vector<8x64xf32> to vector<8x32xf32>
    %c0_80 = arith.constant 0 : index
    %c0_81 = arith.constant 0 : index
    %c0_82 = arith.constant 0 : index
    %163 = vector.load %arg10[%c0_80, %c0_81, %c0_82] : memref<1x32x32xf32, #tpu.memory_space<vmem>>, vector<1x32x32xf32>
    %164 = vector.shape_cast %163 : vector<1x32x32xf32> to vector<32x32xf32>
    %c0_83 = arith.constant 0 : index
    %c0_84 = arith.constant 0 : index
    %c0_85 = arith.constant 0 : index
    %165 = vector.load %arg11[%c0_83, %c0_84, %c0_85] : memref<1x1x32xf32, #tpu.memory_space<vmem>>, vector<1x1x32xf32>
    %166 = vector.shape_cast %165 : vector<1x1x32xf32> to vector<1x32xf32>
    %c0_86 = arith.constant 0 : index
    %c0_87 = arith.constant 0 : index
    %c0_88 = arith.constant 0 : index
    %167 = vector.load %arg12[%c0_86, %c0_87, %c0_88] : memref<1x1x32xf32, #tpu.memory_space<vmem>>, vector<1x1x32xf32>
    %168 = vector.shape_cast %167 : vector<1x1x32xf32> to vector<1x32xf32>
    %c0_89 = arith.constant 0 : index
    %c0_90 = arith.constant 0 : index
    %c0_91 = arith.constant 0 : index
    %169 = vector.load %arg13[%c0_89, %c0_90, %c0_91] : memref<1x1x32xf32, #tpu.memory_space<vmem>>, vector<1x1x32xf32>
    %170 = vector.shape_cast %169 : vector<1x1x32xf32> to vector<1x32xf32>
    %171 = vector.extract_strided_slice %24 {offsets = [0, 0], sizes = [8, 8], strides = [1, 1]} : vector<8x32xf32> to vector<8x8xf32>
    %172 = vector.extract_strided_slice %161 {offsets = [0, 0], sizes = [8, 8], strides = [1, 1]} : vector<8x32xf32> to vector<8x8xf32>
    %cst_92 = arith.constant dense<0.000000e+00> : vector<8x8xf32>
    %173 = tpu.matmul %171, %172, %cst_92 {dimension_numbers = #tpu.dot_dimension_numbers<[1], [1], [0], [0], [0, 0, 1, 0], [], []>} : vector<8x8xf32>, vector<8x8xf32>, vector<8x8xf32> -> vector<8x8xf32>
    %cst_93 = arith.constant 0.353553385 : f32
    %174 = vector.broadcast %cst_93 : f32 to vector<8x8xf32>
    %175 = arith.mulf %173, %174 : vector<8x8xf32>
    %176 = vector.broadcast %8 : vector<1x8xf32> to vector<8x8xf32>
    %177 = arith.addf %175, %176 : vector<8x8xf32>
    %cst_94 = arith.constant dense<0xFF800000> : vector<8xf32>
    %178 = vector.multi_reduction <maximumf>, %177, %cst_94 [1] : vector<8x8xf32> to vector<8xf32>
    %179 = vector.shape_cast %178 : vector<8xf32> to vector<8x1xf32>
    %180 = vector.broadcast %179 : vector<8x1xf32> to vector<8x8xf32>
    %181 = arith.subf %177, %180 : vector<8x8xf32>
    %182 = math.exp %181 : vector<8x8xf32>
    %cst_95 = arith.constant dense<0.000000e+00> : vector<8xf32>
    %183 = vector.multi_reduction <add>, %182, %cst_95 [1] : vector<8x8xf32> to vector<8xf32>
    %184 = vector.shape_cast %183 : vector<8xf32> to vector<8x1xf32>
    %185 = tpu.reciprocal %184 {approx = true} : vector<8x1xf32> -> vector<8x1xf32>
    %186 = vector.broadcast %185 : vector<8x1xf32> to vector<8x8xf32>
    %187 = arith.mulf %182, %186 : vector<8x8xf32>
    %188 = vector.extract_strided_slice %162 {offsets = [0, 0], sizes = [8, 8], strides = [1, 1]} : vector<8x32xf32> to vector<8x8xf32>
    %cst_96 = arith.constant dense<0.000000e+00> : vector<8x8xf32>
    %189 = tpu.matmul %187, %188, %cst_96 {dimension_numbers = #tpu.dot_dimension_numbers<[1], [0], [0], [1], [0, 0, 1, 1], [], []>} : vector<8x8xf32>, vector<8x8xf32>, vector<8x8xf32> -> vector<8x8xf32>
    %190 = vector.extract_strided_slice %164 {offsets = [0, 0], sizes = [8, 32], strides = [1, 1]} : vector<32x32xf32> to vector<8x32xf32>
    %cst_97 = arith.constant dense<0.000000e+00> : vector<8x32xf32>
    %191 = tpu.matmul %189, %190, %cst_97 {dimension_numbers = #tpu.dot_dimension_numbers<[1], [0], [0], [1], [0, 0, 1, 1], [], []>} : vector<8x8xf32>, vector<8x32xf32>, vector<8x32xf32> -> vector<8x32xf32>
    %192 = vector.extract_strided_slice %24 {offsets = [0, 8], sizes = [8, 8], strides = [1, 1]} : vector<8x32xf32> to vector<8x8xf32>
    %193 = vector.extract_strided_slice %161 {offsets = [0, 8], sizes = [8, 8], strides = [1, 1]} : vector<8x32xf32> to vector<8x8xf32>
    %cst_98 = arith.constant dense<0.000000e+00> : vector<8x8xf32>
    %194 = tpu.matmul %192, %193, %cst_98 {dimension_numbers = #tpu.dot_dimension_numbers<[1], [1], [0], [0], [0, 0, 1, 0], [], []>} : vector<8x8xf32>, vector<8x8xf32>, vector<8x8xf32> -> vector<8x8xf32>
    %cst_99 = arith.constant 0.353553385 : f32
    %195 = vector.broadcast %cst_99 : f32 to vector<8x8xf32>
    %196 = arith.mulf %194, %195 : vector<8x8xf32>
    %197 = vector.broadcast %8 : vector<1x8xf32> to vector<8x8xf32>
    %198 = arith.addf %196, %197 : vector<8x8xf32>
    %cst_100 = arith.constant dense<0xFF800000> : vector<8xf32>
    %199 = vector.multi_reduction <maximumf>, %198, %cst_100 [1] : vector<8x8xf32> to vector<8xf32>
    %200 = vector.shape_cast %199 : vector<8xf32> to vector<8x1xf32>
    %201 = vector.broadcast %200 : vector<8x1xf32> to vector<8x8xf32>
    %202 = arith.subf %198, %201 : vector<8x8xf32>
    %203 = math.exp %202 : vector<8x8xf32>
    %cst_101 = arith.constant dense<0.000000e+00> : vector<8xf32>
    %204 = vector.multi_reduction <add>, %203, %cst_101 [1] : vector<8x8xf32> to vector<8xf32>
    %205 = vector.shape_cast %204 : vector<8xf32> to vector<8x1xf32>
    %206 = tpu.reciprocal %205 {approx = true} : vector<8x1xf32> -> vector<8x1xf32>
    %207 = vector.broadcast %206 : vector<8x1xf32> to vector<8x8xf32>
    %208 = arith.mulf %203, %207 : vector<8x8xf32>
    %209 = vector.extract_strided_slice %162 {offsets = [0, 8], sizes = [8, 8], strides = [1, 1]} : vector<8x32xf32> to vector<8x8xf32>
    %cst_102 = arith.constant dense<0.000000e+00> : vector<8x8xf32>
    %210 = tpu.matmul %208, %209, %cst_102 {dimension_numbers = #tpu.dot_dimension_numbers<[1], [0], [0], [1], [0, 0, 1, 1], [], []>} : vector<8x8xf32>, vector<8x8xf32>, vector<8x8xf32> -> vector<8x8xf32>
    %211 = vector.extract_strided_slice %164 {offsets = [8, 0], sizes = [8, 32], strides = [1, 1]} : vector<32x32xf32> to vector<8x32xf32>
    %cst_103 = arith.constant dense<0.000000e+00> : vector<8x32xf32>
    %212 = tpu.matmul %210, %211, %cst_103 {dimension_numbers = #tpu.dot_dimension_numbers<[1], [0], [0], [1], [0, 0, 1, 1], [], []>} : vector<8x8xf32>, vector<8x32xf32>, vector<8x32xf32> -> vector<8x32xf32>
    %213 = arith.addf %191, %212 : vector<8x32xf32>
    %214 = vector.extract_strided_slice %24 {offsets = [0, 16], sizes = [8, 8], strides = [1, 1]} : vector<8x32xf32> to vector<8x8xf32>
    %215 = vector.extract_strided_slice %161 {offsets = [0, 16], sizes = [8, 8], strides = [1, 1]} : vector<8x32xf32> to vector<8x8xf32>
    %cst_104 = arith.constant dense<0.000000e+00> : vector<8x8xf32>
    %216 = tpu.matmul %214, %215, %cst_104 {dimension_numbers = #tpu.dot_dimension_numbers<[1], [1], [0], [0], [0, 0, 1, 0], [], []>} : vector<8x8xf32>, vector<8x8xf32>, vector<8x8xf32> -> vector<8x8xf32>
    %cst_105 = arith.constant 0.353553385 : f32
    %217 = vector.broadcast %cst_105 : f32 to vector<8x8xf32>
    %218 = arith.mulf %216, %217 : vector<8x8xf32>
    %219 = vector.broadcast %8 : vector<1x8xf32> to vector<8x8xf32>
    %220 = arith.addf %218, %219 : vector<8x8xf32>
    %cst_106 = arith.constant dense<0xFF800000> : vector<8xf32>
    %221 = vector.multi_reduction <maximumf>, %220, %cst_106 [1] : vector<8x8xf32> to vector<8xf32>
    %222 = vector.shape_cast %221 : vector<8xf32> to vector<8x1xf32>
    %223 = vector.broadcast %222 : vector<8x1xf32> to vector<8x8xf32>
    %224 = arith.subf %220, %223 : vector<8x8xf32>
    %225 = math.exp %224 : vector<8x8xf32>
    %cst_107 = arith.constant dense<0.000000e+00> : vector<8xf32>
    %226 = vector.multi_reduction <add>, %225, %cst_107 [1] : vector<8x8xf32> to vector<8xf32>
    %227 = vector.shape_cast %226 : vector<8xf32> to vector<8x1xf32>
    %228 = tpu.reciprocal %227 {approx = true} : vector<8x1xf32> -> vector<8x1xf32>
    %229 = vector.broadcast %228 : vector<8x1xf32> to vector<8x8xf32>
    %230 = arith.mulf %225, %229 : vector<8x8xf32>
    %231 = vector.extract_strided_slice %162 {offsets = [0, 16], sizes = [8, 8], strides = [1, 1]} : vector<8x32xf32> to vector<8x8xf32>
    %cst_108 = arith.constant dense<0.000000e+00> : vector<8x8xf32>
    %232 = tpu.matmul %230, %231, %cst_108 {dimension_numbers = #tpu.dot_dimension_numbers<[1], [0], [0], [1], [0, 0, 1, 1], [], []>} : vector<8x8xf32>, vector<8x8xf32>, vector<8x8xf32> -> vector<8x8xf32>
    %233 = vector.extract_strided_slice %164 {offsets = [16, 0], sizes = [8, 32], strides = [1, 1]} : vector<32x32xf32> to vector<8x32xf32>
    %cst_109 = arith.constant dense<0.000000e+00> : vector<8x32xf32>
    %234 = tpu.matmul %232, %233, %cst_109 {dimension_numbers = #tpu.dot_dimension_numbers<[1], [0], [0], [1], [0, 0, 1, 1], [], []>} : vector<8x8xf32>, vector<8x32xf32>, vector<8x32xf32> -> vector<8x32xf32>
    %235 = arith.addf %213, %234 : vector<8x32xf32>
    %236 = vector.extract_strided_slice %24 {offsets = [0, 24], sizes = [8, 8], strides = [1, 1]} : vector<8x32xf32> to vector<8x8xf32>
    %237 = vector.extract_strided_slice %161 {offsets = [0, 24], sizes = [8, 8], strides = [1, 1]} : vector<8x32xf32> to vector<8x8xf32>
    %cst_110 = arith.constant dense<0.000000e+00> : vector<8x8xf32>
    %238 = tpu.matmul %236, %237, %cst_110 {dimension_numbers = #tpu.dot_dimension_numbers<[1], [1], [0], [0], [0, 0, 1, 0], [], []>} : vector<8x8xf32>, vector<8x8xf32>, vector<8x8xf32> -> vector<8x8xf32>
    %cst_111 = arith.constant 0.353553385 : f32
    %239 = vector.broadcast %cst_111 : f32 to vector<8x8xf32>
    %240 = arith.mulf %238, %239 : vector<8x8xf32>
    %241 = vector.broadcast %8 : vector<1x8xf32> to vector<8x8xf32>
    %242 = arith.addf %240, %241 : vector<8x8xf32>
    %cst_112 = arith.constant dense<0xFF800000> : vector<8xf32>
    %243 = vector.multi_reduction <maximumf>, %242, %cst_112 [1] : vector<8x8xf32> to vector<8xf32>
    %244 = vector.shape_cast %243 : vector<8xf32> to vector<8x1xf32>
    %245 = vector.broadcast %244 : vector<8x1xf32> to vector<8x8xf32>
    %246 = arith.subf %242, %245 : vector<8x8xf32>
    %247 = math.exp %246 : vector<8x8xf32>
    %cst_113 = arith.constant dense<0.000000e+00> : vector<8xf32>
    %248 = vector.multi_reduction <add>, %247, %cst_113 [1] : vector<8x8xf32> to vector<8xf32>
    %249 = vector.shape_cast %248 : vector<8xf32> to vector<8x1xf32>
    %250 = tpu.reciprocal %249 {approx = true} : vector<8x1xf32> -> vector<8x1xf32>
    %251 = vector.broadcast %250 : vector<8x1xf32> to vector<8x8xf32>
    %252 = arith.mulf %247, %251 : vector<8x8xf32>
    %253 = vector.extract_strided_slice %162 {offsets = [0, 24], sizes = [8, 8], strides = [1, 1]} : vector<8x32xf32> to vector<8x8xf32>
    %cst_114 = arith.constant dense<0.000000e+00> : vector<8x8xf32>
    %254 = tpu.matmul %252, %253, %cst_114 {dimension_numbers = #tpu.dot_dimension_numbers<[1], [0], [0], [1], [0, 0, 1, 1], [], []>} : vector<8x8xf32>, vector<8x8xf32>, vector<8x8xf32> -> vector<8x8xf32>
    %255 = vector.extract_strided_slice %164 {offsets = [24, 0], sizes = [8, 32], strides = [1, 1]} : vector<32x32xf32> to vector<8x32xf32>
    %cst_115 = arith.constant dense<0.000000e+00> : vector<8x32xf32>
    %256 = tpu.matmul %254, %255, %cst_115 {dimension_numbers = #tpu.dot_dimension_numbers<[1], [0], [0], [1], [0, 0, 1, 1], [], []>} : vector<8x8xf32>, vector<8x32xf32>, vector<8x32xf32> -> vector<8x32xf32>
    %257 = arith.addf %235, %256 : vector<8x32xf32>
    %258 = vector.broadcast %166 : vector<1x32xf32> to vector<8x32xf32>
    %259 = arith.addf %257, %258 : vector<8x32xf32>
    %260 = arith.addf %259, %6 : vector<8x32xf32>
    %cst_116 = arith.constant dense<0.000000e+00> : vector<8xf32>
    %261 = vector.multi_reduction <add>, %260, %cst_116 [1] : vector<8x32xf32> to vector<8xf32>
    %262 = vector.shape_cast %261 : vector<8xf32> to vector<8x1xf32>
    %cst_117 = arith.constant 3.200000e+01 : f32
    %263 = vector.broadcast %cst_117 : f32 to vector<8x1xf32>
    %264 = arith.divf %262, %263 : vector<8x1xf32>
    %265 = vector.broadcast %264 : vector<8x1xf32> to vector<8x32xf32>
    %266 = arith.subf %260, %265 : vector<8x32xf32>
    %267 = arith.mulf %266, %266 : vector<8x32xf32>
    %cst_118 = arith.constant dense<0.000000e+00> : vector<8xf32>
    %268 = vector.multi_reduction <add>, %267, %cst_118 [1] : vector<8x32xf32> to vector<8xf32>
    %269 = vector.shape_cast %268 : vector<8xf32> to vector<8x1xf32>
    %cst_119 = arith.constant 3.200000e+01 : f32
    %270 = vector.broadcast %cst_119 : f32 to vector<8x1xf32>
    %271 = arith.divf %269, %270 : vector<8x1xf32>
    %272 = vector.broadcast %264 : vector<8x1xf32> to vector<8x32xf32>
    %273 = arith.subf %260, %272 : vector<8x32xf32>
    %cst_120 = arith.constant 9.99999996E-13 : f32
    %274 = vector.broadcast %cst_120 : f32 to vector<8x1xf32>
    %275 = arith.addf %271, %274 : vector<8x1xf32>
    %276 = math.rsqrt %275 : vector<8x1xf32>
    %277 = vector.broadcast %276 : vector<8x1xf32> to vector<8x32xf32>
    %278 = arith.mulf %273, %277 : vector<8x32xf32>
    %279 = vector.broadcast %168 : vector<1x32xf32> to vector<8x32xf32>
    %280 = arith.mulf %278, %279 : vector<8x32xf32>
    %281 = vector.broadcast %170 : vector<1x32xf32> to vector<8x32xf32>
    %282 = arith.addf %280, %281 : vector<8x32xf32>
    %c0_121 = arith.constant 0 : index
    %c0_122 = arith.constant 0 : index
    %c0_123 = arith.constant 0 : index
    %283 = vector.load %arg14[%c0_121, %c0_122, %c0_123] : memref<1x32x96xf32, #tpu.memory_space<vmem>>, vector<1x32x96xf32>
    %284 = vector.shape_cast %283 : vector<1x32x96xf32> to vector<32x96xf32>
    %cst_124 = arith.constant dense<0.000000e+00> : vector<8x96xf32>
    %285 = tpu.matmul %160, %284, %cst_124 {dimension_numbers = #tpu.dot_dimension_numbers<[1], [0], [0], [1], [0, 0, 1, 1], [], []>} : vector<8x32xf32>, vector<32x96xf32>, vector<8x96xf32> -> vector<8x96xf32>
    %c0_125 = arith.constant 0 : index
    %c0_126 = arith.constant 0 : index
    %c0_127 = arith.constant 0 : index
    %286 = vector.load %arg15[%c0_125, %c0_126, %c0_127] : memref<1x1x96xf32, #tpu.memory_space<vmem>>, vector<1x1x96xf32>
    %287 = vector.shape_cast %286 : vector<1x1x96xf32> to vector<1x96xf32>
    %288 = vector.broadcast %287 : vector<1x96xf32> to vector<8x96xf32>
    %289 = arith.addf %285, %288 : vector<8x96xf32>
    %290 = vector.extract_strided_slice %289 {offsets = [0, 0], sizes = [8, 32], strides = [1, 1]} : vector<8x96xf32> to vector<8x32xf32>
    %291 = vector.extract_strided_slice %289 {offsets = [0, 32], sizes = [8, 32], strides = [1, 1]} : vector<8x96xf32> to vector<8x32xf32>
    %292 = vector.extract_strided_slice %289 {offsets = [0, 64], sizes = [8, 32], strides = [1, 1]} : vector<8x96xf32> to vector<8x32xf32>
    %c0_128 = arith.constant 0 : index
    %c0_129 = arith.constant 0 : index
    %c0_130 = arith.constant 0 : index
    %293 = vector.load %arg16[%c0_128, %c0_129, %c0_130] : memref<1x32x32xf32, #tpu.memory_space<vmem>>, vector<1x32x32xf32>
    %294 = vector.shape_cast %293 : vector<1x32x32xf32> to vector<32x32xf32>
    %c0_131 = arith.constant 0 : index
    %c0_132 = arith.constant 0 : index
    %c0_133 = arith.constant 0 : index
    %295 = vector.load %arg17[%c0_131, %c0_132, %c0_133] : memref<1x1x32xf32, #tpu.memory_space<vmem>>, vector<1x1x32xf32>
    %296 = vector.shape_cast %295 : vector<1x1x32xf32> to vector<1x32xf32>
    %c0_134 = arith.constant 0 : index
    %c0_135 = arith.constant 0 : index
    %c0_136 = arith.constant 0 : index
    %297 = vector.load %arg18[%c0_134, %c0_135, %c0_136] : memref<1x1x32xf32, #tpu.memory_space<vmem>>, vector<1x1x32xf32>
    %298 = vector.shape_cast %297 : vector<1x1x32xf32> to vector<1x32xf32>
    %c0_137 = arith.constant 0 : index
    %c0_138 = arith.constant 0 : index
    %c0_139 = arith.constant 0 : index
    %299 = vector.load %arg19[%c0_137, %c0_138, %c0_139] : memref<1x1x32xf32, #tpu.memory_space<vmem>>, vector<1x1x32xf32>
    %300 = vector.shape_cast %299 : vector<1x1x32xf32> to vector<1x32xf32>
    %301 = vector.extract_strided_slice %290 {offsets = [0, 0], sizes = [8, 8], strides = [1, 1]} : vector<8x32xf32> to vector<8x8xf32>
    %302 = vector.extract_strided_slice %291 {offsets = [0, 0], sizes = [8, 8], strides = [1, 1]} : vector<8x32xf32> to vector<8x8xf32>
    %cst_140 = arith.constant dense<0.000000e+00> : vector<8x8xf32>
    %303 = tpu.matmul %301, %302, %cst_140 {dimension_numbers = #tpu.dot_dimension_numbers<[1], [1], [0], [0], [0, 0, 1, 0], [], []>} : vector<8x8xf32>, vector<8x8xf32>, vector<8x8xf32> -> vector<8x8xf32>
    %cst_141 = arith.constant 0.353553385 : f32
    %304 = vector.broadcast %cst_141 : f32 to vector<8x8xf32>
    %305 = arith.mulf %303, %304 : vector<8x8xf32>
    %306 = vector.broadcast %8 : vector<1x8xf32> to vector<8x8xf32>
    %307 = arith.addf %305, %306 : vector<8x8xf32>
    %cst_142 = arith.constant dense<0xFF800000> : vector<8xf32>
    %308 = vector.multi_reduction <maximumf>, %307, %cst_142 [1] : vector<8x8xf32> to vector<8xf32>
    %309 = vector.shape_cast %308 : vector<8xf32> to vector<8x1xf32>
    %310 = vector.broadcast %309 : vector<8x1xf32> to vector<8x8xf32>
    %311 = arith.subf %307, %310 : vector<8x8xf32>
    %312 = math.exp %311 : vector<8x8xf32>
    %cst_143 = arith.constant dense<0.000000e+00> : vector<8xf32>
    %313 = vector.multi_reduction <add>, %312, %cst_143 [1] : vector<8x8xf32> to vector<8xf32>
    %314 = vector.shape_cast %313 : vector<8xf32> to vector<8x1xf32>
    %315 = tpu.reciprocal %314 {approx = true} : vector<8x1xf32> -> vector<8x1xf32>
    %316 = vector.broadcast %315 : vector<8x1xf32> to vector<8x8xf32>
    %317 = arith.mulf %312, %316 : vector<8x8xf32>
    %318 = vector.extract_strided_slice %292 {offsets = [0, 0], sizes = [8, 8], strides = [1, 1]} : vector<8x32xf32> to vector<8x8xf32>
    %cst_144 = arith.constant dense<0.000000e+00> : vector<8x8xf32>
    %319 = tpu.matmul %317, %318, %cst_144 {dimension_numbers = #tpu.dot_dimension_numbers<[1], [0], [0], [1], [0, 0, 1, 1], [], []>} : vector<8x8xf32>, vector<8x8xf32>, vector<8x8xf32> -> vector<8x8xf32>
    %320 = vector.extract_strided_slice %294 {offsets = [0, 0], sizes = [8, 32], strides = [1, 1]} : vector<32x32xf32> to vector<8x32xf32>
    %cst_145 = arith.constant dense<0.000000e+00> : vector<8x32xf32>
    %321 = tpu.matmul %319, %320, %cst_145 {dimension_numbers = #tpu.dot_dimension_numbers<[1], [0], [0], [1], [0, 0, 1, 1], [], []>} : vector<8x8xf32>, vector<8x32xf32>, vector<8x32xf32> -> vector<8x32xf32>
    %322 = vector.extract_strided_slice %290 {offsets = [0, 8], sizes = [8, 8], strides = [1, 1]} : vector<8x32xf32> to vector<8x8xf32>
    %323 = vector.extract_strided_slice %291 {offsets = [0, 8], sizes = [8, 8], strides = [1, 1]} : vector<8x32xf32> to vector<8x8xf32>
    %cst_146 = arith.constant dense<0.000000e+00> : vector<8x8xf32>
    %324 = tpu.matmul %322, %323, %cst_146 {dimension_numbers = #tpu.dot_dimension_numbers<[1], [1], [0], [0], [0, 0, 1, 0], [], []>} : vector<8x8xf32>, vector<8x8xf32>, vector<8x8xf32> -> vector<8x8xf32>
    %cst_147 = arith.constant 0.353553385 : f32
    %325 = vector.broadcast %cst_147 : f32 to vector<8x8xf32>
    %326 = arith.mulf %324, %325 : vector<8x8xf32>
    %327 = vector.broadcast %8 : vector<1x8xf32> to vector<8x8xf32>
    %328 = arith.addf %326, %327 : vector<8x8xf32>
    %cst_148 = arith.constant dense<0xFF800000> : vector<8xf32>
    %329 = vector.multi_reduction <maximumf>, %328, %cst_148 [1] : vector<8x8xf32> to vector<8xf32>
    %330 = vector.shape_cast %329 : vector<8xf32> to vector<8x1xf32>
    %331 = vector.broadcast %330 : vector<8x1xf32> to vector<8x8xf32>
    %332 = arith.subf %328, %331 : vector<8x8xf32>
    %333 = math.exp %332 : vector<8x8xf32>
    %cst_149 = arith.constant dense<0.000000e+00> : vector<8xf32>
    %334 = vector.multi_reduction <add>, %333, %cst_149 [1] : vector<8x8xf32> to vector<8xf32>
    %335 = vector.shape_cast %334 : vector<8xf32> to vector<8x1xf32>
    %336 = tpu.reciprocal %335 {approx = true} : vector<8x1xf32> -> vector<8x1xf32>
    %337 = vector.broadcast %336 : vector<8x1xf32> to vector<8x8xf32>
    %338 = arith.mulf %333, %337 : vector<8x8xf32>
    %339 = vector.extract_strided_slice %292 {offsets = [0, 8], sizes = [8, 8], strides = [1, 1]} : vector<8x32xf32> to vector<8x8xf32>
    %cst_150 = arith.constant dense<0.000000e+00> : vector<8x8xf32>
    %340 = tpu.matmul %338, %339, %cst_150 {dimension_numbers = #tpu.dot_dimension_numbers<[1], [0], [0], [1], [0, 0, 1, 1], [], []>} : vector<8x8xf32>, vector<8x8xf32>, vector<8x8xf32> -> vector<8x8xf32>
    %341 = vector.extract_strided_slice %294 {offsets = [8, 0], sizes = [8, 32], strides = [1, 1]} : vector<32x32xf32> to vector<8x32xf32>
    %cst_151 = arith.constant dense<0.000000e+00> : vector<8x32xf32>
    %342 = tpu.matmul %340, %341, %cst_151 {dimension_numbers = #tpu.dot_dimension_numbers<[1], [0], [0], [1], [0, 0, 1, 1], [], []>} : vector<8x8xf32>, vector<8x32xf32>, vector<8x32xf32> -> vector<8x32xf32>
    %343 = arith.addf %321, %342 : vector<8x32xf32>
    %344 = vector.extract_strided_slice %290 {offsets = [0, 16], sizes = [8, 8], strides = [1, 1]} : vector<8x32xf32> to vector<8x8xf32>
    %345 = vector.extract_strided_slice %291 {offsets = [0, 16], sizes = [8, 8], strides = [1, 1]} : vector<8x32xf32> to vector<8x8xf32>
    %cst_152 = arith.constant dense<0.000000e+00> : vector<8x8xf32>
    %346 = tpu.matmul %344, %345, %cst_152 {dimension_numbers = #tpu.dot_dimension_numbers<[1], [1], [0], [0], [0, 0, 1, 0], [], []>} : vector<8x8xf32>, vector<8x8xf32>, vector<8x8xf32> -> vector<8x8xf32>
    %cst_153 = arith.constant 0.353553385 : f32
    %347 = vector.broadcast %cst_153 : f32 to vector<8x8xf32>
    %348 = arith.mulf %346, %347 : vector<8x8xf32>
    %349 = vector.broadcast %8 : vector<1x8xf32> to vector<8x8xf32>
    %350 = arith.addf %348, %349 : vector<8x8xf32>
    %cst_154 = arith.constant dense<0xFF800000> : vector<8xf32>
    %351 = vector.multi_reduction <maximumf>, %350, %cst_154 [1] : vector<8x8xf32> to vector<8xf32>
    %352 = vector.shape_cast %351 : vector<8xf32> to vector<8x1xf32>
    %353 = vector.broadcast %352 : vector<8x1xf32> to vector<8x8xf32>
    %354 = arith.subf %350, %353 : vector<8x8xf32>
    %355 = math.exp %354 : vector<8x8xf32>
    %cst_155 = arith.constant dense<0.000000e+00> : vector<8xf32>
    %356 = vector.multi_reduction <add>, %355, %cst_155 [1] : vector<8x8xf32> to vector<8xf32>
    %357 = vector.shape_cast %356 : vector<8xf32> to vector<8x1xf32>
    %358 = tpu.reciprocal %357 {approx = true} : vector<8x1xf32> -> vector<8x1xf32>
    %359 = vector.broadcast %358 : vector<8x1xf32> to vector<8x8xf32>
    %360 = arith.mulf %355, %359 : vector<8x8xf32>
    %361 = vector.extract_strided_slice %292 {offsets = [0, 16], sizes = [8, 8], strides = [1, 1]} : vector<8x32xf32> to vector<8x8xf32>
    %cst_156 = arith.constant dense<0.000000e+00> : vector<8x8xf32>
    %362 = tpu.matmul %360, %361, %cst_156 {dimension_numbers = #tpu.dot_dimension_numbers<[1], [0], [0], [1], [0, 0, 1, 1], [], []>} : vector<8x8xf32>, vector<8x8xf32>, vector<8x8xf32> -> vector<8x8xf32>
    %363 = vector.extract_strided_slice %294 {offsets = [16, 0], sizes = [8, 32], strides = [1, 1]} : vector<32x32xf32> to vector<8x32xf32>
    %cst_157 = arith.constant dense<0.000000e+00> : vector<8x32xf32>
    %364 = tpu.matmul %362, %363, %cst_157 {dimension_numbers = #tpu.dot_dimension_numbers<[1], [0], [0], [1], [0, 0, 1, 1], [], []>} : vector<8x8xf32>, vector<8x32xf32>, vector<8x32xf32> -> vector<8x32xf32>
    %365 = arith.addf %343, %364 : vector<8x32xf32>
    %366 = vector.extract_strided_slice %290 {offsets = [0, 24], sizes = [8, 8], strides = [1, 1]} : vector<8x32xf32> to vector<8x8xf32>
    %367 = vector.extract_strided_slice %291 {offsets = [0, 24], sizes = [8, 8], strides = [1, 1]} : vector<8x32xf32> to vector<8x8xf32>
    %cst_158 = arith.constant dense<0.000000e+00> : vector<8x8xf32>
    %368 = tpu.matmul %366, %367, %cst_158 {dimension_numbers = #tpu.dot_dimension_numbers<[1], [1], [0], [0], [0, 0, 1, 0], [], []>} : vector<8x8xf32>, vector<8x8xf32>, vector<8x8xf32> -> vector<8x8xf32>
    %cst_159 = arith.constant 0.353553385 : f32
    %369 = vector.broadcast %cst_159 : f32 to vector<8x8xf32>
    %370 = arith.mulf %368, %369 : vector<8x8xf32>
    %371 = vector.broadcast %8 : vector<1x8xf32> to vector<8x8xf32>
    %372 = arith.addf %370, %371 : vector<8x8xf32>
    %cst_160 = arith.constant dense<0xFF800000> : vector<8xf32>
    %373 = vector.multi_reduction <maximumf>, %372, %cst_160 [1] : vector<8x8xf32> to vector<8xf32>
    %374 = vector.shape_cast %373 : vector<8xf32> to vector<8x1xf32>
    %375 = vector.broadcast %374 : vector<8x1xf32> to vector<8x8xf32>
    %376 = arith.subf %372, %375 : vector<8x8xf32>
    %377 = math.exp %376 : vector<8x8xf32>
    %cst_161 = arith.constant dense<0.000000e+00> : vector<8xf32>
    %378 = vector.multi_reduction <add>, %377, %cst_161 [1] : vector<8x8xf32> to vector<8xf32>
    %379 = vector.shape_cast %378 : vector<8xf32> to vector<8x1xf32>
    %380 = tpu.reciprocal %379 {approx = true} : vector<8x1xf32> -> vector<8x1xf32>
    %381 = vector.broadcast %380 : vector<8x1xf32> to vector<8x8xf32>
    %382 = arith.mulf %377, %381 : vector<8x8xf32>
    %383 = vector.extract_strided_slice %292 {offsets = [0, 24], sizes = [8, 8], strides = [1, 1]} : vector<8x32xf32> to vector<8x8xf32>
    %cst_162 = arith.constant dense<0.000000e+00> : vector<8x8xf32>
    %384 = tpu.matmul %382, %383, %cst_162 {dimension_numbers = #tpu.dot_dimension_numbers<[1], [0], [0], [1], [0, 0, 1, 1], [], []>} : vector<8x8xf32>, vector<8x8xf32>, vector<8x8xf32> -> vector<8x8xf32>
    %385 = vector.extract_strided_slice %294 {offsets = [24, 0], sizes = [8, 32], strides = [1, 1]} : vector<32x32xf32> to vector<8x32xf32>
    %cst_163 = arith.constant dense<0.000000e+00> : vector<8x32xf32>
    %386 = tpu.matmul %384, %385, %cst_163 {dimension_numbers = #tpu.dot_dimension_numbers<[1], [0], [0], [1], [0, 0, 1, 1], [], []>} : vector<8x8xf32>, vector<8x32xf32>, vector<8x32xf32> -> vector<8x32xf32>
    %387 = arith.addf %365, %386 : vector<8x32xf32>
    %388 = vector.broadcast %296 : vector<1x32xf32> to vector<8x32xf32>
    %389 = arith.addf %387, %388 : vector<8x32xf32>
    %390 = arith.addf %389, %160 : vector<8x32xf32>
    %cst_164 = arith.constant dense<0.000000e+00> : vector<8xf32>
    %391 = vector.multi_reduction <add>, %390, %cst_164 [1] : vector<8x32xf32> to vector<8xf32>
    %392 = vector.shape_cast %391 : vector<8xf32> to vector<8x1xf32>
    %cst_165 = arith.constant 3.200000e+01 : f32
    %393 = vector.broadcast %cst_165 : f32 to vector<8x1xf32>
    %394 = arith.divf %392, %393 : vector<8x1xf32>
    %395 = vector.broadcast %394 : vector<8x1xf32> to vector<8x32xf32>
    %396 = arith.subf %390, %395 : vector<8x32xf32>
    %397 = arith.mulf %396, %396 : vector<8x32xf32>
    %cst_166 = arith.constant dense<0.000000e+00> : vector<8xf32>
    %398 = vector.multi_reduction <add>, %397, %cst_166 [1] : vector<8x32xf32> to vector<8xf32>
    %399 = vector.shape_cast %398 : vector<8xf32> to vector<8x1xf32>
    %cst_167 = arith.constant 3.200000e+01 : f32
    %400 = vector.broadcast %cst_167 : f32 to vector<8x1xf32>
    %401 = arith.divf %399, %400 : vector<8x1xf32>
    %402 = vector.broadcast %394 : vector<8x1xf32> to vector<8x32xf32>
    %403 = arith.subf %390, %402 : vector<8x32xf32>
    %cst_168 = arith.constant 9.99999996E-13 : f32
    %404 = vector.broadcast %cst_168 : f32 to vector<8x1xf32>
    %405 = arith.addf %401, %404 : vector<8x1xf32>
    %406 = math.rsqrt %405 : vector<8x1xf32>
    %407 = vector.broadcast %406 : vector<8x1xf32> to vector<8x32xf32>
    %408 = arith.mulf %403, %407 : vector<8x32xf32>
    %409 = vector.broadcast %298 : vector<1x32xf32> to vector<8x32xf32>
    %410 = arith.mulf %408, %409 : vector<8x32xf32>
    %411 = vector.broadcast %300 : vector<1x32xf32> to vector<8x32xf32>
    %412 = arith.addf %410, %411 : vector<8x32xf32>
    %c0_169 = arith.constant 0 : index
    %c0_170 = arith.constant 0 : index
    %c0_171 = arith.constant 0 : index
    %413 = vector.load %arg20[%c0_169, %c0_170, %c0_171] : memref<1x32x96xf32, #tpu.memory_space<vmem>>, vector<1x32x96xf32>
    %414 = vector.shape_cast %413 : vector<1x32x96xf32> to vector<32x96xf32>
    %cst_172 = arith.constant dense<0.000000e+00> : vector<8x96xf32>
    %415 = tpu.matmul %282, %414, %cst_172 {dimension_numbers = #tpu.dot_dimension_numbers<[1], [0], [0], [1], [0, 0, 1, 1], [], []>} : vector<8x32xf32>, vector<32x96xf32>, vector<8x96xf32> -> vector<8x96xf32>
    %c0_173 = arith.constant 0 : index
    %c0_174 = arith.constant 0 : index
    %c0_175 = arith.constant 0 : index
    %416 = vector.load %arg21[%c0_173, %c0_174, %c0_175] : memref<1x1x96xf32, #tpu.memory_space<vmem>>, vector<1x1x96xf32>
    %417 = vector.shape_cast %416 : vector<1x1x96xf32> to vector<1x96xf32>
    %418 = vector.broadcast %417 : vector<1x96xf32> to vector<8x96xf32>
    %419 = arith.addf %415, %418 : vector<8x96xf32>
    %420 = vector.extract_strided_slice %419 {offsets = [0, 0], sizes = [8, 32], strides = [1, 1]} : vector<8x96xf32> to vector<8x32xf32>
    %421 = vector.extract_strided_slice %419 {offsets = [0, 32], sizes = [8, 32], strides = [1, 1]} : vector<8x96xf32> to vector<8x32xf32>
    %422 = vector.extract_strided_slice %419 {offsets = [0, 64], sizes = [8, 32], strides = [1, 1]} : vector<8x96xf32> to vector<8x32xf32>
    %c0_176 = arith.constant 0 : index
    %c0_177 = arith.constant 0 : index
    %c0_178 = arith.constant 0 : index
    %423 = vector.load %arg22[%c0_176, %c0_177, %c0_178] : memref<1x32x32xf32, #tpu.memory_space<vmem>>, vector<1x32x32xf32>
    %424 = vector.shape_cast %423 : vector<1x32x32xf32> to vector<32x32xf32>
    %c0_179 = arith.constant 0 : index
    %c0_180 = arith.constant 0 : index
    %c0_181 = arith.constant 0 : index
    %425 = vector.load %arg23[%c0_179, %c0_180, %c0_181] : memref<1x1x32xf32, #tpu.memory_space<vmem>>, vector<1x1x32xf32>
    %426 = vector.shape_cast %425 : vector<1x1x32xf32> to vector<1x32xf32>
    %c0_182 = arith.constant 0 : index
    %c0_183 = arith.constant 0 : index
    %c0_184 = arith.constant 0 : index
    %427 = vector.load %arg24[%c0_182, %c0_183, %c0_184] : memref<1x1x32xf32, #tpu.memory_space<vmem>>, vector<1x1x32xf32>
    %428 = vector.shape_cast %427 : vector<1x1x32xf32> to vector<1x32xf32>
    %c0_185 = arith.constant 0 : index
    %c0_186 = arith.constant 0 : index
    %c0_187 = arith.constant 0 : index
    %429 = vector.load %arg25[%c0_185, %c0_186, %c0_187] : memref<1x1x32xf32, #tpu.memory_space<vmem>>, vector<1x1x32xf32>
    %430 = vector.shape_cast %429 : vector<1x1x32xf32> to vector<1x32xf32>
    %431 = vector.extract_strided_slice %420 {offsets = [0, 0], sizes = [8, 8], strides = [1, 1]} : vector<8x32xf32> to vector<8x8xf32>
    %432 = vector.extract_strided_slice %421 {offsets = [0, 0], sizes = [8, 8], strides = [1, 1]} : vector<8x32xf32> to vector<8x8xf32>
    %cst_188 = arith.constant dense<0.000000e+00> : vector<8x8xf32>
    %433 = tpu.matmul %431, %432, %cst_188 {dimension_numbers = #tpu.dot_dimension_numbers<[1], [1], [0], [0], [0, 0, 1, 0], [], []>} : vector<8x8xf32>, vector<8x8xf32>, vector<8x8xf32> -> vector<8x8xf32>
    %cst_189 = arith.constant 0.353553385 : f32
    %434 = vector.broadcast %cst_189 : f32 to vector<8x8xf32>
    %435 = arith.mulf %433, %434 : vector<8x8xf32>
    %436 = vector.broadcast %10 : vector<1x8xf32> to vector<8x8xf32>
    %437 = arith.addf %435, %436 : vector<8x8xf32>
    %cst_190 = arith.constant dense<0xFF800000> : vector<8xf32>
    %438 = vector.multi_reduction <maximumf>, %437, %cst_190 [1] : vector<8x8xf32> to vector<8xf32>
    %439 = vector.shape_cast %438 : vector<8xf32> to vector<8x1xf32>
    %440 = vector.broadcast %439 : vector<8x1xf32> to vector<8x8xf32>
    %441 = arith.subf %437, %440 : vector<8x8xf32>
    %442 = math.exp %441 : vector<8x8xf32>
    %cst_191 = arith.constant dense<0.000000e+00> : vector<8xf32>
    %443 = vector.multi_reduction <add>, %442, %cst_191 [1] : vector<8x8xf32> to vector<8xf32>
    %444 = vector.shape_cast %443 : vector<8xf32> to vector<8x1xf32>
    %445 = tpu.reciprocal %444 {approx = true} : vector<8x1xf32> -> vector<8x1xf32>
    %446 = vector.broadcast %445 : vector<8x1xf32> to vector<8x8xf32>
    %447 = arith.mulf %442, %446 : vector<8x8xf32>
    %448 = vector.extract_strided_slice %422 {offsets = [0, 0], sizes = [8, 8], strides = [1, 1]} : vector<8x32xf32> to vector<8x8xf32>
    %cst_192 = arith.constant dense<0.000000e+00> : vector<8x8xf32>
    %449 = tpu.matmul %447, %448, %cst_192 {dimension_numbers = #tpu.dot_dimension_numbers<[1], [0], [0], [1], [0, 0, 1, 1], [], []>} : vector<8x8xf32>, vector<8x8xf32>, vector<8x8xf32> -> vector<8x8xf32>
    %450 = vector.extract_strided_slice %424 {offsets = [0, 0], sizes = [8, 32], strides = [1, 1]} : vector<32x32xf32> to vector<8x32xf32>
    %cst_193 = arith.constant dense<0.000000e+00> : vector<8x32xf32>
    %451 = tpu.matmul %449, %450, %cst_193 {dimension_numbers = #tpu.dot_dimension_numbers<[1], [0], [0], [1], [0, 0, 1, 1], [], []>} : vector<8x8xf32>, vector<8x32xf32>, vector<8x32xf32> -> vector<8x32xf32>
    %452 = vector.extract_strided_slice %420 {offsets = [0, 8], sizes = [8, 8], strides = [1, 1]} : vector<8x32xf32> to vector<8x8xf32>
    %453 = vector.extract_strided_slice %421 {offsets = [0, 8], sizes = [8, 8], strides = [1, 1]} : vector<8x32xf32> to vector<8x8xf32>
    %cst_194 = arith.constant dense<0.000000e+00> : vector<8x8xf32>
    %454 = tpu.matmul %452, %453, %cst_194 {dimension_numbers = #tpu.dot_dimension_numbers<[1], [1], [0], [0], [0, 0, 1, 0], [], []>} : vector<8x8xf32>, vector<8x8xf32>, vector<8x8xf32> -> vector<8x8xf32>
    %cst_195 = arith.constant 0.353553385 : f32
    %455 = vector.broadcast %cst_195 : f32 to vector<8x8xf32>
    %456 = arith.mulf %454, %455 : vector<8x8xf32>
    %457 = vector.broadcast %10 : vector<1x8xf32> to vector<8x8xf32>
    %458 = arith.addf %456, %457 : vector<8x8xf32>
    %cst_196 = arith.constant dense<0xFF800000> : vector<8xf32>
    %459 = vector.multi_reduction <maximumf>, %458, %cst_196 [1] : vector<8x8xf32> to vector<8xf32>
    %460 = vector.shape_cast %459 : vector<8xf32> to vector<8x1xf32>
    %461 = vector.broadcast %460 : vector<8x1xf32> to vector<8x8xf32>
    %462 = arith.subf %458, %461 : vector<8x8xf32>
    %463 = math.exp %462 : vector<8x8xf32>
    %cst_197 = arith.constant dense<0.000000e+00> : vector<8xf32>
    %464 = vector.multi_reduction <add>, %463, %cst_197 [1] : vector<8x8xf32> to vector<8xf32>
    %465 = vector.shape_cast %464 : vector<8xf32> to vector<8x1xf32>
    %466 = tpu.reciprocal %465 {approx = true} : vector<8x1xf32> -> vector<8x1xf32>
    %467 = vector.broadcast %466 : vector<8x1xf32> to vector<8x8xf32>
    %468 = arith.mulf %463, %467 : vector<8x8xf32>
    %469 = vector.extract_strided_slice %422 {offsets = [0, 8], sizes = [8, 8], strides = [1, 1]} : vector<8x32xf32> to vector<8x8xf32>
    %cst_198 = arith.constant dense<0.000000e+00> : vector<8x8xf32>
    %470 = tpu.matmul %468, %469, %cst_198 {dimension_numbers = #tpu.dot_dimension_numbers<[1], [0], [0], [1], [0, 0, 1, 1], [], []>} : vector<8x8xf32>, vector<8x8xf32>, vector<8x8xf32> -> vector<8x8xf32>
    %471 = vector.extract_strided_slice %424 {offsets = [8, 0], sizes = [8, 32], strides = [1, 1]} : vector<32x32xf32> to vector<8x32xf32>
    %cst_199 = arith.constant dense<0.000000e+00> : vector<8x32xf32>
    %472 = tpu.matmul %470, %471, %cst_199 {dimension_numbers = #tpu.dot_dimension_numbers<[1], [0], [0], [1], [0, 0, 1, 1], [], []>} : vector<8x8xf32>, vector<8x32xf32>, vector<8x32xf32> -> vector<8x32xf32>
    %473 = arith.addf %451, %472 : vector<8x32xf32>
    %474 = vector.extract_strided_slice %420 {offsets = [0, 16], sizes = [8, 8], strides = [1, 1]} : vector<8x32xf32> to vector<8x8xf32>
    %475 = vector.extract_strided_slice %421 {offsets = [0, 16], sizes = [8, 8], strides = [1, 1]} : vector<8x32xf32> to vector<8x8xf32>
    %cst_200 = arith.constant dense<0.000000e+00> : vector<8x8xf32>
    %476 = tpu.matmul %474, %475, %cst_200 {dimension_numbers = #tpu.dot_dimension_numbers<[1], [1], [0], [0], [0, 0, 1, 0], [], []>} : vector<8x8xf32>, vector<8x8xf32>, vector<8x8xf32> -> vector<8x8xf32>
    %cst_201 = arith.constant 0.353553385 : f32
    %477 = vector.broadcast %cst_201 : f32 to vector<8x8xf32>
    %478 = arith.mulf %476, %477 : vector<8x8xf32>
    %479 = vector.broadcast %10 : vector<1x8xf32> to vector<8x8xf32>
    %480 = arith.addf %478, %479 : vector<8x8xf32>
    %cst_202 = arith.constant dense<0xFF800000> : vector<8xf32>
    %481 = vector.multi_reduction <maximumf>, %480, %cst_202 [1] : vector<8x8xf32> to vector<8xf32>
    %482 = vector.shape_cast %481 : vector<8xf32> to vector<8x1xf32>
    %483 = vector.broadcast %482 : vector<8x1xf32> to vector<8x8xf32>
    %484 = arith.subf %480, %483 : vector<8x8xf32>
    %485 = math.exp %484 : vector<8x8xf32>
    %cst_203 = arith.constant dense<0.000000e+00> : vector<8xf32>
    %486 = vector.multi_reduction <add>, %485, %cst_203 [1] : vector<8x8xf32> to vector<8xf32>
    %487 = vector.shape_cast %486 : vector<8xf32> to vector<8x1xf32>
    %488 = tpu.reciprocal %487 {approx = true} : vector<8x1xf32> -> vector<8x1xf32>
    %489 = vector.broadcast %488 : vector<8x1xf32> to vector<8x8xf32>
    %490 = arith.mulf %485, %489 : vector<8x8xf32>
    %491 = vector.extract_strided_slice %422 {offsets = [0, 16], sizes = [8, 8], strides = [1, 1]} : vector<8x32xf32> to vector<8x8xf32>
    %cst_204 = arith.constant dense<0.000000e+00> : vector<8x8xf32>
    %492 = tpu.matmul %490, %491, %cst_204 {dimension_numbers = #tpu.dot_dimension_numbers<[1], [0], [0], [1], [0, 0, 1, 1], [], []>} : vector<8x8xf32>, vector<8x8xf32>, vector<8x8xf32> -> vector<8x8xf32>
    %493 = vector.extract_strided_slice %424 {offsets = [16, 0], sizes = [8, 32], strides = [1, 1]} : vector<32x32xf32> to vector<8x32xf32>
    %cst_205 = arith.constant dense<0.000000e+00> : vector<8x32xf32>
    %494 = tpu.matmul %492, %493, %cst_205 {dimension_numbers = #tpu.dot_dimension_numbers<[1], [0], [0], [1], [0, 0, 1, 1], [], []>} : vector<8x8xf32>, vector<8x32xf32>, vector<8x32xf32> -> vector<8x32xf32>
    %495 = arith.addf %473, %494 : vector<8x32xf32>
    %496 = vector.extract_strided_slice %420 {offsets = [0, 24], sizes = [8, 8], strides = [1, 1]} : vector<8x32xf32> to vector<8x8xf32>
    %497 = vector.extract_strided_slice %421 {offsets = [0, 24], sizes = [8, 8], strides = [1, 1]} : vector<8x32xf32> to vector<8x8xf32>
    %cst_206 = arith.constant dense<0.000000e+00> : vector<8x8xf32>
    %498 = tpu.matmul %496, %497, %cst_206 {dimension_numbers = #tpu.dot_dimension_numbers<[1], [1], [0], [0], [0, 0, 1, 0], [], []>} : vector<8x8xf32>, vector<8x8xf32>, vector<8x8xf32> -> vector<8x8xf32>
    %cst_207 = arith.constant 0.353553385 : f32
    %499 = vector.broadcast %cst_207 : f32 to vector<8x8xf32>
    %500 = arith.mulf %498, %499 : vector<8x8xf32>
    %501 = vector.broadcast %10 : vector<1x8xf32> to vector<8x8xf32>
    %502 = arith.addf %500, %501 : vector<8x8xf32>
    %cst_208 = arith.constant dense<0xFF800000> : vector<8xf32>
    %503 = vector.multi_reduction <maximumf>, %502, %cst_208 [1] : vector<8x8xf32> to vector<8xf32>
    %504 = vector.shape_cast %503 : vector<8xf32> to vector<8x1xf32>
    %505 = vector.broadcast %504 : vector<8x1xf32> to vector<8x8xf32>
    %506 = arith.subf %502, %505 : vector<8x8xf32>
    %507 = math.exp %506 : vector<8x8xf32>
    %cst_209 = arith.constant dense<0.000000e+00> : vector<8xf32>
    %508 = vector.multi_reduction <add>, %507, %cst_209 [1] : vector<8x8xf32> to vector<8xf32>
    %509 = vector.shape_cast %508 : vector<8xf32> to vector<8x1xf32>
    %510 = tpu.reciprocal %509 {approx = true} : vector<8x1xf32> -> vector<8x1xf32>
    %511 = vector.broadcast %510 : vector<8x1xf32> to vector<8x8xf32>
    %512 = arith.mulf %507, %511 : vector<8x8xf32>
    %513 = vector.extract_strided_slice %422 {offsets = [0, 24], sizes = [8, 8], strides = [1, 1]} : vector<8x32xf32> to vector<8x8xf32>
    %cst_210 = arith.constant dense<0.000000e+00> : vector<8x8xf32>
    %514 = tpu.matmul %512, %513, %cst_210 {dimension_numbers = #tpu.dot_dimension_numbers<[1], [0], [0], [1], [0, 0, 1, 1], [], []>} : vector<8x8xf32>, vector<8x8xf32>, vector<8x8xf32> -> vector<8x8xf32>
    %515 = vector.extract_strided_slice %424 {offsets = [24, 0], sizes = [8, 32], strides = [1, 1]} : vector<32x32xf32> to vector<8x32xf32>
    %cst_211 = arith.constant dense<0.000000e+00> : vector<8x32xf32>
    %516 = tpu.matmul %514, %515, %cst_211 {dimension_numbers = #tpu.dot_dimension_numbers<[1], [0], [0], [1], [0, 0, 1, 1], [], []>} : vector<8x8xf32>, vector<8x32xf32>, vector<8x32xf32> -> vector<8x32xf32>
    %517 = arith.addf %495, %516 : vector<8x32xf32>
    %518 = vector.broadcast %426 : vector<1x32xf32> to vector<8x32xf32>
    %519 = arith.addf %517, %518 : vector<8x32xf32>
    %520 = arith.addf %519, %282 : vector<8x32xf32>
    %cst_212 = arith.constant dense<0.000000e+00> : vector<8xf32>
    %521 = vector.multi_reduction <add>, %520, %cst_212 [1] : vector<8x32xf32> to vector<8xf32>
    %522 = vector.shape_cast %521 : vector<8xf32> to vector<8x1xf32>
    %cst_213 = arith.constant 3.200000e+01 : f32
    %523 = vector.broadcast %cst_213 : f32 to vector<8x1xf32>
    %524 = arith.divf %522, %523 : vector<8x1xf32>
    %525 = vector.broadcast %524 : vector<8x1xf32> to vector<8x32xf32>
    %526 = arith.subf %520, %525 : vector<8x32xf32>
    %527 = arith.mulf %526, %526 : vector<8x32xf32>
    %cst_214 = arith.constant dense<0.000000e+00> : vector<8xf32>
    %528 = vector.multi_reduction <add>, %527, %cst_214 [1] : vector<8x32xf32> to vector<8xf32>
    %529 = vector.shape_cast %528 : vector<8xf32> to vector<8x1xf32>
    %cst_215 = arith.constant 3.200000e+01 : f32
    %530 = vector.broadcast %cst_215 : f32 to vector<8x1xf32>
    %531 = arith.divf %529, %530 : vector<8x1xf32>
    %532 = vector.broadcast %524 : vector<8x1xf32> to vector<8x32xf32>
    %533 = arith.subf %520, %532 : vector<8x32xf32>
    %cst_216 = arith.constant 9.99999996E-13 : f32
    %534 = vector.broadcast %cst_216 : f32 to vector<8x1xf32>
    %535 = arith.addf %531, %534 : vector<8x1xf32>
    %536 = math.rsqrt %535 : vector<8x1xf32>
    %537 = vector.broadcast %536 : vector<8x1xf32> to vector<8x32xf32>
    %538 = arith.mulf %533, %537 : vector<8x32xf32>
    %539 = vector.broadcast %428 : vector<1x32xf32> to vector<8x32xf32>
    %540 = arith.mulf %538, %539 : vector<8x32xf32>
    %541 = vector.broadcast %430 : vector<1x32xf32> to vector<8x32xf32>
    %542 = arith.addf %540, %541 : vector<8x32xf32>
    %c0_217 = arith.constant 0 : index
    %c0_218 = arith.constant 0 : index
    %c0_219 = arith.constant 0 : index
    %543 = vector.load %arg26[%c0_217, %c0_218, %c0_219] : memref<1x32x64xf32, #tpu.memory_space<vmem>>, vector<1x32x64xf32>
    %544 = vector.shape_cast %543 : vector<1x32x64xf32> to vector<32x64xf32>
    %c0_220 = arith.constant 0 : index
    %c0_221 = arith.constant 0 : index
    %c0_222 = arith.constant 0 : index
    %545 = vector.load %arg27[%c0_220, %c0_221, %c0_222] : memref<1x1x64xf32, #tpu.memory_space<vmem>>, vector<1x1x64xf32>
    %546 = vector.shape_cast %545 : vector<1x1x64xf32> to vector<1x64xf32>
    %c0_223 = arith.constant 0 : index
    %c0_224 = arith.constant 0 : index
    %c0_225 = arith.constant 0 : index
    %547 = vector.load %arg28[%c0_223, %c0_224, %c0_225] : memref<1x64x32xf32, #tpu.memory_space<vmem>>, vector<1x64x32xf32>
    %548 = vector.shape_cast %547 : vector<1x64x32xf32> to vector<64x32xf32>
    %c0_226 = arith.constant 0 : index
    %c0_227 = arith.constant 0 : index
    %c0_228 = arith.constant 0 : index
    %549 = vector.load %arg29[%c0_226, %c0_227, %c0_228] : memref<1x1x32xf32, #tpu.memory_space<vmem>>, vector<1x1x32xf32>
    %550 = vector.shape_cast %549 : vector<1x1x32xf32> to vector<1x32xf32>
    %c0_229 = arith.constant 0 : index
    %c0_230 = arith.constant 0 : index
    %c0_231 = arith.constant 0 : index
    %551 = vector.load %arg30[%c0_229, %c0_230, %c0_231] : memref<1x1x32xf32, #tpu.memory_space<vmem>>, vector<1x1x32xf32>
    %552 = vector.shape_cast %551 : vector<1x1x32xf32> to vector<1x32xf32>
    %c0_232 = arith.constant 0 : index
    %c0_233 = arith.constant 0 : index
    %c0_234 = arith.constant 0 : index
    %553 = vector.load %arg31[%c0_232, %c0_233, %c0_234] : memref<1x1x32xf32, #tpu.memory_space<vmem>>, vector<1x1x32xf32>
    %554 = vector.shape_cast %553 : vector<1x1x32xf32> to vector<1x32xf32>
    %cst_235 = arith.constant dense<0.000000e+00> : vector<8x64xf32>
    %555 = tpu.matmul %412, %544, %cst_235 {dimension_numbers = #tpu.dot_dimension_numbers<[1], [0], [0], [1], [0, 0, 1, 1], [], []>} : vector<8x32xf32>, vector<32x64xf32>, vector<8x64xf32> -> vector<8x64xf32>
    %556 = vector.broadcast %546 : vector<1x64xf32> to vector<8x64xf32>
    %557 = arith.addf %555, %556 : vector<8x64xf32>
    %cst_236 = arith.constant 5.000000e-01 : f32
    %558 = vector.broadcast %cst_236 : f32 to vector<8x64xf32>
    %559 = arith.mulf %558, %557 : vector<8x64xf32>
    %cst_237 = arith.constant 4.471500e-02 : f32
    %560 = vector.broadcast %cst_237 : f32 to vector<8x64xf32>
    %561 = arith.mulf %560, %557 : vector<8x64xf32>
    %562 = arith.mulf %561, %557 : vector<8x64xf32>
    %563 = arith.mulf %562, %557 : vector<8x64xf32>
    %564 = arith.addf %557, %563 : vector<8x64xf32>
    %cst_238 = arith.constant 0.797884583 : f32
    %565 = vector.broadcast %cst_238 : f32 to vector<8x64xf32>
    %566 = arith.mulf %565, %564 : vector<8x64xf32>
    %567 = math.tanh %566 : vector<8x64xf32>
    %cst_239 = arith.constant 1.000000e+00 : f32
    %568 = vector.broadcast %cst_239 : f32 to vector<8x64xf32>
    %569 = arith.addf %568, %567 : vector<8x64xf32>
    %570 = arith.mulf %559, %569 : vector<8x64xf32>
    %cst_240 = arith.constant dense<0.000000e+00> : vector<8x32xf32>
    %571 = tpu.matmul %570, %548, %cst_240 {dimension_numbers = #tpu.dot_dimension_numbers<[1], [0], [0], [1], [0, 0, 1, 1], [], []>} : vector<8x64xf32>, vector<64x32xf32>, vector<8x32xf32> -> vector<8x32xf32>
    %572 = vector.broadcast %550 : vector<1x32xf32> to vector<8x32xf32>
    %573 = arith.addf %571, %572 : vector<8x32xf32>
    %574 = arith.addf %573, %412 : vector<8x32xf32>
    %cst_241 = arith.constant dense<0.000000e+00> : vector<8xf32>
    %575 = vector.multi_reduction <add>, %574, %cst_241 [1] : vector<8x32xf32> to vector<8xf32>
    %576 = vector.shape_cast %575 : vector<8xf32> to vector<8x1xf32>
    %cst_242 = arith.constant 3.200000e+01 : f32
    %577 = vector.broadcast %cst_242 : f32 to vector<8x1xf32>
    %578 = arith.divf %576, %577 : vector<8x1xf32>
    %579 = vector.broadcast %578 : vector<8x1xf32> to vector<8x32xf32>
    %580 = arith.subf %574, %579 : vector<8x32xf32>
    %581 = arith.mulf %580, %580 : vector<8x32xf32>
    %cst_243 = arith.constant dense<0.000000e+00> : vector<8xf32>
    %582 = vector.multi_reduction <add>, %581, %cst_243 [1] : vector<8x32xf32> to vector<8xf32>
    %583 = vector.shape_cast %582 : vector<8xf32> to vector<8x1xf32>
    %cst_244 = arith.constant 3.200000e+01 : f32
    %584 = vector.broadcast %cst_244 : f32 to vector<8x1xf32>
    %585 = arith.divf %583, %584 : vector<8x1xf32>
    %586 = vector.broadcast %578 : vector<8x1xf32> to vector<8x32xf32>
    %587 = arith.subf %574, %586 : vector<8x32xf32>
    %cst_245 = arith.constant 9.99999996E-13 : f32
    %588 = vector.broadcast %cst_245 : f32 to vector<8x1xf32>
    %589 = arith.addf %585, %588 : vector<8x1xf32>
    %590 = math.rsqrt %589 : vector<8x1xf32>
    %591 = vector.broadcast %590 : vector<8x1xf32> to vector<8x32xf32>
    %592 = arith.mulf %587, %591 : vector<8x32xf32>
    %593 = vector.broadcast %552 : vector<1x32xf32> to vector<8x32xf32>
    %594 = arith.mulf %592, %593 : vector<8x32xf32>
    %595 = vector.broadcast %554 : vector<1x32xf32> to vector<8x32xf32>
    %596 = arith.addf %594, %595 : vector<8x32xf32>
    %c0_246 = arith.constant 0 : index
    %c0_247 = arith.constant 0 : index
    %c0_248 = arith.constant 0 : index
    %597 = vector.load %arg32[%c0_246, %c0_247, %c0_248] : memref<1x32x64xf32, #tpu.memory_space<vmem>>, vector<1x32x64xf32>
    %598 = vector.shape_cast %597 : vector<1x32x64xf32> to vector<32x64xf32>
    %c0_249 = arith.constant 0 : index
    %c0_250 = arith.constant 0 : index
    %c0_251 = arith.constant 0 : index
    %599 = vector.load %arg33[%c0_249, %c0_250, %c0_251] : memref<1x1x64xf32, #tpu.memory_space<vmem>>, vector<1x1x64xf32>
    %600 = vector.shape_cast %599 : vector<1x1x64xf32> to vector<1x64xf32>
    %c0_252 = arith.constant 0 : index
    %c0_253 = arith.constant 0 : index
    %c0_254 = arith.constant 0 : index
    %601 = vector.load %arg34[%c0_252, %c0_253, %c0_254] : memref<1x64x32xf32, #tpu.memory_space<vmem>>, vector<1x64x32xf32>
    %602 = vector.shape_cast %601 : vector<1x64x32xf32> to vector<64x32xf32>
    %c0_255 = arith.constant 0 : index
    %c0_256 = arith.constant 0 : index
    %c0_257 = arith.constant 0 : index
    %603 = vector.load %arg35[%c0_255, %c0_256, %c0_257] : memref<1x1x32xf32, #tpu.memory_space<vmem>>, vector<1x1x32xf32>
    %604 = vector.shape_cast %603 : vector<1x1x32xf32> to vector<1x32xf32>
    %c0_258 = arith.constant 0 : index
    %c0_259 = arith.constant 0 : index
    %c0_260 = arith.constant 0 : index
    %605 = vector.load %arg36[%c0_258, %c0_259, %c0_260] : memref<1x1x32xf32, #tpu.memory_space<vmem>>, vector<1x1x32xf32>
    %606 = vector.shape_cast %605 : vector<1x1x32xf32> to vector<1x32xf32>
    %c0_261 = arith.constant 0 : index
    %c0_262 = arith.constant 0 : index
    %c0_263 = arith.constant 0 : index
    %607 = vector.load %arg37[%c0_261, %c0_262, %c0_263] : memref<1x1x32xf32, #tpu.memory_space<vmem>>, vector<1x1x32xf32>
    %608 = vector.shape_cast %607 : vector<1x1x32xf32> to vector<1x32xf32>
    %cst_264 = arith.constant dense<0.000000e+00> : vector<8x64xf32>
    %609 = tpu.matmul %542, %598, %cst_264 {dimension_numbers = #tpu.dot_dimension_numbers<[1], [0], [0], [1], [0, 0, 1, 1], [], []>} : vector<8x32xf32>, vector<32x64xf32>, vector<8x64xf32> -> vector<8x64xf32>
    %610 = vector.broadcast %600 : vector<1x64xf32> to vector<8x64xf32>
    %611 = arith.addf %609, %610 : vector<8x64xf32>
    %cst_265 = arith.constant 5.000000e-01 : f32
    %612 = vector.broadcast %cst_265 : f32 to vector<8x64xf32>
    %613 = arith.mulf %612, %611 : vector<8x64xf32>
    %cst_266 = arith.constant 4.471500e-02 : f32
    %614 = vector.broadcast %cst_266 : f32 to vector<8x64xf32>
    %615 = arith.mulf %614, %611 : vector<8x64xf32>
    %616 = arith.mulf %615, %611 : vector<8x64xf32>
    %617 = arith.mulf %616, %611 : vector<8x64xf32>
    %618 = arith.addf %611, %617 : vector<8x64xf32>
    %cst_267 = arith.constant 0.797884583 : f32
    %619 = vector.broadcast %cst_267 : f32 to vector<8x64xf32>
    %620 = arith.mulf %619, %618 : vector<8x64xf32>
    %621 = math.tanh %620 : vector<8x64xf32>
    %cst_268 = arith.constant 1.000000e+00 : f32
    %622 = vector.broadcast %cst_268 : f32 to vector<8x64xf32>
    %623 = arith.addf %622, %621 : vector<8x64xf32>
    %624 = arith.mulf %613, %623 : vector<8x64xf32>
    %cst_269 = arith.constant dense<0.000000e+00> : vector<8x32xf32>
    %625 = tpu.matmul %624, %602, %cst_269 {dimension_numbers = #tpu.dot_dimension_numbers<[1], [0], [0], [1], [0, 0, 1, 1], [], []>} : vector<8x64xf32>, vector<64x32xf32>, vector<8x32xf32> -> vector<8x32xf32>
    %626 = vector.broadcast %604 : vector<1x32xf32> to vector<8x32xf32>
    %627 = arith.addf %625, %626 : vector<8x32xf32>
    %628 = arith.addf %627, %542 : vector<8x32xf32>
    %cst_270 = arith.constant dense<0.000000e+00> : vector<8xf32>
    %629 = vector.multi_reduction <add>, %628, %cst_270 [1] : vector<8x32xf32> to vector<8xf32>
    %630 = vector.shape_cast %629 : vector<8xf32> to vector<8x1xf32>
    %cst_271 = arith.constant 3.200000e+01 : f32
    %631 = vector.broadcast %cst_271 : f32 to vector<8x1xf32>
    %632 = arith.divf %630, %631 : vector<8x1xf32>
    %633 = vector.broadcast %632 : vector<8x1xf32> to vector<8x32xf32>
    %634 = arith.subf %628, %633 : vector<8x32xf32>
    %635 = arith.mulf %634, %634 : vector<8x32xf32>
    %cst_272 = arith.constant dense<0.000000e+00> : vector<8xf32>
    %636 = vector.multi_reduction <add>, %635, %cst_272 [1] : vector<8x32xf32> to vector<8xf32>
    %637 = vector.shape_cast %636 : vector<8xf32> to vector<8x1xf32>
    %cst_273 = arith.constant 3.200000e+01 : f32
    %638 = vector.broadcast %cst_273 : f32 to vector<8x1xf32>
    %639 = arith.divf %637, %638 : vector<8x1xf32>
    %640 = vector.broadcast %632 : vector<8x1xf32> to vector<8x32xf32>
    %641 = arith.subf %628, %640 : vector<8x32xf32>
    %cst_274 = arith.constant 9.99999996E-13 : f32
    %642 = vector.broadcast %cst_274 : f32 to vector<8x1xf32>
    %643 = arith.addf %639, %642 : vector<8x1xf32>
    %644 = math.rsqrt %643 : vector<8x1xf32>
    %645 = vector.broadcast %644 : vector<8x1xf32> to vector<8x32xf32>
    %646 = arith.mulf %641, %645 : vector<8x32xf32>
    %647 = vector.broadcast %606 : vector<1x32xf32> to vector<8x32xf32>
    %648 = arith.mulf %646, %647 : vector<8x32xf32>
    %649 = vector.broadcast %608 : vector<1x32xf32> to vector<8x32xf32>
    %650 = arith.addf %648, %649 : vector<8x32xf32>
    %c0_275 = arith.constant 0 : index
    %c0_276 = arith.constant 0 : index
    %c0_277 = arith.constant 0 : index
    %651 = vector.load %arg40[%c0_275, %c0_276, %c0_277] : memref<1x8x32xf32, #tpu.memory_space<vmem>>, vector<1x8x32xf32>
    %652 = vector.shape_cast %651 : vector<1x8x32xf32> to vector<8x32xf32>
    %653 = vector.shape_cast %596 : vector<8x32xf32> to vector<1x8x32xf32>
    tpu.vector_store %arg40[%c0_275, %c0_276, %c0_277], %653 {strides = array<i32>} : memref<1x8x32xf32, #tpu.memory_space<vmem>>, vector<1x8x32xf32>,
    %c0_278 = arith.constant 0 : index
    %c0_279 = arith.constant 0 : index
    %c0_280 = arith.constant 0 : index
    %654 = vector.load %arg41[%c0_278, %c0_279, %c0_280] : memref<1x8x32xf32, #tpu.memory_space<vmem>>, vector<1x8x32xf32>
    %655 = vector.shape_cast %654 : vector<1x8x32xf32> to vector<8x32xf32>
    %656 = vector.shape_cast %650 : vector<8x32xf32> to vector<1x8x32xf32>
    tpu.vector_store %arg41[%c0_278, %c0_279, %c0_280], %656 {strides = array<i32>} : memref<1x8x32xf32, #tpu.memory_space<vmem>>, vector<1x8x32xf32>,
    %c4_i32 = arith.constant 4 : i32
    %657 = arith.cmpi eq, %arg1, %c4_i32 : i32
    %658 = arith.extui %657 : i1 to i32
    %c0_i32_281 = arith.constant 0 : i32
    %659 = arith.cmpi ne, %658, %c0_i32_281 : i32
    scf.if %659 {
      %660 = vector.extract_strided_slice %596 {offsets = [0, 0], sizes = [1, 32], strides = [1, 1]} : vector<8x32xf32> to vector<1x32xf32>
      %c0_282 = arith.constant 0 : index
      %c0_283 = arith.constant 0 : index
      %661 = vector.load %arg38[%c0_282, %c0_283] : memref<32x32xf32, #tpu.memory_space<vmem>>, vector<32x32xf32>
      %cst_284 = arith.constant dense<0.000000e+00> : vector<1x32xf32>
      %662 = tpu.matmul %660, %661, %cst_284 {dimension_numbers = #tpu.dot_dimension_numbers<[1], [0], [0], [1], [0, 0, 1, 1], [], []>} : vector<1x32xf32>, vector<32x32xf32>, vector<1x32xf32> -> vector<1x32xf32>
      %c0_285 = arith.constant 0 : index
      %c0_286 = arith.constant 0 : index
      %663 = vector.load %arg39[%c0_285, %c0_286] : memref<1x32xf32, #tpu.memory_space<vmem>>, vector<1x32xf32>
      %664 = arith.addf %662, %663 : vector<1x32xf32>
      %665 = math.tanh %664 : vector<1x32xf32>
      %c0_287 = arith.constant 0 : index
      %c0_288 = arith.constant 0 : index
      %c0_289 = arith.constant 0 : index
      %666 = vector.load %arg42[%c0_287, %c0_288, %c0_289] : memref<1x1x32xf32, #tpu.memory_space<vmem>>, vector<1x1x32xf32>
      %667 = vector.shape_cast %666 : vector<1x1x32xf32> to vector<1x32xf32>
      %668 = vector.shape_cast %665 : vector<1x32xf32> to vector<1x1x32xf32>
      tpu.vector_store %arg42[%c0_287, %c0_288, %c0_289], %668 {strides = array<i32>} : memref<1x1x32xf32, #tpu.memory_space<vmem>>, vector<1x1x32xf32>,
    } else {
    }
    return
  }
  func.func @transform_0(%arg0: i32, %arg1: i32) -> (i32, i32, i32) {
    %c0_i32 = arith.constant 0 : i32
    %c0_i32_0 = arith.constant 0 : i32
    %c0_i32_1 = arith.constant 0 : i32
    return %arg0, %c0_i32, %c0_i32_0 : i32, i32, i32
  }
  func.func @transform_1(%arg0: i32, %arg1: i32) -> (i32, i32, i32) {
    %c0_i32 = arith.constant 0 : i32
    %c0_i32_0 = arith.constant 0 : i32
    %c0_i32_1 = arith.constant 0 : i32
    return %arg0, %c0_i32, %c0_i32_0 : i32, i32, i32
  }
  func.func @transform_2(%arg0: i32, %arg1: i32) -> (i32, i32, i32) {
    %c0_i32 = arith.constant 0 : i32
    %c0_i32_0 = arith.constant 0 : i32
    %c0_i32_1 = arith.constant 0 : i32
    return %arg0, %c0_i32, %c0_i32_0 : i32, i32, i32
  }
  func.func @transform_3(%arg0: i32, %arg1: i32) -> (i32, i32, i32) {
    %c0_i32 = arith.constant 0 : i32
    %c0_i32_0 = arith.constant 0 : i32
    %c0_i32_1 = arith.constant 0 : i32
    return %arg0, %c0_i32, %c0_i32_0 : i32, i32, i32
  }
  func.func @transform_4(%arg0: i32, %arg1: i32) -> (i32, i32, i32) {
    %c0_i32 = arith.constant 0 : i32
    %c0_i32_0 = arith.constant 0 : i32
    %c0_i32_1 = arith.constant 0 : i32
    return %arg1, %c0_i32, %c0_i32_0 : i32, i32, i32
  }
  func.func @transform_5(%arg0: i32, %arg1: i32) -> (i32, i32, i32) {
    %c0_i32 = arith.constant 0 : i32
    %c0_i32_0 = arith.constant 0 : i32
    %c0_i32_1 = arith.constant 0 : i32
    return %arg1, %c0_i32, %c0_i32_0 : i32, i32, i32
  }
  func.func @transform_6(%arg0: i32, %arg1: i32) -> (i32, i32, i32) {
    %c0_i32 = arith.constant 0 : i32
    %c0_i32_0 = arith.constant 0 : i32
    %c0_i32_1 = arith.constant 0 : i32
    return %arg1, %c0_i32, %c0_i32_0 : i32, i32, i32
  }
  func.func @transform_7(%arg0: i32, %arg1: i32) -> (i32, i32, i32) {
    %c0_i32 = arith.constant 0 : i32
    %c0_i32_0 = arith.constant 0 : i32
    %c0_i32_1 = arith.constant 0 : i32
    return %arg1, %c0_i32, %c0_i32_0 : i32, i32, i32
  }
  func.func @transform_8(%arg0: i32, %arg1: i32) -> (i32, i32, i32) {
    %c0_i32 = arith.constant 0 : i32
    %c0_i32_0 = arith.constant 0 : i32
    %c0_i32_1 = arith.constant 0 : i32
    return %arg1, %c0_i32, %c0_i32_0 : i32, i32, i32
  }
  func.func @transform_9(%arg0: i32, %arg1: i32) -> (i32, i32, i32) {
    %c0_i32 = arith.constant 0 : i32
    %c0_i32_0 = arith.constant 0 : i32
    %c0_i32_1 = arith.constant 0 : i32
    return %arg1, %c0_i32, %c0_i32_0 : i32, i32, i32
  }
  func.func @transform_10(%arg0: i32, %arg1: i32) -> (i32, i32, i32) {
    %c0_i32 = arith.constant 0 : i32
    %c0_i32_0 = arith.constant 0 : i32
    %c0_i32_1 = arith.constant 0 : i32
    return %arg1, %c0_i32, %c0_i32_0 : i32, i32, i32
  }
  func.func @transform_11(%arg0: i32, %arg1: i32) -> (i32, i32, i32) {
    %c0_i32 = arith.constant 0 : i32
    %c0_i32_0 = arith.constant 0 : i32
    %c0_i32_1 = arith.constant 0 : i32
    return %arg1, %c0_i32, %c0_i32_0 : i32, i32, i32
  }
  func.func @transform_12(%arg0: i32, %arg1: i32) -> (i32, i32, i32) {
    %c0_i32 = arith.constant 0 : i32
    %c0_i32_0 = arith.constant 0 : i32
    %c0_i32_1 = arith.constant 0 : i32
    return %arg1, %c0_i32, %c0_i32_0 : i32, i32, i32
  }
  func.func @transform_13(%arg0: i32, %arg1: i32) -> (i32, i32, i32) {
    %c0_i32 = arith.constant 0 : i32
    %c0_i32_0 = arith.constant 0 : i32
    %c0_i32_1 = arith.constant 0 : i32
    return %arg1, %c0_i32, %c0_i32_0 : i32, i32, i32
  }
  func.func @transform_14(%arg0: i32, %arg1: i32) -> (i32, i32, i32) {
    %c0_i32 = arith.constant 0 : i32
    %c0_i32_0 = arith.constant 0 : i32
    %c0_i32_1 = arith.constant 0 : i32
    return %arg1, %c0_i32, %c0_i32_0 : i32, i32, i32
  }
  func.func @transform_15(%arg0: i32, %arg1: i32) -> (i32, i32, i32) {
    %c0_i32 = arith.constant 0 : i32
    %c0_i32_0 = arith.constant 0 : i32
    %c0_i32_1 = arith.constant 0 : i32
    return %arg1, %c0_i32, %c0_i32_0 : i32, i32, i32
  }
  func.func @transform_16(%arg0: i32, %arg1: i32) -> (i32, i32, i32) {
    %c0_i32 = arith.constant 0 : i32
    %c0_i32_0 = arith.constant 0 : i32
    %c0_i32_1 = arith.constant 0 : i32
    return %arg1, %c0_i32, %c0_i32_0 : i32, i32, i32
  }
  func.func @transform_17(%arg0: i32, %arg1: i32) -> (i32, i32, i32) {
    %c0_i32 = arith.constant 0 : i32
    %c0_i32_0 = arith.constant 0 : i32
    %c0_i32_1 = arith.constant 0 : i32
    return %arg1, %c0_i32, %c0_i32_0 : i32, i32, i32
  }
  func.func @transform_18(%arg0: i32, %arg1: i32) -> (i32, i32, i32) {
    %c0_i32 = arith.constant 0 : i32
    %c0_i32_0 = arith.constant 0 : i32
    %c0_i32_1 = arith.constant 0 : i32
    return %arg1, %c0_i32, %c0_i32_0 : i32, i32, i32
  }
  func.func @transform_19(%arg0: i32, %arg1: i32) -> (i32, i32, i32) {
    %c0_i32 = arith.constant 0 : i32
    %c0_i32_0 = arith.constant 0 : i32
    %c0_i32_1 = arith.constant 0 : i32
    return %arg1, %c0_i32, %c0_i32_0 : i32, i32, i32
  }
  func.func @transform_20(%arg0: i32, %arg1: i32) -> (i32, i32, i32) {
    %c0_i32 = arith.constant 0 : i32
    %c0_i32_0 = arith.constant 0 : i32
    %c0_i32_1 = arith.constant 0 : i32
    return %arg1, %c0_i32, %c0_i32_0 : i32, i32, i32
  }
  func.func @transform_21(%arg0: i32, %arg1: i32) -> (i32, i32, i32) {
    %c0_i32 = arith.constant 0 : i32
    %c0_i32_0 = arith.constant 0 : i32
    %c0_i32_1 = arith.constant 0 : i32
    return %arg1, %c0_i32, %c0_i32_0 : i32, i32, i32
  }
  func.func @transform_22(%arg0: i32, %arg1: i32) -> (i32, i32, i32) {
    %c0_i32 = arith.constant 0 : i32
    %c0_i32_0 = arith.constant 0 : i32
    %c0_i32_1 = arith.constant 0 : i32
    return %arg1, %c0_i32, %c0_i32_0 : i32, i32, i32
  }
  func.func @transform_23(%arg0: i32, %arg1: i32) -> (i32, i32, i32) {
    %c0_i32 = arith.constant 0 : i32
    %c0_i32_0 = arith.constant 0 : i32
    %c0_i32_1 = arith.constant 0 : i32
    return %arg1, %c0_i32, %c0_i32_0 : i32, i32, i32
  }
  func.func @transform_24(%arg0: i32, %arg1: i32) -> (i32, i32, i32) {
    %c0_i32 = arith.constant 0 : i32
    %c0_i32_0 = arith.constant 0 : i32
    %c0_i32_1 = arith.constant 0 : i32
    return %arg1, %c0_i32, %c0_i32_0 : i32, i32, i32
  }
  func.func @transform_25(%arg0: i32, %arg1: i32) -> (i32, i32, i32) {
    %c0_i32 = arith.constant 0 : i32
    %c0_i32_0 = arith.constant 0 : i32
    %c0_i32_1 = arith.constant 0 : i32
    return %arg1, %c0_i32, %c0_i32_0 : i32, i32, i32
  }
  func.func @transform_26(%arg0: i32, %arg1: i32) -> (i32, i32, i32) {
    %c0_i32 = arith.constant 0 : i32
    %c0_i32_0 = arith.constant 0 : i32
    %c0_i32_1 = arith.constant 0 : i32
    return %arg1, %c0_i32, %c0_i32_0 : i32, i32, i32
  }
  func.func @transform_27(%arg0: i32, %arg1: i32) -> (i32, i32, i32) {
    %c0_i32 = arith.constant 0 : i32
    %c0_i32_0 = arith.constant 0 : i32
    %c0_i32_1 = arith.constant 0 : i32
    return %arg1, %c0_i32, %c0_i32_0 : i32, i32, i32
  }
  func.func @transform_28(%arg0: i32, %arg1: i32) -> (i32, i32, i32) {
    %c0_i32 = arith.constant 0 : i32
    %c0_i32_0 = arith.constant 0 : i32
    %c0_i32_1 = arith.constant 0 : i32
    return %arg1, %c0_i32, %c0_i32_0 : i32, i32, i32
  }
  func.func @transform_29(%arg0: i32, %arg1: i32) -> (i32, i32, i32) {
    %c0_i32 = arith.constant 0 : i32
    %c0_i32_0 = arith.constant 0 : i32
    %c0_i32_1 = arith.constant 0 : i32
    return %arg1, %c0_i32, %c0_i32_0 : i32, i32, i32
  }
  func.func @transform_30(%arg0: i32, %arg1: i32) -> (i32, i32, i32) {
    %c0_i32 = arith.constant 0 : i32
    %c0_i32_0 = arith.constant 0 : i32
    %c0_i32_1 = arith.constant 0 : i32
    return %arg1, %c0_i32, %c0_i32_0 : i32, i32, i32
  }
  func.func @transform_31(%arg0: i32, %arg1: i32) -> (i32, i32, i32) {
    %c0_i32 = arith.constant 0 : i32
    %c0_i32_0 = arith.constant 0 : i32
    %c0_i32_1 = arith.constant 0 : i32
    return %arg1, %c0_i32, %c0_i32_0 : i32, i32, i32
  }
  func.func @transform_32(%arg0: i32, %arg1: i32) -> (i32, i32, i32) {
    %c0_i32 = arith.constant 0 : i32
    %c0_i32_0 = arith.constant 0 : i32
    %c0_i32_1 = arith.constant 0 : i32
    return %arg1, %c0_i32, %c0_i32_0 : i32, i32, i32
  }
  func.func @transform_33(%arg0: i32, %arg1: i32) -> (i32, i32, i32) {
    %c0_i32 = arith.constant 0 : i32
    %c0_i32_0 = arith.constant 0 : i32
    %c0_i32_1 = arith.constant 0 : i32
    return %arg1, %c0_i32, %c0_i32_0 : i32, i32, i32
  }
  func.func @transform_34(%arg0: i32, %arg1: i32) -> (i32, i32, i32) {
    %c0_i32 = arith.constant 0 : i32
    %c0_i32_0 = arith.constant 0 : i32
    %c0_i32_1 = arith.constant 0 : i32
    return %arg1, %c0_i32, %c0_i32_0 : i32, i32, i32
  }
  func.func @transform_35(%arg0: i32, %arg1: i32) -> (i32, i32, i32) {
    %c0_i32 = arith.constant 0 : i32
    %c0_i32_0 = arith.constant 0 : i32
    %c0_i32_1 = arith.constant 0 : i32
    return %arg1, %c0_i32, %c0_i32_0 : i32, i32, i32
  }
  func.func @transform_36(%arg0: i32, %arg1: i32) -> (i32, i32) {
    %c0_i32 = arith.constant 0 : i32
    %c0_i32_0 = arith.constant 0 : i32
    %c0_i32_1 = arith.constant 0 : i32
    return %c0_i32, %c0_i32_0 : i32, i32
  }
  func.func @transform_37(%arg0: i32, %arg1: i32) -> (i32, i32) {
    %c0_i32 = arith.constant 0 : i32
    %c0_i32_0 = arith.constant 0 : i32
    %c0_i32_1 = arith.constant 0 : i32
    return %c0_i32, %c0_i32_0 : i32, i32
  }
  func.func @transform_38(%arg0: i32, %arg1: i32) -> (i32, i32, i32) {
    %c0_i32 = arith.constant 0 : i32
    %c0_i32_0 = arith.constant 0 : i32
    %c0_i32_1 = arith.constant 0 : i32
    return %arg0, %c0_i32, %c0_i32_0 : i32, i32, i32
  }
  func.func @transform_39(%arg0: i32, %arg1: i32) -> (i32, i32, i32) {
    %c0_i32 = arith.constant 0 : i32
    %c0_i32_0 = arith.constant 0 : i32
    %c0_i32_1 = arith.constant 0 : i32
    return %arg0, %c0_i32, %c0_i32_0 : i32, i32, i32
  }
  func.func @transform_40(%arg0: i32, %arg1: i32) -> (i32, i32, i32) {
    %c0_i32 = arith.constant 0 : i32
    %c0_i32_0 = arith.constant 0 : i32
    %c0_i32_1 = arith.constant 0 : i32
    return %arg0, %c0_i32, %c0_i32_0 : i32, i32, i32
  }
}

</mosaic_0001>

<bundles_post_ra>
// kernel: cross_encoder_forward.2
= control target key start
LH: loop header
LB: loop body
LE: loop exit
PB: predicated region body
PF: predicated region fallthrough
CT: control target
= control target key end

     0   :  { %s4537_s0 = inlined_call_operand.vmem [shape: f32[2,8,16], index: 0, kind: input, shape index: {}]   ;;  %s4538_s1 = inlined_call_operand.vmem [shape: f32[2,1,8], index: 1, kind: input, shape index: {}]   ;;  %s4539_s2 = inlined_call_operand.hbm [shape: f32[16,32], index: 2, kind: input, shape index: {}]   ;;  %s4540_s3 = inlined_call_operand.vmem [shape: f32[1,32], index: 3, kind: input, shape index: {}]   ;;  %s4541_s4 = inlined_call_operand.hbm [shape: f32[1,32], index: 4, kind: input, shape index: {}]   ;;  %s4542_s5 = inlined_call_operand.hbm [shape: f32[1,32], index: 5, kind: input, shape index: {}]   ;;  %s4543_s6 = inlined_call_operand.vmem [shape: f32[3,32,96], index: 6, kind: input, shape index: {}]   ;;  %s4544_s7 = inlined_call_operand.hbm [shape: f32[3,1,96], index: 7, kind: input, shape index: {}]   ;;  %s4545_s8 = inlined_call_operand.hbm [shape: f32[3,32,32], index: 8, kind: input, shape index: {}]   ;;  %s4546_s9 = inlined_call_operand.hbm [shape: f32[3,1,32], index: 9, kind: input, shape index: {}]   ;;  %s4547_s10 = inlined_call_operand.hbm [shape: f32[3,1,32], index: 10, kind: input, shape index: {}]   ;;  %s4548_s11 = inlined_call_operand.hbm [shape: f32[3,1,32], index: 11, kind: input, shape index: {}]   ;;  %s4549_s12 = inlined_call_operand.hbm [shape: f32[3,32,64], index: 12, kind: input, shape index: {}]   ;;  %s4550_s13 = inlined_call_operand.hbm [shape: f32[3,1,64], index: 13, kind: input, shape index: {}]   ;;  %s4551_s14 = inlined_call_operand.vmem [shape: f32[3,64,32], index: 14, kind: input, shape index: {}]   ;;  %s4552_s15 = inlined_call_operand.hbm [shape: f32[3,1,32], index: 15, kind: input, shape index: {}]   ;;  %s4553_s16 = inlined_call_operand.hbm [shape: f32[3,1,32], index: 16, kind: input, shape index: {}]   ;;  %s4554_s17 = inlined_call_operand.hbm [shape: f32[3,1,32], index: 17, kind: input, shape index: {}]   ;;  %s4555_s18 = inlined_call_operand.vmem [shape: f32[2,8,32], index: 18, kind: output, shape index: {}]  }
   0x1   :  { %4583 = sst [smem:[#allocation40_spill]] %s4537_s0 }
   0x2   :  { %4584 = sst [smem:[#allocation41_spill]] %s4538_s1 }
   0x3   :  { %4585 = sst [smem:[#allocation42_spill]] %s4539_s2 }
   0x4   :  { %4586 = sst [smem:[#allocation43_spill]] %s4540_s3 }
   0x5   :  { %4587 = sst [smem:[#allocation44_spill]] %s4541_s4 }
   0x6   :  { %4588 = sst [smem:[#allocation45_spill]] %s4542_s5 }
   0x7   :  { %4589 = sst [smem:[#allocation46_spill]] %s4543_s6 }
   0x8   :  { %4590 = sst [smem:[#allocation47_spill]] %s4544_s7 }
   0x9   :  { %4591 = sst [smem:[#allocation48_spill]] %s4545_s8 }
   0xa   :  { %4592 = sst [smem:[#allocation49_spill]] %s4546_s9 }
   0xb   :  { %4593 = sst [smem:[#allocation50_spill]] %s4547_s10 }
   0xc   :  { %4594 = sst [smem:[#allocation51_spill]] %s4548_s11 }
   0xd   :  { %4595 = sst [smem:[#allocation52_spill]] %s4550_s13 }
   0xe   :  { %4596 = sst [smem:[#allocation53_spill]] %s4551_s14 }
   0xf   :  { %4597 = sst [smem:[#allocation54_spill]] %s4553_s16 }
  0x10   :  { %4598 = sst [smem:[#allocation55_spill]] %s4555_s18 }
  0x11   :  { %23 = vsyncpa [#allocation3], 0 }
  0x12   :  { %24 = vsyncpa [#allocation5], 0 }
  0x13   :  { %25 = vsyncpa [#allocation8], 0 }
  0x14   :  { %27 = vsyncpa [#allocation8 + $0x1], 0 }
  0x15   :  { %28 = vsyncpa [#allocation11], 0 }
  0x16   :  { %30 = vsyncpa [#allocation11 + $0x1], 0 }
  0x17   :  { %31 = vsyncpa [#allocation14], 0 }
  0x18   :  { %33 = vsyncpa [#allocation14 + $0x1], 0 }
  0x19   :  { %34 = vsyncpa [#allocation17], 0 }
  0x1a   :  { %36 = vsyncpa [#allocation17 + $0x1], 0 }
  0x1b   :  { %37 = vsyncpa [#allocation20], 0 }
  0x1c   :  { %39 = vsyncpa [#allocation20 + $0x1], 0  ;;  %s3811_s27 = smov 0   ;;  %s3813_s28 = smov 0  }
  0x1d   :  { %s3815_s29 = smov 0   ;;  %s3817_s30 = smov 0  }
  0x1e   :  { %s3819_s0 = smov 0   ;;  %s3821_s19 = smov 0  }
  0x1f   :  { %s3823_s1 = smov 0   ;;  %s3825_s20 = smov 0  }
  0x20 LB: > { %4599 = sst [smem:[#allocation29_spill]] %s3658_s28  ;;  %s4558_s21 = sadd.s32 4294967295, %s3682_s20   ;;  %s3682_s20 = sphi %s3825_s20, %s45_s20   ;;  %s3678_s1 = sphi %s3823_s1, %s4680_s1   ;;  %s3674_s19 = sphi %s3821_s19, %s4682_s19   ;;  %s3670_s0 = sphi %s3819_s0, %s4678_s0   ;;  %s3666_s30 = sphi %s3817_s30, %s4681_s30   ;;  %s3662_s29 = sphi %s3815_s29, %s4677_s29   ;;  %s3658_s28 = sphi %s3813_s28, %s4676_s28   ;;  %s3654_s27 = sphi %s3811_s27, %s4675_s27  }
  0x21   : > { %4600 = sst [smem:[#allocation30_spill]] %s3662_s29  ;;  %s54_s22 = sadd.s32 1, %s3674_s19 }
  0x22   : > { %4601 = sst [smem:[#allocation31_spill]] %s3666_s30  ;;  %p55_p0 = scmp.ge.s32.totalorder %s54_s22, 3 }
  0x23   : > { %4602 = sst [smem:[#allocation32_spill]] %s3670_s0  ;;  %s57_s2 = sadd.s32 1, %s3678_s1 }
  0x24   : > { %4603 = sst [smem:[#allocation33_spill]] %s3678_s1  ;;  %s226_s23 = sadd.s32 1, %s3662_s29 }
  0x25   : > { %4604 = sst [smem:[#allocation34_spill]] %s3682_s20  ;;  %p233_p1 = scmp.ne.s32.totalorder %s3662_s29, %s3658_s28 }
  0x26   : > { %s4684_s22 = smov (%p55_p0, %s54_s22), 0  ;;  %s4686_s2 = smov (!%p55_p0, %s57_s2), %s3678_s1 }
  0x27   : > { %4605 = sst [smem:[#allocation35_spill]] %s4684_s22  ;;  %s223_s24 = ssub.s32 %s3674_s19, %s4684_s22 }
  0x28   : > { %p234_p2 = scmp.eq.s32.totalorder %s3682_s20, 0  ;;  %p59_p3 = scmp.ge.s32.totalorder %s4686_s2, 2 }
  0x29   : > { %p224_p4 = scmp.eq.s32.totalorder %s223_s24, 0  ;;  %p239_p6 = scmp.ne.s32.totalorder %s3658_s28, %s3654_s27 }
  0x2a   : > { %p3861_p5 = por %p234_p2, %p233_p1  ;;  %s4688_s2 = smov (%p59_p3, %s4686_s2), 0 }
  0x2b   : > { %4607 = sst [smem:[#allocation36_spill]] %s4688_s2  ;;  %p3873_p7 = scmp.eq.s32.totalorder %s4558_s21, 0 }
  0x2c   : > { %s3869_s26 = scalar_select %p224_p4, %s3662_s29, %s226_s23  }
  0x2d   : > { %s4609_s1 = scalar_select %p3873_p7, 1, 0 }
  0x2e   : > { %4608 = sst [smem:[#allocation37_spill]] %s3869_s26  ;;  %p2767_p8 = scmp.ge.s32.totalorder %s3682_s20, 1 }
  0x2f   : > { %4610 = sst [smem:[#allocation38_spill]] %s4609_s1  ;;  %p536_p9 = scmp.lt.s32.totalorder %s3682_s20, 7 }
  0x30   : > { %p3881_p10 = por %p3873_p7, %p239_p6  ;;  %s3684_s23 = smov [#allocation4]  }
  0x31   : > { %p3885_p11 = pnand %p2767_p8, %p536_p9  ;;  %s565_s2 = sshll.u32 %s3684_s23, 4  ;;  %s566_s2 = int_to_ptr.vmem [resolvable:$true] %s565_s2 }
  0x32   : > { %s4611_s24 = scalar_select %p3881_p10, 1, 0 }
  0x33   : > { %s4613_s27 = scalar_select %p3885_p11, 1, 0 }
  0x34   : > { %4612 = sst [smem:[#allocation39_spill]] %s4611_s24  ;;  %p3050_p12 = pneg %p3885_p11 }
  0x35   : > { %p3094_p13 = scmp.lt.s32.totalorder %s3682_s20, 6  ;;  %s3893_s21 = sand.u32 1, %s3662_s29  }
  0x36   : > { %s3896_s22 = sand.u32 1, %s3682_s20   ;;  %p3900_p0 = pnand %p3050_p12, %p3873_p7 }
  0x37   : > { %p3906_p1 = pnand %p3094_p13, %p3861_p5  ;;  %s4616_s4 = sld [smem:[#allocation44_spill]] }
  0x38   : > { %s4614_s26 = scalar_select %p3900_p0, 1, 0 }
  0x39   : > { %s4615_s3 = scalar_select %p3906_p1, 1, 0 }
  0x3a   : > { %p3918_p3 = pneg %p3900_p0 }
  0x3c   : > { %s4617_s30 = scalar_select %p3918_p3, 1, 0 }
  0x3d   : > { %s3208_s14 = scalar_lea.hbm %s4616_s4, 16 }
  0x3e   : > { %p3209_p2 = scmp.ne.s32.totalorder %s4616_s4, %s3208_s14  ;;  %p3215_p6 = scmp.lt.u32.totalorder %s3208_s14, %s4616_s4 }
  0x40   : > { %p3211_p4 = pnand %p3918_p3, %p3209_p2 }
  0x42   : > { %p3212_p5 = pneg %p3211_p4 }
  0x44   : > { %p3217_p8 = pnand %p3215_p6, %p3212_p5 }
  0x46   : > { %3220 = shalt.err (!%p3217_p8)
}
  0x47   : > { %s3221_s18 = scalar_lea.vmem %s566_s2, 16  ;;  %s3228_s6 = scalar_lea.vmem %s566_s2, 32 }
  0x48   : > { %p3222_p9 = scmp.ne.s32.totalorder %s566_s2, %s3221_s18  ;;  %p3229_p10 = scmp.lt.s32.totalorder %s566_s2, %s566_s2 }
  0x49   : > { %p3230_p7 = scmp.lt.s32.totalorder %s3228_s6, %s3221_s18 }
  0x4a   : > { %p3224_p12 = pnand %p3222_p9, %p3918_p3 }
  0x4b   : > { %p3231_p11 = por %p3230_p7, %p3229_p10 }
  0x4c   : > { %p3225_p13 = pneg %p3224_p12 }
  0x4e   : > { %p3232_p1 = pnand %p3231_p11, %p3225_p13 }
  0x50   : > { %3235 = shalt.err (!%p3232_p1)
}
  0x51   : > { %3056 = dma.hbm_to_vmem [thread:$0]  (!%p3900_p0), %s4616_s4, 16, %s566_s2, [#allocation5]  }
  0x52   : > { %s3935_s14 = sshll.u32 %s3674_s19, 4  ;;  %s611_s0 = scalar_lea.vmem [#allocation7], %s3893_s21 }
  0x53   : > { %s618_s25 = sshll.u32 %s611_s0, 4  ;;  %s4618_s7 = sld [smem:[#allocation47_spill]]  ;;  %s3944_s25 = int_to_ptr.vmem [resolvable:$true] %s618_s25 }
  0x54   : > { %p4619_p10 = scmp.ne.s32.totalorder %s4615_s3, 0 }
  0x56   : > { %p3951_p11 = pneg %p4619_p10 }
  0x58   : > { %s4620_s2 = scalar_select %p3951_p11, 1, 0 }
  0x59   : > { %s3942_s6 = scalar_lea.hbm %s4618_s7, %s3935_s14  ;;  %s3241_s18 = scalar_lea.hbm %s4618_s7, 48 }
  0x5a   : > { %s3236_s23 = scalar_lea.hbm %s3942_s6, 16  ;;  %p3242_p4 = scmp.lt.u32.totalorder %s3942_s6, %s4618_s7 }
  0x5b   : > { %p3237_p7 = scmp.ne.s32.totalorder %s3942_s6, %s3236_s23  ;;  %p3243_p5 = scmp.lt.u32.totalorder %s3241_s18, %s3236_s23 }
  0x5c   : > { %p3245_p8 = scmp.lt.u32.totalorder %s3236_s23, %s3942_s6 }
  0x5d   : > { %p3239_p1 = pnand %p3951_p11, %p3237_p7  ;;  %p3244_p6 = por %p3243_p5, %p3242_p4 }
  0x5f   : > { %p3240_p2 = pneg %p3239_p1  ;;  %p3246_p9 = por %p3245_p8, %p3244_p6 }
  0x61   : > { %p3247_p12 = pnand %p3246_p9, %p3240_p2 }
  0x63   : > { %3250 = shalt.err (!%p3247_p12)
}
  0x64   : > { %s3251_s29 = scalar_lea.vmem %s3944_s25, 16  ;;  %s3685_s24 = smov [#allocation7]  }
  0x65   : > { %p3252_p13 = scmp.ne.s32.totalorder %s3944_s25, %s3251_s29  ;;  %s3256_s0 = sshll.u32 %s3685_s24, 4  ;;  %s3257_s0 = int_to_ptr.vmem [resolvable:$false] %s3256_s0 }
  0x66   : > { %s3258_s4 = scalar_lea.vmem %s3257_s0, 32  ;;  %p3259_p0 = scmp.lt.s32.totalorder %s3944_s25, %s3257_s0 }
  0x67   : > { %p3254_p7 = pnand %p3252_p13, %p3951_p11  ;;  %p3260_p3 = scmp.lt.s32.totalorder %s3258_s4, %s3251_s29 }
  0x69   : > { %p3255_p1 = pneg %p3254_p7  ;;  %p3261_p4 = por %p3260_p3, %p3259_p0 }
  0x6b   : > { %p3262_p5 = pnand %p3261_p4, %p3255_p1 }
  0x6d   : > { %3265 = shalt.err (!%p3262_p5)
}
  0x6e   : > { %s4621_s28 = scalar_lea.sflag [#allocation8], %s3896_s22  ;;  %s4622_s9 = sld [smem:[#allocation49_spill]] }
  0x6f   : > { %3063 = dma.hbm_to_vmem [thread:$0]  (!%p4619_p10), %s3942_s6, 16, %s3944_s25, %s4621_s28  }
  0x70   : > { %s649_s29 = scalar_lea.vmem [#allocation10], %s3893_s21 }
  0x71   : > { %s656_s0 = sshll.u32 %s649_s29, 4  ;;  %s657_s0 = int_to_ptr.vmem [resolvable:$true] %s656_s0 }
  0x74   : > { %s3980_s24 = scalar_lea.hbm %s4622_s9, %s3935_s14  ;;  %s3271_s6 = scalar_lea.hbm %s4622_s9, 48 }
  0x75   : > { %s3266_s7 = scalar_lea.hbm %s3980_s24, 16  ;;  %p3272_p6 = scmp.lt.u32.totalorder %s3980_s24, %s4622_s9 }
  0x76   : > { %p3267_p0 = scmp.ne.s32.totalorder %s3980_s24, %s3266_s7  ;;  %p3273_p8 = scmp.lt.u32.totalorder %s3271_s6, %s3266_s7 }
  0x77   : > { %p3275_p12 = scmp.lt.u32.totalorder %s3266_s7, %s3980_s24 }
  0x78   : > { %p3269_p3 = pnand %p3267_p0, %p3951_p11  ;;  %p3274_p9 = por %p3273_p8, %p3272_p6 }
  0x7a   : > { %p3270_p2 = pneg %p3269_p3  ;;  %p3276_p13 = por %p3275_p12, %p3274_p9 }
  0x7c   : > { %p3277_p7 = pnand %p3276_p13, %p3270_p2 }
  0x7e   : > { %3280 = shalt.err (!%p3277_p7)
}
  0x7f   : > { %s3281_s18 = scalar_lea.vmem %s657_s0, 16  ;;  %s3686_s29 = smov [#allocation10]  }
  0x80   : > { %p3282_p1 = scmp.ne.s32.totalorder %s657_s0, %s3281_s18  ;;  %s3286_s4 = sshll.u32 %s3686_s29, 4  ;;  %s3287_s4 = int_to_ptr.vmem [resolvable:$false] %s3286_s4 }
  0x81   : > { %s3288_s20 = scalar_lea.vmem %s3287_s4, 32  ;;  %p3289_p0 = scmp.lt.s32.totalorder %s657_s0, %s3287_s4 }
  0x82   : > { %p3284_p4 = pnand %p3282_p1, %p3951_p11  ;;  %p3290_p3 = scmp.lt.s32.totalorder %s3288_s20, %s3281_s18 }
  0x84   : > { %p3285_p5 = pneg %p3284_p4  ;;  %p3291_p10 = por %p3290_p3, %p3289_p0 }
  0x86   : > { %p3292_p6 = pnand %p3291_p10, %p3285_p5 }
  0x88   : > { %3295 = shalt.err (!%p3292_p6)
}
  0x89   : > { %p4623_p8 = scmp.ne.s32.totalorder %s4615_s3, 0  ;;  %s4624_s7 = scalar_lea.sflag [#allocation11], %s3896_s22 }
  0x8a   : > { %s4625_s11 = sld [smem:[#allocation51_spill]]  ;;  %s683_s4 = scalar_lea.vmem [#allocation13], %s3893_s21 }
  0x8b   : > { %3069 = dma.hbm_to_vmem [thread:$0]  (!%p4623_p8), %s3980_s24, 16, %s657_s0, %s4624_s7  }
  0x8c   : > { %s690_s23 = sshll.u32 %s683_s4, 4  ;;  %s691_s23 = int_to_ptr.vmem [resolvable:$true] %s690_s23 }
  0x90   : > { %s4007_s28 = scalar_lea.hbm %s4625_s11, %s3935_s14  ;;  %s3301_s0 = scalar_lea.hbm %s4625_s11, 48 }
  0x91   : > { %s3296_s29 = scalar_lea.hbm %s4007_s28, 16  ;;  %p3302_p12 = scmp.lt.u32.totalorder %s4007_s28, %s4625_s11 }
  0x92   : > { %p3297_p10 = scmp.ne.s32.totalorder %s4007_s28, %s3296_s29  ;;  %p3303_p13 = scmp.lt.u32.totalorder %s3301_s0, %s3296_s29 }
  0x93   : > { %p3305_p1 = scmp.lt.u32.totalorder %s3296_s29, %s4007_s28 }
  0x94   : > { %p3299_p2 = pnand %p3297_p10, %p3951_p11  ;;  %p3304_p7 = por %p3303_p13, %p3302_p12 }
  0x96   : > { %p3300_p9 = pneg %p3299_p2  ;;  %p3306_p4 = por %p3305_p1, %p3304_p7 }
  0x98   : > { %p3307_p5 = pnand %p3306_p4, %p3300_p9 }
  0x9a   : > { %3310 = shalt.err (!%p3307_p5)
}
  0x9b   : > { %s3311_s6 = scalar_lea.vmem %s691_s23, 16  ;;  %s3687_s4 = smov [#allocation13]  }
  0x9c   : > { %p3312_p0 = scmp.ne.s32.totalorder %s691_s23, %s3311_s6  ;;  %s3316_s18 = sshll.u32 %s3687_s4, 4  ;;  %s3317_s18 = int_to_ptr.vmem [resolvable:$false] %s3316_s18 }
  0x9d   : > { %s3318_s20 = scalar_lea.vmem %s3317_s18, 32  ;;  %p3319_p10 = scmp.lt.s32.totalorder %s691_s23, %s3317_s18 }
  0x9e   : > { %p3314_p3 = pnand %p3312_p0, %p3951_p11  ;;  %p3320_p2 = scmp.lt.s32.totalorder %s3318_s20, %s3311_s6 }
  0xa0   : > { %p3315_p6 = pneg %p3314_p3  ;;  %p3321_p8 = por %p3320_p2, %p3319_p10 }
  0xa2   : > { %p3322_p12 = pnand %p3321_p8, %p3315_p6 }
  0xa4   : > { %3325 = shalt.err (!%p3322_p12)
}
  0xa5   : > { %p4626_p13 = scmp.ne.s32.totalorder %s4615_s3, 0  ;;  %s4627_s29 = scalar_lea.sflag [#allocation14], %s3896_s22 }
  0xa6   : > { %s4628_s13 = sld [smem:[#allocation52_spill]]  ;;  %s721_s18 = scalar_lea.vmem [#allocation16], %s3893_s21 }
  0xa7   : > { %3075 = dma.hbm_to_vmem [thread:$0]  (!%p4626_p13), %s4007_s28, 16, %s691_s23, %s4627_s29  }
  0xa8   : > { %s728_s25 = sshll.u32 %s721_s18, 4  ;;  %s729_s25 = int_to_ptr.vmem [resolvable:$true] %s728_s25 }
  0xac   : > { %s4034_s7 = scalar_lea.hbm %s4628_s13, %s3935_s14  ;;  %s3331_s23 = scalar_lea.hbm %s4628_s13, 48 }
  0xad   : > { %s3326_s4 = scalar_lea.hbm %s4034_s7, 16  ;;  %p3332_p1 = scmp.lt.u32.totalorder %s4034_s7, %s4628_s13 }
  0xae   : > { %p3327_p8 = scmp.ne.s32.totalorder %s4034_s7, %s3326_s4  ;;  %p3333_p4 = scmp.lt.u32.totalorder %s3331_s23, %s3326_s4 }
  0xaf   : > { %p3335_p0 = scmp.lt.u32.totalorder %s3326_s4, %s4034_s7 }
  0xb0   : > { %p3329_p9 = pnand %p3327_p8, %p3951_p11  ;;  %p3334_p5 = por %p3333_p4, %p3332_p1 }
  0xb2   : > { %p3330_p7 = pneg %p3329_p9  ;;  %p3336_p3 = por %p3335_p0, %p3334_p5 }
  0xb4   : > { %p3337_p6 = pnand %p3336_p3, %p3330_p7 }
  0xb6   : > { %3340 = shalt.err (!%p3337_p6)
}
  0xb7   : > { %s3341_s0 = scalar_lea.vmem %s729_s25, 16  ;;  %s3688_s18 = smov [#allocation16]  }
  0xb8   : > { %p3342_p10 = scmp.ne.s32.totalorder %s729_s25, %s3341_s0  ;;  %s3346_s6 = sshll.u32 %s3688_s18, 4  ;;  %s3347_s6 = int_to_ptr.vmem [resolvable:$false] %s3346_s6 }
  0xb9   : > { %s3348_s20 = scalar_lea.vmem %s3347_s6, 32  ;;  %p3349_p8 = scmp.lt.s32.totalorder %s729_s25, %s3347_s6 }
  0xba   : > { %p3344_p2 = pnand %p3342_p10, %p3951_p11  ;;  %p3350_p9 = scmp.lt.s32.totalorder %s3348_s20, %s3341_s0 }
  0xbc   : > { %p3345_p12 = pneg %p3344_p2  ;;  %p3351_p13 = por %p3350_p9, %p3349_p8 }
  0xbe   : > { %p3352_p1 = pnand %p3351_p13, %p3345_p12 }
  0xc0   : > { %3355 = shalt.err (!%p3352_p1)
}
  0xc1   : > { %p4629_p4 = scmp.ne.s32.totalorder %s4615_s3, 0  ;;  %s4630_s4 = scalar_lea.sflag [#allocation17], %s3896_s22 }
  0xc2   : > { %s4631_s16 = sld [smem:[#allocation54_spill]]  ;;  %s763_s6 = scalar_lea.vmem [#allocation19], %s3893_s21 }
  0xc3   : > { %3081 = dma.hbm_to_vmem [thread:$0]  (!%p4629_p4), %s4034_s7, 16, %s729_s25, %s4630_s4  }
  0xc4   : > { %s770_s24 = sshll.u32 %s763_s6, 4  ;;  %s771_s24 = int_to_ptr.vmem [resolvable:$true] %s770_s24 }
  0xc8   : > { %s4061_s29 = scalar_lea.hbm %s4631_s16, %s3935_s14  ;;  %s3361_s25 = scalar_lea.hbm %s4631_s16, 48 }
  0xc9   : > { %s3356_s18 = scalar_lea.hbm %s4061_s29, 16  ;;  %p3362_p0 = scmp.lt.u32.totalorder %s4061_s29, %s4631_s16 }
  0xca   : > { %p3357_p13 = scmp.ne.s32.totalorder %s4061_s29, %s3356_s18  ;;  %p3363_p3 = scmp.lt.u32.totalorder %s3361_s25, %s3356_s18 }
  0xcb   : > { %p3365_p10 = scmp.lt.u32.totalorder %s3356_s18, %s4061_s29 }
  0xcc   : > { %p3359_p7 = pnand %p3357_p13, %p3951_p11  ;;  %p3364_p6 = por %p3363_p3, %p3362_p0 }
  0xce   : > { %p3360_p5 = pneg %p3359_p7  ;;  %p3366_p2 = por %p3365_p10, %p3364_p6 }
  0xd0   : > { %p3367_p12 = pnand %p3366_p2, %p3360_p5 }
  0xd2   : > { %3370 = shalt.err (!%p3367_p12)
}
  0xd3   : > { %s3371_s23 = scalar_lea.vmem %s771_s24, 16  ;;  %s3689_s6 = smov [#allocation19]  }
  0xd4   : > { %p3372_p8 = scmp.ne.s32.totalorder %s771_s24, %s3371_s23  ;;  %s3376_s0 = sshll.u32 %s3689_s6, 4  ;;  %s3377_s0 = int_to_ptr.vmem [resolvable:$false] %s3376_s0 }
  0xd5   : > { %s3378_s20 = scalar_lea.vmem %s3377_s0, 32  ;;  %p3379_p13 = scmp.lt.s32.totalorder %s771_s24, %s3377_s0 }
  0xd6   : > { %p3374_p9 = pnand %p3372_p8, %p3951_p11  ;;  %p3380_p7 = scmp.lt.s32.totalorder %s3378_s20, %s3371_s23 }
  0xd8   : > { %p3375_p1 = pneg %p3374_p9  ;;  %p3381_p4 = por %p3380_p7, %p3379_p13 }
  0xda   : > { %p3382_p0 = pnand %p3381_p4, %p3375_p1 }
  0xdc   : > { %3385 = shalt.err (!%p3382_p0)
}
  0xdd   : > { %p4632_p3 = scmp.ne.s32.totalorder %s4615_s3, 0  ;;  %s4633_s18 = scalar_lea.sflag [#allocation20], %s3896_s22 }
  0xde   : > { %s3690_s7 = smov [#allocation2]   ;;  %s4634_s6 = sld [smem:[#allocation42_spill]] }
  0xdf   : > { %3087 = dma.hbm_to_vmem [thread:$0]  (!%p4632_p3), %s4061_s29, 16, %s771_s24, %s4633_s18  }
  0xe0   : > { %s548_s25 = sshll.u32 %s3690_s7, 4  ;;  %p4635_p4 = scmp.ne.s32.totalorder %s4617_s30, 0  ;;  %s549_s25 = int_to_ptr.vmem [resolvable:$true] %s548_s25 }
  0xe4   : > { %s3386_s9 = scalar_lea.hbm %s4634_s6, 256 }
  0xe5   : > { %p3387_p5 = scmp.ne.s32.totalorder %s4634_s6, %s3386_s9  ;;  %p3393_p2 = scmp.lt.u32.totalorder %s3386_s9, %s4634_s6 }
  0xe7   : > { %p3389_p6 = pnand %p3387_p5, %p4635_p4 }
  0xe9   : > { %p3390_p10 = pneg %p3389_p6 }
  0xeb   : > { %p3395_p12 = pnand %p3393_p2, %p3390_p10 }
  0xed   : > { %3398 = shalt.err (!%p3395_p12)
}
  0xee   : > { %s3399_s29 = scalar_lea.vmem %s549_s25, 256  ;;  %p3407_p13 = scmp.lt.s32.totalorder %s549_s25, %s549_s25 }
  0xef   : > { %p3400_p8 = scmp.ne.s32.totalorder %s549_s25, %s3399_s29  ;;  %p3408_p7 = scmp.lt.s32.totalorder %s3399_s29, %s3399_s29 }
  0xf1   : > { %p3402_p9 = pnand %p3400_p8, %p4635_p4  ;;  %p3409_p0 = por %p3408_p7, %p3407_p13 }
  0xf3   : > { %p3403_p1 = pneg %p3402_p9 }
  0xf5   : > { %p3410_p3 = pnand %p3409_p0, %p3403_p1 }
  0xf7   : > { %3413 = shalt.err (!%p3410_p3)
}
  0xf8   : > { %s3691_s11 = smov 128   ;;  %s3692_s24 = smov 8  }
  0xf9   : > { %p4636_p5 = scmp.ne.s32.totalorder %s4614_s26, 0  ;;  %s3693_s7 = smov [#allocation6]  }
  0xfa   : > { %s576_s4 = sshll.u32 %s3693_s7, 4  ;;  %s2773_s28 = sshll.u32 %s3893_s21, 5  ;;  %s577_s4 = int_to_ptr.vmem [resolvable:$true] %s576_s4 }
  0xfb   : > { %3053 = dma.hbm_to_vmem [thread:$0]  (!%p4636_p5), %s4634_s6, 256, %s549_s25, [#allocation3], %s3691_s11, %s3691_s11, %s3692_s24  }
  0xfc   : > { %s4637_s5 = sld [smem:[#allocation45_spill]] }
 0x102   : > { %s3414_s20 = scalar_lea.hbm %s4637_s5, 16 }
 0x103   : > { %p3415_p3 = scmp.ne.s32.totalorder %s4637_s5, %s3414_s20  ;;  %p3421_p2 = scmp.lt.u32.totalorder %s3414_s20, %s4637_s5 }
 0x105   : > { %p3417_p6 = pnand %p3415_p3, %p4635_p4 }
 0x107   : > { %p3418_p10 = pneg %p3417_p6 }
 0x109   : > { %p3423_p12 = pnand %p3421_p2, %p3418_p10 }
 0x10b   : > { %3426 = shalt.err (!%p3423_p12)
}
 0x10c   : > { %s3427_s25 = scalar_lea.vmem %s577_s4, 16  ;;  %s3434_s9 = scalar_lea.vmem %s577_s4, 32 }
 0x10d   : > { %p3428_p8 = scmp.ne.s32.totalorder %s577_s4, %s3427_s25  ;;  %p3435_p13 = scmp.lt.s32.totalorder %s577_s4, %s577_s4 }
 0x10e   : > { %p3436_p7 = scmp.lt.s32.totalorder %s3434_s9, %s3427_s25 }
 0x10f   : > { %p3430_p9 = pnand %p3428_p8, %p4635_p4 }
 0x110   : > { %p3437_p0 = por %p3436_p7, %p3435_p13 }
 0x111   : > { %p3431_p1 = pneg %p3430_p9 }
 0x113   : > { %p3438_p11 = pnand %p3437_p0, %p3431_p1 }
 0x115   : > { %3441 = shalt.err (!%p3438_p11)
}
 0x116   : > { %3059 = dma.hbm_to_vmem [thread:$0]  (!%p4636_p5), %s4637_s5, 16, %s577_s4, [#allocation5]  }
 0x117   : > { %s2833_s16 = sshll.u32 %s3674_s19, 9  ;;  %s629_s30 = scalar_lea.vmem [#allocation9], %s2773_s28 }
 0x118   : > { %s636_s1 = sshll.u32 %s629_s30, 4  ;;  %s4638_s8 = sld [smem:[#allocation48_spill]]  ;;  %s4134_s1 = int_to_ptr.vmem [resolvable:$true] %s636_s1 }
 0x119   : > { %p4639_p4 = scmp.ne.s32.totalorder %s4620_s2, 0 }
 0x11e   : > { %s4132_s23 = scalar_lea.hbm %s4638_s8, %s2833_s16  ;;  %s3447_s29 = scalar_lea.hbm %s4638_s8, 1536 }
 0x11f   : > { %s3442_s26 = scalar_lea.hbm %s4132_s23, 512  ;;  %p3448_p6 = scmp.lt.u32.totalorder %s4132_s23, %s4638_s8 }
 0x120   : > { %p3443_p11 = scmp.ne.s32.totalorder %s4132_s23, %s3442_s26  ;;  %p3449_p10 = scmp.lt.u32.totalorder %s3447_s29, %s3442_s26 }
 0x121   : > { %p3451_p12 = scmp.lt.u32.totalorder %s3442_s26, %s4132_s23 }
 0x122   : > { %p3445_p5 = pnand %p3443_p11, %p4639_p4  ;;  %p3450_p2 = por %p3449_p10, %p3448_p6 }
 0x124   : > { %p3446_p3 = pneg %p3445_p5  ;;  %p3452_p8 = por %p3451_p12, %p3450_p2 }
 0x126   : > { %p3453_p9 = pnand %p3452_p8, %p3446_p3 }
 0x128   : > { %3456 = shalt.err (!%p3453_p9)
}
 0x129   : > { %s3457_s13 = scalar_lea.vmem %s4134_s1, 512  ;;  %s3694_s18 = smov [#allocation9]  }
 0x12a   : > { %p3458_p1 = scmp.ne.s32.totalorder %s4134_s1, %s3457_s13  ;;  %s3462_s30 = sshll.u32 %s3694_s18, 4  ;;  %s3463_s30 = int_to_ptr.vmem [resolvable:$false] %s3462_s30 }
 0x12b   : > { %s3464_s7 = scalar_lea.vmem %s3463_s30, 1024  ;;  %p3465_p0 = scmp.lt.s32.totalorder %s4134_s1, %s3463_s30 }
 0x12c   : > { %p3460_p13 = pnand %p3458_p1, %p4639_p4  ;;  %p3466_p11 = scmp.lt.s32.totalorder %s3464_s7, %s3457_s13 }
 0x12e   : > { %p3461_p7 = pneg %p3460_p13  ;;  %p3467_p5 = por %p3466_p11, %p3465_p0 }
 0x130   : > { %p3468_p6 = pnand %p3467_p5, %p3461_p7 }
 0x132   : > { %3471 = shalt.err (!%p3468_p6)
}
 0x133   : > { %p4640_p3 = scmp.ne.s32.totalorder %s4615_s3, 0  ;;  %s4641_s0 = scalar_lea.sflag [#allocation8], %s3896_s22 }
 0x134   : > { %s4642_s10 = sld [smem:[#allocation50_spill]]  ;;  %s666_s29 = scalar_lea.vmem [#allocation12], %s3893_s21 }
 0x135   : > { %3066 = dma.hbm_to_vmem [thread:$0]  (!%p4640_p3), %s4132_s23, 512, %s4134_s1, %s4641_s0, %s3691_s11, %s3691_s11, %s3692_s24  }
 0x136   : > { %s673_s25 = sshll.u32 %s666_s29, 4  ;;  %s4174_s18 = scalar_lea.hbm %s4549_s12, %s2833_s16  ;;  %s674_s25 = int_to_ptr.vmem [resolvable:$true] %s673_s25 }
 0x13a   : > { %s4166_s20 = scalar_lea.hbm %s4642_s10, %s3935_s14  ;;  %s3477_s7 = scalar_lea.hbm %s4642_s10, 48 }
 0x13b   : > { %s3472_s30 = scalar_lea.hbm %s4166_s20, 16  ;;  %p3478_p8 = scmp.lt.u32.totalorder %s4166_s20, %s4642_s10 }
 0x13c   : > { %p3473_p10 = scmp.ne.s32.totalorder %s4166_s20, %s3472_s30  ;;  %p3479_p9 = scmp.lt.u32.totalorder %s3477_s7, %s3472_s30 }
 0x13d   : > { %p3481_p13 = scmp.lt.u32.totalorder %s3472_s30, %s4166_s20 }
 0x13e   : > { %p3475_p2 = pnand %p3473_p10, %p4639_p4  ;;  %p3480_p1 = por %p3479_p9, %p3478_p8 }
 0x140   : > { %p3476_p12 = pneg %p3475_p2  ;;  %p3482_p7 = por %p3481_p13, %p3480_p1 }
 0x142   : > { %p3483_p0 = pnand %p3482_p7, %p3476_p12 }
 0x144   : > { %3486 = shalt.err (!%p3483_p0)
}
 0x145   : > { %s3487_s16 = scalar_lea.vmem %s674_s25, 16  ;;  %s3695_s4 = smov [#allocation12]  }
 0x146   : > { %p3488_p11 = scmp.ne.s32.totalorder %s674_s25, %s3487_s16  ;;  %s3492_s29 = sshll.u32 %s3695_s4, 4  ;;  %s3493_s29 = int_to_ptr.vmem [resolvable:$false] %s3492_s29 }
 0x147   : > { %s3494_s9 = scalar_lea.vmem %s3493_s29, 32  ;;  %p3495_p10 = scmp.lt.s32.totalorder %s674_s25, %s3493_s29 }
 0x148   : > { %p3490_p5 = pnand %p3488_p11, %p4639_p4  ;;  %p3496_p2 = scmp.lt.s32.totalorder %s3494_s9, %s3487_s16 }
 0x14a   : > { %p3491_p6 = pneg %p3490_p5  ;;  %p3497_p3 = por %p3496_p2, %p3495_p10 }
 0x14c   : > { %p3498_p8 = pnand %p3497_p3, %p3491_p6 }
 0x14e   : > { %3501 = shalt.err (!%p3498_p8)
}
 0x14f   : > { %p4643_p9 = scmp.ne.s32.totalorder %s4615_s3, 0  ;;  %s4644_s13 = scalar_lea.sflag [#allocation11], %s3896_s22 }
 0x150   : > { %s701_s30 = scalar_lea.vmem [#allocation15], %s2773_s28  ;;  %s4203_s0 = scalar_lea.hbm %s4552_s15, %s3935_s14 }
 0x151   : > { %3072 = dma.hbm_to_vmem [thread:$0]  (!%p4643_p9), %s4166_s20, 16, %s674_s25, %s4644_s13  }
 0x152   : > { %s708_s1 = sshll.u32 %s701_s30, 4  ;;  %s3502_s26 = scalar_lea.hbm %s4174_s18, 512  ;;  %s4197_s1 = int_to_ptr.vmem [resolvable:$true] %s708_s1 }
 0x153   : > { %p3503_p3 = scmp.ne.s32.totalorder %s4174_s18, %s3502_s26  ;;  %s3507_s29 = scalar_lea.hbm %s4549_s12, 1536 }
 0x154   : > { %p3508_p13 = scmp.lt.u32.totalorder %s4174_s18, %s4549_s12  ;;  %p3509_p7 = scmp.lt.u32.totalorder %s3507_s29, %s3502_s26 }
 0x155   : > { %p3505_p12 = pnand %p3503_p3, %p4639_p4  ;;  %p3511_p11 = scmp.lt.u32.totalorder %s3502_s26, %s4174_s18 }
 0x156   : > { %p3510_p0 = por %p3509_p7, %p3508_p13 }
 0x157   : > { %p3506_p1 = pneg %p3505_p12 }
 0x158   : > { %p3512_p5 = por %p3511_p11, %p3510_p0 }
 0x15a   : > { %p3513_p6 = pnand %p3512_p5, %p3506_p1 }
 0x15c   : > { %3516 = shalt.err (!%p3513_p6)
}
 0x15d   : > { %s3517_s28 = scalar_lea.vmem %s4197_s1, 512  ;;  %s3696_s9 = smov [#allocation15]  }
 0x15e   : > { %p3518_p10 = scmp.ne.s32.totalorder %s4197_s1, %s3517_s28  ;;  %s3522_s13 = sshll.u32 %s3696_s9, 4  ;;  %s3523_s13 = int_to_ptr.vmem [resolvable:$false] %s3522_s13 }
 0x15f   : > { %s3524_s30 = scalar_lea.vmem %s3523_s13, 1024  ;;  %p3525_p3 = scmp.lt.s32.totalorder %s4197_s1, %s3523_s13 }
 0x160   : > { %p3520_p2 = pnand %p3518_p10, %p4639_p4  ;;  %p3526_p12 = scmp.lt.s32.totalorder %s3524_s30, %s3517_s28 }
 0x162   : > { %p3521_p8 = pneg %p3520_p2  ;;  %p3527_p13 = por %p3526_p12, %p3525_p3 }
 0x164   : > { %p3528_p7 = pnand %p3527_p13, %p3521_p8 }
 0x166   : > { %3531 = shalt.err (!%p3528_p7)
}
 0x167   : > { %s4645_s23 = scalar_lea.sflag [#allocation14], %s3896_s22  ;;  %s746_s7 = scalar_lea.vmem [#allocation18], %s3893_s21 }
 0x168   : > { %3078 = dma.hbm_to_vmem [thread:$0]  (!%p4643_p9), %s4174_s18, 512, %s4197_s1, %s4645_s23, %s3691_s11, %s3691_s11, %s3692_s24  }
 0x169   : > { %s753_s26 = sshll.u32 %s746_s7, 4  ;;  %s4236_s29 = scalar_lea.hbm %s4554_s17, %s3935_s14  ;;  %s754_s26 = int_to_ptr.vmem [resolvable:$true] %s753_s26 }
 0x16a   : > { %s3532_s20 = scalar_lea.hbm %s4203_s0, 16  ;;  %s3537_s9 = scalar_lea.hbm %s4552_s15, 48 }
 0x16b   : > { %p3533_p1 = scmp.ne.s32.totalorder %s4203_s0, %s3532_s20  ;;  %p3538_p5 = scmp.lt.u32.totalorder %s4203_s0, %s4552_s15 }
 0x16c   : > { %p3539_p6 = scmp.lt.u32.totalorder %s3537_s9, %s3532_s20  ;;  %p3541_p2 = scmp.lt.u32.totalorder %s3532_s20, %s4203_s0 }
 0x16d   : > { %p3535_p0 = pnand %p3533_p1, %p4639_p4 }
 0x16e   : > { %p3540_p10 = por %p3539_p6, %p3538_p5 }
 0x16f   : > { %p3536_p11 = pneg %p3535_p0 }
 0x170   : > { %p3542_p8 = por %p3541_p2, %p3540_p10 }
 0x172   : > { %p3543_p3 = pnand %p3542_p8, %p3536_p11 }
 0x174   : > { %3546 = shalt.err (!%p3543_p3)
}
 0x175   : > { %s3547_s14 = scalar_lea.vmem %s754_s26, 16  ;;  %s3697_s11 = smov [#allocation18]  }
 0x176   : > { %p3548_p12 = scmp.ne.s32.totalorder %s754_s26, %s3547_s14  ;;  %s3552_s24 = sshll.u32 %s3697_s11, 4  ;;  %s3553_s24 = int_to_ptr.vmem [resolvable:$false] %s3552_s24 }
 0x177   : > { %s3554_s18 = scalar_lea.vmem %s3553_s24, 32  ;;  %p3555_p1 = scmp.lt.s32.totalorder %s754_s26, %s3553_s24 }
 0x178   : > { %p3550_p13 = pnand %p3548_p12, %p4639_p4  ;;  %p3556_p0 = scmp.lt.s32.totalorder %s3554_s18, %s3547_s14 }
 0x17a   : > { %p3551_p7 = pneg %p3550_p13  ;;  %p3557_p9 = por %p3556_p0, %p3555_p1 }
 0x17c   : > { %p3558_p5 = pnand %p3557_p9, %p3551_p7 }
 0x17e   : > { %3561 = shalt.err (!%p3558_p5)
}
 0x17f   : > { %p4646_p6 = scmp.ne.s32.totalorder %s4615_s3, 0  ;;  %s4647_s1 = scalar_lea.sflag [#allocation17], %s3896_s22 }
 0x180   : > { %s780_s23 = scalar_lea.vmem [#allocation21], %s3893_s21  ;;  %s3562_s16 = scalar_lea.hbm %s4236_s29, 16 }
 0x181   : > { %3084 = dma.hbm_to_vmem [thread:$0]  (!%p4646_p6), %s4203_s0, 16, %s754_s26, %s4647_s1  }
 0x182   : > { %s787_s7 = sshll.u32 %s780_s23, 4  ;;  %p3563_p11 = scmp.ne.s32.totalorder %s4236_s29, %s3562_s16  ;;  %s788_s7 = int_to_ptr.vmem [resolvable:$true] %s787_s7 }
 0x183   : > { %s3567_s25 = scalar_lea.hbm %s4554_s17, 48  ;;  %p3568_p2 = scmp.lt.u32.totalorder %s4236_s29, %s4554_s17 }
 0x184   : > { %p3565_p9 = pnand %p3563_p11, %p4639_p4  ;;  %p3569_p8 = scmp.lt.u32.totalorder %s3567_s25, %s3562_s16 }
 0x185   : > { %p3571_p12 = scmp.lt.u32.totalorder %s3562_s16, %s4236_s29 }
 0x186   : > { %p3566_p10 = pneg %p3565_p9  ;;  %p3570_p3 = por %p3569_p8, %p3568_p2 }
 0x188   : > { %p3572_p13 = por %p3571_p12, %p3570_p3 }
 0x18a   : > { %p3573_p7 = pnand %p3572_p13, %p3566_p10 }
 0x18c   : > { %3576 = shalt.err (!%p3573_p7)
}
 0x18d   : > { %s3577_s21 = scalar_lea.vmem %s788_s7, 16  ;;  %s3698_s0 = smov [#allocation21]  }
 0x18e   : > { %p3578_p1 = scmp.ne.s32.totalorder %s788_s7, %s3577_s21  ;;  %s3582_s26 = sshll.u32 %s3698_s0, 4  ;;  %s3583_s26 = int_to_ptr.vmem [resolvable:$false] %s3582_s26 }
 0x18f   : > { %s3584_s13 = scalar_lea.vmem %s3583_s26, 32  ;;  %p3585_p11 = scmp.lt.s32.totalorder %s788_s7, %s3583_s26 }
 0x190   : > { %p3580_p0 = pnand %p3578_p1, %p4639_p4  ;;  %p3586_p9 = scmp.lt.s32.totalorder %s3584_s13, %s3577_s21 }
 0x192   : > { %p3581_p5 = pneg %p3580_p0  ;;  %p3587_p6 = por %p3586_p9, %p3585_p11 }
 0x194   : > { %p3588_p2 = pnand %p3587_p6, %p3581_p5 }
 0x196   : > { %3591 = shalt.err (!%p3588_p2)
}
 0x197   : > { %p4648_p8 = scmp.ne.s32.totalorder %s4615_s3, 0  ;;  %s4649_s30 = scalar_lea.sflag [#allocation20], %s3896_s22 }
 0x198   : > { %p4650_p10 = scmp.ne.s32.totalorder %s4613_s27, 0 }
 0x199   : > { %3090 = dma.hbm_to_vmem [thread:$0]  (!%p4648_p8), %s4236_s29, 16, %s788_s7, %s4649_s30  }
 0x19a   : > { %796 = sbr.rel (%p4650_p10) target bundleno = 4651 (0x122b), region = 92  ;;  %s4651_s2 = sld [smem:[#allocation38_spill]] (!%p4650_p10) }
 0x1a0   : > { %p4652_p4 = scmp.ne.s32.totalorder (!%p4650_p10), %s4651_s2, 0 }
 0x1a2   : > { %3625 = dma.done.wait (%p4652_p4), [#allocation3], 256  }
 0x1a3   : > { %3627 = vsyncadd (%p4652_p4), [#allocation3], 4294967040 }
 0x1a4   : > { %3629 = dma.done.wait (%p4652_p4), [#allocation5], 32  }
 0x1a5   : > { %3631 = vsyncadd (%p4652_p4), [#allocation5], 4294967264  ;;  %s4653_s3 = sld [smem:[#allocation34_spill]]  ;;  %s4655_s22 = sld [smem:[#allocation29_spill]] }
 0x1a6   : > { %s4656_s11 = sld [smem:[#allocation39_spill]] }
 0x1ab   : > { %s4654_s14 = sadd.s32 4294967295, %s4653_s3   ;;  %s4290_s24 = sand.u32 1, %s4655_s22  }
 0x1ac   : > { %s810_s29 = sand.u32 1, %s4654_s14   ;;  %p4657_p6 = scmp.ne.s32.totalorder %s4656_s11, 0 }
 0x1ad   : > { %s811_s27 = scalar_lea.sflag [#allocation8], %s810_s29 }
 0x1ae   : > { %3633 = dma.done.wait (%p4657_p6), %s811_s27, 528  }
 0x1af   : > { %3635 = vsyncadd (%p4657_p6), %s811_s27, 4294966768  ;;  %s2790_s1 = sshll.u32 %s4290_s24, 5  ;;  %s828_s7 = scalar_lea.sflag [#allocation11], %s810_s29 }
 0x1b0   : > { %s4298_s23 = scalar_lea.vmem [#allocation9], %s2790_s1 }
 0x1b1   : > { %3637 = dma.done.wait (%p4657_p6), %s828_s7, 32  }
 0x1b2   : > { %3639 = vsyncadd (%p4657_p6), %s828_s7, 4294967264  ;;  %s844_s20 = scalar_lea.sflag [#allocation14], %s810_s29 }
 0x1b3   : > { %3641 = dma.done.wait (%p4657_p6), %s844_s20, 528  }
 0x1b4   : > { %3643 = vsyncadd (%p4657_p6), %s844_s20, 4294966768  ;;  %s4311_s28 = scalar_lea.vmem [#allocation15], %s2790_s1  ;;  %s861_s9 = scalar_lea.sflag [#allocation17], %s810_s29 }
 0x1b5   : > { %3645 = dma.done.wait (%p4657_p6), %s861_s9, 32  }
 0x1b6   : > { %3647 = vsyncadd (%p4657_p6), %s861_s9, 4294967264  ;;  %s877_s26 = scalar_lea.sflag [#allocation20], %s810_s29 }
 0x1b7   : > { %3649 = dma.done.wait (%p4657_p6), %s877_s26, 32  }
 0x1b8   : > { %3651 = vsyncadd (%p4657_p6), %s877_s26, 4294967264  ;;  %s4658_s30 = sld [smem:[#allocation32_spill]]  ;;  %s4659_s2 = sld [smem:[#allocation31_spill]] }
 0x1b9   : > { %s4660_s27 = sld [smem:[#allocation41_spill]]  ;;  %s4661_s20 = sld [smem:[#allocation40_spill]] }
 0x1ba   : > { %s4662_s21 = sld [smem:[#allocation46_spill]]  ;;  %s4663_s5 = sld [smem:[#allocation53_spill]] }
 0x1bb   : > { %s4664_s22 = sld [smem:[#allocation55_spill]] }
 0x1be   : > { %p993_p3 = scmp.lt.s32.totalorder %s4658_s30, 1  ;;  %p1000_p12 = scmp.lt.s32.totalorder %s4659_s2, 2 }
 0x1bf   : > { %p2798_p13 = scmp.ne.s32.totalorder %s4659_s2, 0 }
 0x1c0   : > { %s4690_s30 = smov (!%p993_p3, %s4658_s30), 1  ;;  %v1019_v0 = vld [vmem:[#allocation2] sm:$0xff] (!%p2798_p13)  ;;  %v1020_v1 = vld [vmem:[#allocation2 + $0x8] sm:$0xff] (!%p2798_p13)  ;;  %v3699_v2 = vmov (!%p2798_p13), 0.0|0.0   ;;  %vm3700_vm0 = vmmov (!%p2798_p13), 0   ;;  %v3701_v4 = vmov (!%p2798_p13), 0.0  }
 0x1c1   : > { %s1001_s3 = scalar_select %p1000_p12, %s4659_s2, 2 }
 0x1c2   : > { %s2792_s14 = sshll.u32 %s4690_s30, 3  ;;  %s999_s1 = scalar_lea.vmem %s4660_s27, %s4690_s30  ;;  %2991 = vmatprep.subr.bf16.mxu0 (!%p2798_p13), %v3699_v2  ;;  %v2992_v3 = vpack.c.bf16 (!%p2798_p13), %v1020_v1, %v1019_v0  ;;  %2887 = vmatprep.mubr.msk.f32.mxu0 (!%p2798_p13), %vm3700_vm0, %v3701_v4  ;;  %vm1028_vm1 = vcmask (!%p2798_p13), 130048   ;;  %vm1104_vm2 = vcmask (!%p2798_p13), 261120   ;;  %v2801_v20 = vld [vmem:[#allocation4] ss:$0 sm:$0xff] (!%p2798_p13) }
 0x1c3   : > { %s996_s9 = scalar_lea.vmem %s4661_s20, %s2792_s14  ;;  %s2835_s26 = sshll.u32 %s1001_s3, 5  ;;  %v2802_v22 = vld [vmem:[#allocation6] ss:$0 sm:$0xff] (!%p2798_p13) }
 0x1c4   : > { %s4341_s25 = scalar_lea.vmem %s4662_s21, %s2835_s26  ;;  %s2836_s4 = sshll.u32 %s1001_s3, 6  ;;  %2993 = vmatpush3.bf16.msra.mxu0 (!%p2798_p13), %v2992_v3  ;;  %v1018_v5 = vld [vmem:[%s996_s9] sm:$0xff] (!%p2798_p13) }
 0x1c5   : > { %s4346_s6 = scalar_lea.vmem %s4663_s5, %s2836_s4  ;;  %s4351_s29 = scalar_lea.vmem %s4664_s22, %s2792_s14 }
 0x1c6   : > { %s887_s27 = scalar_lea.vmem [#allocation21], %s4290_s24  ;;  %1017 = sbr.rel (%p2798_p13) target bundleno = 983 (0x3d7), region = 148 }
 0x1c7   : > { %2888 = vmatmul.mubr.msk.f32.vlgmr.msra.gmra.mrb[0].mxu0 (!%p2798_p13), %vm1028_vm1, %v1018_v5  ;;  %s4665_s10 = sld [smem:[#allocation43_spill]] (!%p2798_p13) }
 0x1cd   : > { %v2799_v6 = vld [vmem:[%s4665_s10] ss:$0 sm:$0xff] }
 0x29a   : > { %v1098_v7 = vpop.f32.mrb[0].mxu0 }
 0x29b   : > { %v1099_v8 = vadd.f32 %v2799_v6, %v1098_v7  ;;  %v2889_v9 = vpop.f32.mrb[1].mxu0 }
 0x29d   : > { %v1105_v10 = vsel %vm1104_vm2, %v1099_v8, 0.0 }
 0x29e   : > { %1106 = vadd.xlane.f32.xlu0 %v1105_v10 }
 0x32b   : > { %v1107_v11 = vpop.xlane.xlu0 %1106 }
 0x32c   : > { %v1109_v12 = vmul.f32 0.03125, %v1107_v11 }
 0x32e   : > { %v1110_v13 = vsub.f32 %v1099_v8, %v1109_v12 }
 0x330   : > { %v1111_v14 = vmul.f32 %v1110_v13, %v1110_v13 }
 0x332   : > { %v1112_v15 = vsel %vm1104_vm2, %v1111_v14, 0.0 }
 0x333   : > { %1113 = vadd.xlane.f32.xlu0 %v1112_v15 }
 0x3c0   : > { %v1114_v16 = vpop.xlane.xlu0 %1113 }
 0x3c1   : > { %v1115_v17 = vmul.f32 0.03125, %v1114_v16 }
 0x3c3   : > { %v1116_v18 = vadd.f32 1e-12, %v1115_v17 }
 0x3c5   : > { %3184 = vrsqrt.f32 %v1116_v18 }
 0x3cf   : > { %v3185_v19 = vpop.eup %3184 }
 0x3d0   : > { %v1118_v21 = vmul.f32 %v3185_v19, %v1110_v13 }
 0x3d2   : > { %v1125_v23 = vmul.f32 %v2801_v20, %v1118_v21 }
 0x3d4   : > { %v1132_v24 = vadd.f32 %v2802_v22, %v1125_v23 }
 0x3d6   : > { %1133 = vst.msk [vmem:[%s4351_s29] sm:$0xff] %vm1104_vm2, %v1132_v24 }
 0x3d7 PF: > { %v1136_v25 = vld [vmem:[%s4341_s25] sm:$0xff]  ;;  %v1137_v26 = vld [vmem:[%s4341_s25 + $0x8] sm:$0xff]  ;;  %v1138_v27 = vld [vmem:[%s4341_s25 + $0x10] sm:$0xff]  ;;  %v3702_v28 = vmov 0.0|0.0   ;;  %vm3703_vm3 = vmmov 0   ;;  %v3704_v31 = vmov 0.0  }
 0x3d8   : > { %2994 = vmatprep.subr.bf16.mxu0 %v3702_v28  ;;  %v2995_v29 = vpack.c.bf16 %v1137_v26, %v1136_v25  ;;  %v1139_v30 = vld [vmem:[%s4341_s25 + $0x18] sm:$0xff]  ;;  %2898 = vmatprep.mubr.msk.f32.mxu0 %vm3703_vm3, %v3704_v31  ;;  %vm1147_vm4 = vcmask 261120   ;;  %s4666_s18 = scalar_lea.vmem [#allocation7], %s4290_s24  ;;  %s3705_s16 = smov 120   ;;  %vm1231_vm5 = vcmask 64512   ;;  %vm2342_vm6 = vcmask 523264  }
 0x3d9   : > { %2906 = vmatprep.subr.mxu1 %v3704_v31  ;;  %2908 = vmatprep.mubr.msk.f32.mxu1 %vm3703_vm3, %v3704_v31  ;;  %v2998_v32 = vpack.c.bf16 %v1139_v30, %v1138_v27  ;;  %v2803_v34 = vld [vmem:[%s4666_s18] ss:$0 sm:$0xff]  ;;  %s3706_s4 = smov 96   ;;  %s3707_s25 = smov 88   ;;  %v1221_v7 = vld [vmem:[%s4298_s23] sm:$0xff] }
 0x3da   : > { %2996 = vmatpush3.bf16.msra.mxu0 %v2995_v29  ;;  %v4404_v42 = vld [vmem:[%s999_s1] ss:$0 sm:$0xff]  ;;  %s3708_s30 = smov 56   ;;  %s3709_s2 = smov 64  }
 0x3db   : > { %2997 = vmatprep.subr.bf16.mxu0 %v3702_v28  ;;  %s3710_s3 = smov 80   ;;  %s3711_s14 = smov 112   ;;  %v1222_v62 = vld [vmem:[%s4298_s23 + $0x8] sm:$0xff] }
 0x3dc   : > { %s3712_s1 = smov 72   ;;  %s3713_s7 = smov 104  }
 0x3dd   : > { %v4374_v33 = vld [vmem:[%s4351_s29] sm:$0xff]  ;;  %s3714_s11 = smov 48   ;;  %s3715_s20 = smov 40  }
 0x3de   : > { %2999 = vmatpush3.bf16.msra.mxu0 %v2998_v32  ;;  %s4669_s9 = scalar_lea.vmem [#allocation12], %s4290_s24  ;;  %s4670_s26 = scalar_lea.vmem [#allocation13], %s4290_s24 }
 0x3df   : > { %2901 = vmatprep.subr.mxu0 %v3704_v31  ;;  %s4673_s22 = scalar_lea.vmem [#allocation19], %s4290_s24 }
 0x3e1   : > { %2899 = vmatmul.mubr.msk.f32.vlgmr.msra.gmra.mrb[0].mxu0 %vm1147_vm4, %v4374_v33 }
 0x3e2   : > { %2903 = vmatprep.mubr.msk.f32.mxu0 %vm3703_vm3, %v3704_v31 }
 0x4b4   : > { %v1217_v35 = vpop.f32.mrb[0].mxu0 }
 0x4b5   : > { %v4383_v36 = vadd.f32 %v2803_v34, %v1217_v35  ;;  %v2900_v37 = vpop.f32.mrb[1].mxu0 }
 0x4b7   : > { %1401 = vrot.lane.b32.xlu1 %v4383_v36, %s3705_s16  ;;  %1229 = vrot.lane.b32.xlu0 %v4383_v36, %s3706_s4 }
 0x4bb   : > { %1403 = vrot.lane.b32.xlu0 %v4383_v36, %s3707_s25 }
 0x529   : > { %v1230_v38 = vpop.permute.xlu0 %1229  ;;  %v1402_v40 = vpop.permute.xlu1 %1401 }
 0x52a   : > { %2902 = vmatpush3.xpose.msk.msra.mxu0 %vm1231_vm5, %v1230_v38 }
 0x52b   : > { %2911 = vmatprep.subr.mxu0 %v3704_v31 }
 0x52d   : > { %2904 = vmatmul.mubr.msk.f32.vlgmr.msra.gmra.mrb[2].mxu0 %vm1231_vm5, %v4383_v36  ;;  %v1404_v39 = vpop.permute.xlu0 %1403 }
 0x52e   : > { %2912 = vmatpush3.xpose.msk.msra.mxu0 %vm1231_vm5, %v1404_v39  ;;  %2913 = vmatprep.mubr.msk.f32.mxu0 %vm3703_vm3, %v3704_v31  ;;  %v1223_v39 = vld [vmem:[%s4298_s23 + $0x10] sm:$0xff] }
 0x52f   : > { %2921 = vmatprep.subr.mxu0 %v3704_v31 }
 0x531   : > { %2914 = vmatmul.mubr.msk.f32.vlgmr.msra.gmra.mrb[4].mxu0 %vm1231_vm5, %v1402_v40 }
 0x532   : > { %2923 = vmatprep.mubr.msk.f32.mxu0 %vm3703_vm3, %v3704_v31  ;;  %2922 = vmatpush3.msra.mxu0 %v1222_v62 }
 0x533   : > { %2931 = vmatprep.subr.mxu0 %v3704_v31 }
 0x600   : > { %v1302_v41 = vpop.f32.mrb[2].mxu0 }
 0x601   : > { %v1306_v43 = vmul.f32 0.35355338, %v1302_v41  ;;  %v2905_v44 = vpop.f32.mrb[3].mxu0 }
 0x603   : > { %v1313_v45 = vadd.f32 %v4404_v42, %v1306_v43 }
 0x604   : > { %v1475_v46 = vpop.f32.mrb[4].mxu0 }
 0x605   : > { %v1479_v47 = vmul.f32 0.35355338, %v1475_v46  ;;  %v2915_v48 = vpop.f32.mrb[5].mxu0  ;;  %v1314_v49 = vsel %vm1231_vm5, %v1313_v45, -inf }
 0x606   : > { %1315 = vmax.xlane.f32.xlu1 %v1314_v49 }
 0x607   : > { %v1480_v50 = vadd.f32 %v4404_v42, %v1479_v47 }
 0x609   : > { %v1481_v51 = vsel %vm1231_vm5, %v1480_v50, -inf }
 0x60a   : > { %1482 = vmax.xlane.f32.xlu0 %v1481_v51 }
 0x693   : > { %v1316_v52 = vpop.xlane.xlu1 %1315 }
 0x694   : > { %v1317_v53 = vsub.f32 %v1313_v45, %v1316_v52 }
 0x696   : > { %v1318_v54 = vmul.f32 1.442695, %v1317_v53 }
 0x697   : > { %v1483_v55 = vpop.xlane.xlu0 %1482 }
 0x698   : > { %3186 = vpow2.f32 %v1318_v54  ;;  %v1484_v56 = vsub.f32 %v1480_v50, %v1483_v55  ;;  %v1224_v54 = vld [vmem:[%s4298_s23 + $0x18] sm:$0xff]  ;;  %s4668_s23 = scalar_lea.vmem [#allocation10], %s4290_s24 }
 0x69a   : > { %v1485_v57 = vmul.f32 1.442695, %v1484_v56 }
 0x69c   : > { %3188 = vpow2.f32 %v1485_v57 }
 0x6a2   : > { %v3187_v58 = vpop.eup %3186 }
 0x6a3   : > { %v1320_v59 = vsel %vm1231_vm5, %v3187_v58, 0.0 }
 0x6a4   : > { %1321 = vadd.xlane.f32.xlu0 %v1320_v59 }
 0x6a6   : > { %v3189_v60 = vpop.eup %3188 }
 0x6a7   : > { %v1487_v61 = vsel %vm1231_vm5, %v3189_v60, 0.0 }
 0x6a8   : > { %1488 = vadd.xlane.f32.xlu1 %v1487_v61  ;;  %v2822_v61 = vld [vmem:[%s4668_s23] ss:$0 sm:$0xff] }
 0x6b9   : > { %1492 = vrot.lane.b32.xlu1 %v4383_v36, %s3708_s30 }
 0x6ba   : > { %1325 = vrot.lane.b32.xlu0 %v4383_v36, %s3709_s2 }
 0x6bd   : > { %1716 = vrot.lane.b32.xlu1 %v4383_v36, %s3710_s3 }
 0x6be   : > { %1714 = vrot.lane.b32.xlu0 %v4383_v36, %s3711_s14 }
 0x731   : > { %v1322_v63 = vpop.xlane.xlu0 %1321 }
 0x732   : > { %3190 = vrcp.f32 %v1322_v63 }
 0x735   : > { %v1489_v0 = vpop.xlane.xlu1 %1488  ;;  %v1326_v1 = vpop.permute.xlu0 %1325 }
 0x736   : > { %3192 = vrcp.f32 %v1489_v0  ;;  %2907 = vmatpush3.msra.mxu1 %v1326_v1 }
 0x737   : > { %2916 = vmatprep.subr.mxu1 %v3704_v31 }
 0x739   : > { %v1493_v4 = vpop.permute.xlu1 %1492  ;;  %v1715_v13 = vpop.permute.xlu0 %1714 }
 0x73c   : > { %v3191_v2 = vpop.eup %3190 }
 0x73d   : > { %v1324_v3 = vmul.f32 %v3191_v2, %v3187_v58  ;;  %v1717_v11 = vpop.permute.xlu1 %1716 }
 0x73f   : > { %2909 = vmatmul.mubr.msk.f32.vlgmr.msra.gmra.mrb[0].mxu1 %vm1231_vm5, %v1324_v3 }
 0x740   : > { %v3193_v5 = vpop.eup %3192  ;;  %2917 = vmatpush3.msra.mxu1 %v1493_v4  ;;  %2918 = vmatprep.mubr.msk.f32.mxu1 %vm3703_vm3, %v3704_v31 }
 0x741   : > { %v1491_v6 = vmul.f32 %v3193_v5, %v3189_v60  ;;  %2926 = vmatprep.subr.mxu1 %v3704_v31 }
 0x743   : > { %2919 = vmatmul.mubr.msk.f32.vlgmr.msra.gmra.mrb[2].mxu1 %vm1231_vm5, %v1491_v6 }
 0x744   : > { %2928 = vmatprep.mubr.msk.f32.mxu1 %vm3703_vm3, %v3704_v31  ;;  %2927 = vmatpush3.msra.mxu1 %v1221_v7 }
 0x745   : > { %2936 = vmatprep.subr.mxu1 %v3704_v31 }
 0x812   : > { %v1397_v8 = vpop.f32.mrb[0].mxu1 }
 0x813   : > { %v2910_v9 = vpop.f32.mrb[1].mxu1  ;;  %2929 = vmatmul.mubr.msk.f32.vlgmr.msra.gmra.mrb[4].mxu1 %vm1231_vm5, %v1397_v8  ;;  %v2232_v8 = vld [vmem:[%s4311_s28] sm:$0xff] }
 0x814   : > { %2938 = vmatprep.mubr.msk.f32.mxu1 %vm3703_vm3, %v3704_v31  ;;  %v2233_v9 = vld [vmem:[%s4311_s28 + $0x8] sm:$0xff] }
 0x816   : > { %v1564_v10 = vpop.f32.mrb[2].mxu1 }
 0x817   : > { %v2920_v12 = vpop.f32.mrb[3].mxu1  ;;  %2924 = vmatmul.mubr.msk.f32.vlgmr.msra.gmra.mrb[6].mxu0 %vm1231_vm5, %v1564_v10  ;;  %v3001_v10 = vpack.c.bf16 %v2233_v9, %v2232_v8 }
 0x818   : > { %2932 = vmatpush3.xpose.msk.msra.mxu0 %vm1231_vm5, %v1717_v11  ;;  %2933 = vmatprep.mubr.msk.f32.mxu0 %vm3703_vm3, %v3704_v31  ;;  %v2234_v11 = vld [vmem:[%s4311_s28 + $0x10] sm:$0xff]  ;;  %v2235_v12 = vld [vmem:[%s4311_s28 + $0x18] sm:$0xff]  ;;  %s4671_s28 = scalar_lea.vmem [#allocation16], %s4290_s24 }
 0x819   : > { %2941 = vmatprep.subr.mxu0 %v3704_v31 }
 0x81b   : > { %2934 = vmatmul.mubr.msk.f32.vlgmr.msra.gmra.mrb[8].mxu0 %vm1231_vm5, %v1715_v13 }
 0x81c   : > { %2943 = vmatprep.mubr.msk.f32.mxu0 %vm3703_vm3, %v3704_v31  ;;  %2942 = vmatpush3.msra.mxu0 %v1223_v39 }
 0x81d   : > { %2951 = vmatprep.subr.mxu0 %v3704_v31 }
 0x8e6   : > { %v1710_v14 = vpop.f32.mrb[4].mxu1 }
 0x8e7   : > { %v2930_v15 = vpop.f32.mrb[5].mxu1 }
 0x8ea   : > { %v1637_v16 = vpop.f32.mrb[6].mxu0 }
 0x8eb   : > { %v4439_v17 = vadd.f32 %v1710_v14, %v1637_v16  ;;  %v2925_v18 = vpop.f32.mrb[7].mxu0 }
 0x8ee   : > { %v1788_v19 = vpop.f32.mrb[8].mxu0 }
 0x8ef   : > { %v1792_v20 = vmul.f32 0.35355338, %v1788_v19  ;;  %v2935_v21 = vpop.f32.mrb[9].mxu0  ;;  %v2824_v19 = vld [vmem:[%s4670_s26] ss:$0 sm:$0xff] }
 0x8f1   : > { %v1793_v22 = vadd.f32 %v4404_v42, %v1792_v20 }
 0x8f3   : > { %v1794_v23 = vsel %vm1231_vm5, %v1793_v22, -inf }
 0x8f4   : > { %1795 = vmax.xlane.f32.xlu1 %v1794_v23  ;;  %v2238_v23 = vld [vmem:[%s4346_s6 + $0x8] sm:$0xff] }
 0x905   : > { %1957 = vrot.lane.b32.xlu1 %v4383_v36, %s3712_s1 }
 0x909   : > { %1955 = vrot.lane.b32.xlu1 %v4383_v36, %s3713_s7 }
 0x981   : > { %v1796_v24 = vpop.xlane.xlu1 %1795 }
 0x982   : > { %v1797_v25 = vsub.f32 %v1793_v22, %v1796_v24  ;;  %v2237_v22 = vld [vmem:[%s4346_s6] sm:$0xff] }
 0x983   : > { %v3007_v24 = vpack.c.bf16 %v2238_v23, %v2237_v22 }
 0x984   : > { %v1798_v26 = vmul.f32 1.442695, %v1797_v25  ;;  %v2239_v25 = vld [vmem:[%s4346_s6 + $0x10] sm:$0xff] }
 0x985   : > { %v1958_v35 = vpop.permute.xlu1 %1957 }
 0x986   : > { %3194 = vpow2.f32 %v1798_v26  ;;  %v2240_v26 = vld [vmem:[%s4346_s6 + $0x18] sm:$0xff] }
 0x989   : > { %v1956_v38 = vpop.permute.xlu1 %1955 }
 0x990   : > { %v3195_v27 = vpop.eup %3194 }
 0x991   : > { %v1800_v29 = vsel %vm1231_vm5, %v3195_v27, 0.0 }
 0x992   : > { %1801 = vadd.xlane.f32.xlu0 %v1800_v29  ;;  %v2241_v29 = vld [vmem:[%s4346_s6 + $0x20] sm:$0xff] }
 0x9a8   : > { %1805 = vrot.lane.b32.xlu0 %v4383_v36, %s3714_s11 }
 0xa1f   : > { %v1802_v30 = vpop.xlane.xlu0 %1801 }
 0xa20   : > { %3196 = vrcp.f32 %v1802_v30  ;;  %v2242_v30 = vld [vmem:[%s4346_s6 + $0x28] sm:$0xff] }
 0xa23   : > { %v1806_v32 = vpop.permute.xlu0 %1805 }
 0xa24   : > { %2937 = vmatpush3.msra.mxu1 %v1806_v32  ;;  %v3013_v32 = vpack.c.bf16 %v2242_v30, %v2241_v29 }
 0xa25   : > { %2946 = vmatprep.subr.mxu1 %v3704_v31 }
 0xa2a   : > { %v3197_v34 = vpop.eup %3196 }
 0xa2b   : > { %v1804_v37 = vmul.f32 %v3197_v34, %v3195_v27  ;;  %v3010_v27 = vpack.c.bf16 %v2240_v26, %v2239_v25  ;;  %v2243_v34 = vld [vmem:[%s4346_s6 + $0x30] sm:$0xff] }
 0xa2d   : > { %2939 = vmatmul.mubr.msk.f32.vlgmr.msra.gmra.mrb[6].mxu1 %vm1231_vm5, %v1804_v37 }
 0xa2e   : > { %2947 = vmatpush3.xpose.msk.msra.mxu1 %vm1231_vm5, %v1958_v35  ;;  %2948 = vmatprep.mubr.msk.f32.mxu1 %vm3703_vm3, %v3704_v31  ;;  %v2244_v35 = vld [vmem:[%s4346_s6 + $0x38] sm:$0xff]  ;;  %s4672_s6 = scalar_lea.vmem [#allocation18], %s4290_s24 }
 0xa2f   : > { %2956 = vmatprep.subr.mxu1 %v3704_v31  ;;  %v3016_v37 = vpack.c.bf16 %v2244_v35, %v2243_v34 }
 0xa31   : > { %2949 = vmatmul.mubr.msk.f32.vlgmr.msra.gmra.mrb[8].mxu1 %vm1231_vm5, %v1956_v38  ;;  %v2825_v38 = vld [vmem:[%s4671_s28] ss:$0 sm:$0xff] }
 0xa32   : > { %2958 = vmatprep.mubr.msk.f32.mxu1 %vm3703_vm3, %v3704_v31  ;;  %2957 = vmatpush3.msra.mxu1 %v1224_v54 }
 0xa33   : > { %3006 = vmatprep.subr.bf16.mxu1 %v3702_v28 }
 0xb00   : > { %v1877_v40 = vpop.f32.mrb[6].mxu1 }
 0xb01   : > { %v2940_v41 = vpop.f32.mrb[7].mxu1  ;;  %2944 = vmatmul.mubr.msk.f32.vlgmr.msra.gmra.mrb[10].mxu0 %vm1231_vm5, %v1877_v40 }
 0xb02   : > { %2953 = vmatprep.mubr.msk.f32.mxu0 %vm3703_vm3, %v3704_v31 }
 0xb04   : > { %v2029_v43 = vpop.f32.mrb[8].mxu1 }
 0xb05   : > { %v2033_v44 = vmul.f32 0.35355338, %v2029_v43  ;;  %v2950_v45 = vpop.f32.mrb[9].mxu1 }
 0xb07   : > { %v2034_v46 = vadd.f32 %v4404_v42, %v2033_v44 }
 0xb09   : > { %v2035_v47 = vsel %vm1231_vm5, %v2034_v46, -inf }
 0xb0a   : > { %2036 = vmax.xlane.f32.xlu0 %v2035_v47 }
 0xb20   : > { %2046 = vrot.lane.b32.xlu0 %v4383_v36, %s3715_s20 }
 0xb97   : > { %v2037_v48 = vpop.xlane.xlu0 %2036 }
 0xb98   : > { %v2038_v49 = vsub.f32 %v2034_v46, %v2037_v48 }
 0xb9a   : > { %v2039_v50 = vmul.f32 1.442695, %v2038_v49 }
 0xb9b   : > { %v2047_v51 = vpop.permute.xlu0 %2046 }
 0xb9c   : > { %3198 = vpow2.f32 %v2039_v50  ;;  %2952 = vmatpush3.msra.mxu0 %v2047_v51 }
 0xb9d   : > { %3000 = vmatprep.subr.bf16.mxu0 %v3702_v28 }
 0xba6   : > { %v3199_v52 = vpop.eup %3198 }
 0xba7   : > { %v2041_v53 = vsel %vm1231_vm5, %v3199_v52, 0.0 }
 0xba8   : > { %2042 = vadd.xlane.f32.xlu1 %v2041_v53 }
 0xbd4   : > { %v1950_v42 = vpop.f32.mrb[10].mxu0 }
 0xbd5   : > { %v1954_v36 = vadd.f32 %v1950_v42, %v4439_v17  ;;  %v2945_v55 = vpop.f32.mrb[11].mxu0  ;;  %v2823_v17 = vld [vmem:[%s4669_s9] ss:$0 sm:$0xff] }
 0xc35   : > { %v2043_v56 = vpop.xlane.xlu1 %2042 }
 0xc36   : > { %3200 = vrcp.f32 %v2043_v56 }
 0xc40   : > { %v3201_v57 = vpop.eup %3200 }
 0xc41   : > { %v2045_v58 = vmul.f32 %v3201_v57, %v3199_v52 }
 0xc43   : > { %2954 = vmatmul.mubr.msk.f32.vlgmr.msra.gmra.mrb[12].mxu0 %vm1231_vm5, %v2045_v58 }
 0xc44   : > { %2969 = vmatprep.mubr.msk.f32.mxu0 %vm3703_vm3, %v3704_v31  ;;  %3002 = vmatpush3.bf16.msra.mxu0 %v3001_v10 }
 0xc45   : > { %3003 = vmatprep.subr.bf16.mxu0 %v3702_v28 }
 0xd16   : > { %v2118_v59 = vpop.f32.mrb[12].mxu0 }
 0xd17   : > { %v2955_v60 = vpop.f32.mrb[13].mxu0  ;;  %2959 = vmatmul.mubr.msk.f32.vlgmr.msra.gmra.mrb[10].mxu1 %vm1231_vm5, %v2118_v59 }
 0xd18   : > { %2988 = vmatprep.mubr.msk.f32.mxu1 %vm3703_vm3, %v3704_v31  ;;  %3008 = vmatpush3.bf16.msra.mxu1 %v3007_v24 }
 0xd19   : > { %3009 = vmatprep.subr.bf16.mxu1 %v3702_v28 }
 0xd1c   : > { %3011 = vmatpush3.bf16.msra.mxu1 %v3010_v27 }
 0xd1d   : > { %3012 = vmatprep.subr.bf16.mxu1 %v3702_v28 }
 0xd20   : > { %3014 = vmatpush3.bf16.msra.mxu1 %v3013_v32 }
 0xd21   : > { %3015 = vmatprep.subr.bf16.mxu1 %v3702_v28  ;;  %v2827_v28 = vld [vmem:[%s4672_s6] ss:$0 sm:$0xff] }
 0xd24   : > { %3017 = vmatpush3.bf16.msra.mxu1 %v3016_v37 }
 0xdea   : > { %v2191_v62 = vpop.f32.mrb[10].mxu1 }
 0xdeb   : > { %v2195_v63 = vadd.f32 %v2191_v62, %v1954_v36  ;;  %v2960_v0 = vpop.f32.mrb[11].mxu1 }
 0xdec   : > { %v2829_v0 = vld [vmem:[%s4673_s22] ss:$0 sm:$0xff] }
 0xded   : > { %v2202_v1 = vadd.f32 %v2822_v61, %v2195_v63 }
 0xdef   : > { %v2203_v2 = vadd.f32 %v2202_v1, %v4374_v33  ;;  %v3004_v33 = vpack.c.bf16 %v2235_v12, %v2234_v11 }
 0xdf1   : > { %v2204_v3 = vsel %vm1147_vm4, %v2203_v2, 0.0  ;;  %3005 = vmatpush3.bf16.msra.mxu0 %v3004_v33 }
 0xdf2   : > { %2205 = vadd.xlane.f32.xlu1 %v2204_v3 }
 0xe7f   : > { %v2206_v4 = vpop.xlane.xlu1 %2205 }
 0xe80   : > { %v2208_v5 = vmul.f32 0.03125, %v2206_v4 }
 0xe82   : > { %v2209_v6 = vsub.f32 %v2203_v2, %v2208_v5  ;;  %v2830_v2 = vld [vmem:[%s887_s27] ss:$0 sm:$0xff] }
 0xe84   : > { %v2210_v7 = vmul.f32 %v2209_v6, %v2209_v6 }
 0xe86   : > { %v2211_v31 = vsel %vm1147_vm4, %v2210_v7, 0.0 }
 0xe87   : > { %2212 = vadd.xlane.f32.xlu1 %v2211_v31 }
 0xf14   : > { %v2213_v13 = vpop.xlane.xlu1 %2212 }
 0xf15   : > { %v2214_v14 = vmul.f32 0.03125, %v2213_v13 }
 0xf17   : > { %v2215_v15 = vadd.f32 1e-12, %v2214_v14 }
 0xf19   : > { %3202 = vrsqrt.f32 %v2215_v15 }
 0xf23   : > { %v3203_v16 = vpop.eup %3202 }
 0xf24   : > { %v2217_v18 = vmul.f32 %v3203_v16, %v2209_v6 }
 0xf26   : > { %v2224_v20 = vmul.f32 %v2823_v17, %v2217_v18 }
 0xf28   : > { %v2231_v21 = vadd.f32 %v2824_v19, %v2224_v20 }
 0xf2a   : > { %2970 = vmatmul.mubr.msk.f32.vlgmr.msra.gmra.mrb[14].mxu0 %vm1147_vm4, %v2231_v21 }
 0xffd   : > { %v2323_v39 = vpop.f32.mrb[14].mxu0 }
 0xffe   : > { %v2324_v40 = vadd.f32 %v2825_v38, %v2323_v39  ;;  %v2971_v41 = vpop.f32.mrb[15].mxu0 }
0x1000   : > { %v2328_v43 = vmul.f32 0.044715, %v2324_v40  ;;  %v2327_v49 = vmul.f32 0.5, %v2324_v40 }
0x1002   : > { %v2329_v44 = vmul.f32 %v2328_v43, %v2324_v40 }
0x1004   : > { %v2330_v45 = vmul.f32 %v2329_v44, %v2324_v40 }
0x1006   : > { %v2331_v46 = vadd.f32 %v2330_v45, %v2324_v40 }
0x1008   : > { %v2332_v47 = vmul.f32 0.7978846, %v2331_v46 }
0x100a   : > { %3204 = vtanh.f32 %v2332_v47 }
0x1014   : > { %v3205_v48 = vpop.eup %3204 }
0x1015   : > { %v2334_v50 = vadd.f32 1.0, %v3205_v48 }
0x1017   : > { %v2335_v51 = vmul.f32 %v2334_v50, %v2327_v49 }
0x1019   : > { %2989 = vmatmul.mubr.msk.f32.vlgmr.msra.gmra.mrb[12].mxu1 %vm2342_vm6, %v2335_v51 }
0x10ec   : > { %v2412_v52 = vpop.f32.mrb[12].mxu1 }
0x10ed   : > { %v2413_v53 = vadd.f32 %v2827_v28, %v2412_v52  ;;  %v2990_v54 = vpop.f32.mrb[13].mxu1 }
0x10ef   : > { %v2416_v42 = vadd.f32 %v2413_v53, %v2231_v21 }
0x10f1   : > { %v2417_v36 = vsel %vm1147_vm4, %v2416_v42, 0.0 }
0x10f2   : > { %2418 = vadd.xlane.f32.xlu1 %v2417_v36 }
0x117f   : > { %v2419_v55 = vpop.xlane.xlu1 %2418 }
0x1180   : > { %v2420_v56 = vmul.f32 0.03125, %v2419_v55 }
0x1182   : > { %v2421_v57 = vsub.f32 %v2416_v42, %v2420_v56 }
0x1184   : > { %v2422_v58 = vmul.f32 %v2421_v57, %v2421_v57 }
0x1186   : > { %v2423_v59 = vsel %vm1147_vm4, %v2422_v58, 0.0 }
0x1187   : > { %2424 = vadd.xlane.f32.xlu1 %v2423_v59 }
0x1214   : > { %v2425_v60 = vpop.xlane.xlu1 %2424 }
0x1215   : > { %v2426_v61 = vmul.f32 0.03125, %v2425_v60 }
0x1217   : > { %v2427_v62 = vadd.f32 1e-12, %v2426_v61 }
0x1219   : > { %3206 = vrsqrt.f32 %v2427_v62 }
0x1223   : > { %v3207_v63 = vpop.eup %3206 }
0x1224   : > { %v2429_v1 = vmul.f32 %v3207_v63, %v2421_v57 }
0x1226   : > { %v2436_v3 = vmul.f32 %v2829_v0, %v2429_v1 }
0x1228   : > { %v2443_v4 = vadd.f32 %v2830_v2, %v2436_v3 }
0x122a   : > { %2444 = vst.msk [vmem:[%s4351_s29] sm:$0xff] %vm1147_vm4, %v2443_v4 }
0x122b PF: > { %s4674_s5 = sld [smem:[#allocation34_spill]]  ;;  %s4675_s27 = sld [smem:[#allocation29_spill]] }
0x122c   : > { %s4676_s28 = sld [smem:[#allocation30_spill]]  ;;  %s4677_s29 = sld [smem:[#allocation37_spill]] }
0x122d   : > { %s4678_s0 = sld [smem:[#allocation33_spill]]  ;;  %s4679_s8 = sld [smem:[#allocation35_spill]] }
0x122e   : > { %s4680_s1 = sld [smem:[#allocation36_spill]]  ;;  %s4681_s30 = smov %s3674_s19 }
0x1231   : > { %s45_s20 = sadd.s32 1, %s4674_s5  }
0x1232   : > { %p42_p7 = scmp.ge.s32.totalorder %s45_s20, 8  }
0x1233   : > { %s4682_s19 = smov %s4679_s8 }
0x1234   :  { %44 = sbr.rel (!%p42_p7) target bundleno = 32 (0x20), region = 268 }
0x123b   :  { %2464 = vsyncpa [#allocation3], 1 }
0x123c   :  { %2466 = vsyncpa [#allocation3 + $0x1], 1 }
0x123d   :  { %2467 = vsyncpa [#allocation5], 1 }
0x123e   :  { %2468 = vsyncpa [#allocation8], 1 }
0x123f   :  { %2470 = vsyncpa [#allocation8 + $0x1], 1 }
0x1240   :  { %2471 = vsyncpa [#allocation11], 1 }
0x1241   :  { %2473 = vsyncpa [#allocation11 + $0x1], 1 }
0x1242   :  { %2474 = vsyncpa [#allocation14], 1 }
0x1243   :  { %2476 = vsyncpa [#allocation14 + $0x1], 1 }
0x1244   :  { %2477 = vsyncpa [#allocation17], 1 }
0x1245   :  { %2479 = vsyncpa [#allocation17 + $0x1], 1 }
0x1246   :  { %2480 = vsyncpa [#allocation20], 1 }
0x1247   :  { %2482 = vsyncpa [#allocation20 + $0x1], 1 }

// kernel: cross_encoder_forward.3
= control target key start
LH: loop header
LB: loop body
LE: loop exit
PB: predicated region body
PF: predicated region fallthrough
CT: control target
= control target key end

     0   :  { %s9902_s6 = smov 1   ;;  %s9903_s10 = smov 2   ;;  %s11649_s0 = inlined_call_operand.smem [shape: u32[41], index: -1, kind: input, shape index: {}] }
   0x1   :  { %s9992_s5 = sld [smem:[%s11649_s0]]   ;;  %s9904_s14 = smov 3  }
   0x2   :  { %s9997_s9 = sld [smem:[%s11649_s0 + %s9902_s6]]   ;;  %s9905_s18 = smov 4  }
   0x3   :  { %s10002_s13 = sld [smem:[%s11649_s0 + %s9903_s10]]   ;;  %s9906_s22 = smov 5  }
   0x4   :  { %s10007_s17 = sld [smem:[%s11649_s0 + %s9904_s14]]   ;;  %s9907_s26 = smov 6  }
   0x5   :  { %s10012_s21 = sld [smem:[%s11649_s0 + %s9905_s18]]   ;;  %s9908_s30 = smov 7  }
   0x6   :  { %s10017_s25 = sld [smem:[%s11649_s0 + %s9906_s22]]   ;;  %s9909_s4 = smov 8  }
   0x7   :  { %11720 = sst [smem:[#allocation55_spill]] %s9992_s5  ;;  %s9910_s10 = smov 9  }
   0x8   :  { %11721 = sst [smem:[#allocation56_spill]] %s9997_s9  ;;  %s9911_s15 = smov 10  }
   0x9   :  { %11722 = sst [smem:[#allocation57_spill]] %s10002_s13  ;;  %s9912_s20 = smov 11  }
   0xa   :  { %11723 = sst [smem:[#allocation58_spill]] %s10007_s17  ;;  %s9914_s1 = smov 13  }
   0xb   :  { %11724 = sst [smem:[#allocation59_spill]] %s10012_s21  ;;  %s9915_s7 = smov 14  }
   0xc   :  { %11725 = sst [smem:[#allocation60_spill]] %s10017_s25  ;;  %s9917_s22 = smov 16  }
   0xd   :  { %s10022_s29 = sld [smem:[%s11649_s0 + %s9907_s26]]   ;;  %s9913_s26 = smov 12  }
   0xe   :  { %s10027_s3 = sld [smem:[%s11649_s0 + %s9908_s30]]   ;;  %s9918_s28 = smov 17  }
   0xf   :  { %s10032_s8 = sld [smem:[%s11649_s0 + %s9909_s4]]  }
  0x10   :  { %s10037_s14 = sld [smem:[%s11649_s0 + %s9910_s10]]  }
  0x11   :  { %s10042_s19 = sld [smem:[%s11649_s0 + %s9911_s15]]   ;;  %s9916_s15 = smov 15  }
  0x12   :  { %s10047_s24 = sld [smem:[%s11649_s0 + %s9912_s20]]  }
  0x13   :  { %11726 = sst [smem:[#allocation61_spill]] %s10022_s29 }
  0x14   :  { %11727 = sst [smem:[#allocation62_spill]] %s10027_s3 }
  0x15   :  { %11728 = sst [smem:[#allocation63_spill]] %s10032_s8 }
  0x16   :  { %11729 = sst [smem:[#allocation64_spill]] %s10037_s14 }
  0x17   :  { %11730 = sst [smem:[#allocation65_spill]] %s10042_s19 }
  0x18   :  { %11731 = sst [smem:[#allocation66_spill]] %s10047_s24 }
  0x19   :  { %s10052_s30 = sld [smem:[%s11649_s0 + %s9913_s26]]  }
  0x1a   :  { %s10057_s6 = sld [smem:[%s11649_s0 + %s9914_s1]]  }
  0x1b   :  { %s10062_s12 = sld [smem:[%s11649_s0 + %s9915_s7]]   ;;  %s9919_s7 = smov 18  }
  0x1c   :  { %s10067_s20 = sld [smem:[%s11649_s0 + %s9916_s15]]   ;;  %s9920_s15 = smov 19  }
  0x1d   :  { %s10072_s27 = sld [smem:[%s11649_s0 + %s9917_s22]]   ;;  %s9921_s22 = smov 20  }
  0x1e   :  { %s10077_s4 = sld [smem:[%s11649_s0 + %s9918_s28]]   ;;  %s9922_s28 = smov 21  }
  0x1f   :  { %11732 = sst [smem:[#allocation67_spill]] %s10052_s30 }
  0x20   :  { %11733 = sst [smem:[#allocation68_spill]] %s10057_s6 }
  0x21   :  { %11734 = sst [smem:[#allocation69_spill]] %s10062_s12 }
  0x22   :  { %11735 = sst [smem:[#allocation70_spill]] %s10067_s20 }
  0x23   :  { %11736 = sst [smem:[#allocation71_spill]] %s10072_s27 }
  0x24   :  { %11737 = sst [smem:[#allocation72_spill]] %s10077_s4 }
  0x25   :  { %s10082_s12 = sld [smem:[%s11649_s0 + %s9919_s7]]   ;;  %s9923_s7 = smov 22  }
  0x26   :  { %s10087_s30 = sld [smem:[%s11649_s0 + %s9920_s15]]   ;;  %s9924_s15 = smov 23  }
  0x27   :  { %s10092_s8 = sld [smem:[%s11649_s0 + %s9921_s22]]   ;;  %s9925_s22 = smov 24  }
  0x28   :  { %s10097_s29 = sld [smem:[%s11649_s0 + %s9922_s28]]   ;;  %s9926_s28 = smov 25  }
  0x29   :  { %s10107_s21 = sld [smem:[%s11649_s0 + %s9924_s15]]   ;;  %s9928_s15 = smov 27  }
  0x2a   :  { %s10117_s17 = sld [smem:[%s11649_s0 + %s9926_s28]]   ;;  %s9930_s28 = smov 29  }
  0x2b   :  { %11738 = sst [smem:[#allocation73_spill]] %s10082_s12 }
  0x2c   :  { %11739 = sst [smem:[#allocation74_spill]] %s10087_s30 }
  0x2d   :  { %11740 = sst [smem:[#allocation75_spill]] %s10092_s8 }
  0x2e   :  { %11741 = sst [smem:[#allocation76_spill]] %s10097_s29 }
  0x2f   :  { %s10102_s12 = sld [smem:[%s11649_s0 + %s9923_s7]]   ;;  %s9927_s7 = smov 26  }
  0x30   :  { %11743 = sst [smem:[#allocation78_spill]] %s10107_s21 }
  0x31   :  { %s10112_s8 = sld [smem:[%s11649_s0 + %s9925_s22]]   ;;  %s9929_s22 = smov 28  }
  0x32   :  { %11745 = sst [smem:[#allocation80_spill]] %s10117_s17 }
  0x33   :  { %s10122_s9 = sld [smem:[%s11649_s0 + %s9927_s7]]   ;;  %s9931_s7 = smov 30  }
  0x34   :  { %s10127_s5 = sld [smem:[%s11649_s0 + %s9928_s15]]   ;;  %s9932_s15 = smov 31  }
  0x35   :  { %11742 = sst [smem:[#allocation77_spill]] %s10102_s12 }
  0x36   :  { %s10137_s13 = sld [smem:[%s11649_s0 + %s9930_s28]]   ;;  %s9934_s28 = smov 33  }
  0x37   :  { %11744 = sst [smem:[#allocation79_spill]] %s10112_s8 }
  0x38   :  { %s10132_s8 = sld [smem:[%s11649_s0 + %s9929_s22]]   ;;  %s9933_s22 = smov 32  }
  0x39   :  { %11746 = sst [smem:[#allocation81_spill]] %s10122_s9 }
  0x3a   :  { %11747 = sst [smem:[#allocation82_spill]] %s10127_s5 }
  0x3b   :  { %s10142_s9 = sld [smem:[%s11649_s0 + %s9931_s7]]   ;;  %s9935_s7 = smov 34  }
  0x3c   :  { %11749 = sst [smem:[#allocation84_spill]] %s10137_s13 }
  0x3d   :  { %s10147_s5 = sld [smem:[%s11649_s0 + %s9932_s15]]   ;;  %s9936_s15 = smov 35  }
  0x3e   :  { %11748 = sst [smem:[#allocation83_spill]] %s10132_s8 }
  0x3f   :  { %s10152_s21 = sld [smem:[%s11649_s0 + %s9933_s22]]   ;;  %s9937_s22 = smov 36  }
  0x40   :  { %s10157_s13 = sld [smem:[%s11649_s0 + %s9934_s28]]   ;;  %s9938_s28 = smov 37  }
  0x41   :  { %11750 = sst [smem:[#allocation85_spill]] %s10142_s9 }
  0x42   :  { %s10162_s9 = sld [smem:[%s11649_s0 + %s9935_s7]]   ;;  %s9939_s7 = smov 38  }
  0x43   :  { %11751 = sst [smem:[#allocation86_spill]] %s10147_s5 }
  0x44   :  { %s10167_s29 = sld [smem:[%s11649_s0 + %s9936_s15]]   ;;  %s9940_s15 = smov 39  }
  0x45   :  { %11752 = sst [smem:[#allocation87_spill]] %s10152_s21 }
  0x46   :  { %11753 = sst [smem:[#allocation88_spill]] %s10157_s13 }
  0x47   :  { %s10172_s21 = sld [smem:[%s11649_s0 + %s9937_s22]]   ;;  %s9941_s22 = smov 40  }
  0x48   :  { %11754 = sst [smem:[#allocation89_spill]] %s10162_s9 }
  0x49   :  { %s10177_s13 = sld [smem:[%s11649_s0 + %s9938_s28]]  }
  0x4a   :  { %11755 = sst [smem:[#allocation90_spill]] %s10167_s29 }
  0x4b   :  { %s10182_s4 = sld [smem:[%s11649_s0 + %s9939_s7]]  }
  0x4c   :  { %s10187_s29 = sld [smem:[%s11649_s0 + %s9940_s15]]  }
  0x4d   :  { %11756 = sst [smem:[#allocation91_spill]] %s10172_s21 }
  0x4e   :  { %s10192_s21 = sld [smem:[%s11649_s0 + %s9941_s22]]  }
  0x4f   :  { %11757 = sst [smem:[#allocation92_spill]] %s10177_s13 }
  0x51   :  { %11758 = sst [smem:[#allocation93_spill]] %s10182_s4 }
  0x52   :  { %11759 = sst [smem:[#allocation94_spill]] %s10187_s29 }
  0x54   :  { %11760 = sst [smem:[#allocation95_spill]] %s10192_s21 }
  0x55   :  { %87 = vsyncpa [#allocation3], 0 }
  0x56   :  { %89 = vsyncpa [#allocation3 + $0x1], 0 }
  0x57   :  { %90 = vsyncpa [#allocation6], 0 }
  0x58   :  { %92 = vsyncpa [#allocation6 + $0x1], 0 }
  0x59   :  { %93 = vsyncpa [#allocation9], 0 }
  0x5a   :  { %95 = vsyncpa [#allocation9 + $0x1], 0 }
  0x5b   :  { %96 = vsyncpa [#allocation12], 0 }
  0x5c   :  { %98 = vsyncpa [#allocation12 + $0x1], 0 }
  0x5d   :  { %99 = vsyncpa [#allocation15], 0 }
  0x5e   :  { %101 = vsyncpa [#allocation15 + $0x1], 0 }
  0x5f   :  { %102 = vsyncpa [#allocation18], 0 }
  0x60   :  { %104 = vsyncpa [#allocation18 + $0x1], 0 }
  0x61   :  { %105 = vsyncpa [#allocation21], 0 }
  0x62   :  { %107 = vsyncpa [#allocation21 + $0x1], 0 }
  0x63   :  { %108 = vsyncpa [#allocation24], 0 }
  0x64   :  { %110 = vsyncpa [#allocation24 + $0x1], 0 }
  0x65   :  { %111 = vsyncpa [#allocation27], 0 }
  0x66   :  { %113 = vsyncpa [#allocation27 + $0x1], 0 }
  0x67   :  { %114 = vsyncpa [#allocation30], 0 }
  0x68   :  { %116 = vsyncpa [#allocation30 + $0x1], 0 }
  0x69   :  { %117 = vsyncpa [#allocation33], 0 }
  0x6a   :  { %119 = vsyncpa [#allocation33 + $0x1], 0 }
  0x6b   :  { %120 = vsyncpa [#allocation36], 0 }
  0x6c   :  { %121 = vsyncpa [#allocation4], 0 }
  0x6d   :  { %123 = vsyncpa [#allocation4 + $0x1], 0 }
  0x6e   :  { %124 = vsyncpa [#allocation39], 0 }
  0x6f   :  { %126 = vsyncpa [#allocation39 + $0x1], 0  ;;  %s10194_s0 = smov 0   ;;  %s10196_s28 = smov 0  }
  0x70   :  { %s10198_s1 = smov 0   ;;  %s10200_s2 = smov 0  }
  0x71   :  { %s10202_s7 = smov 0   ;;  %s10204_s10 = smov 0  }
  0x72   :  { %s10206_s11 = smov 0   ;;  %s10208_s15 = smov 0  }
  0x73   :  { %s10210_s16 = smov 0   ;;  %s10212_s18 = smov 0  }
  0x74   :  { %s10214_s22 = smov 0  }
  0x75 LB: > { %s11761_s30 = sld [smem:[#allocation74_spill]]  ;;  %s11762_s27 = sld [smem:[#allocation71_spill]]  ;;  %s9864_s28 = sphi %s10196_s28, %s11885_s28   ;;  %s9860_s0 = sphi %s10194_s0, %s11884_s0   ;;  %s9900_s22 = sphi %s10214_s22, %s132_s22   ;;  %s9896_s18 = sphi %s10212_s18, %s11893_s18   ;;  %s9892_s16 = sphi %s10210_s16, %s11892_s16   ;;  %s9888_s15 = sphi %s10208_s15, %s11891_s15   ;;  %s9884_s11 = sphi %s10206_s11, %s11890_s11   ;;  %s9880_s10 = sphi %s10204_s10, %s11889_s10   ;;  %s9876_s7 = sphi %s10202_s7, %s11888_s7   ;;  %s9872_s2 = sphi %s10200_s2, %s11887_s2   ;;  %s9868_s1 = sphi %s10198_s1, %s11886_s1  }
  0x76   : > { %s11763_s25 = sld [smem:[#allocation60_spill]]  ;;  %s11764_s19 = sld [smem:[#allocation65_spill]] }
  0x77   : > { %s11765_s17 = sld [smem:[#allocation80_spill]]  ;;  %s11767_s12 = sld [smem:[#allocation77_spill]] }
  0x78   : > { %s11766_s14 = sld [smem:[#allocation64_spill]]  ;;  %s11768_s9 = sld [smem:[#allocation89_spill]] }
  0x79   : > { %s11769_s8 = sld [smem:[#allocation83_spill]]  ;;  %s11770_s6 = sld [smem:[#allocation68_spill]] }
  0x7a   : > { %s11771_s5 = sld [smem:[#allocation86_spill]]  ;;  %s11773_s13 = sld [smem:[#allocation92_spill]] }
  0x7b   : > { %s11772_s3 = sld [smem:[#allocation62_spill]]  ;;  %11774 = sst [smem:[#allocation96_spill]] %s9860_s0 }
  0x7c   : > { %11775 = sst [smem:[#allocation97_spill]] %s9864_s28  ;;  %s10248_s23 = sadd.s32 4294967295, %s9900_s22  }
  0x7d   : > { %11776 = sst [smem:[#allocation98_spill]] %s9868_s1  ;;  %s141_s21 = sadd.s32 1, %s9892_s16 }
  0x7e   : > { %11777 = sst [smem:[#allocation99_spill]] %s9876_s7  ;;  %s144_s4 = sadd.s32 1, %s9896_s18 }
  0x7f   : > { %11778 = sst [smem:[#allocation100_spill]] %s9880_s10  ;;  %p142_p0 = scmp.ge.s32.totalorder %s141_s21, 5 }
  0x80   : > { %11779 = sst [smem:[#allocation101_spill]] %s9884_s11  ;;  %s281_s29 = sadd.s32 1, %s9880_s10 }
  0x81   : > { %11780 = sst [smem:[#allocation102_spill]] %s9888_s15  ;;  %p288_p1 = scmp.ne.s32.totalorder %s9880_s10, %s9876_s7 }
  0x82   : > { %11781 = sst [smem:[#allocation103_spill]] %s9892_s16  ;;  %p289_p2 = scmp.eq.s32.totalorder %s9900_s22, 0 }
  0x83   : > { %11782 = sst [smem:[#allocation104_spill]] %s9896_s18  ;;  %s11895_s21 = smov (%p142_p0, %s141_s21), 0 }
  0x84   : > { %11783 = sst [smem:[#allocation105_spill]] %s9900_s22  ;;  %s11897_s4 = smov (!%p142_p0, %s144_s4), %s9896_s18 }
  0x85   : > { %11784 = sst [smem:[#allocation106_spill]] %s11895_s21  ;;  %s278_s11 = ssub.s32 %s9892_s16, %s11895_s21 }
  0x86   : > { %p10262_p3 = por %p289_p2, %p288_p1  ;;  %p146_p4 = scmp.ge.s32.totalorder %s11897_s4, 2 }
  0x87   : > { %p279_p5 = scmp.eq.s32.totalorder %s278_s11, 0  ;;  %p294_p6 = scmp.ne.s32.totalorder %s9876_s7, %s9872_s2 }
  0x88   : > { %s11785_s26 = scalar_select %p10262_p3, 1, 0 }
  0x89   : > { %p11672_p7 = scmp.eq.s32.totalorder %s10248_s23, 0  ;;  %s11899_s4 = smov (%p146_p4, %s11897_s4), 0 }
  0x8a   : > { %11786 = sst [smem:[#allocation107_spill]] %s11899_s4  ;;  %s1126_s20 = ssub.s32 %s9896_s18, %s11899_s4 }
  0x8b   : > { %s10271_s15 = scalar_select %p279_p5, %s9880_s10, %s281_s29  }
  0x8c   : > { %p10275_p8 = por %p11672_p7, %p294_p6  ;;  %p1127_p9 = scmp.eq.s32.totalorder %s1126_s20, 0 }
  0x8d   : > { %11787 = sst [smem:[#allocation108_spill]] %s10271_s15  ;;  %s1129_s24 = sadd.s32 1, %s9868_s1 }
  0x8e   : > { %s11788_s21 = scalar_select %p10275_p8, 1, 0 }
  0x8f   : > { %p1139_p10 = scmp.ne.s32.totalorder %s9868_s1, %s9864_s28  ;;  %p1140_p11 = scmp.eq.s32.totalorder %s10248_s23, 9 }
  0x90   : > { %s10286_s2 = scalar_select %p1127_p9, %s9868_s1, %s1129_s24  }
  0x91   : > { %p10288_p12 = por %p1140_p11, %p1139_p10  ;;  %p1145_p13 = scmp.ne.s32.totalorder %s9864_s28, %s9860_s0 }
  0x92   : > { %11789 = sst [smem:[#allocation109_spill]] %s10286_s2  ;;  %s11792_s29 = sadd.s32 4294967294, %s9900_s22  }
  0x93   : > { %s11790_s11 = scalar_select %p10288_p12, 1, 0 }
  0x94   : > { %p1146_p0 = scmp.eq.s32.totalorder %s11792_s29, 9  ;;  %p7976_p1 = scmp.ge.s32.totalorder %s9900_s22, 1 }
  0x95   : > { %11791 = sst [smem:[#allocation110_spill]] %s11790_s11  ;;  %p1205_p2 = scmp.lt.s32.totalorder %s9900_s22, 11 }
  0x96   : > { %p10298_p4 = por %p1146_p0, %p1145_p13  ;;  %s9942_s24 = smov [#allocation35]  }
  0x97   : > { %p10302_p5 = pnand %p7976_p1, %p1205_p2  ;;  %s1221_s18 = sshll.u32 %s9942_s24, 4  ;;  %s1222_s18 = int_to_ptr.vmem [resolvable:$true] %s1221_s18 }
  0x98   : > { %s11793_s20 = scalar_select %p10298_p4, 1, 0 }
  0x99   : > { %s11795_s4 = scalar_select %p10302_p5, 1, 0 }
  0x9a   : > { %11794 = sst [smem:[#allocation111_spill]] %s11793_s20  ;;  %p8812_p6 = pneg %p10302_p5 }
  0x9b   : > { %s9058_s29 = scalar_lea.hbm %s11773_s13, 16 }
  0x9c   : > { %p10310_p9 = pnand %p8812_p6, %p11672_p7  ;;  %p9059_p10 = scmp.ne.s32.totalorder %s11773_s13, %s9058_s29 }
  0x9d   : > { %p9065_p1 = scmp.lt.u32.totalorder %s9058_s29, %s11773_s13 }
  0x9e   : > { %p9060_p11 = pneg %p10310_p9 }
  0xa0   : > { %p9061_p13 = pnand %p9060_p11, %p9059_p10 }
  0xa2   : > { %p9062_p0 = pneg %p9061_p13 }
  0xa4   : > { %p9067_p2 = pnand %p9065_p1, %p9062_p0 }
  0xa6   : > { %9070 = shalt.err (!%p9067_p2)
}
  0xa7   : > { %s9071_s2 = scalar_lea.vmem %s1222_s18, 16  ;;  %s9078_s24 = scalar_lea.vmem %s1222_s18, 32 }
  0xa8   : > { %p9072_p4 = scmp.ne.s32.totalorder %s1222_s18, %s9071_s2  ;;  %p9079_p5 = scmp.lt.s32.totalorder %s1222_s18, %s1222_s18 }
  0xa9   : > { %p9080_p6 = scmp.lt.s32.totalorder %s9078_s24, %s9071_s2 }
  0xaa   : > { %p9074_p12 = pnand %p9072_p4, %p9060_p11 }
  0xab   : > { %p9081_p7 = por %p9080_p6, %p9079_p5 }
  0xac   : > { %p9075_p8 = pneg %p9074_p12 }
  0xae   : > { %p9082_p3 = pnand %p9081_p7, %p9075_p8 }
  0xb0   : > { %9085 = shalt.err (!%p9082_p3)
}
  0xb1   : > { %8815 = dma.hbm_to_vmem [thread:$0]  (!%p10310_p9), %s11773_s13, 16, %s1222_s18, [#allocation36]  }
  0xb2   : > { %p7978_p10 = scmp.ge.s32.totalorder %s9900_s22, 10 }
  0xb3   : > { %s10324_s29 = sand.u32 (!%p7978_p10), 1, %s9880_s10   ;;  %s10327_s2 = sshll.u32 (!%p7978_p10), %s9892_s16, 4 }
  0xb4   : > { %1228 = sbr.rel (%p7978_p10) target bundleno = 688 (0x2b0), region = 24  ;;  %s10330_s24 = sand.u32 (!%p7978_p10), 1, %s9900_s22  }
  0xb5   : > { %s10334_s15 = scalar_lea.hbm (!%p7978_p10), %s11772_s3, %s10327_s2  ;;  %s1294_s18 = scalar_lea.vmem (!%p7978_p10), [#allocation5], %s10324_s29 }
  0xb6   : > { %s1301_s13 = sshll.u32 (!%p7978_p10), %s1294_s18, 4  ;;  %s9086_s20 = scalar_lea.hbm (!%p7978_p10), %s10334_s15, 16  ;;  %s1302_s13 = int_to_ptr.vmem [resolvable:$true] %s1301_s13 }
  0xb7   : > { %p9087_p3 = scmp.ne.s32.totalorder (!%p7978_p10), %s10334_s15, %s9086_s20  ;;  %p11797_p7 = scmp.ne.s32.totalorder (!%p7978_p10), %s11785_s26, 0 }
  0xb8   : > { %s9090_s16 = scalar_lea.hbm (!%p7978_p10), %s11772_s3, 80  ;;  %p9091_p4 = scmp.lt.u32.totalorder (!%p7978_p10), %s10334_s15, %s11772_s3 }
  0xb9   : > { %p9088_p8 = pnand (!%p7978_p10), %p9087_p3, %p11797_p7  ;;  %p9092_p5 = scmp.lt.u32.totalorder (!%p7978_p10), %s9090_s16, %s9086_s20 }
  0xba   : > { %p9094_p11 = scmp.lt.u32.totalorder (!%p7978_p10), %s9086_s20, %s10334_s15 }
  0xbb   : > { %p9089_p12 = pneg %p9088_p8  ;;  %p9093_p9 = por %p9092_p5, %p9091_p4 }
  0xbd   : > { %p9095_p13 = por %p9094_p11, %p9093_p9 }
  0xbf   : > { %p9096_p0 = pnand %p9095_p13, %p9089_p12 }
  0xc1   : > { %9099 = shalt.err (!%p9096_p0)
}
  0xc2   : > { %s9100_s10 = scalar_lea.vmem %s1302_s13, 16  ;;  %s9943_s18 = smov [#allocation5]  }
  0xc3   : > { %p9101_p1 = scmp.ne.s32.totalorder %s1302_s13, %s9100_s10  ;;  %s9104_s1 = sshll.u32 %s9943_s18, 4  ;;  %s9105_s1 = int_to_ptr.vmem [resolvable:$false] %s9104_s1 }
  0xc4   : > { %s9106_s0 = scalar_lea.vmem %s9105_s1, 32  ;;  %p9107_p10 = scmp.lt.s32.totalorder %s1302_s13, %s9105_s1 }
  0xc5   : > { %p9102_p2 = pnand %p9101_p1, %p11797_p7  ;;  %p9108_p3 = scmp.lt.s32.totalorder %s9106_s0, %s9100_s10 }
  0xc7   : > { %p9103_p6 = pneg %p9102_p2  ;;  %p9109_p8 = por %p9108_p3, %p9107_p10 }
  0xc9   : > { %p9110_p4 = pnand %p9109_p8, %p9103_p6 }
  0xcb   : > { %9113 = shalt.err (!%p9110_p4)
}
  0xcc   : > { %s11798_s16 = scalar_lea.sflag [#allocation6], %s10330_s24  ;;  %s10355_s20 = scalar_lea.hbm %s11764_s19, %s10327_s2 }
  0xcd   : > { %8763 = dma.hbm_to_vmem [thread:$0]  (%p11797_p7), %s10334_s15, 16, %s1302_s13, %s11798_s16  }
  0xce   : > { %s1336_s0 = scalar_lea.vmem [#allocation8], %s10324_s29  ;;  %s11681_s10 = scalar_lea.sflag [#allocation9], %s10330_s24 }
  0xcf   : > { %s1343_s1 = sshll.u32 %s1336_s0, 4  ;;  %s9114_s18 = scalar_lea.hbm %s10355_s20, 16  ;;  %s1344_s1 = int_to_ptr.vmem [resolvable:$true] %s1343_s1 }
  0xd0   : > { %p9115_p12 = scmp.ne.s32.totalorder %s10355_s20, %s9114_s18  ;;  %s9118_s3 = scalar_lea.hbm %s11764_s19, 80 }
  0xd1   : > { %p9119_p11 = scmp.lt.u32.totalorder %s10355_s20, %s11764_s19  ;;  %p9120_p13 = scmp.lt.u32.totalorder %s9118_s3, %s9114_s18 }
  0xd2   : > { %p9116_p5 = pnand %p9115_p12, %p11797_p7  ;;  %p9122_p1 = scmp.lt.u32.totalorder %s9114_s18, %s10355_s20 }
  0xd3   : > { %p9121_p0 = por %p9120_p13, %p9119_p11 }
  0xd4   : > { %p9117_p9 = pneg %p9116_p5 }
  0xd5   : > { %p9123_p2 = por %p9122_p1, %p9121_p0 }
  0xd7   : > { %p9124_p6 = pnand %p9123_p2, %p9117_p9 }
  0xd9   : > { %9127 = shalt.err (!%p9124_p6)
}
  0xda   : > { %s9128_s13 = scalar_lea.vmem %s1344_s1, 16  ;;  %s9944_s15 = smov [#allocation8]  }
  0xdb   : > { %p9129_p10 = scmp.ne.s32.totalorder %s1344_s1, %s9128_s13  ;;  %s9132_s16 = sshll.u32 %s9944_s15, 4  ;;  %s9133_s16 = int_to_ptr.vmem [resolvable:$false] %s9132_s16 }
  0xdc   : > { %s9134_s0 = scalar_lea.vmem %s9133_s16, 32  ;;  %p9135_p4 = scmp.lt.s32.totalorder %s1344_s1, %s9133_s16 }
  0xdd   : > { %p9130_p3 = pnand %p9129_p10, %p11797_p7  ;;  %p9136_p12 = scmp.lt.s32.totalorder %s9134_s0, %s9128_s13 }
  0xdf   : > { %p9131_p8 = pneg %p9130_p3  ;;  %p9137_p5 = por %p9136_p12, %p9135_p4 }
  0xe1   : > { %p9138_p11 = pnand %p9137_p5, %p9131_p8 }
  0xe3   : > { %9141 = shalt.err (!%p9138_p11)
}
  0xe4   : > { %8765 = dma.hbm_to_vmem [thread:$0]  (%p11797_p7), %s10355_s20, 16, %s1344_s1, %s11681_s10  }
  0xe5   : > { %s10376_s3 = scalar_lea.hbm %s11770_s6, %s10327_s2  ;;  %s1378_s18 = scalar_lea.vmem [#allocation11], %s10324_s29 }
  0xe6   : > { %s1385_s13 = sshll.u32 %s1378_s18, 4  ;;  %s11682_s15 = scalar_lea.sflag [#allocation12], %s10330_s24  ;;  %s1386_s13 = int_to_ptr.vmem [resolvable:$true] %s1385_s13 }
  0xe7   : > { %s9142_s16 = scalar_lea.hbm %s10376_s3, 16  ;;  %s9146_s0 = scalar_lea.hbm %s11770_s6, 80 }
  0xe8   : > { %p9143_p9 = scmp.ne.s32.totalorder %s10376_s3, %s9142_s16  ;;  %p9147_p1 = scmp.lt.u32.totalorder %s10376_s3, %s11770_s6 }
  0xe9   : > { %p9148_p2 = scmp.lt.u32.totalorder %s9146_s0, %s9142_s16  ;;  %p9150_p10 = scmp.lt.u32.totalorder %s9142_s16, %s10376_s3 }
  0xea   : > { %p9144_p13 = pnand %p9143_p9, %p11797_p7 }
  0xeb   : > { %p9149_p6 = por %p9148_p2, %p9147_p1 }
  0xec   : > { %p9145_p0 = pneg %p9144_p13 }
  0xed   : > { %p9151_p3 = por %p9150_p10, %p9149_p6 }
  0xef   : > { %p9152_p8 = pnand %p9151_p3, %p9145_p0 }
  0xf1   : > { %9155 = shalt.err (!%p9152_p8)
}
  0xf2   : > { %s9156_s20 = scalar_lea.vmem %s1386_s13, 16  ;;  %s9945_s1 = smov [#allocation11]  }
  0xf3   : > { %p9157_p4 = scmp.ne.s32.totalorder %s1386_s13, %s9156_s20  ;;  %s9160_s18 = sshll.u32 %s9945_s1, 4  ;;  %s9161_s18 = int_to_ptr.vmem [resolvable:$false] %s9160_s18 }
  0xf4   : > { %s9162_s10 = scalar_lea.vmem %s9161_s18, 32  ;;  %p9163_p11 = scmp.lt.s32.totalorder %s1386_s13, %s9161_s18 }
  0xf5   : > { %p9158_p12 = pnand %p9157_p4, %p11797_p7  ;;  %p9164_p9 = scmp.lt.s32.totalorder %s9162_s10, %s9156_s20 }
  0xf7   : > { %p9159_p5 = pneg %p9158_p12  ;;  %p9165_p13 = por %p9164_p9, %p9163_p11 }
  0xf9   : > { %p9166_p1 = pnand %p9165_p13, %p9159_p5 }
  0xfb   : > { %9169 = shalt.err (!%p9166_p1)
}
  0xfc   : > { %8767 = dma.hbm_to_vmem [thread:$0]  (%p11797_p7), %s10376_s3, 16, %s1386_s13, %s11682_s15  }
  0xfd   : > { %s10397_s16 = scalar_lea.hbm %s11762_s27, %s10327_s2  ;;  %s1420_s10 = scalar_lea.vmem [#allocation14], %s10324_s29 }
  0xfe   : > { %s1427_s0 = sshll.u32 %s1420_s10, 4  ;;  %s11683_s20 = scalar_lea.sflag [#allocation15], %s10330_s24  ;;  %s1428_s0 = int_to_ptr.vmem [resolvable:$true] %s1427_s0 }
  0xff   : > { %s9170_s1 = scalar_lea.hbm %s10397_s16, 16  ;;  %s9174_s18 = scalar_lea.hbm %s11762_s27, 80 }
 0x100   : > { %p9171_p0 = scmp.ne.s32.totalorder %s10397_s16, %s9170_s1  ;;  %p9175_p10 = scmp.lt.u32.totalorder %s10397_s16, %s11762_s27 }
 0x101   : > { %p9176_p3 = scmp.lt.u32.totalorder %s9174_s18, %s9170_s1  ;;  %p9178_p4 = scmp.lt.u32.totalorder %s9170_s1, %s10397_s16 }
 0x102   : > { %p9172_p2 = pnand %p9171_p0, %p11797_p7 }
 0x103   : > { %p9177_p8 = por %p9176_p3, %p9175_p10 }
 0x104   : > { %p9173_p6 = pneg %p9172_p2 }
 0x105   : > { %p9179_p12 = por %p9178_p4, %p9177_p8 }
 0x107   : > { %p9180_p5 = pnand %p9179_p12, %p9173_p6 }
 0x109   : > { %9183 = shalt.err (!%p9180_p5)
}
 0x10a   : > { %s9184_s3 = scalar_lea.vmem %s1428_s0, 16  ;;  %s9946_s13 = smov [#allocation14]  }
 0x10b   : > { %p9185_p11 = scmp.ne.s32.totalorder %s1428_s0, %s9184_s3  ;;  %s9188_s10 = sshll.u32 %s9946_s13, 4  ;;  %s9189_s10 = int_to_ptr.vmem [resolvable:$false] %s9188_s10 }
 0x10c   : > { %s9190_s15 = scalar_lea.vmem %s9189_s10, 32  ;;  %p9191_p1 = scmp.lt.s32.totalorder %s1428_s0, %s9189_s10 }
 0x10d   : > { %p9186_p9 = pnand %p9185_p11, %p11797_p7  ;;  %p9192_p0 = scmp.lt.s32.totalorder %s9190_s15, %s9184_s3 }
 0x10f   : > { %p9187_p13 = pneg %p9186_p9  ;;  %p9193_p2 = por %p9192_p0, %p9191_p1 }
 0x111   : > { %p9194_p3 = pnand %p9193_p2, %p9187_p13 }
 0x113   : > { %9197 = shalt.err (!%p9194_p3)
}
 0x114   : > { %8769 = dma.hbm_to_vmem [thread:$0]  (%p11797_p7), %s10397_s16, 16, %s1428_s0, %s11683_s20  }
 0x115   : > { %s10418_s1 = scalar_lea.hbm %s11761_s30, %s10327_s2  ;;  %s1462_s15 = scalar_lea.vmem [#allocation17], %s10324_s29 }
 0x116   : > { %s1469_s18 = sshll.u32 %s1462_s15, 4  ;;  %s11684_s3 = scalar_lea.sflag [#allocation18], %s10330_s24  ;;  %s1470_s18 = int_to_ptr.vmem [resolvable:$true] %s1469_s18 }
 0x117   : > { %s9198_s13 = scalar_lea.hbm %s10418_s1, 16  ;;  %s9202_s10 = scalar_lea.hbm %s11761_s30, 80 }
 0x118   : > { %p9199_p6 = scmp.ne.s32.totalorder %s10418_s1, %s9198_s13  ;;  %p9203_p4 = scmp.lt.u32.totalorder %s10418_s1, %s11761_s30 }
 0x119   : > { %p9204_p12 = scmp.lt.u32.totalorder %s9202_s10, %s9198_s13  ;;  %p9206_p11 = scmp.lt.u32.totalorder %s9198_s13, %s10418_s1 }
 0x11a   : > { %p9200_p10 = pnand %p9199_p6, %p11797_p7 }
 0x11b   : > { %p9205_p5 = por %p9204_p12, %p9203_p4 }
 0x11c   : > { %p9201_p8 = pneg %p9200_p10 }
 0x11d   : > { %p9207_p9 = por %p9206_p11, %p9205_p5 }
 0x11f   : > { %p9208_p13 = pnand %p9207_p9, %p9201_p8 }
 0x121   : > { %9211 = shalt.err (!%p9208_p13)
}
 0x122   : > { %s9212_s16 = scalar_lea.vmem %s1470_s18, 16  ;;  %s9947_s0 = smov [#allocation17]  }
 0x123   : > { %p9213_p1 = scmp.ne.s32.totalorder %s1470_s18, %s9212_s16  ;;  %s9216_s15 = sshll.u32 %s9947_s0, 4  ;;  %s9217_s15 = int_to_ptr.vmem [resolvable:$false] %s9216_s15 }
 0x124   : > { %s9218_s20 = scalar_lea.vmem %s9217_s15, 32  ;;  %p9219_p3 = scmp.lt.s32.totalorder %s1470_s18, %s9217_s15 }
 0x125   : > { %p9214_p0 = pnand %p9213_p1, %p11797_p7  ;;  %p9220_p6 = scmp.lt.s32.totalorder %s9218_s20, %s9212_s16 }
 0x127   : > { %p9215_p2 = pneg %p9214_p0  ;;  %p9221_p10 = por %p9220_p6, %p9219_p3 }
 0x129   : > { %p9222_p4 = pnand %p9221_p10, %p9215_p2 }
 0x12b   : > { %9225 = shalt.err (!%p9222_p4)
}
 0x12c   : > { %8771 = dma.hbm_to_vmem [thread:$0]  (%p11797_p7), %s10418_s1, 16, %s1470_s18, %s11684_s3  }
 0x12d   : > { %s10439_s13 = scalar_lea.hbm %s11767_s12, %s10327_s2  ;;  %s1504_s20 = scalar_lea.vmem [#allocation20], %s10324_s29 }
 0x12e   : > { %s1511_s10 = sshll.u32 %s1504_s20, 4  ;;  %s11685_s16 = scalar_lea.sflag [#allocation21], %s10330_s24  ;;  %s1512_s10 = int_to_ptr.vmem [resolvable:$true] %s1511_s10 }
 0x12f   : > { %s9226_s0 = scalar_lea.hbm %s10439_s13, 16  ;;  %s9230_s15 = scalar_lea.hbm %s11767_s12, 80 }
 0x130   : > { %p9227_p8 = scmp.ne.s32.totalorder %s10439_s13, %s9226_s0  ;;  %p9231_p11 = scmp.lt.u32.totalorder %s10439_s13, %s11767_s12 }
 0x131   : > { %p9232_p9 = scmp.lt.u32.totalorder %s9230_s15, %s9226_s0  ;;  %p9234_p1 = scmp.lt.u32.totalorder %s9226_s0, %s10439_s13 }
 0x132   : > { %p9228_p12 = pnand %p9227_p8, %p11797_p7 }
 0x133   : > { %p9233_p13 = por %p9232_p9, %p9231_p11 }
 0x134   : > { %p9229_p5 = pneg %p9228_p12 }
 0x135   : > { %p9235_p0 = por %p9234_p1, %p9233_p13 }
 0x137   : > { %p9236_p2 = pnand %p9235_p0, %p9229_p5 }
 0x139   : > { %9239 = shalt.err (!%p9236_p2)
}
 0x13a   : > { %s9240_s1 = scalar_lea.vmem %s1512_s10, 16  ;;  %s9948_s18 = smov [#allocation20]  }
 0x13b   : > { %p9241_p3 = scmp.ne.s32.totalorder %s1512_s10, %s9240_s1  ;;  %s9244_s20 = sshll.u32 %s9948_s18, 4  ;;  %s9245_s20 = int_to_ptr.vmem [resolvable:$false] %s9244_s20 }
 0x13c   : > { %s9246_s3 = scalar_lea.vmem %s9245_s20, 32  ;;  %p9247_p4 = scmp.lt.s32.totalorder %s1512_s10, %s9245_s20 }
 0x13d   : > { %p9242_p6 = pnand %p9241_p3, %p11797_p7  ;;  %p9248_p8 = scmp.lt.s32.totalorder %s9246_s3, %s9240_s1 }
 0x13f   : > { %p9243_p10 = pneg %p9242_p6  ;;  %p9249_p12 = por %p9248_p8, %p9247_p4 }
 0x141   : > { %p9250_p9 = pnand %p9249_p12, %p9243_p10 }
 0x143   : > { %9253 = shalt.err (!%p9250_p9)
}
 0x144   : > { %8773 = dma.hbm_to_vmem [thread:$0]  (%p11797_p7), %s10439_s13, 16, %s1512_s10, %s11685_s16  }
 0x145   : > { %s10460_s0 = scalar_lea.hbm %s11765_s17, %s10327_s2  ;;  %s1546_s3 = scalar_lea.vmem [#allocation23], %s10324_s29 }
 0x146   : > { %s1553_s15 = sshll.u32 %s1546_s3, 4  ;;  %s11686_s1 = scalar_lea.sflag [#allocation24], %s10330_s24  ;;  %s1554_s15 = int_to_ptr.vmem [resolvable:$true] %s1553_s15 }
 0x147   : > { %s9254_s18 = scalar_lea.hbm %s10460_s0, 16  ;;  %s9258_s20 = scalar_lea.hbm %s11765_s17, 80 }
 0x148   : > { %p9255_p5 = scmp.ne.s32.totalorder %s10460_s0, %s9254_s18  ;;  %p9259_p1 = scmp.lt.u32.totalorder %s10460_s0, %s11765_s17 }
 0x149   : > { %p9260_p0 = scmp.lt.u32.totalorder %s9258_s20, %s9254_s18  ;;  %p9262_p3 = scmp.lt.u32.totalorder %s9254_s18, %s10460_s0 }
 0x14a   : > { %p9256_p11 = pnand %p9255_p5, %p11797_p7 }
 0x14b   : > { %p9261_p2 = por %p9260_p0, %p9259_p1 }
 0x14c   : > { %p9257_p13 = pneg %p9256_p11 }
 0x14d   : > { %p9263_p6 = por %p9262_p3, %p9261_p2 }
 0x14f   : > { %p9264_p10 = pnand %p9263_p6, %p9257_p13 }
 0x151   : > { %9267 = shalt.err (!%p9264_p10)
}
 0x152   : > { %s9268_s13 = scalar_lea.vmem %s1554_s15, 16  ;;  %s9949_s10 = smov [#allocation23]  }
 0x153   : > { %p9269_p4 = scmp.ne.s32.totalorder %s1554_s15, %s9268_s13  ;;  %s9272_s3 = sshll.u32 %s9949_s10, 4  ;;  %s9273_s3 = int_to_ptr.vmem [resolvable:$false] %s9272_s3 }
 0x154   : > { %s9274_s16 = scalar_lea.vmem %s9273_s3, 32  ;;  %p9275_p9 = scmp.lt.s32.totalorder %s1554_s15, %s9273_s3 }
 0x155   : > { %p9270_p8 = pnand %p9269_p4, %p11797_p7  ;;  %p9276_p5 = scmp.lt.s32.totalorder %s9274_s16, %s9268_s13 }
 0x157   : > { %p9271_p12 = pneg %p9270_p8  ;;  %p9277_p11 = por %p9276_p5, %p9275_p9 }
 0x159   : > { %p9278_p0 = pnand %p9277_p11, %p9271_p12 }
 0x15b   : > { %9281 = shalt.err (!%p9278_p0)
}
 0x15c   : > { %8775 = dma.hbm_to_vmem [thread:$0]  (%p11797_p7), %s10460_s0, 16, %s1554_s15, %s11686_s1  }
 0x15d   : > { %s10481_s18 = scalar_lea.hbm %s11769_s8, %s10327_s2  ;;  %s1588_s16 = scalar_lea.vmem [#allocation26], %s10324_s29 }
 0x15e   : > { %s1595_s20 = sshll.u32 %s1588_s16, 4  ;;  %s11687_s13 = scalar_lea.sflag [#allocation27], %s10330_s24  ;;  %s1596_s20 = int_to_ptr.vmem [resolvable:$true] %s1595_s20 }
 0x15f   : > { %s9282_s10 = scalar_lea.hbm %s10481_s18, 16  ;;  %s9286_s3 = scalar_lea.hbm %s11769_s8, 80 }
 0x160   : > { %p9283_p13 = scmp.ne.s32.totalorder %s10481_s18, %s9282_s10  ;;  %p9287_p3 = scmp.lt.u32.totalorder %s10481_s18, %s11769_s8 }
 0x161   : > { %p9288_p6 = scmp.lt.u32.totalorder %s9286_s3, %s9282_s10  ;;  %p9290_p4 = scmp.lt.u32.totalorder %s9282_s10, %s10481_s18 }
 0x162   : > { %p9284_p1 = pnand %p9283_p13, %p11797_p7 }
 0x163   : > { %p9289_p10 = por %p9288_p6, %p9287_p3 }
 0x164   : > { %p9285_p2 = pneg %p9284_p1 }
 0x165   : > { %p9291_p8 = por %p9290_p4, %p9289_p10 }
 0x167   : > { %p9292_p12 = pnand %p9291_p8, %p9285_p2 }
 0x169   : > { %9295 = shalt.err (!%p9292_p12)
}
 0x16a   : > { %s9296_s0 = scalar_lea.vmem %s1596_s20, 16  ;;  %s9950_s15 = smov [#allocation26]  }
 0x16b   : > { %p9297_p9 = scmp.ne.s32.totalorder %s1596_s20, %s9296_s0  ;;  %s9300_s16 = sshll.u32 %s9950_s15, 4  ;;  %s9301_s16 = int_to_ptr.vmem [resolvable:$false] %s9300_s16 }
 0x16c   : > { %s9302_s1 = scalar_lea.vmem %s9301_s16, 32  ;;  %p9303_p0 = scmp.lt.s32.totalorder %s1596_s20, %s9301_s16 }
 0x16d   : > { %p9298_p5 = pnand %p9297_p9, %p11797_p7  ;;  %p9304_p13 = scmp.lt.s32.totalorder %s9302_s1, %s9296_s0 }
 0x16f   : > { %p9299_p11 = pneg %p9298_p5  ;;  %p9305_p1 = por %p9304_p13, %p9303_p0 }
 0x171   : > { %p9306_p3 = pnand %p9305_p1, %p9299_p11 }
 0x173   : > { %9309 = shalt.err (!%p9306_p3)
}
 0x174   : > { %8777 = dma.hbm_to_vmem [thread:$0]  (%p11797_p7), %s10481_s18, 16, %s1596_s20, %s11687_s13  }
 0x175   : > { %s10502_s10 = scalar_lea.hbm %s11771_s5, %s10327_s2  ;;  %s1630_s1 = scalar_lea.vmem [#allocation29], %s10324_s29 }
 0x176   : > { %s1637_s3 = sshll.u32 %s1630_s1, 4  ;;  %s11688_s0 = scalar_lea.sflag [#allocation30], %s10330_s24  ;;  %s1638_s3 = int_to_ptr.vmem [resolvable:$true] %s1637_s3 }
 0x177   : > { %s9310_s15 = scalar_lea.hbm %s10502_s10, 16  ;;  %s9314_s16 = scalar_lea.hbm %s11771_s5, 80 }
 0x178   : > { %p9311_p2 = scmp.ne.s32.totalorder %s10502_s10, %s9310_s15  ;;  %p9315_p4 = scmp.lt.u32.totalorder %s10502_s10, %s11771_s5 }
 0x179   : > { %p9316_p8 = scmp.lt.u32.totalorder %s9314_s16, %s9310_s15  ;;  %p9318_p9 = scmp.lt.u32.totalorder %s9310_s15, %s10502_s10 }
 0x17a   : > { %p9312_p6 = pnand %p9311_p2, %p11797_p7 }
 0x17b   : > { %p9317_p12 = por %p9316_p8, %p9315_p4 }
 0x17c   : > { %p9313_p10 = pneg %p9312_p6 }
 0x17d   : > { %p9319_p5 = por %p9318_p9, %p9317_p12 }
 0x17f   : > { %p9320_p11 = pnand %p9319_p5, %p9313_p10 }
 0x181   : > { %9323 = shalt.err (!%p9320_p11)
}
 0x182   : > { %s9324_s18 = scalar_lea.vmem %s1638_s3, 16  ;;  %s9951_s20 = smov [#allocation29]  }
 0x183   : > { %p9325_p0 = scmp.ne.s32.totalorder %s1638_s3, %s9324_s18  ;;  %s9328_s1 = sshll.u32 %s9951_s20, 4  ;;  %s9329_s1 = int_to_ptr.vmem [resolvable:$false] %s9328_s1 }
 0x184   : > { %s9330_s13 = scalar_lea.vmem %s9329_s1, 32  ;;  %p9331_p3 = scmp.lt.s32.totalorder %s1638_s3, %s9329_s1 }
 0x185   : > { %p9326_p13 = pnand %p9325_p0, %p11797_p7  ;;  %p9332_p2 = scmp.lt.s32.totalorder %s9330_s13, %s9324_s18 }
 0x187   : > { %p9327_p1 = pneg %p9326_p13  ;;  %p9333_p6 = por %p9332_p2, %p9331_p3 }
 0x189   : > { %p9334_p4 = pnand %p9333_p6, %p9327_p1 }
 0x18b   : > { %9337 = shalt.err (!%p9334_p4)
}
 0x18c   : > { %8779 = dma.hbm_to_vmem [thread:$0]  (%p11797_p7), %s10502_s10, 16, %s1638_s3, %s11688_s0  }
 0x18d   : > { %s10523_s15 = scalar_lea.hbm %s11768_s9, %s10327_s2  ;;  %s1672_s13 = scalar_lea.vmem [#allocation32], %s10324_s29 }
 0x18e   : > { %s1679_s16 = sshll.u32 %s1672_s13, 4  ;;  %s11690_s18 = scalar_lea.sflag [#allocation33], %s10330_s24  ;;  %s1680_s16 = int_to_ptr.vmem [resolvable:$true] %s1679_s16 }
 0x18f   : > { %s9338_s20 = scalar_lea.hbm %s10523_s15, 16  ;;  %s9342_s1 = scalar_lea.hbm %s11768_s9, 80 }
 0x190   : > { %p9339_p10 = scmp.ne.s32.totalorder %s10523_s15, %s9338_s20  ;;  %p9343_p9 = scmp.lt.u32.totalorder %s10523_s15, %s11768_s9 }
 0x191   : > { %p9344_p5 = scmp.lt.u32.totalorder %s9342_s1, %s9338_s20  ;;  %p9346_p0 = scmp.lt.u32.totalorder %s9338_s20, %s10523_s15 }
 0x192   : > { %p9340_p8 = pnand %p9339_p10, %p11797_p7 }
 0x193   : > { %p9345_p11 = por %p9344_p5, %p9343_p9 }
 0x194   : > { %p9341_p12 = pneg %p9340_p8 }
 0x195   : > { %p9347_p13 = por %p9346_p0, %p9345_p11 }
 0x197   : > { %p9348_p1 = pnand %p9347_p13, %p9341_p12 }
 0x199   : > { %9351 = shalt.err (!%p9348_p1)
}
 0x19a   : > { %s9352_s10 = scalar_lea.vmem %s1680_s16, 16  ;;  %s9952_s3 = smov [#allocation32]  }
 0x19b   : > { %p9353_p3 = scmp.ne.s32.totalorder %s1680_s16, %s9352_s10  ;;  %s9356_s13 = sshll.u32 %s9952_s3, 4  ;;  %s9357_s13 = int_to_ptr.vmem [resolvable:$false] %s9356_s13 }
 0x19c   : > { %s9358_s0 = scalar_lea.vmem %s9357_s13, 32  ;;  %p9359_p4 = scmp.lt.s32.totalorder %s1680_s16, %s9357_s13 }
 0x19d   : > { %p9354_p2 = pnand %p9353_p3, %p11797_p7  ;;  %p9360_p10 = scmp.lt.s32.totalorder %s9358_s0, %s9352_s10 }
 0x19f   : > { %p9355_p6 = pneg %p9354_p2  ;;  %p9361_p8 = por %p9360_p10, %p9359_p4 }
 0x1a1   : > { %p9362_p5 = pnand %p9361_p8, %p9355_p6 }
 0x1a3   : > { %9365 = shalt.err (!%p9362_p5)
}
 0x1a4   : > { %8781 = dma.hbm_to_vmem [thread:$0]  (%p11797_p7), %s10523_s15, 16, %s1680_s16, %s11690_s18  }
 0x1a5   : > { %s10544_s20 = scalar_lea.hbm %s11763_s25, %s10327_s2  ;;  %s1269_s0 = scalar_lea.vmem [#allocation2], %s10324_s29 }
 0x1a6   : > { %s1276_s1 = sshll.u32 %s1269_s0, 4  ;;  %s10551_s10 = scalar_lea.hbm %s11766_s14, %s10327_s2  ;;  %s10547_s1 = int_to_ptr.vmem [resolvable:$true] %s1276_s1 }
 0x1a7   : > { %s1267_s3 = scalar_lea.sflag [#allocation3], %s10324_s29  ;;  %s9366_s13 = scalar_lea.hbm %s10544_s20, 16 }
 0x1a8   : > { %p9367_p12 = scmp.ne.s32.totalorder %s10544_s20, %s9366_s13  ;;  %s9370_s5 = scalar_lea.hbm %s11763_s25, 80 }
 0x1a9   : > { %p9371_p0 = scmp.lt.u32.totalorder %s10544_s20, %s11763_s25  ;;  %p9372_p13 = scmp.lt.u32.totalorder %s9370_s5, %s9366_s13 }
 0x1aa   : > { %p9368_p9 = pnand %p9367_p12, %p11797_p7  ;;  %p9374_p3 = scmp.lt.u32.totalorder %s9366_s13, %s10544_s20 }
 0x1ab   : > { %p9373_p1 = por %p9372_p13, %p9371_p0 }
 0x1ac   : > { %p9369_p11 = pneg %p9368_p9 }
 0x1ad   : > { %p9375_p2 = por %p9374_p3, %p9373_p1 }
 0x1af   : > { %p9376_p6 = pnand %p9375_p2, %p9369_p11 }
 0x1b1   : > { %9379 = shalt.err (!%p9376_p6)
}
 0x1b2   : > { %s9380_s15 = scalar_lea.vmem %s10547_s1, 16  ;;  %s9953_s16 = smov [#allocation2]  }
 0x1b3   : > { %p9381_p4 = scmp.ne.s32.totalorder %s10547_s1, %s9380_s15  ;;  %s9384_s0 = sshll.u32 %s9953_s16, 4  ;;  %s9385_s0 = int_to_ptr.vmem [resolvable:$false] %s9384_s0 }
 0x1b4   : > { %s9386_s18 = scalar_lea.vmem %s9385_s0, 32  ;;  %p9387_p5 = scmp.lt.s32.totalorder %s10547_s1, %s9385_s0 }
 0x1b5   : > { %p9382_p10 = pnand %p9381_p4, %p11797_p7  ;;  %p9388_p12 = scmp.lt.s32.totalorder %s9386_s18, %s9380_s15 }
 0x1b7   : > { %p9383_p8 = pneg %p9382_p10  ;;  %p9389_p9 = por %p9388_p12, %p9387_p5 }
 0x1b9   : > { %p9390_p0 = pnand %p9389_p9, %p9383_p8 }
 0x1bb   : > { %9393 = shalt.err (!%p9390_p0)
}
 0x1bc   : > { %s11799_s5 = sld [smem:[#allocation66_spill]]  ;;  %s1319_s13 = scalar_lea.vmem [#allocation7], %s10324_s29 }
 0x1bd   : > { %8762 = dma.hbm_to_vmem [thread:$0]  (%p11797_p7), %s10544_s20, 16, %s10547_s1, %s1267_s3  }
 0x1be   : > { %s1326_s18 = sshll.u32 %s1319_s13, 4  ;;  %s9394_s16 = scalar_lea.hbm %s10551_s10, 16  ;;  %s1327_s18 = int_to_ptr.vmem [resolvable:$true] %s1326_s18 }
 0x1bf   : > { %p9395_p11 = scmp.ne.s32.totalorder %s10551_s10, %s9394_s16  ;;  %s9398_s0 = scalar_lea.hbm %s11766_s14, 80 }
 0x1c0   : > { %p9399_p3 = scmp.lt.u32.totalorder %s10551_s10, %s11766_s14  ;;  %p9400_p2 = scmp.lt.u32.totalorder %s9398_s0, %s9394_s16 }
 0x1c1   : > { %p9396_p13 = pnand %p9395_p11, %p11797_p7  ;;  %p9402_p4 = scmp.lt.u32.totalorder %s9394_s16, %s10551_s10 }
 0x1c2   : > { %s10574_s15 = scalar_lea.hbm %s11799_s5, %s10327_s2  ;;  %p9401_p6 = por %p9400_p2, %p9399_p3 }
 0x1c3   : > { %p9397_p1 = pneg %p9396_p13 }
 0x1c4   : > { %p9403_p10 = por %p9402_p4, %p9401_p6 }
 0x1c6   : > { %p9404_p8 = pnand %p9403_p10, %p9397_p1 }
 0x1c8   : > { %9407 = shalt.err (!%p9404_p8)
}
 0x1c9   : > { %s9408_s6 = scalar_lea.vmem %s1327_s18, 16  ;;  %s9954_s20 = smov [#allocation7]  }
 0x1ca   : > { %p9409_p5 = scmp.ne.s32.totalorder %s1327_s18, %s9408_s6  ;;  %s9412_s1 = sshll.u32 %s9954_s20, 4  ;;  %s9413_s1 = int_to_ptr.vmem [resolvable:$false] %s9412_s1 }
 0x1cb   : > { %s9414_s3 = scalar_lea.vmem %s9413_s1, 32  ;;  %p9415_p0 = scmp.lt.s32.totalorder %s1327_s18, %s9413_s1 }
 0x1cc   : > { %p9410_p12 = pnand %p9409_p5, %p11797_p7  ;;  %p9416_p11 = scmp.lt.s32.totalorder %s9414_s3, %s9408_s6 }
 0x1ce   : > { %p9411_p9 = pneg %p9410_p12  ;;  %p9417_p13 = por %p9416_p11, %p9415_p0 }
 0x1d0   : > { %p9418_p2 = pnand %p9417_p13, %p9411_p9 }
 0x1d2   : > { %9421 = shalt.err (!%p9418_p2)
}
 0x1d3   : > { %s11800_s13 = scalar_lea.sflag [#allocation6], %s10330_s24  ;;  %s11801_s16 = sld [smem:[#allocation70_spill]] }
 0x1d4   : > { %8764 = dma.hbm_to_vmem [thread:$0]  (%p11797_p7), %s10551_s10, 16, %s1327_s18, %s11800_s13  }
 0x1d5   : > { %s1353_s6 = scalar_lea.vmem [#allocation10], %s10324_s29  ;;  %s9422_s1 = scalar_lea.hbm %s10574_s15, 16 }
 0x1d6   : > { %s1360_s0 = sshll.u32 %s1353_s6, 4  ;;  %p9423_p1 = scmp.ne.s32.totalorder %s10574_s15, %s9422_s1  ;;  %s1361_s0 = int_to_ptr.vmem [resolvable:$true] %s1360_s0 }
 0x1d7   : > { %s9426_s3 = scalar_lea.hbm %s11799_s5, 80  ;;  %p9427_p4 = scmp.lt.u32.totalorder %s10574_s15, %s11799_s5 }
 0x1d8   : > { %p9424_p3 = pnand %p9423_p1, %p11797_p7  ;;  %p9428_p10 = scmp.lt.u32.totalorder %s9426_s3, %s9422_s1 }
 0x1d9   : > { %s11802_s8 = smov %s11801_s16  ;;  %s10594_s20 = scalar_lea.hbm %s11801_s16, %s10327_s2 }
 0x1da   : > { %p9425_p6 = pneg %p9424_p3  ;;  %p9429_p8 = por %p9428_p10, %p9427_p4 }
 0x1db   : > { %p9430_p5 = scmp.lt.u32.totalorder %s9422_s1, %s10574_s15 }
 0x1dd   : > { %p9431_p12 = por %p9430_p5, %p9429_p8 }
 0x1df   : > { %p9432_p9 = pnand %p9431_p12, %p9425_p6 }
 0x1e1   : > { %9435 = shalt.err (!%p9432_p9)
}
 0x1e2   : > { %s9436_s9 = scalar_lea.vmem %s1361_s0, 16  ;;  %s9955_s10 = smov [#allocation10]  }
 0x1e3   : > { %p9437_p0 = scmp.ne.s32.totalorder %s1361_s0, %s9436_s9  ;;  %s9440_s18 = sshll.u32 %s9955_s10, 4  ;;  %s9441_s18 = int_to_ptr.vmem [resolvable:$false] %s9440_s18 }
 0x1e4   : > { %s9442_s13 = scalar_lea.vmem %s9441_s18, 32  ;;  %p9443_p2 = scmp.lt.s32.totalorder %s1361_s0, %s9441_s18 }
 0x1e5   : > { %p9438_p11 = pnand %p9437_p0, %p11797_p7  ;;  %p9444_p1 = scmp.lt.s32.totalorder %s9442_s13, %s9436_s9 }
 0x1e7   : > { %p9439_p13 = pneg %p9438_p11  ;;  %p9445_p3 = por %p9444_p1, %p9443_p2 }
 0x1e9   : > { %p9446_p4 = pnand %p9445_p3, %p9439_p13 }
 0x1eb   : > { %9449 = shalt.err (!%p9446_p4)
}
 0x1ec   : > { %s11803_s16 = scalar_lea.sflag [#allocation9], %s10330_s24  ;;  %s11804_s6 = sld [smem:[#allocation72_spill]] }
 0x1ed   : > { %8766 = dma.hbm_to_vmem [thread:$0]  (%p11797_p7), %s10574_s15, 16, %s1361_s0, %s11803_s16  }
 0x1ee   : > { %s1403_s9 = scalar_lea.vmem [#allocation13], %s10324_s29  ;;  %s9450_s10 = scalar_lea.hbm %s10594_s20, 16 }
 0x1ef   : > { %s1410_s1 = sshll.u32 %s1403_s9, 4  ;;  %p9451_p6 = scmp.ne.s32.totalorder %s10594_s20, %s9450_s10  ;;  %s1411_s1 = int_to_ptr.vmem [resolvable:$true] %s1410_s1 }
 0x1f0   : > { %s9454_s18 = scalar_lea.hbm %s11802_s8, 80  ;;  %p9455_p5 = scmp.lt.u32.totalorder %s10594_s20, %s11802_s8 }
 0x1f1   : > { %p9452_p10 = pnand %p9451_p6, %p11797_p7  ;;  %p9456_p12 = scmp.lt.u32.totalorder %s9454_s18, %s9450_s10 }
 0x1f2   : > { %s10614_s3 = scalar_lea.hbm %s11804_s6, %s10327_s2  ;;  %p9458_p0 = scmp.lt.u32.totalorder %s9450_s10, %s10594_s20 }
 0x1f3   : > { %p9453_p8 = pneg %p9452_p10  ;;  %p9457_p9 = por %p9456_p12, %p9455_p5 }
 0x1f5   : > { %p9459_p11 = por %p9458_p0, %p9457_p9 }
 0x1f7   : > { %p9460_p13 = pnand %p9459_p11, %p9453_p8 }
 0x1f9   : > { %9463 = shalt.err (!%p9460_p13)
}
 0x1fa   : > { %s9464_s13 = scalar_lea.vmem %s1411_s1, 16  ;;  %s9956_s15 = smov [#allocation13]  }
 0x1fb   : > { %p9465_p2 = scmp.ne.s32.totalorder %s1411_s1, %s9464_s13  ;;  %s9468_s0 = sshll.u32 %s9956_s15, 4  ;;  %s9469_s0 = int_to_ptr.vmem [resolvable:$false] %s9468_s0 }
 0x1fc   : > { %s9470_s16 = scalar_lea.vmem %s9469_s0, 32  ;;  %p9471_p4 = scmp.lt.s32.totalorder %s1411_s1, %s9469_s0 }
 0x1fd   : > { %p9466_p1 = pnand %p9465_p2, %p11797_p7  ;;  %p9472_p6 = scmp.lt.s32.totalorder %s9470_s16, %s9464_s13 }
 0x1ff   : > { %p9467_p3 = pneg %p9466_p1  ;;  %p9473_p10 = por %p9472_p6, %p9471_p4 }
 0x201   : > { %p9474_p5 = pnand %p9473_p10, %p9467_p3 }
 0x203   : > { %9477 = shalt.err (!%p9474_p5)
}
 0x204   : > { %s11805_s9 = scalar_lea.sflag [#allocation12], %s10330_s24  ;;  %s11806_s10 = sld [smem:[#allocation76_spill]] }
 0x205   : > { %8768 = dma.hbm_to_vmem [thread:$0]  (%p11797_p7), %s10594_s20, 16, %s1411_s1, %s11805_s9  }
 0x206   : > { %s1437_s18 = scalar_lea.vmem [#allocation16], %s10324_s29  ;;  %s9478_s0 = scalar_lea.hbm %s10614_s3, 16 }
 0x207   : > { %s1444_s13 = sshll.u32 %s1437_s18, 4  ;;  %p9479_p8 = scmp.ne.s32.totalorder %s10614_s3, %s9478_s0  ;;  %s1445_s13 = int_to_ptr.vmem [resolvable:$true] %s1444_s13 }
 0x208   : > { %s9482_s16 = scalar_lea.hbm %s11804_s6, 80  ;;  %p9483_p0 = scmp.lt.u32.totalorder %s10614_s3, %s11804_s6 }
 0x209   : > { %p9480_p12 = pnand %p9479_p8, %p11797_p7  ;;  %p9484_p11 = scmp.lt.u32.totalorder %s9482_s16, %s9478_s0 }
 0x20a   : > { %s11807_s5 = smov %s11806_s10  ;;  %s10634_s15 = scalar_lea.hbm %s11806_s10, %s10327_s2 }
 0x20b   : > { %p9481_p9 = pneg %p9480_p12  ;;  %p9485_p13 = por %p9484_p11, %p9483_p0 }
 0x20c   : > { %p9486_p2 = scmp.lt.u32.totalorder %s9478_s0, %s10614_s3 }
 0x20e   : > { %p9487_p1 = por %p9486_p2, %p9485_p13 }
 0x210   : > { %p9488_p3 = pnand %p9487_p1, %p9481_p9 }
 0x212   : > { %9491 = shalt.err (!%p9488_p3)
}
 0x213   : > { %s9492_s8 = scalar_lea.vmem %s1445_s13, 16  ;;  %s9957_s20 = smov [#allocation16]  }
 0x214   : > { %p9493_p4 = scmp.ne.s32.totalorder %s1445_s13, %s9492_s8  ;;  %s9496_s1 = sshll.u32 %s9957_s20, 4  ;;  %s9497_s1 = int_to_ptr.vmem [resolvable:$false] %s9496_s1 }
 0x215   : > { %s9498_s9 = scalar_lea.vmem %s9497_s1, 32  ;;  %p9499_p5 = scmp.lt.s32.totalorder %s1445_s13, %s9497_s1 }
 0x216   : > { %p9494_p6 = pnand %p9493_p4, %p11797_p7  ;;  %p9500_p8 = scmp.lt.s32.totalorder %s9498_s9, %s9492_s8 }
 0x218   : > { %p9495_p10 = pneg %p9494_p6  ;;  %p9501_p12 = por %p9500_p8, %p9499_p5 }
 0x21a   : > { %p9502_p0 = pnand %p9501_p12, %p9495_p10 }
 0x21c   : > { %9505 = shalt.err (!%p9502_p0)
}
 0x21d   : > { %s11808_s10 = scalar_lea.sflag [#allocation15], %s10330_s24  ;;  %s11809_s18 = sld [smem:[#allocation78_spill]] }
 0x21e   : > { %8770 = dma.hbm_to_vmem [thread:$0]  (%p11797_p7), %s10614_s3, 16, %s1445_s13, %s11808_s10  }
 0x21f   : > { %s1487_s8 = scalar_lea.vmem [#allocation19], %s10324_s29  ;;  %s9506_s20 = scalar_lea.hbm %s10634_s15, 16 }
 0x220   : > { %s1494_s0 = sshll.u32 %s1487_s8, 4  ;;  %p9507_p9 = scmp.ne.s32.totalorder %s10634_s15, %s9506_s20  ;;  %s1495_s0 = int_to_ptr.vmem [resolvable:$true] %s1494_s0 }
 0x221   : > { %s9510_s1 = scalar_lea.hbm %s11807_s5, 80  ;;  %p9511_p2 = scmp.lt.u32.totalorder %s10634_s15, %s11807_s5 }
 0x222   : > { %p9508_p11 = pnand %p9507_p9, %p11797_p7  ;;  %p9512_p1 = scmp.lt.u32.totalorder %s9510_s1, %s9506_s20 }
 0x223   : > { %s11810_s6 = smov %s11809_s18  ;;  %s10654_s16 = scalar_lea.hbm %s11809_s18, %s10327_s2 }
 0x224   : > { %p9509_p13 = pneg %p9508_p11  ;;  %p9513_p3 = por %p9512_p1, %p9511_p2 }
 0x225   : > { %p9514_p4 = scmp.lt.u32.totalorder %s9506_s20, %s10634_s15 }
 0x227   : > { %p9515_p6 = por %p9514_p4, %p9513_p3 }
 0x229   : > { %p9516_p10 = pnand %p9515_p6, %p9509_p13 }
 0x22b   : > { %9519 = shalt.err (!%p9516_p10)
}
 0x22c   : > { %s9520_s9 = scalar_lea.vmem %s1495_s0, 16  ;;  %s9958_s3 = smov [#allocation19]  }
 0x22d   : > { %p9521_p5 = scmp.ne.s32.totalorder %s1495_s0, %s9520_s9  ;;  %s9524_s13 = sshll.u32 %s9958_s3, 4  ;;  %s9525_s13 = int_to_ptr.vmem [resolvable:$false] %s9524_s13 }
 0x22e   : > { %s9526_s10 = scalar_lea.vmem %s9525_s13, 32  ;;  %p9527_p0 = scmp.lt.s32.totalorder %s1495_s0, %s9525_s13 }
 0x22f   : > { %p9522_p8 = pnand %p9521_p5, %p11797_p7  ;;  %p9528_p9 = scmp.lt.s32.totalorder %s9526_s10, %s9520_s9 }
 0x231   : > { %p9523_p12 = pneg %p9522_p8  ;;  %p9529_p11 = por %p9528_p9, %p9527_p0 }
 0x233   : > { %p9530_p1 = pnand %p9529_p11, %p9523_p12 }
 0x235   : > { %9533 = shalt.err (!%p9530_p1)
}
 0x236   : > { %s11811_s18 = scalar_lea.sflag [#allocation18], %s10330_s24  ;;  %s11812_s8 = sld [smem:[#allocation82_spill]] }
 0x237   : > { %8772 = dma.hbm_to_vmem [thread:$0]  (%p11797_p7), %s10634_s15, 16, %s1495_s0, %s11811_s18  }
 0x238   : > { %s1521_s20 = scalar_lea.vmem [#allocation22], %s10324_s29  ;;  %s9534_s3 = scalar_lea.hbm %s10654_s16, 16 }
 0x239   : > { %s1528_s1 = sshll.u32 %s1521_s20, 4  ;;  %p9535_p13 = scmp.ne.s32.totalorder %s10654_s16, %s9534_s3  ;;  %s1529_s1 = int_to_ptr.vmem [resolvable:$true] %s1528_s1 }
 0x23a   : > { %s9538_s13 = scalar_lea.hbm %s11810_s6, 80  ;;  %p9539_p4 = scmp.lt.u32.totalorder %s10654_s16, %s11810_s6 }
 0x23b   : > { %p9536_p2 = pnand %p9535_p13, %p11797_p7  ;;  %p9540_p6 = scmp.lt.u32.totalorder %s9538_s13, %s9534_s3 }
 0x23c   : > { %s10674_s9 = scalar_lea.hbm %s11812_s8, %s10327_s2  ;;  %p9542_p5 = scmp.lt.u32.totalorder %s9534_s3, %s10654_s16 }
 0x23d   : > { %p9537_p3 = pneg %p9536_p2  ;;  %p9541_p10 = por %p9540_p6, %p9539_p4 }
 0x23f   : > { %p9543_p8 = por %p9542_p5, %p9541_p10 }
 0x241   : > { %p9544_p12 = pnand %p9543_p8, %p9537_p3 }
 0x243   : > { %9547 = shalt.err (!%p9544_p12)
}
 0x244   : > { %s9548_s10 = scalar_lea.vmem %s1529_s1, 16  ;;  %s9959_s15 = smov [#allocation22]  }
 0x245   : > { %p9549_p0 = scmp.ne.s32.totalorder %s1529_s1, %s9548_s10  ;;  %s9552_s0 = sshll.u32 %s9959_s15, 4  ;;  %s9553_s0 = int_to_ptr.vmem [resolvable:$false] %s9552_s0 }
 0x246   : > { %s9554_s18 = scalar_lea.vmem %s9553_s0, 32  ;;  %p9555_p1 = scmp.lt.s32.totalorder %s1529_s1, %s9553_s0 }
 0x247   : > { %p9550_p9 = pnand %p9549_p0, %p11797_p7  ;;  %p9556_p13 = scmp.lt.s32.totalorder %s9554_s18, %s9548_s10 }
 0x249   : > { %p9551_p11 = pneg %p9550_p9  ;;  %p9557_p2 = por %p9556_p13, %p9555_p1 }
 0x24b   : > { %p9558_p4 = pnand %p9557_p2, %p9551_p11 }
 0x24d   : > { %9561 = shalt.err (!%p9558_p4)
}
 0x24e   : > { %s11813_s20 = scalar_lea.sflag [#allocation21], %s10330_s24  ;;  %s11814_s3 = sld [smem:[#allocation84_spill]] }
 0x24f   : > { %8774 = dma.hbm_to_vmem [thread:$0]  (%p11797_p7), %s10654_s16, 16, %s1529_s1, %s11813_s20  }
 0x250   : > { %s1571_s13 = scalar_lea.vmem [#allocation25], %s10324_s29  ;;  %s9562_s0 = scalar_lea.hbm %s10674_s9, 16 }
 0x251   : > { %s1578_s10 = sshll.u32 %s1571_s13, 4  ;;  %p9563_p3 = scmp.ne.s32.totalorder %s10674_s9, %s9562_s0  ;;  %s1579_s10 = int_to_ptr.vmem [resolvable:$true] %s1578_s10 }
 0x252   : > { %s9566_s18 = scalar_lea.hbm %s11812_s8, 80  ;;  %p9567_p5 = scmp.lt.u32.totalorder %s10674_s9, %s11812_s8 }
 0x253   : > { %p9564_p6 = pnand %p9563_p3, %p11797_p7  ;;  %p9568_p8 = scmp.lt.u32.totalorder %s9566_s18, %s9562_s0 }
 0x254   : > { %s10694_s15 = scalar_lea.hbm %s11814_s3, %s10327_s2  ;;  %p9570_p0 = scmp.lt.u32.totalorder %s9562_s0, %s10674_s9 }
 0x255   : > { %p9565_p10 = pneg %p9564_p6  ;;  %p9569_p12 = por %p9568_p8, %p9567_p5 }
 0x257   : > { %p9571_p9 = por %p9570_p0, %p9569_p12 }
 0x259   : > { %p9572_p11 = pnand %p9571_p9, %p9565_p10 }
 0x25b   : > { %9575 = shalt.err (!%p9572_p11)
}
 0x25c   : > { %s9576_s5 = scalar_lea.vmem %s1579_s10, 16  ;;  %s9960_s16 = smov [#allocation25]  }
 0x25d   : > { %p9577_p1 = scmp.ne.s32.totalorder %s1579_s10, %s9576_s5  ;;  %s9580_s1 = sshll.u32 %s9960_s16, 4  ;;  %s9581_s1 = int_to_ptr.vmem [resolvable:$false] %s9580_s1 }
 0x25e   : > { %s9582_s20 = scalar_lea.vmem %s9581_s1, 32  ;;  %p9583_p4 = scmp.lt.s32.totalorder %s1579_s10, %s9581_s1 }
 0x25f   : > { %p9578_p13 = pnand %p9577_p1, %p11797_p7  ;;  %p9584_p3 = scmp.lt.s32.totalorder %s9582_s20, %s9576_s5 }
 0x261   : > { %p9579_p2 = pneg %p9578_p13  ;;  %p9585_p6 = por %p9584_p3, %p9583_p4 }
 0x263   : > { %p9586_p5 = pnand %p9585_p6, %p9579_p2 }
 0x265   : > { %9589 = shalt.err (!%p9586_p5)
}
 0x266   : > { %s11815_s13 = scalar_lea.sflag [#allocation24], %s10330_s24  ;;  %s11816_s0 = sld [smem:[#allocation88_spill]] }
 0x267   : > { %8776 = dma.hbm_to_vmem [thread:$0]  (%p11797_p7), %s10674_s9, 16, %s1579_s10, %s11815_s13  }
 0x268   : > { %s1605_s5 = scalar_lea.vmem [#allocation28], %s10324_s29  ;;  %s9590_s1 = scalar_lea.hbm %s10694_s15, 16 }
 0x269   : > { %s1612_s18 = sshll.u32 %s1605_s5, 4  ;;  %p9591_p10 = scmp.ne.s32.totalorder %s10694_s15, %s9590_s1  ;;  %s1613_s18 = int_to_ptr.vmem [resolvable:$true] %s1612_s18 }
 0x26a   : > { %s9594_s20 = scalar_lea.hbm %s11814_s3, 80  ;;  %p9595_p0 = scmp.lt.u32.totalorder %s10694_s15, %s11814_s3 }
 0x26b   : > { %p9592_p8 = pnand %p9591_p10, %p11797_p7  ;;  %p9596_p9 = scmp.lt.u32.totalorder %s9594_s20, %s9590_s1 }
 0x26c   : > { %s11817_s6 = smov %s11816_s0  ;;  %s10714_s16 = scalar_lea.hbm %s11816_s0, %s10327_s2 }
 0x26d   : > { %p9593_p12 = pneg %p9592_p8  ;;  %p9597_p11 = por %p9596_p9, %p9595_p0 }
 0x26e   : > { %p9598_p1 = scmp.lt.u32.totalorder %s9590_s1, %s10694_s15 }
 0x270   : > { %p9599_p13 = por %p9598_p1, %p9597_p11 }
 0x272   : > { %p9600_p2 = pnand %p9599_p13, %p9593_p12 }
 0x274   : > { %9603 = shalt.err (!%p9600_p2)
}
 0x275   : > { %s9604_s8 = scalar_lea.vmem %s1613_s18, 16  ;;  %s9961_s9 = smov [#allocation28]  }
 0x276   : > { %p9605_p4 = scmp.ne.s32.totalorder %s1613_s18, %s9604_s8  ;;  %s9608_s10 = sshll.u32 %s9961_s9, 4  ;;  %s9609_s10 = int_to_ptr.vmem [resolvable:$false] %s9608_s10 }
 0x277   : > { %s9610_s13 = scalar_lea.vmem %s9609_s10, 32  ;;  %p9611_p5 = scmp.lt.s32.totalorder %s1613_s18, %s9609_s10 }
 0x278   : > { %p9606_p3 = pnand %p9605_p4, %p11797_p7  ;;  %p9612_p10 = scmp.lt.s32.totalorder %s9610_s13, %s9604_s8 }
 0x27a   : > { %p9607_p6 = pneg %p9606_p3  ;;  %p9613_p8 = por %p9612_p10, %p9611_p5 }
 0x27c   : > { %p9614_p0 = pnand %p9613_p8, %p9607_p6 }
 0x27e   : > { %9617 = shalt.err (!%p9614_p0)
}
 0x27f   : > { %s11818_s0 = scalar_lea.sflag [#allocation27], %s10330_s24  ;;  %s11819_s5 = sld [smem:[#allocation90_spill]] }
 0x280   : > { %8778 = dma.hbm_to_vmem [thread:$0]  (%p11797_p7), %s10694_s15, 16, %s1613_s18, %s11818_s0  }
 0x281   : > { %s1655_s8 = scalar_lea.vmem [#allocation31], %s10324_s29  ;;  %s9618_s9 = scalar_lea.hbm %s10714_s16, 16 }
 0x282   : > { %s1662_s1 = sshll.u32 %s1655_s8, 4  ;;  %p9619_p12 = scmp.ne.s32.totalorder %s10714_s16, %s9618_s9  ;;  %s1663_s1 = int_to_ptr.vmem [resolvable:$true] %s1662_s1 }
 0x283   : > { %s9622_s10 = scalar_lea.hbm %s11817_s6, 80  ;;  %p9623_p1 = scmp.lt.u32.totalorder %s10714_s16, %s11817_s6 }
 0x284   : > { %p9620_p9 = pnand %p9619_p12, %p11797_p7  ;;  %p9624_p13 = scmp.lt.u32.totalorder %s9622_s10, %s9618_s9 }
 0x285   : > { %s10734_s20 = scalar_lea.hbm %s11819_s5, %s10327_s2  ;;  %p9626_p4 = scmp.lt.u32.totalorder %s9618_s9, %s10714_s16 }
 0x286   : > { %p9621_p11 = pneg %p9620_p9  ;;  %p9625_p2 = por %p9624_p13, %p9623_p1 }
 0x288   : > { %p9627_p3 = por %p9626_p4, %p9625_p2 }
 0x28a   : > { %p9628_p6 = pnand %p9627_p3, %p9621_p11 }
 0x28c   : > { %9631 = shalt.err (!%p9628_p6)
}
 0x28d   : > { %s9632_s13 = scalar_lea.vmem %s1663_s1, 16  ;;  %s9962_s2 = smov [#allocation31]  }
 0x28e   : > { %p9633_p5 = scmp.ne.s32.totalorder %s1663_s1, %s9632_s13  ;;  %s9636_s15 = sshll.u32 %s9962_s2, 4  ;;  %s9637_s15 = int_to_ptr.vmem [resolvable:$false] %s9636_s15 }
 0x28f   : > { %s9638_s18 = scalar_lea.vmem %s9637_s15, 32  ;;  %p9639_p0 = scmp.lt.s32.totalorder %s1663_s1, %s9637_s15 }
 0x290   : > { %p9634_p10 = pnand %p9633_p5, %p11797_p7  ;;  %p9640_p12 = scmp.lt.s32.totalorder %s9638_s18, %s9632_s13 }
 0x292   : > { %p9635_p8 = pneg %p9634_p10  ;;  %p9641_p9 = por %p9640_p12, %p9639_p0 }
 0x294   : > { %p9642_p1 = pnand %p9641_p9, %p9635_p8 }
 0x296   : > { %9645 = shalt.err (!%p9642_p1)
}
 0x297   : > { %s11820_s0 = scalar_lea.sflag [#allocation30], %s10330_s24  ;;  %s1689_s8 = scalar_lea.vmem [#allocation34], %s10324_s29 }
 0x298   : > { %8780 = dma.hbm_to_vmem [thread:$0]  (%p11797_p7), %s10714_s16, 16, %s1663_s1, %s11820_s0  }
 0x299   : > { %s1696_s9 = sshll.u32 %s1689_s8, 4  ;;  %s9646_s10 = scalar_lea.hbm %s10734_s20, 16  ;;  %s1697_s9 = int_to_ptr.vmem [resolvable:$true] %s1696_s9 }
 0x29a   : > { %p9647_p11 = scmp.ne.s32.totalorder %s10734_s20, %s9646_s10  ;;  %s9650_s13 = scalar_lea.hbm %s11819_s5, 80 }
 0x29b   : > { %p9651_p4 = scmp.lt.u32.totalorder %s10734_s20, %s11819_s5  ;;  %p9652_p3 = scmp.lt.u32.totalorder %s9650_s13, %s9646_s10 }
 0x29c   : > { %p9648_p13 = pnand %p9647_p11, %p11797_p7  ;;  %p9654_p5 = scmp.lt.u32.totalorder %s9646_s10, %s10734_s20 }
 0x29d   : > { %p9653_p6 = por %p9652_p3, %p9651_p4 }
 0x29e   : > { %p9649_p2 = pneg %p9648_p13 }
 0x29f   : > { %p9655_p10 = por %p9654_p5, %p9653_p6 }
 0x2a1   : > { %p9656_p8 = pnand %p9655_p10, %p9649_p2 }
 0x2a3   : > { %9659 = shalt.err (!%p9656_p8)
}
 0x2a4   : > { %s9660_s2 = scalar_lea.vmem %s1697_s9, 16  ;;  %s9963_s29 = smov [#allocation34]  }
 0x2a5   : > { %p9661_p0 = scmp.ne.s32.totalorder %s1697_s9, %s9660_s2  ;;  %s9664_s16 = sshll.u32 %s9963_s29, 4  ;;  %s9665_s16 = int_to_ptr.vmem [resolvable:$false] %s9664_s16 }
 0x2a6   : > { %s9666_s1 = scalar_lea.vmem %s9665_s16, 32  ;;  %p9667_p1 = scmp.lt.s32.totalorder %s1697_s9, %s9665_s16 }
 0x2a7   : > { %p9662_p12 = pnand %p9661_p0, %p11797_p7  ;;  %p9668_p11 = scmp.lt.s32.totalorder %s9666_s1, %s9660_s2 }
 0x2a9   : > { %p9663_p9 = pneg %p9662_p12  ;;  %p9669_p13 = por %p9668_p11, %p9667_p1 }
 0x2ab   : > { %p9670_p3 = pnand %p9669_p13, %p9663_p9 }
 0x2ad   : > { %9673 = shalt.err (!%p9670_p3)
}
 0x2ae   : > { %s11821_s15 = scalar_lea.sflag [#allocation33], %s10330_s24 }
 0x2af   : > { %8782 = dma.hbm_to_vmem [thread:$0]  (%p11797_p7), %s10734_s20, 16, %s1697_s9, %s11821_s15  }
 0x2b0 PF: > { %p11822_p2 = scmp.ne.s32.totalorder %s11795_s4, 0 }
 0x2b2   : > { %1705 = sbr.rel (%p11822_p2) target bundleno = 10702 (0x29ce), region = 172 }
 0x2b9   : > { %s10770_s18 = sand.u32 1, %s9876_s7   ;;  %p11824_p4 = scmp.ne.s32.totalorder %s11788_s21, 0 }
 0x2ba   : > { %11823 = sst [smem:[#allocation112_spill]] %s10770_s18  ;;  %s1708_s0 = scalar_lea.sflag [#allocation3], %s10770_s18 }
 0x2bb   : > { %9803 = dma.done.wait (%p11824_p4), %s1708_s0, 16  }
 0x2bc   : > { %9805 = vsyncadd (%p11824_p4), %s1708_s0, 4294967280  ;;  %s10779_s26 = sand.u32 1, %s10248_s23  }
 0x2bd   : > { %11825 = sst [smem:[#allocation113_spill]] %s10779_s26  ;;  %s1716_s4 = scalar_lea.sflag [#allocation6], %s10779_s26 }
 0x2be   : > { %9807 = dma.done.wait (%p11824_p4), %s1716_s4, 32  }
 0x2bf   : > { %9809 = vsyncadd (%p11824_p4), %s1716_s4, 4294967264  ;;  %s1732_s9 = scalar_lea.sflag [#allocation9], %s10779_s26 }
 0x2c0   : > { %9811 = dma.done.wait (%p11824_p4), %s1732_s9, 32  }
 0x2c1   : > { %9813 = vsyncadd (%p11824_p4), %s1732_s9, 4294967264  ;;  %s1748_s2 = scalar_lea.sflag [#allocation12], %s10779_s26 }
 0x2c2   : > { %9815 = dma.done.wait (%p11824_p4), %s1748_s2, 32  }
 0x2c3   : > { %9817 = vsyncadd (%p11824_p4), %s1748_s2, 4294967264  ;;  %s1764_s1 = scalar_lea.sflag [#allocation15], %s10779_s26 }
 0x2c4   : > { %9819 = dma.done.wait (%p11824_p4), %s1764_s1, 32  }
 0x2c5   : > { %9821 = vsyncadd (%p11824_p4), %s1764_s1, 4294967264  ;;  %s1780_s4 = scalar_lea.sflag [#allocation18], %s10779_s26 }
 0x2c6   : > { %9823 = dma.done.wait (%p11824_p4), %s1780_s4, 32  }
 0x2c7   : > { %9825 = vsyncadd (%p11824_p4), %s1780_s4, 4294967264  ;;  %s1796_s15 = scalar_lea.sflag [#allocation21], %s10779_s26 }
 0x2c8   : > { %9827 = dma.done.wait (%p11824_p4), %s1796_s15, 32  }
 0x2c9   : > { %9829 = vsyncadd (%p11824_p4), %s1796_s15, 4294967264  ;;  %s1812_s0 = scalar_lea.sflag [#allocation24], %s10779_s26 }
 0x2ca   : > { %9831 = dma.done.wait (%p11824_p4), %s1812_s0, 32  }
 0x2cb   : > { %9833 = vsyncadd (%p11824_p4), %s1812_s0, 4294967264  ;;  %s1828_s16 = scalar_lea.sflag [#allocation27], %s10779_s26 }
 0x2cc   : > { %9835 = dma.done.wait (%p11824_p4), %s1828_s16, 32  }
 0x2cd   : > { %9837 = vsyncadd (%p11824_p4), %s1828_s16, 4294967264  ;;  %s1844_s9 = scalar_lea.sflag [#allocation30], %s10779_s26 }
 0x2ce   : > { %9839 = dma.done.wait (%p11824_p4), %s1844_s9, 32  }
 0x2cf   : > { %9841 = vsyncadd (%p11824_p4), %s1844_s9, 4294967264  ;;  %s1860_s2 = scalar_lea.sflag [#allocation33], %s10779_s26 }
 0x2d0   : > { %9843 = dma.done.wait (%p11824_p4), %s1860_s2, 32  }
 0x2d1   : > { %9845 = vsyncadd (%p11824_p4), %s1860_s2, 4294967264  ;;  %p11826_p7 = scmp.eq.s32.totalorder %s10248_s23, 0 }
 0x2d3   : > { %9847 = dma.done.wait (%p11826_p7), [#allocation36], 16   ;;  %p11827_p6 = pmov %p11826_p7 }
 0x2d4   : > { %s11828_s9 = sld [smem:[#allocation102_spill]]  ;;  %s11829_s15 = sld [smem:[#allocation101_spill]] }
 0x2d5   : > { %9849 = vsyncadd (%p11827_p6), [#allocation36], 4294967280  ;;  %s11831_s1 = sld [smem:[#allocation55_spill]]  ;;  %s11832_s4 = sld [smem:[#allocation56_spill]] }
 0x2d6   : > { %s11833_s29 = sld [smem:[#allocation58_spill]]  ;;  %s11834_s13 = sld [smem:[#allocation59_spill]] }
 0x2d7   : > { %s11835_s21 = sld [smem:[#allocation61_spill]]  ;;  %s11836_s2 = sld [smem:[#allocation63_spill]] }
 0x2d8   : > { %s10856_s10 = sand.u32 1, %s9864_s28   ;;  %s11837_s16 = sld [smem:[#allocation67_spill]] }
 0x2d9   : > { %s11838_s20 = sld [smem:[#allocation69_spill]]  ;;  %s8002_s23 = sshll.u32 %s10856_s10, 3 }
 0x2da   : > { %p2128_p5 = scmp.lt.s32.totalorder %s11828_s9, 1  ;;  %s11839_s8 = sld [smem:[#allocation73_spill]] }
 0x2db   : > { %s11840_s24 = sld [smem:[#allocation75_spill]]  ;;  %p2142_p10 = scmp.lt.s32.totalorder %s11829_s15, 4 }
 0x2dc   : > { %s11901_s9 = smov (!%p2128_p5, %s11828_s9), 1  ;;  %s11841_s3 = sld [smem:[#allocation79_spill]] }
 0x2dd   : > { %s8004_s5 = sshll.u32 %s11901_s9, 3  ;;  %s11842_s6 = sld [smem:[#allocation81_spill]] }
 0x2de   : > { %s11843_s14 = sld [smem:[#allocation85_spill]]  ;;  %s2131_s17 = scalar_lea.vmem %s11831_s1, %s8004_s5 }
 0x2df   : > { %s11844_s19 = sld [smem:[#allocation87_spill]]  ;;  %s2135_s25 = scalar_lea.vmem %s11832_s4, %s8004_s5 }
 0x2e0   : > { %s10871_s27 = scalar_lea.vmem %s11833_s29, %s11901_s9  ;;  %p8028_p8 = scmp.ne.s32.totalorder %s11829_s15, 0 }
 0x2e1   : > { %s2143_s30 = scalar_select %p2142_p10, %s11829_s15, 4 }
 0x2e2   : > { %v2201_v0 = vld [vmem:[%s2131_s17] sm:$0xff] (!%p8028_p8)  ;;  %vm2202_vm0 = vcmask (!%p8028_p8), 261120  }
 0x2e3   : > { %s8135_s7 = sshll.u32 %s2143_s30, 5  ;;  %s8143_s28 = sshll.u32 %s2143_s30, 6  ;;  %v2204_v1 = vld [vmem:[%s2135_s25] sm:$0xff] (!%p8028_p8) }
 0x2e4   : > { %s10875_s22 = scalar_lea.vmem %s11834_s13, %s8135_s7  ;;  %s2151_s11 = scalar_lea.vmem %s11835_s21, %s8135_s7 }
 0x2e5   : > { %s10879_s26 = scalar_lea.vmem %s11836_s2, %s8135_s7  ;;  %s10882_s18 = scalar_lea.vmem %s11837_s16, %s8135_s7 }
 0x2e6   : > { %s10885_s0 = scalar_lea.vmem %s11838_s20, %s8135_s7  ;;  %s10888_s12 = scalar_lea.vmem %s11839_s8, %s8135_s7 }
 0x2e7   : > { %s10891_s1 = scalar_lea.vmem %s11840_s24, %s8135_s7  ;;  %s10894_s5 = scalar_lea.vmem %s11841_s3, %s8135_s7 }
 0x2e8   : > { %s10897_s29 = scalar_lea.vmem %s11842_s6, %s8143_s28  ;;  %s10900_s4 = scalar_lea.vmem %s11843_s14, %s8135_s7 }
 0x2e9   : > { %s10903_s30 = scalar_lea.vmem %s11844_s19, %s8143_s28  ;;  %s10905_s13 = scalar_lea.vmem [#allocation37], %s8002_s23 }
 0x2ea   : > { %s10907_s21 = scalar_lea.vmem [#allocation38], %s8002_s23  ;;  %s2127_s16 = scalar_lea.vmem [#allocation40], %s10856_s10  ;;  %2203 = vst.msk [vmem:[%s10905_s13] sm:$0xff] (!%p8028_p8), %vm2202_vm0, %v2201_v0 }
 0x2eb   : > { %2200 = sbr.rel (%p8028_p8) target bundleno = 754 (0x2f2), region = 264  ;;  %2205 = vst.msk [vmem:[%s10907_s21] sm:$0xff] (!%p8028_p8), %vm2202_vm0, %v2204_v1 }
 0x2f2 PF: > { %v2368_v2 = vld [vmem:[%s2151_s11] sm:$0xff]  ;;  %v2369_v3 = vld [vmem:[%s2151_s11 + $0x8] sm:$0xff]  ;;  %v9964_v5 = vmov 0.0|0.0   ;;  %v2370_v8 = vld [vmem:[%s2151_s11 + $0x10] sm:$0xff]  ;;  %vm9965_vm1 = vmmov 0   ;;  %v9966_v11 = vmov 0.0  }
 0x2f3   : > { %v2210_v4 = vld [vmem:[%s10875_s22] sm:$0xff]  ;;  %8694 = vmatprep.subr.bf16.mxu0 %v9964_v5  ;;  %v8695_v6 = vpack.c.bf16 %v2369_v3, %v2368_v2  ;;  %8682 = vmatprep.subr.bf16.mxu1 %v9964_v5  ;;  %v2211_v7 = vld [vmem:[%s10875_s22 + $0x8] sm:$0xff]  ;;  %v2371_v9 = vld [vmem:[%s2151_s11 + $0x18] sm:$0xff]  ;;  %vm2221_vm2 = vcmask 261120   ;;  %s11845_s17 = sld [smem:[#allocation112_spill]]  ;;  %vm2526_vm3 = vcmask 64512  }
 0x2f4   : > { %v8683_v10 = vpack.c.bf16 %v2211_v7, %v2210_v4  ;;  %8335 = vmatprep.mubr.msk.f32.mxu0 %vm9965_vm1, %v9966_v11  ;;  %v2212_v12 = vld [vmem:[%s10875_s22 + $0x10] sm:$0xff]  ;;  %v2213_v13 = vld [vmem:[%s10875_s22 + $0x18] sm:$0xff]  ;;  %8313 = vmatprep.mubr.msk.f32.mxu1 %vm9965_vm1, %v9966_v11  ;;  %v8698_v14 = vpack.c.bf16 %v2371_v9, %v2370_v8  ;;  %s9967_s19 = smov 120   ;;  %v10984_v29 = vld [vmem:[%s10871_s27] ss:$0 sm:$0xff]  ;;  %s9968_s28 = smov 96  }
 0x2f5   : > { %8696 = vmatpush3.bf16.msra.mxu0 %v8695_v6  ;;  %v8686_v15 = vpack.c.bf16 %v2213_v13, %v2212_v12  ;;  %v10926_v16 = vld [vmem:[%s10907_s21] sm:$0xff]  ;;  %v10929_v17 = vld [vmem:[%s10905_s13] sm:$0xff]  ;;  %s9969_s7 = smov 88   ;;  %s9970_s22 = smov 112   ;;  %vm6796_vm4 = vcmask 523264  }
 0x2f6   : > { %8684 = vmatpush3.bf16.msra.mxu1 %v8683_v10  ;;  %8697 = vmatprep.subr.bf16.mxu0 %v9964_v5  ;;  %v11009_v57 = vld [vmem:[%s10879_s26 + $0x8] sm:$0xff]  ;;  %v11015_v62 = vld [vmem:[%s10879_s26] sm:$0xff]  ;;  %s9971_s11 = smov 80   ;;  %s9972_s6 = smov 104  }
 0x2f7   : > { %8685 = vmatprep.subr.bf16.mxu1 %v9964_v5  ;;  %s9973_s3 = smov 72   ;;  %s11848_s8 = sld [smem:[#allocation57_spill]] }
 0x2f8   : > { %s9975_s2 = smov 56   ;;  %s9976_s23 = smov 48  }
 0x2f9   : > { %8699 = vmatpush3.bf16.msra.mxu0 %v8698_v14  ;;  %s11846_s25 = scalar_lea.vmem [#allocation5], %s11845_s17  ;;  %s11847_s14 = scalar_lea.vmem [#allocation2], %s11845_s17 }
 0x2fa   : > { %8687 = vmatpush3.bf16.msra.mxu1 %v8686_v15  ;;  %8349 = vmatprep.subr.mxu0 %v9966_v11  ;;  %v10955_v18 = vld [vmem:[%s11846_s25] ss:$0 sm:$0xff]  ;;  %s11851_s20 = scalar_lea.vmem [#allocation8], %s11845_s17  ;;  %s11852_s15 = scalar_lea.vmem [#allocation10], %s11845_s17 }
 0x2fb   : > { %8688 = vmatprep.subr.bf16.mxu1 %v9964_v5  ;;  %v10959_v19 = vld [vmem:[%s11847_s14] ss:$0 sm:$0xff]  ;;  %s9977_s25 = smov 40   ;;  %s11860_s14 = scalar_lea.vmem [#allocation22], %s11845_s17 }
 0x2fc   : > { %8336 = vmatmul.mubr.msk.f32.vlgmr.msra.gmra.mrb[0].mxu0 %vm2221_vm2, %v10926_v16 }
 0x2fd   : > { %8314 = vmatmul.mubr.msk.f32.vlgmr.msra.gmra.mrb[0].mxu1 %vm2221_vm2, %v10929_v17  ;;  %8351 = vmatprep.mubr.msk.f32.mxu0 %vm9965_vm1, %v9966_v11  ;;  %s11849_s24 = scalar_lea.vmem %s11848_s8, %s11901_s9  ;;  %s9974_s9 = smov 64  }
 0x2fe   : > { %8690 = vmatpush3.bf16.msra.mxu1 %v8683_v10  ;;  %8324 = vmatprep.mubr.msk.f32.mxu1 %vm9965_vm1, %v9966_v11 }
 0x2ff   : > { %8691 = vmatprep.subr.bf16.mxu1 %v9964_v5 }
 0x302   : > { %8693 = vmatpush3.bf16.msra.mxu1 %v8686_v15 }
 0x303   : > { %8700 = vmatprep.subr.bf16.mxu1 %v9964_v5 }
 0x305   : > { %8325 = vmatmul.mubr.msk.f32.vlgmr.msra.gmra.mrb[2].mxu1 %vm2221_vm2, %v10926_v16 }
 0x306   : > { %8702 = vmatpush3.bf16.msra.mxu1 %v8695_v6  ;;  %8346 = vmatprep.mubr.msk.f32.mxu1 %vm9965_vm1, %v9966_v11 }
 0x307   : > { %8703 = vmatprep.subr.bf16.mxu1 %v9964_v5 }
 0x30a   : > { %8705 = vmatpush3.bf16.msra.mxu1 %v8698_v14 }
 0x30b   : > { %8354 = vmatprep.subr.mxu1 %v9966_v11 }
 0x30d   : > { %8347 = vmatmul.mubr.msk.f32.vlgmr.msra.gmra.mrb[4].mxu1 %vm2221_vm2, %v10929_v17 }
 0x30e   : > { %8356 = vmatprep.mubr.msk.f32.mxu1 %vm9965_vm1, %v9966_v11 }
 0x3cf   : > { %v2445_v20 = vpop.f32.mrb[0].mxu0 }
 0x3d0   : > { %v10962_v21 = vadd.f32 %v10955_v18, %v2445_v20  ;;  %v8337_v22 = vpop.f32.mrb[1].mxu0  ;;  %v2291_v23 = vpop.f32.mrb[0].mxu1 }
 0x3d1   : > { %v10965_v24 = vadd.f32 %v10959_v19, %v2291_v23  ;;  %v8315_v25 = vpop.f32.mrb[1].mxu1 }
 0x3d2   : > { %2700 = vrot.lane.b32.xlu0 %v10962_v21, %s9967_s19  ;;  %8350 = vmatpush3.xpose.msk.msra.mxu0 %vm2526_vm3, %v10962_v21 }
 0x3d3   : > { %8359 = vmatprep.subr.mxu0 %v9966_v11 }
 0x3d5   : > { %8352 = vmatmul.mubr.msk.f32.vlgmr.msra.gmra.mrb[2].mxu0 %vm2526_vm3, %v10965_v24 }
 0x3d6   : > { %2698 = vrot.lane.b32.xlu0 %v10965_v24, %s9967_s19  ;;  %8361 = vmatprep.mubr.msk.f32.mxu0 %vm9965_vm1, %v9966_v11 }
 0x3d8   : > { %v11001_v51 = vpop.f32.mrb[2].mxu1 }
 0x3d9   : > { %v8326_v52 = vpop.f32.mrb[3].mxu1 }
 0x3e0   : > { %v11003_v53 = vpop.f32.mrb[4].mxu1 }
 0x3e1   : > { %v8348_v54 = vpop.f32.mrb[5].mxu1 }
 0x444   : > { %v2701_v26 = vpop.permute.xlu0 %2700 }
 0x445   : > { %8360 = vmatpush3.xpose.msk.msra.mxu0 %vm2526_vm3, %v2701_v26 }
 0x446   : > { %8369 = vmatprep.subr.mxu0 %v9966_v11 }
 0x448   : > { %v2699_v27 = vpop.permute.xlu0 %2698 }
 0x449   : > { %8362 = vmatmul.mubr.msk.f32.vlgmr.msra.gmra.mrb[4].mxu0 %vm2526_vm3, %v2699_v27 }
 0x44a   : > { %8371 = vmatprep.mubr.msk.f32.mxu0 %vm9965_vm1, %v9966_v11  ;;  %8370 = vmatpush3.msra.mxu0 %v11009_v57 }
 0x44b   : > { %8379 = vmatprep.subr.mxu0 %v9966_v11 }
 0x4a8   : > { %v2599_v28 = vpop.f32.mrb[2].mxu0 }
 0x4a9   : > { %v2603_v30 = vmul.f32 0.35355338, %v2599_v28  ;;  %v8353_v31 = vpop.f32.mrb[3].mxu0 }
 0x4ab   : > { %v2610_v32 = vadd.f32 %v10984_v29, %v2603_v30  ;;  %v11049_v30 = vadd.f32 %v10955_v18, %v11003_v53 }
 0x4ad   : > { %v2611_v33 = vsel %vm2526_vm3, %v2610_v32, -inf }
 0x4ae   : > { %2612 = vmax.xlane.f32.xlu1 %v2611_v33 }
 0x51c   : > { %v2772_v34 = vpop.f32.mrb[4].mxu0 }
 0x51d   : > { %v2776_v35 = vmul.f32 0.35355338, %v2772_v34  ;;  %v8363_v36 = vpop.f32.mrb[5].mxu0 }
 0x51f   : > { %v2777_v37 = vadd.f32 %v10984_v29, %v2776_v35 }
 0x521   : > { %v2778_v38 = vsel %vm2526_vm3, %v2777_v37, -inf }
 0x522   : > { %2779 = vmax.xlane.f32.xlu1 %v2778_v38 }
 0x533   : > { %2622 = vrot.lane.b32.xlu1 %v10962_v21, %s9968_s28 }
 0x53b   : > { %v2613_v39 = vpop.xlane.xlu1 %2612 }
 0x53c   : > { %v2614_v40 = vsub.f32 %v2610_v32, %v2613_v39 }
 0x53e   : > { %v2615_v41 = vmul.f32 1.442695, %v2614_v40 }
 0x540   : > { %8975 = vpow2.f32 %v2615_v41 }
 0x54a   : > { %v8976_v42 = vpop.eup %8975 }
 0x54b   : > { %v2617_v43 = vsel %vm2526_vm3, %v8976_v42, 0.0 }
 0x54c   : > { %2618 = vadd.xlane.f32.xlu0 %v2617_v43 }
 0x5af   : > { %v2780_v44 = vpop.xlane.xlu1 %2779 }
 0x5b0   : > { %v2781_v45 = vsub.f32 %v2777_v37, %v2780_v44 }
 0x5b2   : > { %v2782_v46 = vmul.f32 1.442695, %v2781_v45 }
 0x5b3   : > { %v2623_v47 = vpop.permute.xlu1 %2622 }
 0x5b4   : > { %8977 = vpow2.f32 %v2782_v46  ;;  %8355 = vmatpush3.msra.mxu1 %v2623_v47  ;;  %v11075_v47 = vadd.f32 %v10959_v19, %v11001_v51  ;;  %v11098_v51 = vld [vmem:[%s10879_s26 + $0x18] sm:$0xff] }
 0x5b5   : > { %8364 = vmatprep.subr.mxu1 %v9966_v11 }
 0x5be   : > { %v8978_v48 = vpop.eup %8977 }
 0x5bf   : > { %v2784_v49 = vsel %vm2526_vm3, %v8978_v48, 0.0 }
 0x5c0   : > { %2785 = vadd.xlane.f32.xlu1 %v2784_v49 }
 0x5d1   : > { %2789 = vrot.lane.b32.xlu1 %v10962_v21, %s9969_s7 }
 0x5d5   : > { %3013 = vrot.lane.b32.xlu1 %v10962_v21, %s9970_s22 }
 0x5d9   : > { %v2619_v50 = vpop.xlane.xlu0 %2618  ;;  %3011 = vrot.lane.b32.xlu1 %v10965_v24, %s9970_s22 }
 0x5da   : > { %8979 = vrcp.f32 %v2619_v50 }
 0x5e4   : > { %v8980_v55 = vpop.eup %8979 }
 0x5e5   : > { %v2621_v56 = vmul.f32 %v8980_v55, %v8976_v42 }
 0x5e7   : > { %8357 = vmatmul.mubr.msk.f32.vlgmr.msra.gmra.mrb[6].mxu1 %vm2526_vm3, %v2621_v56 }
 0x5e8   : > { %8366 = vmatprep.mubr.msk.f32.mxu1 %vm9965_vm1, %v9966_v11 }
 0x64d   : > { %v2786_v58 = vpop.xlane.xlu1 %2785 }
 0x64e   : > { %8981 = vrcp.f32 %v2786_v58 }
 0x651   : > { %v2790_v59 = vpop.permute.xlu1 %2789 }
 0x652   : > { %8365 = vmatpush3.msra.mxu1 %v2790_v59 }
 0x653   : > { %8374 = vmatprep.subr.mxu1 %v9966_v11 }
 0x655   : > { %v3014_v1 = vpop.permute.xlu1 %3013 }
 0x658   : > { %v8982_v60 = vpop.eup %8981 }
 0x659   : > { %v2788_v61 = vmul.f32 %v8982_v60, %v8978_v48  ;;  %v3012_v4 = vpop.permute.xlu1 %3011 }
 0x65b   : > { %8367 = vmatmul.mubr.msk.f32.vlgmr.msra.gmra.mrb[8].mxu1 %vm2526_vm3, %v2788_v61 }
 0x65c   : > { %8375 = vmatpush3.msra.mxu1 %v11015_v62  ;;  %8376 = vmatprep.mubr.msk.f32.mxu1 %vm9965_vm1, %v9966_v11 }
 0x65d   : > { %8384 = vmatprep.subr.mxu1 %v9966_v11 }
 0x6ba   : > { %v2694_v63 = vpop.f32.mrb[6].mxu1 }
 0x6bb   : > { %v8358_v0 = vpop.f32.mrb[7].mxu1  ;;  %8377 = vmatmul.mubr.msk.f32.vlgmr.msra.gmra.mrb[10].mxu1 %vm2526_vm3, %v2694_v63 }
 0x6bc   : > { %8386 = vmatprep.mubr.msk.f32.mxu1 %vm9965_vm1, %v9966_v11 }
 0x72e   : > { %v2861_v2 = vpop.f32.mrb[8].mxu1 }
 0x72f   : > { %v8368_v3 = vpop.f32.mrb[9].mxu1  ;;  %8372 = vmatmul.mubr.msk.f32.vlgmr.msra.gmra.mrb[6].mxu0 %vm2526_vm3, %v2861_v2 }
 0x730   : > { %8380 = vmatpush3.xpose.msk.msra.mxu0 %vm2526_vm3, %v3014_v1  ;;  %8381 = vmatprep.mubr.msk.f32.mxu0 %vm9965_vm1, %v9966_v11 }
 0x731   : > { %8389 = vmatprep.subr.mxu0 %v9966_v11 }
 0x733   : > { %8382 = vmatmul.mubr.msk.f32.vlgmr.msra.gmra.mrb[8].mxu0 %vm2526_vm3, %v3012_v4 }
 0x734   : > { %8391 = vmatprep.mubr.msk.f32.mxu0 %vm9965_vm1, %v9966_v11 }
 0x78e   : > { %v3007_v6 = vpop.f32.mrb[10].mxu1 }
 0x78f   : > { %v8378_v7 = vpop.f32.mrb[11].mxu1 }
 0x802   : > { %v2934_v8 = vpop.f32.mrb[6].mxu0 }
 0x803   : > { %v11033_v9 = vadd.f32 %v3007_v6, %v2934_v8  ;;  %v8373_v10 = vpop.f32.mrb[7].mxu0 }
 0x806   : > { %v3085_v12 = vpop.f32.mrb[8].mxu0 }
 0x807   : > { %v3089_v13 = vmul.f32 0.35355338, %v3085_v12  ;;  %v8383_v14 = vpop.f32.mrb[9].mxu0 }
 0x809   : > { %v3090_v15 = vadd.f32 %v10984_v29, %v3089_v13 }
 0x80b   : > { %v3091_v20 = vsel %vm2526_vm3, %v3090_v15, -inf }
 0x80c   : > { %3092 = vmax.xlane.f32.xlu0 %v3091_v20 }
 0x822   : > { %3102 = vrot.lane.b32.xlu0 %v10962_v21, %s9971_s11 }
 0x826   : > { %3254 = vrot.lane.b32.xlu0 %v10962_v21, %s9972_s6 }
 0x82a   : > { %3252 = vrot.lane.b32.xlu0 %v10965_v24, %s9972_s6  ;;  %v11054_v24 = vld [vmem:[%s10879_s26 + $0x10] sm:$0xff]  ;;  %s11850_s26 = scalar_lea.vmem [#allocation7], %s11845_s17 }
 0x82b   : > { %8390 = vmatpush3.msra.mxu0 %v11054_v24 }
 0x82c   : > { %8399 = vmatprep.subr.mxu0 %v9966_v11 }
 0x899   : > { %v3093_v22 = vpop.xlane.xlu0 %3092 }
 0x89a   : > { %v3094_v23 = vsub.f32 %v3090_v15, %v3093_v22 }
 0x89c   : > { %v3095_v25 = vmul.f32 1.442695, %v3094_v23 }
 0x89d   : > { %v3103_v26 = vpop.permute.xlu0 %3102 }
 0x89e   : > { %8983 = vpow2.f32 %v3095_v25  ;;  %8385 = vmatpush3.msra.mxu1 %v3103_v26 }
 0x89f   : > { %8394 = vmatprep.subr.mxu1 %v9966_v11 }
 0x8a1   : > { %v3255_v33 = vpop.permute.xlu0 %3254 }
 0x8a5   : > { %v3253_v18 = vpop.permute.xlu0 %3252 }
 0x8a8   : > { %v8984_v27 = vpop.eup %8983 }
 0x8a9   : > { %v3097_v28 = vsel %vm2526_vm3, %v8984_v27, 0.0 }
 0x8aa   : > { %3098 = vadd.xlane.f32.xlu1 %v3097_v28 }
 0x8bb   : > { %3343 = vrot.lane.b32.xlu1 %v10962_v21, %s9973_s3 }
 0x8bf   : > { %3702 = vrot.lane.b32.xlu1 %v11049_v30, %s9967_s19 }
 0x937   : > { %v3099_v31 = vpop.xlane.xlu1 %3098 }
 0x938   : > { %8985 = vrcp.f32 %v3099_v31 }
 0x93b   : > { %v3344_v35 = vpop.permute.xlu1 %3343 }
 0x93f   : > { %v3703_v50 = vpop.permute.xlu1 %3702 }
 0x942   : > { %v8986_v32 = vpop.eup %8985 }
 0x943   : > { %v3101_v34 = vmul.f32 %v8986_v32, %v8984_v27 }
 0x945   : > { %8387 = vmatmul.mubr.msk.f32.vlgmr.msra.gmra.mrb[12].mxu1 %vm2526_vm3, %v3101_v34 }
 0x946   : > { %8395 = vmatpush3.xpose.msk.msra.mxu1 %vm2526_vm3, %v3255_v33  ;;  %8396 = vmatprep.mubr.msk.f32.mxu1 %vm9965_vm1, %v9966_v11 }
 0x947   : > { %8404 = vmatprep.subr.mxu1 %v9966_v11 }
 0x949   : > { %8397 = vmatmul.mubr.msk.f32.vlgmr.msra.gmra.mrb[14].mxu1 %vm2526_vm3, %v3253_v18 }
 0x94a   : > { %8406 = vmatprep.mubr.msk.f32.mxu1 %vm9965_vm1, %v9966_v11  ;;  %8405 = vmatpush3.msra.mxu1 %v11098_v51 }
 0x94b   : > { %8414 = vmatprep.subr.mxu1 %v9966_v11 }
 0xa18   : > { %v3174_v21 = vpop.f32.mrb[12].mxu1 }
 0xa19   : > { %v8388_v36 = vpop.f32.mrb[13].mxu1  ;;  %8392 = vmatmul.mubr.msk.f32.vlgmr.msra.gmra.mrb[10].mxu0 %vm2526_vm3, %v3174_v21 }
 0xa1a   : > { %8400 = vmatpush3.msra.mxu0 %v3344_v35  ;;  %8401 = vmatprep.mubr.msk.f32.mxu0 %vm9965_vm1, %v9966_v11 }
 0xa1b   : > { %8409 = vmatprep.subr.mxu0 %v9966_v11 }
 0xa1c   : > { %v3326_v37 = vpop.f32.mrb[14].mxu1 }
 0xa1d   : > { %v3330_v38 = vmul.f32 0.35355338, %v3326_v37  ;;  %v8398_v39 = vpop.f32.mrb[15].mxu1 }
 0xa1f   : > { %v3331_v40 = vadd.f32 %v10984_v29, %v3330_v38 }
 0xa21   : > { %v3332_v41 = vsel %vm2526_vm3, %v3331_v40, -inf }
 0xa22   : > { %3333 = vmax.xlane.f32.xlu0 %v3332_v41 }
 0xaaf   : > { %v3334_v42 = vpop.xlane.xlu0 %3333 }
 0xab0   : > { %v3335_v43 = vsub.f32 %v3331_v40, %v3334_v42 }
 0xab2   : > { %v3336_v44 = vmul.f32 1.442695, %v3335_v43 }
 0xab4   : > { %8987 = vpow2.f32 %v3336_v44 }
 0xabe   : > { %v8988_v45 = vpop.eup %8987 }
 0xabf   : > { %v3338_v46 = vsel %vm2526_vm3, %v8988_v45, 0.0 }
 0xac0   : > { %3339 = vadd.xlane.f32.xlu1 %v3338_v46 }
 0xad1   : > { %3700 = vrot.lane.b32.xlu1 %v11075_v47, %s9967_s19 }
 0xaec   : > { %v3247_v48 = vpop.f32.mrb[10].mxu0 }
 0xaed   : > { %v3251_v29 = vadd.f32 %v3247_v48, %v11033_v9  ;;  %v8393_v49 = vpop.f32.mrb[11].mxu0 }
 0xb4d   : > { %v3340_v52 = vpop.xlane.xlu1 %3339 }
 0xb4e   : > { %8989 = vrcp.f32 %v3340_v52 }
 0xb51   : > { %v3701_v19 = vpop.permute.xlu1 %3700 }
 0xb58   : > { %v8990_v53 = vpop.eup %8989 }
 0xb59   : > { %v3342_v54 = vmul.f32 %v8990_v53, %v8988_v45 }
 0xb5b   : > { %8402 = vmatmul.mubr.msk.f32.vlgmr.msra.gmra.mrb[12].mxu0 %vm2526_vm3, %v3342_v54 }
 0xb5c   : > { %8410 = vmatpush3.xpose.msk.msra.mxu0 %vm2526_vm3, %v11049_v30  ;;  %8411 = vmatprep.mubr.msk.f32.mxu0 %vm9965_vm1, %v9966_v11 }
 0xb5d   : > { %8419 = vmatprep.subr.mxu0 %v9966_v11 }
 0xb5f   : > { %8412 = vmatmul.mubr.msk.f32.vlgmr.msra.gmra.mrb[14].mxu0 %vm2526_vm3, %v11075_v47 }
 0xb60   : > { %8420 = vmatpush3.xpose.msk.msra.mxu0 %vm2526_vm3, %v3703_v50  ;;  %8421 = vmatprep.mubr.msk.f32.mxu0 %vm9965_vm1, %v9966_v11 }
 0xb61   : > { %8429 = vmatprep.subr.mxu0 %v9966_v11 }
 0xb63   : > { %8422 = vmatmul.mubr.msk.f32.vlgmr.msra.gmra.mrb[16].mxu0 %vm2526_vm3, %v3701_v19  ;;  %v11161_v19 = vld [vmem:[%s11850_s26] ss:$0 sm:$0xff] }
 0xb64   : > { %8430 = vmatpush3.msra.mxu0 %v11009_v57  ;;  %8431 = vmatprep.mubr.msk.f32.mxu0 %vm9965_vm1, %v9966_v11  ;;  %v11108_v57 = vld [vmem:[%s11849_s24] ss:$0 sm:$0xff] }
 0xb65   : > { %8439 = vmatprep.subr.mxu0 %v9966_v11 }
 0xc2e   : > { %v3415_v55 = vpop.f32.mrb[12].mxu0 }
 0xc2f   : > { %v8403_v56 = vpop.f32.mrb[13].mxu0  ;;  %8407 = vmatmul.mubr.msk.f32.vlgmr.msra.gmra.mrb[16].mxu1 %vm2526_vm3, %v3415_v55 }
 0xc30   : > { %8416 = vmatprep.mubr.msk.f32.mxu1 %vm9965_vm1, %v9966_v11 }
 0xc32   : > { %v3601_v58 = vpop.f32.mrb[14].mxu0 }
 0xc33   : > { %v3605_v59 = vmul.f32 0.35355338, %v3601_v58  ;;  %v8413_v60 = vpop.f32.mrb[15].mxu0 }
 0xc35   : > { %v3612_v61 = vadd.f32 %v11108_v57, %v3605_v59 }
 0xc36   : > { %v3774_v63 = vpop.f32.mrb[16].mxu0 }
 0xc37   : > { %v3778_v0 = vmul.f32 0.35355338, %v3774_v63  ;;  %v8423_v1 = vpop.f32.mrb[17].mxu0  ;;  %v3613_v2 = vsel %vm2526_vm3, %v3612_v61, -inf }
 0xc38   : > { %3614 = vmax.xlane.f32.xlu0 %v3613_v2 }
 0xc39   : > { %v3779_v3 = vadd.f32 %v11108_v57, %v3778_v0 }
 0xc3b   : > { %v3780_v4 = vsel %vm2526_vm3, %v3779_v3, -inf }
 0xc3c   : > { %3781 = vmax.xlane.f32.xlu1 %v3780_v4 }
 0xc4d   : > { %4013 = vrot.lane.b32.xlu1 %v11075_v47, %s9970_s22 }
 0xc4e   : > { %3624 = vrot.lane.b32.xlu0 %v11049_v30, %s9968_s28 }
 0xcc5   : > { %v3615_v6 = vpop.xlane.xlu0 %3614 }
 0xcc6   : > { %v3616_v7 = vsub.f32 %v3612_v61, %v3615_v6 }
 0xcc8   : > { %v3617_v8 = vmul.f32 1.442695, %v3616_v7 }
 0xcc9   : > { %v3625_v9 = vpop.permute.xlu0 %3624  ;;  %v3782_v10 = vpop.xlane.xlu1 %3781 }
 0xcca   : > { %8991 = vpow2.f32 %v3617_v8  ;;  %v3783_v12 = vsub.f32 %v3779_v3, %v3782_v10  ;;  %8415 = vmatpush3.msra.mxu1 %v3625_v9 }
 0xccb   : > { %8424 = vmatprep.subr.mxu1 %v9966_v11 }
 0xccc   : > { %v3784_v13 = vmul.f32 1.442695, %v3783_v12 }
 0xcce   : > { %8993 = vpow2.f32 %v3784_v13 }
 0xcd4   : > { %v8992_v14 = vpop.eup %8991 }
 0xcd5   : > { %v3619_v15 = vsel %vm2526_vm3, %v8992_v14, 0.0 }
 0xcd6   : > { %3620 = vadd.xlane.f32.xlu0 %v3619_v15 }
 0xcd8   : > { %v8994_v20 = vpop.eup %8993 }
 0xcd9   : > { %v3786_v22 = vsel %vm2526_vm3, %v8994_v20, 0.0 }
 0xcda   : > { %3787 = vadd.xlane.f32.xlu0 %v3786_v22 }
 0xcf0   : > { %3791 = vrot.lane.b32.xlu0 %v11049_v30, %s9969_s7 }
 0xcf4   : > { %4015 = vrot.lane.b32.xlu0 %v11049_v30, %s9970_s22 }
 0xd02   : > { %v3488_v23 = vpop.f32.mrb[16].mxu1 }
 0xd03   : > { %v3492_v25 = vadd.f32 %v3488_v23, %v3251_v29  ;;  %v8408_v26 = vpop.f32.mrb[17].mxu1 }
 0xd63   : > { %v3621_v27 = vpop.xlane.xlu0 %3620 }
 0xd64   : > { %8995 = vrcp.f32 %v3621_v27 }
 0xd67   : > { %v3788_v28 = vpop.xlane.xlu0 %3787 }
 0xd68   : > { %8997 = vrcp.f32 %v3788_v28 }
 0xd6b   : > { %v3792_v33 = vpop.permute.xlu0 %3791 }
 0xd6e   : > { %v8996_v31 = vpop.eup %8995 }
 0xd6f   : > { %v3623_v32 = vmul.f32 %v8996_v31, %v8992_v14  ;;  %v4016_v37 = vpop.permute.xlu0 %4015 }
 0xd71   : > { %8417 = vmatmul.mubr.msk.f32.vlgmr.msra.gmra.mrb[18].mxu1 %vm2526_vm3, %v3623_v32 }
 0xd72   : > { %v8998_v34 = vpop.eup %8997  ;;  %8425 = vmatpush3.msra.mxu1 %v3792_v33  ;;  %8426 = vmatprep.mubr.msk.f32.mxu1 %vm9965_vm1, %v9966_v11  ;;  %v4512_v33 = vld [vmem:[%s10882_s18] sm:$0xff] }
 0xd73   : > { %v3790_v18 = vmul.f32 %v8998_v34, %v8994_v20  ;;  %8434 = vmatprep.subr.mxu1 %v9966_v11 }
 0xd75   : > { %8427 = vmatmul.mubr.msk.f32.vlgmr.msra.gmra.mrb[20].mxu1 %vm2526_vm3, %v3790_v18 }
 0xd76   : > { %8435 = vmatpush3.msra.mxu1 %v11015_v62  ;;  %8436 = vmatprep.mubr.msk.f32.mxu1 %vm9965_vm1, %v9966_v11  ;;  %v4014_v62 = vpop.permute.xlu1 %4013 }
 0xd77   : > { %8444 = vmatprep.subr.mxu1 %v9966_v11 }
 0xe44   : > { %v3696_v21 = vpop.f32.mrb[18].mxu1 }
 0xe45   : > { %v8418_v35 = vpop.f32.mrb[19].mxu1  ;;  %8437 = vmatmul.mubr.msk.f32.vlgmr.msra.gmra.mrb[22].mxu1 %vm2526_vm3, %v3696_v21 }
 0xe46   : > { %8446 = vmatprep.mubr.msk.f32.mxu1 %vm9965_vm1, %v9966_v11 }
 0xe48   : > { %v3863_v36 = vpop.f32.mrb[20].mxu1 }
 0xe49   : > { %v8428_v38 = vpop.f32.mrb[21].mxu1  ;;  %8432 = vmatmul.mubr.msk.f32.vlgmr.msra.gmra.mrb[18].mxu0 %vm2526_vm3, %v3863_v36 }
 0xe4a   : > { %8440 = vmatpush3.xpose.msk.msra.mxu0 %vm2526_vm3, %v4016_v37  ;;  %8441 = vmatprep.mubr.msk.f32.mxu0 %vm9965_vm1, %v9966_v11  ;;  %v4514_v37 = vld [vmem:[%s10882_s18 + $0x10] sm:$0xff]  ;;  %v4515_v38 = vld [vmem:[%s10882_s18 + $0x18] sm:$0xff] }
 0xe4b   : > { %8449 = vmatprep.subr.mxu0 %v9966_v11 }
 0xe4d   : > { %8442 = vmatmul.mubr.msk.f32.vlgmr.msra.gmra.mrb[20].mxu0 %vm2526_vm3, %v4014_v62  ;;  %v11193_v62 = vld [vmem:[%s11851_s20] ss:$0 sm:$0xff] }
 0xe4e   : > { %8450 = vmatpush3.msra.mxu0 %v11054_v24  ;;  %8451 = vmatprep.mubr.msk.f32.mxu0 %vm9965_vm1, %v9966_v11 }
 0xe4f   : > { %8459 = vmatprep.subr.mxu0 %v9966_v11 }
 0xf18   : > { %v4009_v39 = vpop.f32.mrb[22].mxu1 }
 0xf19   : > { %v8438_v40 = vpop.f32.mrb[23].mxu1 }
 0xf1c   : > { %v3936_v41 = vpop.f32.mrb[18].mxu0 }
 0xf1d   : > { %v11147_v42 = vadd.f32 %v4009_v39, %v3936_v41  ;;  %v8433_v43 = vpop.f32.mrb[19].mxu0  ;;  %v8710_v39 = vpack.c.bf16 %v4515_v38, %v4514_v37  ;;  %v11202_v41 = vld [vmem:[%s11852_s15] ss:$0 sm:$0xff] }
 0xf20   : > { %v4087_v44 = vpop.f32.mrb[20].mxu0 }
 0xf21   : > { %v4091_v45 = vmul.f32 0.35355338, %v4087_v44  ;;  %v8443_v46 = vpop.f32.mrb[21].mxu0 }
 0xf23   : > { %v4092_v48 = vadd.f32 %v11108_v57, %v4091_v45 }
 0xf25   : > { %v4093_v29 = vsel %vm2526_vm3, %v4092_v48, -inf }
 0xf26   : > { %4094 = vmax.xlane.f32.xlu0 %v4093_v29 }
 0xf3c   : > { %4104 = vrot.lane.b32.xlu0 %v11049_v30, %s9971_s11 }
 0xf40   : > { %4254 = vrot.lane.b32.xlu0 %v11075_v47, %s9972_s6  ;;  %v3499_v47 = vadd.f32 %v11161_v19, %v3492_v25 }
 0xf42   : > { %v3500_v55 = vadd.f32 %v3499_v47, %v10929_v17 }
 0xf44   : > { %v3501_v56 = vsel %vm2221_vm2, %v3500_v55, 0.0 }
 0xfb3   : > { %v4095_v24 = vpop.xlane.xlu0 %4094 }
 0xfb4   : > { %v4096_v49 = vsub.f32 %v4092_v48, %v4095_v24 }
 0xfb6   : > { %v4097_v50 = vmul.f32 1.442695, %v4096_v49 }
 0xfb7   : > { %v4105_v52 = vpop.permute.xlu0 %4104 }
 0xfb8   : > { %8999 = vpow2.f32 %v4097_v50  ;;  %8445 = vmatpush3.msra.mxu1 %v4105_v52 }
 0xfb9   : > { %8454 = vmatprep.subr.mxu1 %v9966_v11 }
 0xfbb   : > { %v4255_v63 = vpop.permute.xlu0 %4254 }
 0xfc2   : > { %v9000_v53 = vpop.eup %8999 }
 0xfc3   : > { %v4099_v54 = vsel %vm2526_vm3, %v9000_v53, 0.0 }
 0xfc4   : > { %4100 = vadd.xlane.f32.xlu1 %v4099_v54 }
 0xfd5   : > { %4256 = vrot.lane.b32.xlu1 %v11049_v30, %s9972_s6 }
 0xff9   : > { %3502 = vadd.xlane.f32.xlu1 %v3501_v56 }
0x1051   : > { %v4101_v58 = vpop.xlane.xlu1 %4100 }
0x1052   : > { %9001 = vrcp.f32 %v4101_v58 }
0x1055   : > { %v4257_v61 = vpop.permute.xlu1 %4256 }
0x105c   : > { %v9002_v59 = vpop.eup %9001 }
0x105d   : > { %v4103_v60 = vmul.f32 %v9002_v59, %v9000_v53 }
0x105f   : > { %8447 = vmatmul.mubr.msk.f32.vlgmr.msra.gmra.mrb[24].mxu1 %vm2526_vm3, %v4103_v60 }
0x1060   : > { %8455 = vmatpush3.xpose.msk.msra.mxu1 %vm2526_vm3, %v4257_v61  ;;  %8456 = vmatprep.mubr.msk.f32.mxu1 %vm9965_vm1, %v9966_v11 }
0x1061   : > { %8464 = vmatprep.subr.mxu1 %v9966_v11 }
0x1063   : > { %8457 = vmatmul.mubr.msk.f32.vlgmr.msra.gmra.mrb[26].mxu1 %vm2526_vm3, %v4255_v63 }
0x1064   : > { %8465 = vmatpush3.msra.mxu1 %v11098_v51  ;;  %8466 = vmatprep.mubr.msk.f32.mxu1 %vm9965_vm1, %v9966_v11 }
0x1065   : > { %8480 = vmatprep.subr.mxu1 %v9966_v11 }
0x1086   : > { %v3503_v17 = vpop.xlane.xlu1 %3502 }
0x1087   : > { %v3505_v1 = vmul.f32 0.03125, %v3503_v17 }
0x1089   : > { %v3506_v4 = vsub.f32 %v3500_v55, %v3505_v1 }
0x108b   : > { %v3507_v9 = vmul.f32 %v3506_v4, %v3506_v4 }
0x108d   : > { %v3508_v10 = vsel %vm2221_vm2, %v3507_v9, 0.0 }
0x1132   : > { %v4176_v0 = vpop.f32.mrb[24].mxu1 }
0x1133   : > { %v8448_v2 = vpop.f32.mrb[25].mxu1  ;;  %8452 = vmatmul.mubr.msk.f32.vlgmr.msra.gmra.mrb[22].mxu0 %vm2526_vm3, %v4176_v0 }
0x1134   : > { %8461 = vmatprep.mubr.msk.f32.mxu0 %vm9965_vm1, %v9966_v11 }
0x1136   : > { %v4328_v3 = vpop.f32.mrb[26].mxu1 }
0x1137   : > { %v4332_v6 = vmul.f32 0.35355338, %v4328_v3  ;;  %v8458_v7 = vpop.f32.mrb[27].mxu1 }
0x1139   : > { %v4333_v51 = vadd.f32 %v11108_v57, %v4332_v6 }
0x113b   : > { %v4334_v8 = vsel %vm2526_vm3, %v4333_v51, -inf }
0x113c   : > { %4335 = vmax.xlane.f32.xlu0 %v4334_v8 }
0x1140   : > { %3509 = vadd.xlane.f32.xlu0 %v3508_v10 }
0x11c9   : > { %v4336_v12 = vpop.xlane.xlu0 %4335 }
0x11ca   : > { %v4337_v13 = vsub.f32 %v4333_v51, %v4336_v12 }
0x11cc   : > { %v4338_v14 = vmul.f32 1.442695, %v4337_v13  ;;  %v4597_v13 = vld [vmem:[%s10885_s0 + $0x8] sm:$0xff] }
0x11cd   : > { %v3510_v26 = vpop.xlane.xlu0 %3509 }
0x11ce   : > { %9003 = vpow2.f32 %v4338_v14  ;;  %v3511_v27 = vmul.f32 0.03125, %v3510_v26 }
0x11d0   : > { %v3512_v28 = vadd.f32 1e-12, %v3511_v27  ;;  %v4596_v27 = vld [vmem:[%s10885_s0] sm:$0xff] }
0x11d2   : > { %9005 = vrsqrt.f32 %v3512_v28 }
0x11d8   : > { %v9004_v15 = vpop.eup %9003 }
0x11d9   : > { %v4340_v20 = vsel %vm2526_vm3, %v9004_v15, 0.0 }
0x11da   : > { %4341 = vadd.xlane.f32.xlu0 %v4340_v20 }
0x11dc   : > { %v9006_v34 = vpop.eup %9005 }
0x11dd   : > { %v3514_v35 = vmul.f32 %v9006_v34, %v3506_v4 }
0x11df   : > { %v3521_v40 = vmul.f32 %v11193_v62, %v3514_v35 }
0x11f0   : > { %4345 = vrot.lane.b32.xlu0 %v11049_v30, %s9973_s3  ;;  %v4513_v30 = vld [vmem:[%s10882_s18 + $0x8] sm:$0xff]  ;;  %s11853_s18 = scalar_lea.vmem [#allocation11], %s11845_s17 }
0x11f1   : > { %v8707_v21 = vpack.c.bf16 %v4513_v30, %v4512_v33  ;;  %v8072_v45 = vld [vmem:[%s11853_s18] ss:$0 sm:$0xff] }
0x1206   : > { %v4249_v22 = vpop.f32.mrb[22].mxu0 }
0x1207   : > { %v4253_v23 = vadd.f32 %v4249_v22, %v11147_v42  ;;  %v8453_v25 = vpop.f32.mrb[23].mxu0  ;;  %v11205_v42 = vadd.f32 %v11202_v41, %v3521_v40 }
0x1267   : > { %v4342_v31 = vpop.xlane.xlu0 %4341 }
0x1268   : > { %9007 = vrcp.f32 %v4342_v31 }
0x126b   : > { %v4346_v32 = vpop.permute.xlu0 %4345 }
0x126c   : > { %8460 = vmatpush3.msra.mxu0 %v4346_v32 }
0x126d   : > { %8706 = vmatprep.subr.bf16.mxu0 %v9964_v5 }
0x1272   : > { %v9008_v18 = vpop.eup %9007 }
0x1273   : > { %v4344_v36 = vmul.f32 %v9008_v18, %v9004_v15 }
0x1275   : > { %8462 = vmatmul.mubr.msk.f32.vlgmr.msra.gmra.mrb[24].mxu0 %vm2526_vm3, %v4344_v36 }
0x1276   : > { %8708 = vmatpush3.bf16.msra.mxu0 %v8707_v21  ;;  %8477 = vmatprep.mubr.msk.f32.mxu0 %vm9965_vm1, %v9966_v11 }
0x1277   : > { %8709 = vmatprep.subr.bf16.mxu0 %v9964_v5 }
0x127a   : > { %8711 = vmatpush3.bf16.msra.mxu0 %v8710_v39 }
0x127b   : > { %8490 = vmatprep.subr.mxu0 %v9966_v11 }
0x127d   : > { %8478 = vmatmul.mubr.msk.f32.vlgmr.msra.gmra.mrb[26].mxu0 %vm2221_vm2, %v11205_v42 }
0x127e   : > { %8492 = vmatprep.mubr.msk.f32.mxu0 %vm9965_vm1, %v9966_v11 }
0x1348   : > { %v4417_v43 = vpop.f32.mrb[24].mxu0 }
0x1349   : > { %v8463_v44 = vpop.f32.mrb[25].mxu0  ;;  %8467 = vmatmul.mubr.msk.f32.vlgmr.msra.gmra.mrb[28].mxu1 %vm2526_vm3, %v4417_v43 }
0x134a   : > { %8482 = vmatprep.mubr.msk.f32.mxu1 %vm9965_vm1, %v9966_v11 }
0x1350   : > { %v4592_v46 = vpop.f32.mrb[26].mxu0 }
0x1351   : > { %v11217_v48 = vadd.f32 %v8072_v45, %v4592_v46  ;;  %v8479_v29 = vpop.f32.mrb[27].mxu0 }
0x1353   : > { %4771 = vrot.lane.b32.xlu0 %v11217_v48, %s9969_s7  ;;  %4604 = vrot.lane.b32.xlu1 %v11217_v48, %s9968_s28 }
0x1357   : > { %4769 = vrot.lane.b32.xlu1 %v11217_v48, %s9967_s19 }
0x13c5   : > { %v4772_v24 = vpop.permute.xlu0 %4771  ;;  %v4605_v49 = vpop.permute.xlu1 %4604 }
0x13c6   : > { %8481 = vmatpush3.xpose.msk.msra.mxu1 %vm2526_vm3, %v4605_v49  ;;  %8491 = vmatpush3.xpose.msk.msra.mxu0 %vm2526_vm3, %v4772_v24 }
0x13c7   : > { %8485 = vmatprep.subr.mxu1 %v9966_v11  ;;  %8500 = vmatprep.subr.mxu0 %v9966_v11 }
0x13c9   : > { %8483 = vmatmul.mubr.msk.f32.vlgmr.msra.gmra.mrb[30].mxu1 %vm2526_vm3, %v11217_v48  ;;  %v4770_v50 = vpop.permute.xlu1 %4769 }
0x13ca   : > { %8493 = vmatmul.mubr.msk.f32.vlgmr.msra.gmra.mrb[28].mxu0 %vm2526_vm3, %v4770_v50  ;;  %8487 = vmatprep.mubr.msk.f32.mxu1 %vm9965_vm1, %v9966_v11 }
0x13cb   : > { %8502 = vmatprep.mubr.msk.f32.mxu0 %vm9965_vm1, %v9966_v11  ;;  %8501 = vmatpush3.msra.mxu0 %v4597_v13 }
0x13cc   : > { %8510 = vmatprep.subr.mxu0 %v9966_v11 }
0x141c   : > { %v4490_v52 = vpop.f32.mrb[28].mxu1 }
0x141d   : > { %v11236_v53 = vadd.f32 %v4490_v52, %v4253_v23  ;;  %v8468_v54 = vpop.f32.mrb[29].mxu1 }
0x141f   : > { %v4495_v45 = vadd.f32 %v11161_v19, %v11236_v53 }
0x1421   : > { %v4496_v46 = vadd.f32 %v4495_v45, %v10926_v16 }
0x1423   : > { %v4497_v29 = vsel %vm2221_vm2, %v4496_v46, 0.0 }
0x149c   : > { %v4676_v47 = vpop.f32.mrb[30].mxu1 }
0x149d   : > { %v4680_v55 = vmul.f32 0.35355338, %v4676_v47  ;;  %v8484_v56 = vpop.f32.mrb[31].mxu1  ;;  %v4843_v58 = vpop.f32.mrb[28].mxu0 }
0x149e   : > { %v4847_v59 = vmul.f32 0.35355338, %v4843_v58  ;;  %v8494_v60 = vpop.f32.mrb[29].mxu0 }
0x149f   : > { %v4681_v61 = vadd.f32 %v11108_v57, %v4680_v55 }
0x14a0   : > { %v4848_v63 = vadd.f32 %v11108_v57, %v4847_v59  ;;  %v4598_v59 = vld [vmem:[%s10885_s0 + $0x10] sm:$0xff] }
0x14a1   : > { %v4682_v17 = vsel %vm2526_vm3, %v4681_v61, -inf }
0x14a2   : > { %4683 = vmax.xlane.f32.xlu0 %v4682_v17  ;;  %v4849_v0 = vsel %vm2526_vm3, %v4848_v63, -inf }
0x14a3   : > { %4850 = vmax.xlane.f32.xlu1 %v4849_v0 }
0x14b4   : > { %4693 = vrot.lane.b32.xlu1 %v11217_v48, %s9974_s9 }
0x14b8   : > { %5084 = vrot.lane.b32.xlu1 %v11217_v48, %s9971_s11 }
0x14bc   : > { %5082 = vrot.lane.b32.xlu1 %v11217_v48, %s9970_s22 }
0x152f   : > { %v4684_v1 = vpop.xlane.xlu0 %4683 }
0x1530   : > { %v4685_v2 = vsub.f32 %v4681_v61, %v4684_v1  ;;  %v4851_v3 = vpop.xlane.xlu1 %4850 }
0x1531   : > { %v4852_v4 = vsub.f32 %v4848_v63, %v4851_v3 }
0x1532   : > { %v4686_v6 = vmul.f32 1.442695, %v4685_v2 }
0x1533   : > { %v4853_v7 = vmul.f32 1.442695, %v4852_v4 }
0x1534   : > { %9009 = vpow2.f32 %v4686_v6  ;;  %v4694_v51 = vpop.permute.xlu1 %4693 }
0x1535   : > { %8486 = vmatpush3.msra.mxu1 %v4694_v51  ;;  %9011 = vpow2.f32 %v4853_v7 }
0x1536   : > { %8495 = vmatprep.subr.mxu1 %v9966_v11 }
0x1538   : > { %v5085_v32 = vpop.permute.xlu1 %5084 }
0x153c   : > { %v5083_v34 = vpop.permute.xlu1 %5082 }
0x153e   : > { %v9010_v8 = vpop.eup %9009 }
0x153f   : > { %v4688_v9 = vsel %vm2526_vm3, %v9010_v8, 0.0  ;;  %v9012_v10 = vpop.eup %9011 }
0x1540   : > { %4689 = vadd.xlane.f32.xlu0 %v4688_v9  ;;  %v4855_v12 = vsel %vm2526_vm3, %v9012_v10, 0.0 }
0x1544   : > { %4856 = vadd.xlane.f32.xlu0 %v4855_v12 }
0x155a   : > { %4860 = vrot.lane.b32.xlu0 %v11217_v48, %s9975_s2 }
0x15cd   : > { %v4690_v14 = vpop.xlane.xlu0 %4689 }
0x15ce   : > { %9013 = vrcp.f32 %v4690_v14 }
0x15d1   : > { %v4857_v15 = vpop.xlane.xlu0 %4856 }
0x15d2   : > { %9015 = vrcp.f32 %v4857_v15 }
0x15d5   : > { %v4861_v23 = vpop.permute.xlu0 %4860 }
0x15d8   : > { %v9014_v20 = vpop.eup %9013 }
0x15d9   : > { %v4692_v22 = vmul.f32 %v9014_v20, %v9010_v8 }
0x15db   : > { %8488 = vmatmul.mubr.msk.f32.vlgmr.msra.gmra.mrb[32].mxu1 %vm2526_vm3, %v4692_v22 }
0x15dc   : > { %v9016_v25 = vpop.eup %9015  ;;  %8496 = vmatpush3.msra.mxu1 %v4861_v23  ;;  %8497 = vmatprep.mubr.msk.f32.mxu1 %vm9965_vm1, %v9966_v11 }
0x15dd   : > { %v4859_v26 = vmul.f32 %v9016_v25, %v9012_v10  ;;  %8505 = vmatprep.subr.mxu1 %v9966_v11  ;;  %v5599_v25 = vld [vmem:[%s10888_s12] sm:$0xff] }
0x15df   : > { %8498 = vmatmul.mubr.msk.f32.vlgmr.msra.gmra.mrb[34].mxu1 %vm2526_vm3, %v4859_v26  ;;  %v5600_v26 = vld [vmem:[%s10888_s12 + $0x8] sm:$0xff] }
0x15e0   : > { %8507 = vmatprep.mubr.msk.f32.mxu1 %vm9965_vm1, %v9966_v11  ;;  %8506 = vmatpush3.msra.mxu1 %v4596_v27 }
0x15e1   : > { %8515 = vmatprep.subr.mxu1 %v9966_v11 }
0x16ae   : > { %v4765_v28 = vpop.f32.mrb[32].mxu1 }
0x16af   : > { %v8489_v31 = vpop.f32.mrb[33].mxu1  ;;  %8508 = vmatmul.mubr.msk.f32.vlgmr.msra.gmra.mrb[36].mxu1 %vm2526_vm3, %v4765_v28 }
0x16b0   : > { %8517 = vmatprep.mubr.msk.f32.mxu1 %vm9965_vm1, %v9966_v11  ;;  %v8713_v31 = vpack.c.bf16 %v5600_v26, %v5599_v25 }
0x16b2   : > { %v4932_v33 = vpop.f32.mrb[34].mxu1 }
0x16b3   : > { %v8499_v30 = vpop.f32.mrb[35].mxu1  ;;  %8503 = vmatmul.mubr.msk.f32.vlgmr.msra.gmra.mrb[30].mxu0 %vm2526_vm3, %v4932_v33 }
0x16b4   : > { %8511 = vmatpush3.xpose.msk.msra.mxu0 %vm2526_vm3, %v5085_v32  ;;  %8512 = vmatprep.mubr.msk.f32.mxu0 %vm9965_vm1, %v9966_v11  ;;  %v5601_v30 = vld [vmem:[%s10888_s12 + $0x10] sm:$0xff] }
0x16b5   : > { %8520 = vmatprep.subr.mxu0 %v9966_v11 }
0x16b7   : > { %8513 = vmatmul.mubr.msk.f32.vlgmr.msra.gmra.mrb[32].mxu0 %vm2526_vm3, %v5083_v34  ;;  %v5602_v34 = vld [vmem:[%s10888_s12 + $0x18] sm:$0xff]  ;;  %s11854_s12 = scalar_lea.vmem [#allocation17], %s11845_s17 }
0x16b8   : > { %8522 = vmatprep.mubr.msk.f32.mxu0 %vm9965_vm1, %v9966_v11  ;;  %8521 = vmatpush3.msra.mxu0 %v4598_v59 }
0x16b9   : > { %8530 = vmatprep.subr.mxu0 %v9966_v11 }
0x1782   : > { %v5078_v18 = vpop.f32.mrb[36].mxu1 }
0x1783   : > { %v8509_v21 = vpop.f32.mrb[37].mxu1 }
0x1786   : > { %v5005_v35 = vpop.f32.mrb[30].mxu0 }
0x1787   : > { %v11275_v36 = vadd.f32 %v5078_v18, %v5005_v35  ;;  %v8504_v37 = vpop.f32.mrb[31].mxu0  ;;  %v8716_v18 = vpack.c.bf16 %v5602_v34, %v5601_v30 }
0x178a   : > { %v5156_v38 = vpop.f32.mrb[32].mxu0 }
0x178b   : > { %v5160_v39 = vmul.f32 0.35355338, %v5156_v38  ;;  %v8514_v40 = vpop.f32.mrb[33].mxu0 }
0x178d   : > { %v5161_v43 = vadd.f32 %v11108_v57, %v5160_v39 }
0x178f   : > { %v5162_v44 = vsel %vm2526_vm3, %v5161_v43, -inf }
0x1790   : > { %5163 = vmax.xlane.f32.xlu0 %v5162_v44 }
0x17a6   : > { %5173 = vrot.lane.b32.xlu0 %v11217_v48, %s9976_s23 }
0x17aa   : > { %5323 = vrot.lane.b32.xlu0 %v11217_v48, %s9972_s6 }
0x17c9   : > { %4498 = vadd.xlane.f32.xlu0 %v4497_v29 }
0x181d   : > { %v5164_v24 = vpop.xlane.xlu0 %5163 }
0x181e   : > { %v5165_v49 = vsub.f32 %v5161_v43, %v5164_v24 }
0x1820   : > { %v5166_v50 = vmul.f32 1.442695, %v5165_v49 }
0x1821   : > { %v5174_v52 = vpop.permute.xlu0 %5173 }
0x1822   : > { %9017 = vpow2.f32 %v5166_v50  ;;  %8516 = vmatpush3.msra.mxu1 %v5174_v52 }
0x1823   : > { %8525 = vmatprep.subr.mxu1 %v9966_v11 }
0x1825   : > { %v5324_v16 = vpop.permute.xlu0 %5323 }
0x182c   : > { %v9018_v54 = vpop.eup %9017 }
0x182d   : > { %v5168_v47 = vsel %vm2526_vm3, %v9018_v54, 0.0 }
0x182e   : > { %5169 = vadd.xlane.f32.xlu1 %v5168_v47 }
0x183f   : > { %5325 = vrot.lane.b32.xlu1 %v11217_v48, %s9973_s3 }
0x1856   : > { %v4499_v19 = vpop.xlane.xlu0 %4498 }
0x1857   : > { %v4500_v53 = vmul.f32 0.03125, %v4499_v19 }
0x1859   : > { %v4501_v55 = vsub.f32 %v4496_v46, %v4500_v53 }
0x185b   : > { %v4502_v56 = vmul.f32 %v4501_v55, %v4501_v55 }
0x185d   : > { %v4503_v58 = vsel %vm2221_vm2, %v4502_v56, 0.0 }
0x185e   : > { %4504 = vadd.xlane.f32.xlu0 %v4503_v58 }
0x1874   : > { %5414 = vrot.lane.b32.xlu0 %v11217_v48, %s9977_s25 }
0x18bb   : > { %v5170_v60 = vpop.xlane.xlu1 %5169 }
0x18bc   : > { %9019 = vrcp.f32 %v5170_v60 }
0x18bf   : > { %v5326_v17 = vpop.permute.xlu1 %5325 }
0x18c6   : > { %v9020_v61 = vpop.eup %9019 }
0x18c7   : > { %v5172_v63 = vmul.f32 %v9020_v61, %v9018_v54  ;;  %v11358_v54 = vld [vmem:[%s10871_s27] ss:$0 sm:$0xff]  ;;  %s11855_s27 = scalar_lea.vmem [#allocation13], %s11845_s17 }
0x18c9   : > { %8518 = vmatmul.mubr.msk.f32.vlgmr.msra.gmra.mrb[38].mxu1 %vm2526_vm3, %v5172_v63 }
0x18ca   : > { %8526 = vmatpush3.xpose.msk.msra.mxu1 %vm2526_vm3, %v5326_v17  ;;  %8527 = vmatprep.mubr.msk.f32.mxu1 %vm9965_vm1, %v9966_v11 }
0x18cb   : > { %8535 = vmatprep.subr.mxu1 %v9966_v11 }
0x18cd   : > { %8528 = vmatmul.mubr.msk.f32.vlgmr.msra.gmra.mrb[40].mxu1 %vm2526_vm3, %v5324_v16 }
0x18ce   : > { %8537 = vmatprep.mubr.msk.f32.mxu1 %vm9965_vm1, %v9966_v11 }
0x18eb   : > { %v4505_v48 = vpop.xlane.xlu0 %4504 }
0x18ef   : > { %v5415_v1 = vpop.permute.xlu0 %5414 }
0x199c   : > { %v5245_v0 = vpop.f32.mrb[38].mxu1 }
0x199d   : > { %v8519_v2 = vpop.f32.mrb[39].mxu1  ;;  %8523 = vmatmul.mubr.msk.f32.vlgmr.msra.gmra.mrb[34].mxu0 %vm2526_vm3, %v5245_v0 }
0x199e   : > { %8531 = vmatpush3.msra.mxu0 %v5415_v1  ;;  %8532 = vmatprep.mubr.msk.f32.mxu0 %vm9965_vm1, %v9966_v11 }
0x199f   : > { %8712 = vmatprep.subr.bf16.mxu0 %v9964_v5 }
0x19a0   : > { %v5397_v3 = vpop.f32.mrb[40].mxu1 }
0x19a1   : > { %v5401_v4 = vmul.f32 0.35355338, %v5397_v3  ;;  %v8529_v6 = vpop.f32.mrb[41].mxu1 }
0x19a3   : > { %v5402_v7 = vadd.f32 %v11108_v57, %v5401_v4  ;;  %v4506_v57 = vmul.f32 0.03125, %v4505_v48  ;;  %v5684_v4 = vld [vmem:[%s10891_s1 + $0x8] sm:$0xff] }
0x19a5   : > { %v5403_v51 = vsel %vm2526_vm3, %v5402_v7, -inf  ;;  %v4507_v22 = vadd.f32 1e-12, %v4506_v57 }
0x19a6   : > { %5404 = vmax.xlane.f32.xlu1 %v5403_v51 }
0x1a33   : > { %v5405_v8 = vpop.xlane.xlu1 %5404 }
0x1a34   : > { %v5406_v9 = vsub.f32 %v5402_v7, %v5405_v8 }
0x1a36   : > { %v5407_v10 = vmul.f32 1.442695, %v5406_v9 }
0x1a38   : > { %9021 = vpow2.f32 %v5407_v10 }
0x1a39   : > { %9023 = vrsqrt.f32 %v4507_v22 }
0x1a42   : > { %v9022_v12 = vpop.eup %9021 }
0x1a43   : > { %v5409_v13 = vsel %vm2526_vm3, %v9022_v12, 0.0  ;;  %v9024_v27 = vpop.eup %9023 }
0x1a44   : > { %5410 = vadd.xlane.f32.xlu1 %v5409_v13  ;;  %v4509_v32 = vmul.f32 %v9024_v27, %v4501_v55 }
0x1a46   : > { %v4510_v21 = vmul.f32 %v11193_v62, %v4509_v32  ;;  %v8093_v62 = vld [vmem:[%s11854_s12] ss:$0 sm:$0xff] }
0x1a48   : > { %v11322_v35 = vadd.f32 %v11202_v41, %v4510_v21 }
0x1a70   : > { %v5318_v14 = vpop.f32.mrb[34].mxu0 }
0x1a71   : > { %v5322_v15 = vadd.f32 %v5318_v14, %v11275_v36  ;;  %v8524_v20 = vpop.f32.mrb[35].mxu0  ;;  %v4599_v36 = vld [vmem:[%s10885_s0 + $0x18] sm:$0xff]  ;;  %v5683_v14 = vld [vmem:[%s10891_s1] sm:$0xff]  ;;  %s11856_s0 = scalar_lea.vmem [#allocation19], %s11845_s17 }
0x1a72   : > { %8536 = vmatpush3.msra.mxu1 %v4599_v36 }
0x1a73   : > { %8551 = vmatprep.subr.mxu1 %v9966_v11 }
0x1ad1   : > { %v5411_v23 = vpop.xlane.xlu1 %5410 }
0x1ad2   : > { %9025 = vrcp.f32 %v5411_v23 }
0x1adc   : > { %v9026_v28 = vpop.eup %9025 }
0x1add   : > { %v5413_v33 = vmul.f32 %v9026_v28, %v9022_v12 }
0x1adf   : > { %8533 = vmatmul.mubr.msk.f32.vlgmr.msra.gmra.mrb[36].mxu0 %vm2526_vm3, %v5413_v33 }
0x1ae0   : > { %8714 = vmatpush3.bf16.msra.mxu0 %v8713_v31  ;;  %8548 = vmatprep.mubr.msk.f32.mxu0 %vm9965_vm1, %v9966_v11 }
0x1ae1   : > { %8715 = vmatprep.subr.bf16.mxu0 %v9964_v5 }
0x1ae4   : > { %8717 = vmatpush3.bf16.msra.mxu0 %v8716_v18 }
0x1ae5   : > { %8561 = vmatprep.subr.mxu0 %v9966_v11 }
0x1ae7   : > { %8549 = vmatmul.mubr.msk.f32.vlgmr.msra.gmra.mrb[38].mxu0 %vm2221_vm2, %v11322_v35 }
0x1ae8   : > { %8563 = vmatprep.mubr.msk.f32.mxu0 %vm9965_vm1, %v9966_v11 }
0x1bb2   : > { %v5486_v37 = vpop.f32.mrb[36].mxu0 }
0x1bb3   : > { %v8534_v38 = vpop.f32.mrb[37].mxu0  ;;  %8538 = vmatmul.mubr.msk.f32.vlgmr.msra.gmra.mrb[42].mxu1 %vm2526_vm3, %v5486_v37 }
0x1bb4   : > { %8553 = vmatprep.mubr.msk.f32.mxu1 %vm9965_vm1, %v9966_v11 }
0x1bba   : > { %v5679_v41 = vpop.f32.mrb[38].mxu0 }
0x1bbb   : > { %v11336_v39 = vadd.f32 %v8093_v62, %v5679_v41  ;;  %v8550_v40 = vpop.f32.mrb[39].mxu0 }
0x1bbd   : > { %5856 = vrot.lane.b32.xlu0 %v11336_v39, %s9967_s19  ;;  %5691 = vrot.lane.b32.xlu1 %v11336_v39, %s9968_s28  ;;  %s11862_s19 = scalar_lea.vmem [#allocation29], %s11845_s17  ;;  %s11864_s28 = scalar_lea.vmem [#allocation31], %s11845_s17 }
0x1bc1   : > { %5858 = vrot.lane.b32.xlu1 %v11336_v39, %s9969_s7  ;;  %s11865_s7 = scalar_lea.vmem [#allocation26], %s11845_s17 }
0x1c2f   : > { %v5692_v43 = vpop.permute.xlu1 %5691  ;;  %v5857_v45 = vpop.permute.xlu0 %5856 }
0x1c30   : > { %8552 = vmatpush3.xpose.msk.msra.mxu1 %vm2526_vm3, %v5692_v43 }
0x1c31   : > { %8556 = vmatprep.subr.mxu1 %v9966_v11 }
0x1c33   : > { %8554 = vmatmul.mubr.msk.f32.vlgmr.msra.gmra.mrb[44].mxu1 %vm2526_vm3, %v11336_v39  ;;  %v5859_v44 = vpop.permute.xlu1 %5858 }
0x1c34   : > { %8562 = vmatpush3.xpose.msk.msra.mxu0 %vm2526_vm3, %v5859_v44  ;;  %8558 = vmatprep.mubr.msk.f32.mxu1 %vm9965_vm1, %v9966_v11 }
0x1c35   : > { %8571 = vmatprep.subr.mxu0 %v9966_v11 }
0x1c37   : > { %8564 = vmatmul.mubr.msk.f32.vlgmr.msra.gmra.mrb[40].mxu0 %vm2526_vm3, %v5857_v45 }
0x1c38   : > { %8573 = vmatprep.mubr.msk.f32.mxu0 %vm9965_vm1, %v9966_v11  ;;  %8572 = vmatpush3.msra.mxu0 %v5684_v4 }
0x1c39   : > { %8581 = vmatprep.subr.mxu0 %v9966_v11 }
0x1c86   : > { %v5559_v46 = vpop.f32.mrb[42].mxu1 }
0x1c87   : > { %v11355_v29 = vadd.f32 %v5559_v46, %v5322_v15  ;;  %v8539_v24 = vpop.f32.mrb[43].mxu1 }
0x1d06   : > { %v5763_v49 = vpop.f32.mrb[44].mxu1 }
0x1d07   : > { %v5767_v50 = vmul.f32 0.35355338, %v5763_v49  ;;  %v8555_v52 = vpop.f32.mrb[45].mxu1  ;;  %v5685_v49 = vld [vmem:[%s10891_s1 + $0x10] sm:$0xff] }
0x1d09   : > { %v5768_v47 = vadd.f32 %v11358_v54, %v5767_v50 }
0x1d0a   : > { %v5930_v16 = vpop.f32.mrb[40].mxu0 }
0x1d0b   : > { %v5934_v19 = vmul.f32 0.35355338, %v5930_v16  ;;  %v8565_v53 = vpop.f32.mrb[41].mxu0  ;;  %v5769_v55 = vsel %vm2526_vm3, %v5768_v47, -inf }
0x1d0c   : > { %5770 = vmax.xlane.f32.xlu1 %v5769_v55 }
0x1d0d   : > { %v5935_v56 = vadd.f32 %v11358_v54, %v5934_v19 }
0x1d0f   : > { %v5936_v58 = vsel %vm2526_vm3, %v5935_v56, -inf }
0x1d10   : > { %5937 = vmax.xlane.f32.xlu0 %v5936_v58 }
0x1d99   : > { %v5771_v59 = vpop.xlane.xlu1 %5770 }
0x1d9a   : > { %v5772_v60 = vsub.f32 %v5768_v47, %v5771_v59 }
0x1d9c   : > { %v5773_v61 = vmul.f32 1.442695, %v5772_v60 }
0x1d9d   : > { %v5938_v63 = vpop.xlane.xlu0 %5937 }
0x1d9e   : > { %9027 = vpow2.f32 %v5773_v61  ;;  %v5939_v17 = vsub.f32 %v5935_v56, %v5938_v63  ;;  %v8090_v61 = vld [vmem:[%s11855_s27] ss:$0 sm:$0xff] }
0x1d9f   : > { %v5570_v63 = vadd.f32 %v8090_v61, %v11355_v29  ;;  %v6697_v61 = vld [vmem:[%s10897_s29 + $0x30] sm:$0xff] }
0x1da0   : > { %v5940_v48 = vmul.f32 1.442695, %v5939_v17 }
0x1da2   : > { %9029 = vpow2.f32 %v5940_v48  ;;  %v5571_v48 = vadd.f32 %v5570_v63, %v11205_v42  ;;  %v6698_v63 = vld [vmem:[%s10897_s29 + $0x38] sm:$0xff] }
0x1da8   : > { %v9028_v0 = vpop.eup %9027 }
0x1da9   : > { %v5775_v1 = vsel %vm2526_vm3, %v9028_v0, 0.0 }
0x1daa   : > { %5776 = vadd.xlane.f32.xlu0 %v5775_v1 }
0x1dac   : > { %v9030_v2 = vpop.eup %9029 }
0x1dad   : > { %v5942_v3 = vsel %vm2526_vm3, %v9030_v2, 0.0 }
0x1dae   : > { %5943 = vadd.xlane.f32.xlu1 %v5942_v3 }
0x1dbf   : > { %5947 = vrot.lane.b32.xlu1 %v11336_v39, %s9975_s2 }
0x1dc0   : > { %5780 = vrot.lane.b32.xlu0 %v11336_v39, %s9974_s9 }
0x1dc3   : > { %6171 = vrot.lane.b32.xlu1 %v11336_v39, %s9971_s11  ;;  %s11867_s11 = scalar_lea.vmem [#allocation32], %s11845_s17 }
0x1dc4   : > { %6169 = vrot.lane.b32.xlu0 %v11336_v39, %s9970_s22  ;;  %s11866_s22 = scalar_lea.vmem [#allocation28], %s11845_s17 }
0x1e37   : > { %v5777_v6 = vpop.xlane.xlu0 %5776 }
0x1e38   : > { %9031 = vrcp.f32 %v5777_v6 }
0x1e3b   : > { %v5781_v7 = vpop.permute.xlu0 %5780  ;;  %v5944_v51 = vpop.xlane.xlu1 %5943 }
0x1e3c   : > { %9033 = vrcp.f32 %v5944_v51  ;;  %8557 = vmatpush3.msra.mxu1 %v5781_v7 }
0x1e3d   : > { %8566 = vmatprep.subr.mxu1 %v9966_v11 }
0x1e3f   : > { %v5948_v10 = vpop.permute.xlu1 %5947  ;;  %v6170_v25 = vpop.permute.xlu0 %6169 }
0x1e42   : > { %v9032_v8 = vpop.eup %9031 }
0x1e43   : > { %v5779_v9 = vmul.f32 %v9032_v8, %v9028_v0  ;;  %v6172_v22 = vpop.permute.xlu1 %6171  ;;  %v5686_v0 = vld [vmem:[%s10891_s1 + $0x18] sm:$0xff]  ;;  %s11857_s1 = scalar_lea.vmem [#allocation14], %s11845_s17 }
0x1e45   : > { %8559 = vmatmul.mubr.msk.f32.vlgmr.msra.gmra.mrb[46].mxu1 %vm2526_vm3, %v5779_v9  ;;  %v8111_v9 = vld [vmem:[%s11856_s0] ss:$0 sm:$0xff] }
0x1e46   : > { %v9034_v12 = vpop.eup %9033  ;;  %8567 = vmatpush3.msra.mxu1 %v5948_v10  ;;  %8568 = vmatprep.mubr.msk.f32.mxu1 %vm9965_vm1, %v9966_v11 }
0x1e47   : > { %v5946_v13 = vmul.f32 %v9034_v12, %v9030_v2  ;;  %8576 = vmatprep.subr.mxu1 %v9966_v11 }
0x1e49   : > { %8569 = vmatmul.mubr.msk.f32.vlgmr.msra.gmra.mrb[48].mxu1 %vm2526_vm3, %v5946_v13 }
0x1e4a   : > { %8578 = vmatprep.mubr.msk.f32.mxu1 %vm9965_vm1, %v9966_v11  ;;  %8577 = vmatpush3.msra.mxu1 %v5683_v14 }
0x1e4b   : > { %8586 = vmatprep.subr.mxu1 %v9966_v11 }
0x1f18   : > { %v5852_v15 = vpop.f32.mrb[46].mxu1 }
0x1f19   : > { %v8560_v20 = vpop.f32.mrb[47].mxu1  ;;  %8579 = vmatmul.mubr.msk.f32.vlgmr.msra.gmra.mrb[50].mxu1 %vm2526_vm3, %v5852_v15 }
0x1f1a   : > { %8588 = vmatprep.mubr.msk.f32.mxu1 %vm9965_vm1, %v9966_v11 }
0x1f1c   : > { %v6019_v57 = vpop.f32.mrb[48].mxu1 }
0x1f1d   : > { %v8570_v23 = vpop.f32.mrb[49].mxu1  ;;  %8574 = vmatmul.mubr.msk.f32.vlgmr.msra.gmra.mrb[42].mxu0 %vm2526_vm3, %v6019_v57 }
0x1f1e   : > { %8582 = vmatpush3.xpose.msk.msra.mxu0 %vm2526_vm3, %v6172_v22  ;;  %8583 = vmatprep.mubr.msk.f32.mxu0 %vm9965_vm1, %v9966_v11 }
0x1f1f   : > { %8591 = vmatprep.subr.mxu0 %v9966_v11 }
0x1f21   : > { %8584 = vmatmul.mubr.msk.f32.vlgmr.msra.gmra.mrb[44].mxu0 %vm2526_vm3, %v6170_v25  ;;  %v6686_v25 = vld [vmem:[%s10894_s5] sm:$0xff] }
0x1f22   : > { %8593 = vmatprep.mubr.msk.f32.mxu0 %vm9965_vm1, %v9966_v11  ;;  %8592 = vmatpush3.msra.mxu0 %v5685_v49  ;;  %v6900_v49 = vld [vmem:[%s10900_s4 + $0x10] sm:$0xff] }
0x1f23   : > { %8601 = vmatprep.subr.mxu0 %v9966_v11 }
0x1fec   : > { %v6165_v26 = vpop.f32.mrb[50].mxu1 }
0x1fed   : > { %v8580_v27 = vpop.f32.mrb[51].mxu1 }
0x1ff0   : > { %v6092_v28 = vpop.f32.mrb[42].mxu0 }
0x1ff1   : > { %v11397_v31 = vadd.f32 %v6165_v26, %v6092_v28  ;;  %v8575_v32 = vpop.f32.mrb[43].mxu0  ;;  %v6687_v26 = vld [vmem:[%s10894_s5 + $0x8] sm:$0xff]  ;;  %v6688_v28 = vld [vmem:[%s10894_s5 + $0x10] sm:$0xff] }
0x1ff2   : > { %v8719_v27 = vpack.c.bf16 %v6687_v26, %v6686_v25  ;;  %v6905_v25 = vld [vmem:[%s10903_s30 + $0x10] sm:$0xff]  ;;  %v6906_v26 = vld [vmem:[%s10903_s30 + $0x18] sm:$0xff] }
0x1ff4   : > { %v6243_v33 = vpop.f32.mrb[44].mxu0 }
0x1ff5   : > { %v6247_v30 = vmul.f32 0.35355338, %v6243_v33  ;;  %v8585_v34 = vpop.f32.mrb[45].mxu0 }
0x1ff7   : > { %v6248_v18 = vadd.f32 %v11358_v54, %v6247_v30 }
0x1ff9   : > { %v6249_v21 = vsel %vm2526_vm3, %v6248_v18, -inf }
0x1ffa   : > { %6250 = vmax.xlane.f32.xlu1 %v6249_v21 }
0x200b   : > { %6412 = vrot.lane.b32.xlu1 %v11336_v39, %s9973_s3  ;;  %s11869_s3 = sld [smem:[#allocation101_spill]] }
0x200f   : > { %6410 = vrot.lane.b32.xlu1 %v11336_v39, %s9972_s6  ;;  %s11868_s6 = scalar_lea.vmem [#allocation34], %s11845_s17 }
0x2011   : > { %p8126_p0 = scmp.ne.s32.totalorder %s11869_s3, 4 }
0x2012   : > { %s11870_s8 = sld [smem:[#allocation91_spill]] (!%p8126_p0)  ;;  %vm9979_vm5 = vmmov (!%p8126_p0), 0   ;;  %vm7194_vm6 = vcmask (!%p8126_p0), 253952  }
0x2087   : > { %v6251_v36 = vpop.xlane.xlu1 %6250 }
0x2088   : > { %v6252_v37 = vsub.f32 %v6248_v18, %v6251_v36 }
0x208a   : > { %v6253_v38 = vmul.f32 1.442695, %v6252_v37 }
0x208b   : > { %v6413_v45 = vpop.permute.xlu1 %6412 }
0x208c   : > { %9035 = vpow2.f32 %v6253_v38 }
0x208f   : > { %v6411_v24 = vpop.permute.xlu1 %6410 }
0x2096   : > { %v9036_v62 = vpop.eup %9035 }
0x2097   : > { %v6255_v41 = vsel %vm2526_vm3, %v9036_v62, 0.0 }
0x2098   : > { %6256 = vadd.xlane.f32.xlu0 %v6255_v41 }
0x20ae   : > { %6260 = vrot.lane.b32.xlu0 %v11336_v39, %s9976_s23 }
0x2125   : > { %v6257_v40 = vpop.xlane.xlu0 %6256 }
0x2126   : > { %9037 = vrcp.f32 %v6257_v40 }
0x2129   : > { %v6261_v43 = vpop.permute.xlu0 %6260 }
0x212a   : > { %8587 = vmatpush3.msra.mxu1 %v6261_v43 }
0x212b   : > { %8596 = vmatprep.subr.mxu1 %v9966_v11 }
0x2130   : > { %v9038_v44 = vpop.eup %9037 }
0x2131   : > { %v6259_v46 = vmul.f32 %v9038_v44, %v9036_v62  ;;  %v8091_v62 = vld [vmem:[%s11857_s1] ss:$0 sm:$0xff] }
0x2133   : > { %8589 = vmatmul.mubr.msk.f32.vlgmr.msra.gmra.mrb[52].mxu1 %vm2526_vm3, %v6259_v46  ;;  %v6899_v46 = vld [vmem:[%s10900_s4 + $0x8] sm:$0xff] }
0x2134   : > { %8597 = vmatpush3.xpose.msk.msra.mxu1 %vm2526_vm3, %v6413_v45  ;;  %8598 = vmatprep.mubr.msk.f32.mxu1 %vm9965_vm1, %v9966_v11  ;;  %v6898_v45 = vld [vmem:[%s10900_s4] sm:$0xff] }
0x2135   : > { %8606 = vmatprep.subr.mxu1 %v9966_v11 }
0x2137   : > { %8599 = vmatmul.mubr.msk.f32.vlgmr.msra.gmra.mrb[54].mxu1 %vm2526_vm3, %v6411_v24  ;;  %v8737_v24 = vpack.c.bf16 %v6899_v46, %v6898_v45 }
0x2138   : > { %8608 = vmatprep.mubr.msk.f32.mxu1 %vm9965_vm1, %v9966_v11  ;;  %8607 = vmatpush3.msra.mxu1 %v5686_v0 }
0x2139   : > { %8724 = vmatprep.subr.bf16.mxu1 %v9964_v5 }
0x2206   : > { %v6332_v50 = vpop.f32.mrb[52].mxu1 }
0x2207   : > { %v8590_v52 = vpop.f32.mrb[53].mxu1  ;;  %8594 = vmatmul.mubr.msk.f32.vlgmr.msra.gmra.mrb[46].mxu0 %vm2526_vm3, %v6332_v50  ;;  %v6901_v50 = vld [vmem:[%s10900_s4 + $0x18] sm:$0xff]  ;;  %s11859_s4 = scalar_lea.vmem [#allocation20], %s11845_s17 }
0x2208   : > { %8603 = vmatprep.mubr.msk.f32.mxu0 %vm9965_vm1, %v9966_v11  ;;  %v8740_v52 = vpack.c.bf16 %v6901_v50, %v6900_v49 }
0x220a   : > { %v6484_v47 = vpop.f32.mrb[54].mxu1 }
0x220b   : > { %v6488_v16 = vmul.f32 0.35355338, %v6484_v47  ;;  %v8600_v19 = vpop.f32.mrb[55].mxu1  ;;  %v6691_v47 = vld [vmem:[%s10897_s29] sm:$0xff] }
0x220d   : > { %v6489_v53 = vadd.f32 %v11358_v54, %v6488_v16  ;;  %v6692_v16 = vld [vmem:[%s10897_s29 + $0x8] sm:$0xff] }
0x220e   : > { %v8725_v19 = vpack.c.bf16 %v6692_v16, %v6691_v47 }
0x220f   : > { %v6490_v55 = vsel %vm2526_vm3, %v6489_v53, -inf }
0x2210   : > { %6491 = vmax.xlane.f32.xlu0 %v6490_v55  ;;  %v6694_v55 = vld [vmem:[%s10897_s29 + $0x18] sm:$0xff] }
0x2226   : > { %6501 = vrot.lane.b32.xlu0 %v11336_v39, %s9977_s25  ;;  %v5572_v39 = vsel %vm2221_vm2, %v5571_v48, 0.0 }
0x229d   : > { %v6492_v56 = vpop.xlane.xlu0 %6491 }
0x229e   : > { %v6493_v58 = vsub.f32 %v6489_v53, %v6492_v56  ;;  %v6693_v53 = vld [vmem:[%s10897_s29 + $0x10] sm:$0xff] }
0x229f   : > { %v8728_v56 = vpack.c.bf16 %v6694_v55, %v6693_v53 }
0x22a0   : > { %v6494_v59 = vmul.f32 1.442695, %v6493_v58  ;;  %v6695_v58 = vld [vmem:[%s10897_s29 + $0x20] sm:$0xff] }
0x22a1   : > { %v6502_v60 = vpop.permute.xlu0 %6501 }
0x22a2   : > { %9039 = vpow2.f32 %v6494_v59  ;;  %8602 = vmatpush3.msra.mxu0 %v6502_v60  ;;  %v6696_v59 = vld [vmem:[%s10897_s29 + $0x28] sm:$0xff]  ;;  %s11861_s29 = scalar_lea.vmem [#allocation23], %s11845_s17 }
0x22a3   : > { %8718 = vmatprep.subr.bf16.mxu0 %v9964_v5  ;;  %v8731_v60 = vpack.c.bf16 %v6696_v59, %v6695_v58 }
0x22ac   : > { %v9040_v54 = vpop.eup %9039 }
0x22ad   : > { %v6496_v17 = vsel %vm2526_vm3, %v9040_v54, 0.0 }
0x22ae   : > { %6497 = vadd.xlane.f32.xlu1 %v6496_v17 }
0x22b2   : > { %5573 = vadd.xlane.f32.xlu1 %v5572_v39 }
0x22da   : > { %v6405_v1 = vpop.f32.mrb[46].mxu0 }
0x22db   : > { %v6409_v2 = vadd.f32 %v6405_v1, %v11397_v31  ;;  %v8595_v3 = vpop.f32.mrb[47].mxu0  ;;  %v6689_v31 = vld [vmem:[%s10894_s5 + $0x18] sm:$0xff]  ;;  %s11858_s5 = scalar_lea.vmem [#allocation16], %s11845_s17  ;;  %v8112_v1 = vld [vmem:[%s11859_s4] ss:$0 sm:$0xff] }
0x22dc   : > { %v8722_v32 = vpack.c.bf16 %v6689_v31, %v6688_v28  ;;  %v8092_v40 = vld [vmem:[%s11858_s5] ss:$0 sm:$0xff]  ;;  %v6908_v31 = vld [vmem:[%s10903_s30 + $0x28] sm:$0xff] }
0x22dd   : > { %v8113_v3 = vld [vmem:[%s11860_s14] ss:$0 sm:$0xff] }
0x22de   : > { %v6907_v28 = vld [vmem:[%s10903_s30 + $0x20] sm:$0xff] }
0x233b   : > { %v6498_v4 = vpop.xlane.xlu1 %6497 }
0x233c   : > { %9041 = vrcp.f32 %v6498_v4 }
0x233f   : > { %v5574_v51 = vpop.xlane.xlu1 %5573 }
0x2340   : > { %v5575_v8 = vmul.f32 0.03125, %v5574_v51 }
0x2342   : > { %v5576_v14 = vsub.f32 %v5571_v48, %v5575_v8 }
0x2344   : > { %v5577_v22 = vmul.f32 %v5576_v14, %v5576_v14 }
0x2346   : > { %v9042_v29 = vpop.eup %9041  ;;  %v5578_v23 = vsel %vm2221_vm2, %v5577_v22, 0.0  ;;  %v6904_v22 = vld [vmem:[%s10903_s30 + $0x8] sm:$0xff] }
0x2347   : > { %v6500_v6 = vmul.f32 %v9042_v29, %v9040_v54  ;;  %v8734_v54 = vpack.c.bf16 %v6698_v63, %v6697_v61 }
0x2349   : > { %8604 = vmatmul.mubr.msk.f32.vlgmr.msra.gmra.mrb[48].mxu0 %vm2526_vm3, %v6500_v6  ;;  %v8114_v6 = vld [vmem:[%s11861_s29] ss:$0 sm:$0xff] }
0x234a   : > { %8619 = vmatprep.mubr.msk.f32.mxu0 %vm9965_vm1, %v9966_v11  ;;  %8720 = vmatpush3.bf16.msra.mxu0 %v8719_v27  ;;  %v8746_v27 = vpack.c.bf16 %v6906_v26, %v6905_v25  ;;  %v7117_v25 = vld [vmem:[%s11870_s8 + $0x10] sm:$0xff] (!%p8126_p0)  ;;  %v9978_v26 = vmov (!%p8126_p0), 0.0|0.0  }
0x234b   : > { %8721 = vmatprep.subr.bf16.mxu0 %v9964_v5 }
0x234e   : > { %8723 = vmatpush3.bf16.msra.mxu0 %v8722_v32  ;;  %v8749_v32 = vpack.c.bf16 %v6908_v31, %v6907_v28  ;;  %v7118_v28 = vld [vmem:[%s11870_s8 + $0x18] sm:$0xff] (!%p8126_p0)  ;;  %v9980_v31 = vmov (!%p8126_p0), 0.0  }
0x234f   : > { %8736 = vmatprep.subr.bf16.mxu0 %v9964_v5 }
0x241c   : > { %v6573_v42 = vpop.f32.mrb[48].mxu0 }
0x241d   : > { %v8605_v7 = vpop.f32.mrb[49].mxu0  ;;  %8609 = vmatmul.mubr.msk.f32.vlgmr.msra.gmra.mrb[56].mxu1 %vm2526_vm3, %v6573_v42 }
0x241e   : > { %8638 = vmatprep.mubr.msk.f32.mxu1 %vm9965_vm1, %v9966_v11  ;;  %8726 = vmatpush3.bf16.msra.mxu1 %v8725_v19  ;;  %v8122_v19 = vld [vmem:[%s11864_s28] ss:$0 sm:$0xff] }
0x241f   : > { %8727 = vmatprep.subr.bf16.mxu1 %v9964_v5 }
0x2422   : > { %8729 = vmatpush3.bf16.msra.mxu1 %v8728_v56 }
0x2423   : > { %8730 = vmatprep.subr.bf16.mxu1 %v9964_v5 }
0x2426   : > { %8732 = vmatpush3.bf16.msra.mxu1 %v8731_v60 }
0x2427   : > { %8733 = vmatprep.subr.bf16.mxu1 %v9964_v5 }
0x242a   : > { %8735 = vmatpush3.bf16.msra.mxu1 %v8734_v54 }
0x24f0   : > { %v6646_v10 = vpop.f32.mrb[56].mxu1 }
0x24f1   : > { %v6650_v12 = vadd.f32 %v6646_v10, %v6409_v2  ;;  %v8610_v13 = vpop.f32.mrb[57].mxu1 }
0x24f3   : > { %v6657_v15 = vadd.f32 %v8111_v9, %v6650_v12 }
0x24f5   : > { %v6658_v20 = vadd.f32 %v6657_v15, %v11322_v35 }
0x24f7   : > { %v6659_v57 = vsel %vm2221_vm2, %v6658_v20, 0.0 }
0x24f8   : > { %6660 = vadd.xlane.f32.xlu1 %v6659_v57  ;;  %v6903_v57 = vld [vmem:[%s10903_s30] sm:$0xff] }
0x24fc   : > { %5579 = vadd.xlane.f32.xlu1 %v5578_v23  ;;  %v8743_v23 = vpack.c.bf16 %v6904_v22, %v6903_v57  ;;  %v7115_v22 = vld [vmem:[%s11870_s8] sm:$0xff] (!%p8126_p0) }
0x2585   : > { %v6661_v35 = vpop.xlane.xlu1 %6660 }
0x2586   : > { %v6662_v33 = vmul.f32 0.03125, %v6661_v35  ;;  %v6909_v35 = vld [vmem:[%s10903_s30 + $0x30] sm:$0xff] }
0x2588   : > { %v6663_v30 = vsub.f32 %v6658_v20, %v6662_v33  ;;  %v6910_v33 = vld [vmem:[%s10903_s30 + $0x38] sm:$0xff]  ;;  %s11863_s30 = scalar_lea.vmem [#allocation25], %s11845_s17 }
0x2589   : > { %v5580_v34 = vpop.xlane.xlu1 %5579 }
0x258a   : > { %v5581_v18 = vmul.f32 0.03125, %v5580_v34  ;;  %v6664_v21 = vmul.f32 %v6663_v30, %v6663_v30  ;;  %v8120_v34 = vld [vmem:[%s11862_s19] ss:$0 sm:$0xff] }
0x258c   : > { %v5582_v36 = vadd.f32 1e-12, %v5581_v18  ;;  %v6665_v37 = vsel %vm2221_vm2, %v6664_v21, 0.0 }
0x258d   : > { %6666 = vadd.xlane.f32.xlu1 %v6665_v37 }
0x258e   : > { %9043 = vrsqrt.f32 %v5582_v36 }
0x2598   : > { %v9044_v38 = vpop.eup %9043 }
0x2599   : > { %v5584_v41 = vmul.f32 %v9044_v38, %v5576_v14 }
0x259b   : > { %v5591_v43 = vmul.f32 %v8091_v62, %v5584_v41 }
0x259d   : > { %v11458_v44 = vadd.f32 %v8092_v40, %v5591_v43 }
0x259f   : > { %8620 = vmatmul.mubr.msk.f32.vlgmr.msra.gmra.mrb[50].mxu0 %vm2221_vm2, %v11458_v44 }
0x25a0   : > { %8649 = vmatprep.mubr.msk.f32.mxu0 %vm9965_vm1, %v9966_v11  ;;  %8738 = vmatpush3.bf16.msra.mxu0 %v8737_v24 }
0x25a1   : > { %8739 = vmatprep.subr.bf16.mxu0 %v9964_v5 }
0x25a4   : > { %8741 = vmatpush3.bf16.msra.mxu0 %v8740_v52 }
0x25a5   : > { %8742 = vmatprep.subr.bf16.mxu0 %v9964_v5 }
0x261a   : > { %v6667_v17 = vpop.xlane.xlu1 %6666 }
0x261b   : > { %v6668_v48 = vmul.f32 0.03125, %v6667_v17 }
0x261d   : > { %v6669_v39 = vadd.f32 1e-12, %v6668_v48 }
0x261f   : > { %9045 = vrsqrt.f32 %v6669_v39 }
0x2629   : > { %v9046_v0 = vpop.eup %9045 }
0x262a   : > { %v6671_v2 = vmul.f32 %v9046_v0, %v6663_v30  ;;  %v8752_v30 = vpack.c.bf16 %v6910_v33, %v6909_v35  ;;  %v7119_v35 = vld [vmem:[#allocation35] sm:$0x1] (!%p8126_p0) }
0x262c   : > { %v6678_v4 = vmul.f32 %v8112_v1, %v6671_v2 }
0x262e   : > { %v11485_v29 = vadd.f32 %v8113_v3, %v6678_v4 }
0x2630   : > { %8650 = vmatmul.mubr.msk.f32.vlgmr.msra.gmra.mrb[52].mxu0 %vm2221_vm2, %v11485_v29 }
0x2631   : > { %8668 = vmatprep.mubr.msk.f32.mxu0 %vm9965_vm1, %v9966_v11  ;;  %8744 = vmatpush3.bf16.msra.mxu0 %v8743_v23  ;;  %v7116_v23 = vld [vmem:[%s11870_s8 + $0x8] sm:$0xff] (!%p8126_p0) }
0x2632   : > { %8745 = vmatprep.subr.bf16.mxu0 %v9964_v5 }
0x2635   : > { %8747 = vmatpush3.bf16.msra.mxu0 %v8746_v27  ;;  %v8755_v27 = vpack.c.bf16 (!%p8126_p0), %v7116_v23, %v7115_v22 }
0x2636   : > { %8748 = vmatprep.subr.bf16.mxu0 %v9964_v5 }
0x2639   : > { %8750 = vmatpush3.bf16.msra.mxu0 %v8749_v32  ;;  %v8758_v32 = vpack.c.bf16 (!%p8126_p0), %v7118_v28, %v7117_v25 }
0x263a   : > { %8751 = vmatprep.subr.bf16.mxu0 %v9964_v5  ;;  %v8116_v5 = vld [vmem:[%s11863_s30] ss:$0 sm:$0xff] }
0x263d   : > { %8753 = vmatpush3.bf16.msra.mxu0 %v8752_v30 }
0x263e   : > { %8754 = vmatprep.subr.bf16.mxu0 (!%p8126_p0), %v9978_v26 }
0x2672   : > { %v6777_v42 = vpop.f32.mrb[50].mxu0 }
0x2673   : > { %v6778_v7 = vadd.f32 %v8114_v6, %v6777_v42  ;;  %v8621_v51 = vpop.f32.mrb[51].mxu0  ;;  %v8118_v6 = vld [vmem:[%s11865_s7] ss:$0 sm:$0xff] }
0x2675   : > { %v6782_v8 = vmul.f32 0.044715, %v6778_v7  ;;  %v6781_v15 = vmul.f32 0.5, %v6778_v7 }
0x2677   : > { %v6783_v9 = vmul.f32 %v6782_v8, %v6778_v7 }
0x2679   : > { %v6784_v10 = vmul.f32 %v6783_v9, %v6778_v7 }
0x267b   : > { %v6785_v12 = vadd.f32 %v6784_v10, %v6778_v7  ;;  %v8119_v7 = vld [vmem:[%s11866_s22] ss:$0 sm:$0xff] }
0x267d   : > { %v6786_v13 = vmul.f32 0.7978846, %v6785_v12 }
0x267f   : > { %9047 = vtanh.f32 %v6786_v13 }
0x2689   : > { %v9048_v14 = vpop.eup %9047 }
0x268a   : > { %v6788_v11 = vadd.f32 1.0, %v9048_v14  ;;  %v8124_v14 = vld [vmem:[%s11867_s11] ss:$0 sm:$0xff] }
0x268c   : > { %v6789_v20 = vmul.f32 %v6788_v11, %v6781_v15  ;;  %v8125_v11 = vld [vmem:[%s11868_s6] ss:$0 sm:$0xff] }
0x268e   : > { %8639 = vmatmul.mubr.msk.f32.vlgmr.msra.gmra.mrb[58].mxu1 %vm6796_vm4, %v6789_v20 }
0x2703   : > { %v6989_v18 = vpop.f32.mrb[52].mxu0 }
0x2704   : > { %v6990_v21 = vadd.f32 %v8120_v34, %v6989_v18  ;;  %v8651_v36 = vpop.f32.mrb[53].mxu0 }
0x2706   : > { %v6994_v37 = vmul.f32 0.044715, %v6990_v21  ;;  %v6993_v45 = vmul.f32 0.5, %v6990_v21 }
0x2708   : > { %v6995_v38 = vmul.f32 %v6994_v37, %v6990_v21 }
0x270a   : > { %v6996_v62 = vmul.f32 %v6995_v38, %v6990_v21 }
0x270c   : > { %v6997_v41 = vadd.f32 %v6996_v62, %v6990_v21 }
0x270e   : > { %v6998_v40 = vmul.f32 0.7978846, %v6997_v41 }
0x2710   : > { %9049 = vtanh.f32 %v6998_v40 }
0x271a   : > { %v9050_v43 = vpop.eup %9049 }
0x271b   : > { %v7000_v46 = vadd.f32 1.0, %v9050_v43 }
0x271d   : > { %v7001_v24 = vmul.f32 %v7000_v46, %v6993_v45 }
0x271f   : > { %8669 = vmatmul.mubr.msk.f32.vlgmr.msra.gmra.mrb[54].mxu0 %vm6796_vm4, %v7001_v24 }
0x2720   : > { %8679 = vmatprep.mubr.msk.f32.mxu0 (!%p8126_p0), %vm9979_vm5, %v9980_v31  ;;  %8756 = vmatpush3.bf16.msra.mxu0 (!%p8126_p0), %v8755_v27 }
0x2721   : > { %8757 = vmatprep.subr.bf16.mxu0 (!%p8126_p0), %v9978_v26 }
0x2724   : > { %8759 = vmatpush3.bf16.msra.mxu0 (!%p8126_p0), %v8758_v32 }
0x2761   : > { %v6866_v49 = vpop.f32.mrb[58].mxu1 }
0x2762   : > { %v6867_v50 = vadd.f32 %v8116_v5, %v6866_v49  ;;  %v8640_v52 = vpop.f32.mrb[59].mxu1 }
0x2764   : > { %v6870_v47 = vadd.f32 %v6867_v50, %v11458_v44 }
0x2766   : > { %v6871_v16 = vsel %vm2221_vm2, %v6870_v47, 0.0 }
0x2767   : > { %6872 = vadd.xlane.f32.xlu0 %v6871_v16 }
0x27f2   : > { %v7077_v53 = vpop.f32.mrb[54].mxu0 }
0x27f3   : > { %v7078_v55 = vadd.f32 %v8122_v19, %v7077_v53  ;;  %v8670_v56 = vpop.f32.mrb[55].mxu0 }
0x27f4   : > { %v6873_v58 = vpop.xlane.xlu0 %6872 }
0x27f5   : > { %v6874_v59 = vmul.f32 0.03125, %v6873_v58  ;;  %v7081_v60 = vadd.f32 %v7078_v55, %v11485_v29 }
0x27f7   : > { %v6875_v61 = vsub.f32 %v6870_v47, %v6874_v59  ;;  %v7082_v63 = vsel %vm2221_vm2, %v7081_v60, 0.0 }
0x27f8   : > { %7083 = vadd.xlane.f32.xlu1 %v7082_v63 }
0x27f9   : > { %v6876_v54 = vmul.f32 %v6875_v61, %v6875_v61 }
0x27fb   : > { %v6877_v44 = vsel %vm2221_vm2, %v6876_v54, 0.0 }
0x27fc   : > { %6878 = vadd.xlane.f32.xlu1 %v6877_v44 }
0x2885   : > { %v7084_v17 = vpop.xlane.xlu1 %7083 }
0x2886   : > { %v7085_v48 = vmul.f32 0.03125, %v7084_v17 }
0x2888   : > { %v7086_v39 = vsub.f32 %v7081_v60, %v7085_v48 }
0x2889   : > { %v6879_v0 = vpop.xlane.xlu1 %6878 }
0x288a   : > { %v6880_v1 = vmul.f32 0.03125, %v6879_v0  ;;  %v7087_v2 = vmul.f32 %v7086_v39, %v7086_v39 }
0x288c   : > { %v6881_v3 = vadd.f32 1e-12, %v6880_v1  ;;  %v7088_v4 = vsel %vm2221_vm2, %v7087_v2, 0.0 }
0x288d   : > { %7089 = vadd.xlane.f32.xlu1 %v7088_v4 }
0x288e   : > { %9051 = vrsqrt.f32 %v6881_v3 }
0x2898   : > { %v9052_v29 = vpop.eup %9051 }
0x2899   : > { %v6883_v42 = vmul.f32 %v9052_v29, %v6875_v61 }
0x289b   : > { %v6890_v51 = vmul.f32 %v8118_v6, %v6883_v42 }
0x289d   : > { %v6897_v8 = vadd.f32 %v8119_v7, %v6890_v51 }
0x289f   : > { %7109 = vst.msk [vmem:[%s10905_s13] sm:$0xff] %vm2221_vm2, %v6897_v8  ;;  %8680 = vmatmul.mubr.msk.f32.vlgmr.msra.gmra.mrb[0].mxu0 (!%p8126_p0), %vm2221_vm2, %v6897_v8 }
0x291a   : > { %v7090_v9 = vpop.xlane.xlu1 %7089 }
0x291b   : > { %v7091_v10 = vmul.f32 0.03125, %v7090_v9 }
0x291d   : > { %v7092_v12 = vadd.f32 1e-12, %v7091_v10 }
0x291f   : > { %9053 = vrsqrt.f32 %v7092_v12 }
0x2929   : > { %v9054_v13 = vpop.eup %9053 }
0x292a   : > { %v7094_v15 = vmul.f32 %v9054_v13, %v7086_v39  ;;  %7114 = sbr.rel (%p8126_p0) target bundleno = 10625 (0x2981), region = 268 }
0x292c   : > { %v7101_v20 = vmul.f32 %v8124_v14, %v7094_v15 }
0x292e   : > { %v7108_v57 = vadd.f32 %v8125_v11, %v7101_v20 }
0x2930   : > { %7110 = vst.msk [vmem:[%s10907_s21] sm:$0xff] %vm2221_vm2, %v7108_v57 }
0x2972   : > { %v7189_v33 = vpop.f32.mrb[0].mxu0 }
0x2973   : > { %v7190_v30 = vadd.f32 %v7189_v33, %v7119_v35  ;;  %v8681_v34 = vpop.f32.mrb[1].mxu0 }
0x2975   : > { %9056 = vtanh.f32 %v7190_v30 }
0x297f   : > { %v9057_v18 = vpop.eup %9056 }
0x2980   : > { %7195 = vst.msk [vmem:[%s2127_s16] sm:$0x1] %vm7194_vm6, %v9057_v18 }
0x2981 PF: > { %s11871_s17 = sld [smem:[#allocation102_spill]]  ;;  %s11872_s24 = sld [smem:[#allocation94_spill]] }
0x2982   : > { %s11873_s26 = sld [smem:[#allocation113_spill]]  ;;  %s11874_s20 = sld [smem:[#allocation110_spill]] }
0x2983   : > { %s7232_s9 = sshll.u32 %s10907_s21, 4  ;;  %s9981_s25 = smov [#allocation38]   ;;  %s7233_s9 = int_to_ptr.vmem [resolvable:$true] %s7232_s9 }
0x2984   : > { %s9674_s23 = scalar_lea.vmem %s7233_s9, 128  ;;  %s9678_s12 = sshll.u32 %s9981_s25, 4  ;;  %s9679_s12 = int_to_ptr.vmem [resolvable:$false] %s9678_s12 }
0x2985   : > { %p9675_p12 = scmp.ne.s32.totalorder %s7233_s9, %s9674_s23  ;;  %s9680_s27 = scalar_lea.vmem %s9679_s12, 256 }
0x2986   : > { %p9681_p13 = scmp.lt.s32.totalorder %s7233_s9, %s9679_s12  ;;  %p9682_p3 = scmp.lt.s32.totalorder %s9680_s27, %s9674_s23 }
0x2987   : > { %s8130_s15 = sshll.u32 %s11871_s17, 7 }
0x2988   : > { %s11542_s18 = scalar_lea.hbm %s11872_s24, %s8130_s15  ;;  %s7202_s2 = scalar_lea.sflag [#allocation39], %s11873_s26 }
0x2989   : > { %p11875_p9 = scmp.ne.s32.totalorder %s11874_s20, 0  ;;  %p9683_p2 = por %p9682_p3, %p9681_p13 }
0x298b   : > { %p9676_p1 = pnand %p9675_p12, %p11875_p9 }
0x298d   : > { %p9677_p11 = pneg %p9676_p1 }
0x298f   : > { %p9684_p4 = pnand %p9683_p2, %p9677_p11 }
0x2991   : > { %9687 = shalt.err (!%p9684_p4)
}
0x2992   : > { %s9688_s21 = scalar_lea.hbm %s11542_s18, 128  ;;  %s9692_s0 = scalar_lea.hbm %s11872_s24, 256 }
0x2993   : > { %p9689_p7 = scmp.ne.s32.totalorder %s11542_s18, %s9688_s21  ;;  %p9693_p10 = scmp.lt.u32.totalorder %s11542_s18, %s11872_s24 }
0x2994   : > { %p9694_p8 = scmp.lt.u32.totalorder %s9692_s0, %s9688_s21  ;;  %p9696_p12 = scmp.lt.u32.totalorder %s9688_s21, %s11542_s18 }
0x2995   : > { %p9690_p6 = pnand %p9689_p7, %p11875_p9 }
0x2996   : > { %p9695_p0 = por %p9694_p8, %p9693_p10 }
0x2997   : > { %p9691_p5 = pneg %p9690_p6 }
0x2998   : > { %p9697_p1 = por %p9696_p12, %p9695_p0 }
0x299a   : > { %p9698_p11 = pnand %p9697_p1, %p9691_p5 }
0x299c   : > { %9701 = shalt.err (!%p9698_p11)
}
0x299d   : > { %s11876_s1 = sld [smem:[#allocation93_spill]]  ;;  %s7219_s14 = sshll.u32 %s10905_s13, 4  ;;  %s11567_s14 = int_to_ptr.vmem [resolvable:$true] %s7219_s14 }
0x299e   : > { %8807 = dma.vmem_to_hbm [thread:$0]  (%p11875_p9), %s7233_s9, 128, %s11542_s18, %s7202_s2  }
0x299f   : > { %s8132_s29 = sshll.u32 %s11871_s17, 4  ;;  %s7197_s19 = scalar_lea.sflag [#allocation4], %s10856_s10 }
0x29a0   : > { %s9702_s30 = scalar_lea.vmem %s11567_s14, 128  ;;  %s9982_s28 = smov [#allocation37]  }
0x29a1   : > { %p9703_p13 = scmp.ne.s32.totalorder %s11567_s14, %s9702_s30  ;;  %s9706_s7 = sshll.u32 %s9982_s28, 4  ;;  %s9707_s7 = int_to_ptr.vmem [resolvable:$false] %s9706_s7 }
0x29a2   : > { %s9708_s22 = scalar_lea.vmem %s9707_s7, 256  ;;  %p9709_p4 = scmp.lt.s32.totalorder %s11567_s14, %s9707_s7 }
0x29a3   : > { %s11877_s5 = smov %s11876_s1  ;;  %s11564_s4 = scalar_lea.hbm %s11876_s1, %s8130_s15 }
0x29a4   : > { %p9704_p3 = pnand %p9703_p13, %p11875_p9  ;;  %p9710_p7 = scmp.lt.s32.totalorder %s9708_s22, %s9702_s30 }
0x29a6   : > { %p9705_p2 = pneg %p9704_p3  ;;  %p9711_p6 = por %p9710_p7, %p9709_p4 }
0x29a8   : > { %p9712_p5 = pnand %p9711_p6, %p9705_p2 }
0x29aa   : > { %9715 = shalt.err (!%p9712_p5)
}
0x29ab   : > { %s9716_s13 = scalar_lea.hbm %s11564_s4, 128  ;;  %s9720_s11 = scalar_lea.hbm %s11877_s5, 256 }
0x29ac   : > { %p9717_p10 = scmp.ne.s32.totalorder %s11564_s4, %s9716_s13  ;;  %p9721_p12 = scmp.lt.u32.totalorder %s11564_s4, %s11877_s5 }
0x29ad   : > { %p9722_p1 = scmp.lt.u32.totalorder %s9720_s11, %s9716_s13  ;;  %p9724_p13 = scmp.lt.u32.totalorder %s9716_s13, %s11564_s4 }
0x29ae   : > { %p9718_p8 = pnand %p9717_p10, %p11875_p9 }
0x29af   : > { %p9723_p11 = por %p9722_p1, %p9721_p12 }
0x29b0   : > { %p9719_p0 = pneg %p9718_p8 }
0x29b1   : > { %p9725_p3 = por %p9724_p13, %p9723_p11 }
0x29b3   : > { %p9726_p2 = pnand %p9725_p3, %p9719_p0 }
0x29b5   : > { %9729 = shalt.err (!%p9726_p2)
}
0x29b6   : > { %s11878_s6 = sld [smem:[#allocation95_spill]]  ;;  %s7245_s15 = sshll.u32 %s2127_s16, 4  ;;  %s7246_s15 = int_to_ptr.vmem [resolvable:$true] %s7245_s15 }
0x29b7   : > { %8806 = dma.vmem_to_hbm [thread:$0]  (%p11875_p9), %s11567_s14, 128, %s11564_s4, %s7197_s19  }
0x29b8   : > { %s9730_s18 = scalar_lea.vmem %s7246_s15, 16  ;;  %s9983_s9 = smov [#allocation40]  }
0x29b9   : > { %p9731_p4 = scmp.ne.s32.totalorder %s7246_s15, %s9730_s18  ;;  %s9734_s23 = sshll.u32 %s9983_s9, 4  ;;  %s9735_s23 = int_to_ptr.vmem [resolvable:$false] %s9734_s23 }
0x29ba   : > { %s9736_s25 = scalar_lea.vmem %s9735_s23, 32  ;;  %p9737_p5 = scmp.lt.s32.totalorder %s7246_s15, %s9735_s23 }
0x29bb   : > { %p9732_p7 = pnand %p9731_p4, %p11875_p9  ;;  %p9738_p10 = scmp.lt.s32.totalorder %s9736_s25, %s9730_s18 }
0x29bc   : > { %s11591_s3 = scalar_lea.hbm %s11878_s6, %s8132_s29 }
0x29bd   : > { %p9733_p6 = pneg %p9732_p7  ;;  %p9739_p8 = por %p9738_p10, %p9737_p5 }
0x29bf   : > { %p9740_p0 = pnand %p9739_p8, %p9733_p6 }
0x29c1   : > { %9743 = shalt.err (!%p9740_p0)
}
0x29c2   : > { %s9744_s10 = scalar_lea.hbm %s11591_s3, 16  ;;  %s9748_s16 = scalar_lea.hbm %s11878_s6, 32 }
0x29c3   : > { %p9745_p12 = scmp.ne.s32.totalorder %s11591_s3, %s9744_s10  ;;  %p9749_p13 = scmp.lt.u32.totalorder %s11591_s3, %s11878_s6 }
0x29c4   : > { %p9750_p3 = scmp.lt.u32.totalorder %s9748_s16, %s9744_s10  ;;  %p9752_p4 = scmp.lt.u32.totalorder %s9744_s10, %s11591_s3 }
0x29c5   : > { %p9746_p1 = pnand %p9745_p12, %p11875_p9 }
0x29c6   : > { %p9751_p2 = por %p9750_p3, %p9749_p13 }
0x29c7   : > { %p9747_p11 = pneg %p9746_p1 }
0x29c8   : > { %p9753_p7 = por %p9752_p4, %p9751_p2 }
0x29ca   : > { %p9754_p6 = pnand %p9753_p7, %p9747_p11 }
0x29cc   : > { %9757 = shalt.err (!%p9754_p6)
}
0x29cd   : > { %8808 = dma.vmem_to_hbm [thread:$0]  (%p11875_p9), %s7246_s15, 16, %s11591_s3, %s7202_s2  }
0x29ce PF: > { %s11879_s17 = sld [smem:[#allocation105_spill]]  ;;  %s11880_s12 = sld [smem:[#allocation96_spill]] }
0x29cf   : > { %s11881_s27 = sld [smem:[#allocation111_spill]] }
0x29d4   : > { %p8828_p5 = scmp.ge.s32.totalorder %s11879_s17, 2  ;;  %s7257_s21 = sand.u32 1, %s11880_s12  }
0x29d5   : > { %p11882_p10 = scmp.ne.s32.totalorder %s11881_s27, 0  ;;  %s7258_s0 = scalar_lea.sflag [#allocation4], %s7257_s21 }
0x29d7   : > { %p8817_p8 = pnand %p8828_p5, %p11882_p10 }
0x29d9   : > { %9851 = dma.done.wait (!%p8817_p8), %s7258_s0, 128  }
0x29da   : > { %9853 = vsyncadd (!%p8817_p8), %s7258_s0, 4294967168  ;;  %s11883_s1 = sadd.s32 4294967294, %s11879_s17  }
0x29db   : > { %s7266_s4 = sand.u32 1, %s11883_s1  }
0x29dc   : > { %s7267_s14 = scalar_lea.sflag [#allocation39], %s7266_s4 }
0x29dd   : > { %9855 = dma.done.wait (!%p8817_p8), %s7267_s14, 144  }
0x29de   : > { %9857 = vsyncadd (!%p8817_p8), %s7267_s14, 4294967152  ;;  %s132_s22 = sadd.s32 1, %s11879_s17   ;;  %s11884_s0 = sld [smem:[#allocation97_spill]] }
0x29df   : > { %p129_p9 = scmp.ge.s32.totalorder %s132_s22, 12   ;;  %s11885_s28 = sld [smem:[#allocation98_spill]] }
0x29e0   : > { %s11886_s1 = sld [smem:[#allocation109_spill]]  ;;  %s11887_s2 = sld [smem:[#allocation99_spill]] }
0x29e1   : > { %s11888_s7 = sld [smem:[#allocation100_spill]]  ;;  %s11889_s10 = sld [smem:[#allocation108_spill]] }
0x29e2   : > { %s11890_s11 = sld [smem:[#allocation103_spill]]  ;;  %s11891_s15 = sld [smem:[#allocation104_spill]] }
0x29e3   : > { %s11892_s16 = sld [smem:[#allocation106_spill]]  ;;  %s11893_s18 = sld [smem:[#allocation107_spill]] }
0x29e4   :  { %131 = sbr.rel (!%p129_p9) target bundleno = 117 (0x75), region = 586 }
0x29eb   :  { %7280 = vsyncpa [#allocation3], 1 }
0x29ec   :  { %7282 = vsyncpa [#allocation3 + $0x1], 1 }
0x29ed   :  { %7283 = vsyncpa [#allocation6], 1 }
0x29ee   :  { %7285 = vsyncpa [#allocation6 + $0x1], 1 }
0x29ef   :  { %7286 = vsyncpa [#allocation9], 1 }
0x29f0   :  { %7288 = vsyncpa [#allocation9 + $0x1], 1 }
0x29f1   :  { %7289 = vsyncpa [#allocation12], 1 }
0x29f2   :  { %7291 = vsyncpa [#allocation12 + $0x1], 1 }
0x29f3   :  { %7292 = vsyncpa [#allocation15], 1 }
0x29f4   :  { %7294 = vsyncpa [#allocation15 + $0x1], 1 }
0x29f5   :  { %7295 = vsyncpa [#allocation18], 1 }
0x29f6   :  { %7297 = vsyncpa [#allocation18 + $0x1], 1 }
0x29f7   :  { %7298 = vsyncpa [#allocation21], 1 }
0x29f8   :  { %7300 = vsyncpa [#allocation21 + $0x1], 1 }
0x29f9   :  { %7301 = vsyncpa [#allocation24], 1 }
0x29fa   :  { %7303 = vsyncpa [#allocation24 + $0x1], 1 }
0x29fb   :  { %7304 = vsyncpa [#allocation27], 1 }
0x29fc   :  { %7306 = vsyncpa [#allocation27 + $0x1], 1 }
0x29fd   :  { %7307 = vsyncpa [#allocation30], 1 }
0x29fe   :  { %7309 = vsyncpa [#allocation30 + $0x1], 1 }
0x29ff   :  { %7310 = vsyncpa [#allocation33], 1 }
0x2a00   :  { %7312 = vsyncpa [#allocation33 + $0x1], 1 }
0x2a01   :  { %7313 = vsyncpa [#allocation36], 1 }
0x2a02   :  { %7314 = vsyncpa [#allocation4], 1 }
0x2a03   :  { %7316 = vsyncpa [#allocation4 + $0x1], 1 }
0x2a04   :  { %7317 = vsyncpa [#allocation39], 1 }
0x2a05   :  { %7319 = vsyncpa [#allocation39 + $0x1], 1 }

</bundles_post_ra>
